<compile_context>
chip_gen: v7x
topology: tpu7x:2x2x1
jax: 0.10.0
libtpu: 0.0.40
codegen_flags: <defaults>
</compile_context>

<pallas_src>
import math

import jax
import jax.numpy as jnp
from jax.experimental import pallas as pl

# ---------------- configuration (small, consistent with the module) ----------------
B = 2            # batch size
C_IN = 4         # backbone output channels (backbone.num_channels[-1])
H = W = 16       # feature-map spatial size
D = 32           # hidden_dim (transformer.d_model)
NQ = 8           # num_queries
K = 17           # num_body_points
NC = 2           # num_classes
L = 2            # transformer.num_decoder_layers
N_ENC = 8        # number of encoder (two-stage) proposals
GN_GROUPS = 32   # GroupNorm(32, hidden_dim)
INV_SIG_EPS = 1e-3
GN_EPS = 1e-5
Z_VIS = 1.0 / (1.0 + math.exp(-1.0))   # sigmoid(1.0): constant visibility flag

ROW_CHUNK = 96   # decoder token rows per chunk (caps live vregs; 288 = 3 * 96)
PACK_W = 128     # lane-dense packed-output width
# packed-output lane map: 0:2 keypoint xy | 2:4 class logits | 4:6 interm logits (layer 0, rows 0:B*N_ENC)


# ---------------- single fused kernel ----------------
def fused_kernel(src_ref, tok_ref, ref_ref, mix_ref, dec_ref, misc_ref,
                 proj_ref, head_ref):
    Bb, Cin, hw = src_ref.shape
    Ld, R, Dd = tok_ref.shape
    F = head_ref.shape[-1]
    gsz = Dd // GN_GROUPS
    assert R % ROW_CHUNK == 0 and mix_ref.shape[0] <= ROW_CHUNK and F >= 6

    # ===== input_proj: 1x1 Conv + GroupNorm(32, D), transposed (D, HW) layout =====
    misc = misc_ref[...]                        # (D+3, D) packed misc slab
    wT    = misc[0:Dd, 0:Cin]                   # (D, Cin) conv weight (torch layout, transposed)
    cbias = misc[0:Dd, Cin:Cin + 1]             # (D, 1)
    gamma = misc[0:Dd, Cin + 1:Cin + 2]         # (D, 1)
    beta  = misc[0:Dd, Cin + 2:Cin + 3]         # (D, 1)
    if gsz != 1:                                # general GroupNorm path (dead at D=32 / 32 groups)
        row = jax.lax.broadcasted_iota(jnp.int32, (Dd, Dd), 0) // gsz
        col = jax.lax.broadcasted_iota(jnp.int32, (Dd, Dd), 1) // gsz
        gavg = jnp.where(row == col, jnp.float32(1.0 / gsz), jnp.float32(0.0))  # hoisted out of batch loop
    for b in range(Bb):                         # static unroll over the tiny batch
        x = src_ref[b]                          # (Cin, HW)
        y = wT[:, 0:1] * x[0:1, :]              # Cin=4 contraction on the VPU (no MXU latency)
        for c in range(1, Cin):
            y = y + wT[:, c:c + 1] * x[c:c + 1, :]
        y = y + cbias                           # (D, HW)
        mean_c = jnp.mean(y, axis=-1, keepdims=True)        # per-channel mean over HW
        if gsz == 1:                                        # group == channel at this config
            mean = mean_c
            cent = y - mean
            var = jnp.mean(cent * cent, axis=-1, keepdims=True)
        else:
            mean = jnp.dot(gavg, mean_c, preferred_element_type=jnp.float32)
            cent = y - mean
            var = jnp.dot(gavg, jnp.mean(cent * cent, axis=-1, keepdims=True),
                          preferred_element_type=jnp.float32)
        proj_ref[b] = (cent * jax.lax.rsqrt(var + GN_EPS)) * gamma + beta   # (D, HW) lane-dense store

    # ===== two-stage encoder class head (enc_out_class_embed): lane reductions, no MXU =====
    ew0 = misc[Dd:Dd + 1, 0:Dd]                 # (1, D)  enc class weight column 0 (as a row)
    ew1 = misc[Dd + 1:Dd + 2, 0:Dd]             # (1, D)  enc class weight column 1
    eb  = misc[Dd + 2:Dd + 3, 0:NC]             # (1, NC)
    mix = mix_ref[...]                          # (B*N_ENC, D)
    interm = jnp.concatenate(
        [jnp.sum(mix * ew0, axis=-1, keepdims=True),
         jnp.sum(mix * ew1, axis=-1, keepdims=True)], axis=-1) + eb         # (B*N_ENC, NC)

    # ===== decoder prediction heads (class head fused into the pose MLP's first matmul) =====
    # per-layer packed slab row map (width D+NC):
    #   [0:D]       = [W1 | Wc]     (fused first-matmul weight)
    #   [D:2D]      = [W2 | 0 ]
    #   [2D]        = [b1 | bc]
    #   [2D+1]      = [b2 | b3]
    #   [2D+2:2D+4] = W3^T (rows = x / y output coords, cols 0:D)
    n_chunks = R // ROW_CHUNK
    zpad = jnp.zeros((ROW_CHUNK, F - 6), jnp.float32)        # hoisted: lanes 6: of packed rows
    zcol = jnp.zeros((ROW_CHUNK, NC), jnp.float32)
    enc_col = jnp.concatenate(
        [interm, jnp.zeros((ROW_CHUNK - interm.shape[0], NC), jnp.float32)], axis=0)
    for l in range(Ld):                          # L layers statically unrolled (weights loaded once)
        P = dec_ref[l]                           # (2D+4, D+NC)
        w1c = P[0:Dd, :]                         # (D, D+NC)
        w2  = P[Dd:2 * Dd, 0:Dd]                 # (D, D)
        b1c = P[2 * Dd:2 * Dd + 1, :]            # (1, D+NC)
        b2  = P[2 * Dd + 1:2 * Dd + 2, 0:Dd]     # (1, D)
        b3  = P[2 * Dd + 1:2 * Dd + 2, Dd:Dd + NC]
        w3x = P[2 * Dd + 2:2 * Dd + 3, 0:Dd]     # (1, D)
        w3y = P[2 * Dd + 3:2 * Dd + 4, 0:Dd]     # (1, D)
        for c in range(n_chunks):                # 96-row chunks keep live tensors ~12 vregs each
            r0 = c * ROW_CHUNK
            tok = tok_ref[l, pl.ds(r0, ROW_CHUNK), :]                            # (CH, D)
            h1a = jnp.dot(tok, w1c, preferred_element_type=jnp.float32) + b1c    # (CH, D+NC) MXU
            h1 = jnp.maximum(h1a[:, 0:Dd], 0.0)                                  # MLP layer 1
            logit = h1a[:, Dd:Dd + NC]                                           # fused class head
            h2 = jnp.maximum(
                jnp.dot(h1, w2, preferred_element_type=jnp.float32) + b2, 0.0)   # MLP layer 2 (MXU)
            # MLP layer 3 (out dim 2): VPU multiply + lane reductions (idle XLU), no tiny MXU dot
            delta = jnp.concatenate(
                [jnp.sum(h2 * w3x, axis=-1, keepdims=True),
                 jnp.sum(h2 * w3y, axis=-1, keepdims=True)], axis=-1) + b3       # (CH, 2)
            # inverse_sigmoid(refpoints) + delta, then sigmoid
            r = jnp.clip(ref_ref[l, pl.ds(r0, ROW_CHUNK), :], 0.0, 1.0)
            unsig = (jnp.log(jnp.maximum(r, INV_SIG_EPS))
                     - jnp.log(jnp.maximum(1.0 - r, INV_SIG_EPS)) + delta)
            xy = jax.nn.sigmoid(unsig)                                           # (CH, 2)
            extra = enc_col if (l == 0 and c == 0) else zcol
            head_ref[l, pl.ds(r0, ROW_CHUNK), :] = jnp.concatenate(
                [xy, logit, extra, zpad], axis=-1)                # (CH, 128) unmasked dense store


# ---------------- deterministic parameter init (mirrors the module's __init__) ----------------
def init_params(key):
    """Parameters mirroring GroupPose.__init__, pre-packed once into two kernel slabs."""
    ks = jax.random.split(key, 6)
    # input_proj: Conv2d(C_IN, D, k=1) xavier_uniform(gain=1), bias=0; GroupNorm affine defaults
    a = math.sqrt(6.0 / (C_IN + D))
    conv_wT = jax.random.uniform(ks[0], (D, C_IN), jnp.float32, -a, a)   # (D, Cin) == torch layout
    conv_b = jnp.zeros((D,), jnp.float32)
    gn_gamma = jnp.ones((D,), jnp.float32)
    gn_beta = jnp.zeros((D,), jnp.float32)
    # class embed: Linear(D, NC), bias = -log((1-p)/p); deepcopies => identical init per layer
    bound = 1.0 / math.sqrt(D)
    cls_w = jax.random.uniform(ks[1], (D, NC), jnp.float32, -bound, bound)
    cls_b = jnp.full((NC,), -math.log((1 - 0.01) / 0.01), jnp.float32)
    # pose embed MLP(D, D, 2, 3); last layer weight/bias zeroed per __init__
    w1 = jax.random.uniform(ks[2], (D, D), jnp.float32, -bound, bound)
    b1 = jax.random.uniform(ks[3], (D,), jnp.float32, -bound, bound)
    w2 = jax.random.uniform(ks[4], (D, D), jnp.float32, -bound, bound)
    b2 = jax.random.uniform(ks[5], (D,), jnp.float32, -bound, bound)
    w3 = jnp.zeros((D, 2), jnp.float32)
    b3 = jnp.zeros((2,), jnp.float32)

    # ---- per-layer decoder slab (L, 2D+4, D+NC); row map documented in fused_kernel ----
    w1c = jnp.concatenate([w1, cls_w], axis=1)                                  # (D, D+NC)
    w2p = jnp.concatenate([w2, jnp.zeros((D, NC), jnp.float32)], axis=1)        # (D, D+NC)
    b1c = jnp.concatenate([b1, cls_b])[None, :]                                 # (1, D+NC)
    b23 = jnp.concatenate([b2, b3])[None, :]                                    # (1, D+NC)
    w3T = jnp.concatenate([w3.T, jnp.zeros((2, NC), jnp.float32)], axis=1)      # (2, D+NC)
    dec_layer = jnp.concatenate([w1c, w2p, b1c, b23, w3T], axis=0)              # (2D+4, D+NC)
    dec_p = jnp.tile(dec_layer[None], (L, 1, 1))   # deepcopied heads -> identical initial values

    # ---- misc slab (D+3, D): conv + groupnorm params, shared enc class head ----
    top = jnp.concatenate(
        [conv_wT, conv_b[:, None], gn_gamma[:, None], gn_beta[:, None],
         jnp.zeros((D, D - C_IN - 3), jnp.float32)], axis=1)                    # (D, D)
    enc_rows = jnp.concatenate(
        [cls_w.T,
         jnp.concatenate([cls_b[None, :], jnp.zeros((1, D - NC), jnp.float32)], axis=1)],
        axis=0)                                                                 # (3, D)
    misc_p = jnp.concatenate([top, enc_rows], axis=0)                           # (D+3, D)
    return dict(dec_p=dec_p, misc_p=misc_p)


# ---------------- full forward (one Pallas launch + reshape/slice-only glue) ----------------
def group_pose_forward(src, hs_pose, refpoint_pose, mix_refpoint, mix_embedding, params):
    Bb, Cin, Hh, Ww = src.shape
    hw = Hh * Ww
    Ld = hs_pose.shape[0]
    T = K + 1
    R = Bb * NQ * T

    # glue BEFORE the kernel: pure reshapes only (no strided slices, no transposes)
    src_flat = src.reshape(Bb, Cin, hw)
    tokens = hs_pose.reshape(Ld, R, D)
    refs = refpoint_pose.reshape(Ld, R, 2)
    mix_flat = mix_embedding.reshape(Bb * N_ENC, D)

    out_shapes = (
        jax.ShapeDtypeStruct((Bb, D, hw), jnp.float32),       # projected feature map (flat NCHW)
        jax.ShapeDtypeStruct((Ld, R, PACK_W), jnp.float32),   # packed lane-dense head outputs
    )
    proj, head = pl.pallas_call(fused_kernel, out_shape=out_shapes)(
        src_flat, tokens, refs, mix_flat, params["dec_p"], params["misc_p"])

    # glue AFTER the kernel: cheap reshapes / slices of the packed slab
    src_proj = proj.reshape(Bb, D, Hh, Ww)                          # back to NCHW, no transpose
    head5 = head.reshape(Ld, Bb, NQ, T, PACK_W)
    xy2k = head5[:, :, :, 1:, 0:2].reshape(Ld, Bb, NQ, 2 * K)       # xyxy... interleave (contiguous)
    logits = head5[:, :, :, 0, 2:4]                                 # class-token logits
    interm_class = head[0, :Bb * N_ENC, 4:6].reshape(Bb, N_ENC, NC)
    z = jnp.full((Ld, Bb, NQ, K), Z_VIS, jnp.float32)               # sigmoid(1.0) constant vis flag
    keypoints = jnp.concatenate([xy2k, z], axis=-1)                 # xyxy...zz layout

    out = {
        "pred_logits": logits[-1],
        "pred_keypoints": keypoints[-1],
        "interm_outputs": {"pred_logits": interm_class, "pred_keypoints": mix_refpoint},
    }
    return out, src_proj


if __name__ == "__main__":
    key = jax.random.PRNGKey(0)
    k1, k2, k3, k4, k5, kp = jax.random.split(key, 6)
    # synthetic backbone / transformer outputs (those modules are injected, not defined here)
    src = jax.random.normal(k1, (B, C_IN, H, W), jnp.float32)
    hs_pose = jax.random.normal(k2, (L, B, NQ, K + 1, D), jnp.float32)
    refpoint_pose = jax.nn.sigmoid(jax.random.normal(k3, (L, B, NQ, 2 * (K + 1)), jnp.float32))
    mix_refpoint = jax.nn.sigmoid(jax.random.normal(k4, (B, N_ENC, 3 * K), jnp.float32))
    mix_embedding = jax.random.normal(k5, (B, N_ENC, D), jnp.float32)

    params = init_params(kp)
    fwd = jax.jit(group_pose_forward)
    out, src_proj = fwd(src, hs_pose, refpoint_pose, mix_refpoint, mix_embedding, params)
    jax.tree_util.tree_map(jax.block_until_ready, (out, src_proj))

    assert out["pred_logits"].shape == (B, NQ, NC)
    assert out["pred_keypoints"].shape == (B, NQ, 3 * K)
    assert out["interm_outputs"]["pred_logits"].shape == (B, N_ENC, NC)
    assert out["interm_outputs"]["pred_keypoints"].shape == (B, N_ENC, 3 * K)
    assert src_proj.shape == (B, D, H, W)
    print("KERNEL_OK")
</pallas_src>

<mosaic_0001>
module attributes {stable_mosaic.version = 11 : i64} {
  func.func @fused_kernel(%arg0: memref<2x4x256xf32, #tpu.memory_space<vmem>>, %arg1: memref<2x288x32xf32, #tpu.memory_space<vmem>>, %arg2: memref<2x288x2xf32, #tpu.memory_space<vmem>>, %arg3: memref<16x32xf32, #tpu.memory_space<vmem>>, %arg4: memref<2x68x34xf32, #tpu.memory_space<vmem>>, %arg5: memref<35x32xf32, #tpu.memory_space<vmem>>, %arg6: memref<2x32x256xf32, #tpu.memory_space<vmem>>, %arg7: memref<2x288x128xf32, #tpu.memory_space<vmem>>) attributes {dimension_semantics = [], scalar_prefetch = 0 : i64, scratch_operands = 0 : i64, tpu.core_type = #tpu.core_type<tc>} {
    %c0 = arith.constant 0 : index
    %c0_0 = arith.constant 0 : index
    %0 = vector.load %arg5[%c0, %c0_0] : memref<35x32xf32, #tpu.memory_space<vmem>>, vector<35x32xf32>
    %1 = vector.extract_strided_slice %0 {offsets = [0, 0], sizes = [32, 4], strides = [1, 1]} : vector<35x32xf32> to vector<32x4xf32>
    %2 = vector.extract_strided_slice %0 {offsets = [0, 4], sizes = [32, 1], strides = [1, 1]} : vector<35x32xf32> to vector<32x1xf32>
    %3 = vector.extract_strided_slice %0 {offsets = [0, 5], sizes = [32, 1], strides = [1, 1]} : vector<35x32xf32> to vector<32x1xf32>
    %4 = vector.extract_strided_slice %0 {offsets = [0, 6], sizes = [32, 1], strides = [1, 1]} : vector<35x32xf32> to vector<32x1xf32>
    %c0_1 = arith.constant 0 : index
    %c0_2 = arith.constant 0 : index
    %c0_3 = arith.constant 0 : index
    %5 = vector.load %arg0[%c0_1, %c0_2, %c0_3] : memref<2x4x256xf32, #tpu.memory_space<vmem>>, vector<1x4x256xf32>
    %6 = vector.shape_cast %5 : vector<1x4x256xf32> to vector<4x256xf32>
    %7 = vector.extract_strided_slice %1 {offsets = [0, 0], sizes = [32, 1], strides = [1, 1]} : vector<32x4xf32> to vector<32x1xf32>
    %8 = vector.extract_strided_slice %6 {offsets = [0, 0], sizes = [1, 256], strides = [1, 1]} : vector<4x256xf32> to vector<1x256xf32>
    %9 = vector.broadcast %7 : vector<32x1xf32> to vector<32x256xf32>
    %10 = vector.broadcast %8 : vector<1x256xf32> to vector<32x256xf32>
    %11 = arith.mulf %9, %10 : vector<32x256xf32>
    %12 = vector.extract_strided_slice %1 {offsets = [0, 1], sizes = [32, 1], strides = [1, 1]} : vector<32x4xf32> to vector<32x1xf32>
    %13 = vector.extract_strided_slice %6 {offsets = [1, 0], sizes = [1, 256], strides = [1, 1]} : vector<4x256xf32> to vector<1x256xf32>
    %14 = vector.broadcast %12 : vector<32x1xf32> to vector<32x256xf32>
    %15 = vector.broadcast %13 : vector<1x256xf32> to vector<32x256xf32>
    %16 = arith.mulf %14, %15 : vector<32x256xf32>
    %17 = arith.addf %11, %16 : vector<32x256xf32>
    %18 = vector.extract_strided_slice %1 {offsets = [0, 2], sizes = [32, 1], strides = [1, 1]} : vector<32x4xf32> to vector<32x1xf32>
    %19 = vector.extract_strided_slice %6 {offsets = [2, 0], sizes = [1, 256], strides = [1, 1]} : vector<4x256xf32> to vector<1x256xf32>
    %20 = vector.broadcast %18 : vector<32x1xf32> to vector<32x256xf32>
    %21 = vector.broadcast %19 : vector<1x256xf32> to vector<32x256xf32>
    %22 = arith.mulf %20, %21 : vector<32x256xf32>
    %23 = arith.addf %17, %22 : vector<32x256xf32>
    %24 = vector.extract_strided_slice %1 {offsets = [0, 3], sizes = [32, 1], strides = [1, 1]} : vector<32x4xf32> to vector<32x1xf32>
    %25 = vector.extract_strided_slice %6 {offsets = [3, 0], sizes = [1, 256], strides = [1, 1]} : vector<4x256xf32> to vector<1x256xf32>
    %26 = vector.broadcast %24 : vector<32x1xf32> to vector<32x256xf32>
    %27 = vector.broadcast %25 : vector<1x256xf32> to vector<32x256xf32>
    %28 = arith.mulf %26, %27 : vector<32x256xf32>
    %29 = arith.addf %23, %28 : vector<32x256xf32>
    %30 = vector.broadcast %2 : vector<32x1xf32> to vector<32x256xf32>
    %31 = arith.addf %29, %30 : vector<32x256xf32>
    %cst = arith.constant dense<0.000000e+00> : vector<32xf32>
    %32 = vector.multi_reduction <add>, %31, %cst [1] : vector<32x256xf32> to vector<32xf32>
    %33 = vector.shape_cast %32 : vector<32xf32> to vector<32x1xf32>
    %cst_4 = arith.constant 2.560000e+02 : f32
    %34 = vector.broadcast %cst_4 : f32 to vector<32x1xf32>
    %35 = arith.divf %33, %34 : vector<32x1xf32>
    %36 = vector.broadcast %35 : vector<32x1xf32> to vector<32x256xf32>
    %37 = arith.subf %31, %36 : vector<32x256xf32>
    %38 = arith.mulf %37, %37 : vector<32x256xf32>
    %cst_5 = arith.constant dense<0.000000e+00> : vector<32xf32>
    %39 = vector.multi_reduction <add>, %38, %cst_5 [1] : vector<32x256xf32> to vector<32xf32>
    %40 = vector.shape_cast %39 : vector<32xf32> to vector<32x1xf32>
    %cst_6 = arith.constant 2.560000e+02 : f32
    %41 = vector.broadcast %cst_6 : f32 to vector<32x1xf32>
    %42 = arith.divf %40, %41 : vector<32x1xf32>
    %cst_7 = arith.constant 9.99999974E-6 : f32
    %43 = vector.broadcast %cst_7 : f32 to vector<32x1xf32>
    %44 = arith.addf %42, %43 : vector<32x1xf32>
    %45 = math.rsqrt %44 : vector<32x1xf32>
    %46 = vector.broadcast %45 : vector<32x1xf32> to vector<32x256xf32>
    %47 = arith.mulf %37, %46 : vector<32x256xf32>
    %48 = vector.broadcast %3 : vector<32x1xf32> to vector<32x256xf32>
    %49 = arith.mulf %47, %48 : vector<32x256xf32>
    %50 = vector.broadcast %4 : vector<32x1xf32> to vector<32x256xf32>
    %51 = arith.addf %49, %50 : vector<32x256xf32>
    %c0_8 = arith.constant 0 : index
    %c0_9 = arith.constant 0 : index
    %c0_10 = arith.constant 0 : index
    %52 = vector.load %arg6[%c0_8, %c0_9, %c0_10] : memref<2x32x256xf32, #tpu.memory_space<vmem>>, vector<1x32x256xf32>
    %53 = vector.shape_cast %52 : vector<1x32x256xf32> to vector<32x256xf32>
    %54 = vector.shape_cast %51 : vector<32x256xf32> to vector<1x32x256xf32>
    tpu.vector_store %arg6[%c0_8, %c0_9, %c0_10], %54 {strides = array<i32>} : memref<2x32x256xf32, #tpu.memory_space<vmem>>, vector<1x32x256xf32>,
    %c1 = arith.constant 1 : index
    %c0_11 = arith.constant 0 : index
    %c0_12 = arith.constant 0 : index
    %55 = vector.load %arg0[%c1, %c0_11, %c0_12] : memref<2x4x256xf32, #tpu.memory_space<vmem>>, vector<1x4x256xf32>
    %56 = vector.shape_cast %55 : vector<1x4x256xf32> to vector<4x256xf32>
    %57 = vector.extract_strided_slice %1 {offsets = [0, 0], sizes = [32, 1], strides = [1, 1]} : vector<32x4xf32> to vector<32x1xf32>
    %58 = vector.extract_strided_slice %56 {offsets = [0, 0], sizes = [1, 256], strides = [1, 1]} : vector<4x256xf32> to vector<1x256xf32>
    %59 = vector.broadcast %57 : vector<32x1xf32> to vector<32x256xf32>
    %60 = vector.broadcast %58 : vector<1x256xf32> to vector<32x256xf32>
    %61 = arith.mulf %59, %60 : vector<32x256xf32>
    %62 = vector.extract_strided_slice %1 {offsets = [0, 1], sizes = [32, 1], strides = [1, 1]} : vector<32x4xf32> to vector<32x1xf32>
    %63 = vector.extract_strided_slice %56 {offsets = [1, 0], sizes = [1, 256], strides = [1, 1]} : vector<4x256xf32> to vector<1x256xf32>
    %64 = vector.broadcast %62 : vector<32x1xf32> to vector<32x256xf32>
    %65 = vector.broadcast %63 : vector<1x256xf32> to vector<32x256xf32>
    %66 = arith.mulf %64, %65 : vector<32x256xf32>
    %67 = arith.addf %61, %66 : vector<32x256xf32>
    %68 = vector.extract_strided_slice %1 {offsets = [0, 2], sizes = [32, 1], strides = [1, 1]} : vector<32x4xf32> to vector<32x1xf32>
    %69 = vector.extract_strided_slice %56 {offsets = [2, 0], sizes = [1, 256], strides = [1, 1]} : vector<4x256xf32> to vector<1x256xf32>
    %70 = vector.broadcast %68 : vector<32x1xf32> to vector<32x256xf32>
    %71 = vector.broadcast %69 : vector<1x256xf32> to vector<32x256xf32>
    %72 = arith.mulf %70, %71 : vector<32x256xf32>
    %73 = arith.addf %67, %72 : vector<32x256xf32>
    %74 = vector.extract_strided_slice %1 {offsets = [0, 3], sizes = [32, 1], strides = [1, 1]} : vector<32x4xf32> to vector<32x1xf32>
    %75 = vector.extract_strided_slice %56 {offsets = [3, 0], sizes = [1, 256], strides = [1, 1]} : vector<4x256xf32> to vector<1x256xf32>
    %76 = vector.broadcast %74 : vector<32x1xf32> to vector<32x256xf32>
    %77 = vector.broadcast %75 : vector<1x256xf32> to vector<32x256xf32>
    %78 = arith.mulf %76, %77 : vector<32x256xf32>
    %79 = arith.addf %73, %78 : vector<32x256xf32>
    %80 = vector.broadcast %2 : vector<32x1xf32> to vector<32x256xf32>
    %81 = arith.addf %79, %80 : vector<32x256xf32>
    %cst_13 = arith.constant dense<0.000000e+00> : vector<32xf32>
    %82 = vector.multi_reduction <add>, %81, %cst_13 [1] : vector<32x256xf32> to vector<32xf32>
    %83 = vector.shape_cast %82 : vector<32xf32> to vector<32x1xf32>
    %cst_14 = arith.constant 2.560000e+02 : f32
    %84 = vector.broadcast %cst_14 : f32 to vector<32x1xf32>
    %85 = arith.divf %83, %84 : vector<32x1xf32>
    %86 = vector.broadcast %85 : vector<32x1xf32> to vector<32x256xf32>
    %87 = arith.subf %81, %86 : vector<32x256xf32>
    %88 = arith.mulf %87, %87 : vector<32x256xf32>
    %cst_15 = arith.constant dense<0.000000e+00> : vector<32xf32>
    %89 = vector.multi_reduction <add>, %88, %cst_15 [1] : vector<32x256xf32> to vector<32xf32>
    %90 = vector.shape_cast %89 : vector<32xf32> to vector<32x1xf32>
    %cst_16 = arith.constant 2.560000e+02 : f32
    %91 = vector.broadcast %cst_16 : f32 to vector<32x1xf32>
    %92 = arith.divf %90, %91 : vector<32x1xf32>
    %cst_17 = arith.constant 9.99999974E-6 : f32
    %93 = vector.broadcast %cst_17 : f32 to vector<32x1xf32>
    %94 = arith.addf %92, %93 : vector<32x1xf32>
    %95 = math.rsqrt %94 : vector<32x1xf32>
    %96 = vector.broadcast %95 : vector<32x1xf32> to vector<32x256xf32>
    %97 = arith.mulf %87, %96 : vector<32x256xf32>
    %98 = vector.broadcast %3 : vector<32x1xf32> to vector<32x256xf32>
    %99 = arith.mulf %97, %98 : vector<32x256xf32>
    %100 = vector.broadcast %4 : vector<32x1xf32> to vector<32x256xf32>
    %101 = arith.addf %99, %100 : vector<32x256xf32>
    %c1_18 = arith.constant 1 : index
    %c0_19 = arith.constant 0 : index
    %c0_20 = arith.constant 0 : index
    %102 = vector.load %arg6[%c1_18, %c0_19, %c0_20] : memref<2x32x256xf32, #tpu.memory_space<vmem>>, vector<1x32x256xf32>
    %103 = vector.shape_cast %102 : vector<1x32x256xf32> to vector<32x256xf32>
    %104 = vector.shape_cast %101 : vector<32x256xf32> to vector<1x32x256xf32>
    tpu.vector_store %arg6[%c1_18, %c0_19, %c0_20], %104 {strides = array<i32>} : memref<2x32x256xf32, #tpu.memory_space<vmem>>, vector<1x32x256xf32>,
    %105 = vector.extract_strided_slice %0 {offsets = [32, 0], sizes = [1, 32], strides = [1, 1]} : vector<35x32xf32> to vector<1x32xf32>
    %106 = vector.extract_strided_slice %0 {offsets = [33, 0], sizes = [1, 32], strides = [1, 1]} : vector<35x32xf32> to vector<1x32xf32>
    %107 = vector.extract_strided_slice %0 {offsets = [34, 0], sizes = [1, 2], strides = [1, 1]} : vector<35x32xf32> to vector<1x2xf32>
    %c0_21 = arith.constant 0 : index
    %c0_22 = arith.constant 0 : index
    %108 = vector.load %arg3[%c0_21, %c0_22] : memref<16x32xf32, #tpu.memory_space<vmem>>, vector<16x32xf32>
    %109 = vector.broadcast %105 : vector<1x32xf32> to vector<16x32xf32>
    %110 = arith.mulf %108, %109 : vector<16x32xf32>
    %cst_23 = arith.constant dense<0.000000e+00> : vector<16xf32>
    %111 = vector.multi_reduction <add>, %110, %cst_23 [1] : vector<16x32xf32> to vector<16xf32>
    %112 = vector.shape_cast %111 : vector<16xf32> to vector<16x1xf32>
    %113 = vector.broadcast %106 : vector<1x32xf32> to vector<16x32xf32>
    %114 = arith.mulf %108, %113 : vector<16x32xf32>
    %cst_24 = arith.constant dense<0.000000e+00> : vector<16xf32>
    %115 = vector.multi_reduction <add>, %114, %cst_24 [1] : vector<16x32xf32> to vector<16xf32>
    %116 = vector.shape_cast %115 : vector<16xf32> to vector<16x1xf32>
    %117 = tpu.concatenate %112, %116 in 1 : vector<16x1xf32>, vector<16x1xf32> -> vector<16x2xf32>
    %118 = vector.broadcast %107 : vector<1x2xf32> to vector<16x2xf32>
    %119 = arith.addf %117, %118 : vector<16x2xf32>
    %cst_25 = arith.constant 0.000000e+00 : f32
    %120 = vector.broadcast %cst_25 : f32 to vector<96x122xf32>
    %cst_26 = arith.constant 0.000000e+00 : f32
    %121 = vector.broadcast %cst_26 : f32 to vector<96x2xf32>
    %cst_27 = arith.constant 0.000000e+00 : f32
    %122 = vector.broadcast %cst_27 : f32 to vector<80x2xf32>
    %123 = tpu.concatenate %119, %122 in 0 : vector<16x2xf32>, vector<80x2xf32> -> vector<96x2xf32>
    %c0_28 = arith.constant 0 : index
    %c0_29 = arith.constant 0 : index
    %c0_30 = arith.constant 0 : index
    %124 = vector.load %arg4[%c0_28, %c0_29, %c0_30] : memref<2x68x34xf32, #tpu.memory_space<vmem>>, vector<1x68x34xf32>
    %125 = vector.shape_cast %124 : vector<1x68x34xf32> to vector<68x34xf32>
    %126 = vector.extract_strided_slice %125 {offsets = [0, 0], sizes = [32, 34], strides = [1, 1]} : vector<68x34xf32> to vector<32x34xf32>
    %127 = vector.extract_strided_slice %125 {offsets = [32, 0], sizes = [32, 32], strides = [1, 1]} : vector<68x34xf32> to vector<32x32xf32>
    %128 = vector.extract_strided_slice %125 {offsets = [64, 0], sizes = [1, 34], strides = [1, 1]} : vector<68x34xf32> to vector<1x34xf32>
    %129 = vector.extract_strided_slice %125 {offsets = [65, 0], sizes = [1, 32], strides = [1, 1]} : vector<68x34xf32> to vector<1x32xf32>
    %130 = vector.extract_strided_slice %125 {offsets = [65, 32], sizes = [1, 2], strides = [1, 1]} : vector<68x34xf32> to vector<1x2xf32>
    %131 = vector.extract_strided_slice %125 {offsets = [66, 0], sizes = [1, 32], strides = [1, 1]} : vector<68x34xf32> to vector<1x32xf32>
    %132 = vector.extract_strided_slice %125 {offsets = [67, 0], sizes = [1, 32], strides = [1, 1]} : vector<68x34xf32> to vector<1x32xf32>
    %c0_31 = arith.constant 0 : index
    %c0_32 = arith.constant 0 : index
    %c0_33 = arith.constant 0 : index
    %133 = vector.load %arg1[%c0_31, %c0_32, %c0_33] : memref<2x288x32xf32, #tpu.memory_space<vmem>>, vector<1x96x32xf32>
    %134 = vector.shape_cast %133 : vector<1x96x32xf32> to vector<96x32xf32>
    %cst_34 = arith.constant dense<0.000000e+00> : vector<96x34xf32>
    %135 = tpu.matmul %134, %126, %cst_34 {dimension_numbers = #tpu.dot_dimension_numbers<[1], [0], [0], [1], [0, 0, 1, 1], [], []>} : vector<96x32xf32>, vector<32x34xf32>, vector<96x34xf32> -> vector<96x34xf32>
    %136 = vector.broadcast %128 : vector<1x34xf32> to vector<96x34xf32>
    %137 = arith.addf %135, %136 : vector<96x34xf32>
    %138 = vector.extract_strided_slice %137 {offsets = [0, 0], sizes = [96, 32], strides = [1, 1]} : vector<96x34xf32> to vector<96x32xf32>
    %cst_35 = arith.constant 0.000000e+00 : f32
    %139 = vector.broadcast %cst_35 : f32 to vector<96x32xf32>
    %140 = arith.maximumf %138, %139 : vector<96x32xf32>
    %141 = vector.extract_strided_slice %137 {offsets = [0, 32], sizes = [96, 2], strides = [1, 1]} : vector<96x34xf32> to vector<96x2xf32>
    %cst_36 = arith.constant dense<0.000000e+00> : vector<96x32xf32>
    %142 = tpu.matmul %140, %127, %cst_36 {dimension_numbers = #tpu.dot_dimension_numbers<[1], [0], [0], [1], [0, 0, 1, 1], [], []>} : vector<96x32xf32>, vector<32x32xf32>, vector<96x32xf32> -> vector<96x32xf32>
    %143 = vector.broadcast %129 : vector<1x32xf32> to vector<96x32xf32>
    %144 = arith.addf %142, %143 : vector<96x32xf32>
    %cst_37 = arith.constant 0.000000e+00 : f32
    %145 = vector.broadcast %cst_37 : f32 to vector<96x32xf32>
    %146 = arith.maximumf %144, %145 : vector<96x32xf32>
    %147 = vector.broadcast %131 : vector<1x32xf32> to vector<96x32xf32>
    %148 = arith.mulf %146, %147 : vector<96x32xf32>
    %cst_38 = arith.constant dense<0.000000e+00> : vector<96xf32>
    %149 = vector.multi_reduction <add>, %148, %cst_38 [1] : vector<96x32xf32> to vector<96xf32>
    %150 = vector.shape_cast %149 : vector<96xf32> to vector<96x1xf32>
    %151 = vector.broadcast %132 : vector<1x32xf32> to vector<96x32xf32>
    %152 = arith.mulf %146, %151 : vector<96x32xf32>
    %cst_39 = arith.constant dense<0.000000e+00> : vector<96xf32>
    %153 = vector.multi_reduction <add>, %152, %cst_39 [1] : vector<96x32xf32> to vector<96xf32>
    %154 = vector.shape_cast %153 : vector<96xf32> to vector<96x1xf32>
    %155 = tpu.concatenate %150, %154 in 1 : vector<96x1xf32>, vector<96x1xf32> -> vector<96x2xf32>
    %156 = vector.broadcast %130 : vector<1x2xf32> to vector<96x2xf32>
    %157 = arith.addf %155, %156 : vector<96x2xf32>
    %c0_40 = arith.constant 0 : index
    %c0_41 = arith.constant 0 : index
    %c0_42 = arith.constant 0 : index
    %158 = vector.load %arg2[%c0_40, %c0_41, %c0_42] : memref<2x288x2xf32, #tpu.memory_space<vmem>>, vector<1x96x2xf32>
    %159 = vector.shape_cast %158 : vector<1x96x2xf32> to vector<96x2xf32>
    %cst_43 = arith.constant 0.000000e+00 : f32
    %cst_44 = arith.constant 1.000000e+00 : f32
    %160 = vector.broadcast %cst_43 : f32 to vector<96x2xf32>
    %161 = arith.maximumf %160, %159 : vector<96x2xf32>
    %162 = vector.broadcast %cst_44 : f32 to vector<96x2xf32>
    %163 = arith.minimumf %162, %161 : vector<96x2xf32>
    %cst_45 = arith.constant 1.000000e-03 : f32
    %164 = vector.broadcast %cst_45 : f32 to vector<96x2xf32>
    %165 = arith.maximumf %163, %164 : vector<96x2xf32>
    %166 = math.log %165 : vector<96x2xf32>
    %cst_46 = arith.constant 1.000000e+00 : f32
    %167 = vector.broadcast %cst_46 : f32 to vector<96x2xf32>
    %168 = arith.subf %167, %163 : vector<96x2xf32>
    %cst_47 = arith.constant 1.000000e-03 : f32
    %169 = vector.broadcast %cst_47 : f32 to vector<96x2xf32>
    %170 = arith.maximumf %168, %169 : vector<96x2xf32>
    %171 = math.log %170 : vector<96x2xf32>
    %172 = arith.subf %166, %171 : vector<96x2xf32>
    %173 = arith.addf %172, %157 : vector<96x2xf32>
    %174 = arith.negf %173 : vector<96x2xf32>
    %175 = math.exp %174 : vector<96x2xf32>
    %cst_48 = arith.constant 1.000000e+00 : f32
    %176 = vector.broadcast %cst_48 : f32 to vector<96x2xf32>
    %177 = arith.addf %176, %175 : vector<96x2xf32>
    %178 = arith.divf %176, %177 : vector<96x2xf32>
    %179 = tpu.concatenate %178, %141, %123, %120 in 1 : vector<96x2xf32>, vector<96x2xf32>, vector<96x2xf32>, vector<96x122xf32> -> vector<96x128xf32>
    %c0_49 = arith.constant 0 : index
    %c0_50 = arith.constant 0 : index
    %c0_51 = arith.constant 0 : index
    %180 = vector.load %arg7[%c0_49, %c0_50, %c0_51] : memref<2x288x128xf32, #tpu.memory_space<vmem>>, vector<1x96x128xf32>
    %181 = vector.shape_cast %180 : vector<1x96x128xf32> to vector<96x128xf32>
    %182 = vector.shape_cast %179 : vector<96x128xf32> to vector<1x96x128xf32>
    tpu.vector_store %arg7[%c0_49, %c0_50, %c0_51], %182 {strides = array<i32>} : memref<2x288x128xf32, #tpu.memory_space<vmem>>, vector<1x96x128xf32>,
    %c0_52 = arith.constant 0 : index
    %c96 = arith.constant 96 : index
    %c0_53 = arith.constant 0 : index
    %183 = vector.load %arg1[%c0_52, %c96, %c0_53] : memref<2x288x32xf32, #tpu.memory_space<vmem>>, vector<1x96x32xf32>
    %184 = vector.shape_cast %183 : vector<1x96x32xf32> to vector<96x32xf32>
    %cst_54 = arith.constant dense<0.000000e+00> : vector<96x34xf32>
    %185 = tpu.matmul %184, %126, %cst_54 {dimension_numbers = #tpu.dot_dimension_numbers<[1], [0], [0], [1], [0, 0, 1, 1], [], []>} : vector<96x32xf32>, vector<32x34xf32>, vector<96x34xf32> -> vector<96x34xf32>
    %186 = vector.broadcast %128 : vector<1x34xf32> to vector<96x34xf32>
    %187 = arith.addf %185, %186 : vector<96x34xf32>
    %188 = vector.extract_strided_slice %187 {offsets = [0, 0], sizes = [96, 32], strides = [1, 1]} : vector<96x34xf32> to vector<96x32xf32>
    %cst_55 = arith.constant 0.000000e+00 : f32
    %189 = vector.broadcast %cst_55 : f32 to vector<96x32xf32>
    %190 = arith.maximumf %188, %189 : vector<96x32xf32>
    %191 = vector.extract_strided_slice %187 {offsets = [0, 32], sizes = [96, 2], strides = [1, 1]} : vector<96x34xf32> to vector<96x2xf32>
    %cst_56 = arith.constant dense<0.000000e+00> : vector<96x32xf32>
    %192 = tpu.matmul %190, %127, %cst_56 {dimension_numbers = #tpu.dot_dimension_numbers<[1], [0], [0], [1], [0, 0, 1, 1], [], []>} : vector<96x32xf32>, vector<32x32xf32>, vector<96x32xf32> -> vector<96x32xf32>
    %193 = vector.broadcast %129 : vector<1x32xf32> to vector<96x32xf32>
    %194 = arith.addf %192, %193 : vector<96x32xf32>
    %cst_57 = arith.constant 0.000000e+00 : f32
    %195 = vector.broadcast %cst_57 : f32 to vector<96x32xf32>
    %196 = arith.maximumf %194, %195 : vector<96x32xf32>
    %197 = vector.broadcast %131 : vector<1x32xf32> to vector<96x32xf32>
    %198 = arith.mulf %196, %197 : vector<96x32xf32>
    %cst_58 = arith.constant dense<0.000000e+00> : vector<96xf32>
    %199 = vector.multi_reduction <add>, %198, %cst_58 [1] : vector<96x32xf32> to vector<96xf32>
    %200 = vector.shape_cast %199 : vector<96xf32> to vector<96x1xf32>
    %201 = vector.broadcast %132 : vector<1x32xf32> to vector<96x32xf32>
    %202 = arith.mulf %196, %201 : vector<96x32xf32>
    %cst_59 = arith.constant dense<0.000000e+00> : vector<96xf32>
    %203 = vector.multi_reduction <add>, %202, %cst_59 [1] : vector<96x32xf32> to vector<96xf32>
    %204 = vector.shape_cast %203 : vector<96xf32> to vector<96x1xf32>
    %205 = tpu.concatenate %200, %204 in 1 : vector<96x1xf32>, vector<96x1xf32> -> vector<96x2xf32>
    %206 = vector.broadcast %130 : vector<1x2xf32> to vector<96x2xf32>
    %207 = arith.addf %205, %206 : vector<96x2xf32>
    %c0_60 = arith.constant 0 : index
    %c96_61 = arith.constant 96 : index
    %c0_62 = arith.constant 0 : index
    %208 = vector.load %arg2[%c0_60, %c96_61, %c0_62] : memref<2x288x2xf32, #tpu.memory_space<vmem>>, vector<1x96x2xf32>
    %209 = vector.shape_cast %208 : vector<1x96x2xf32> to vector<96x2xf32>
    %cst_63 = arith.constant 0.000000e+00 : f32
    %cst_64 = arith.constant 1.000000e+00 : f32
    %210 = vector.broadcast %cst_63 : f32 to vector<96x2xf32>
    %211 = arith.maximumf %210, %209 : vector<96x2xf32>
    %212 = vector.broadcast %cst_64 : f32 to vector<96x2xf32>
    %213 = arith.minimumf %212, %211 : vector<96x2xf32>
    %cst_65 = arith.constant 1.000000e-03 : f32
    %214 = vector.broadcast %cst_65 : f32 to vector<96x2xf32>
    %215 = arith.maximumf %213, %214 : vector<96x2xf32>
    %216 = math.log %215 : vector<96x2xf32>
    %cst_66 = arith.constant 1.000000e+00 : f32
    %217 = vector.broadcast %cst_66 : f32 to vector<96x2xf32>
    %218 = arith.subf %217, %213 : vector<96x2xf32>
    %cst_67 = arith.constant 1.000000e-03 : f32
    %219 = vector.broadcast %cst_67 : f32 to vector<96x2xf32>
    %220 = arith.maximumf %218, %219 : vector<96x2xf32>
    %221 = math.log %220 : vector<96x2xf32>
    %222 = arith.subf %216, %221 : vector<96x2xf32>
    %223 = arith.addf %222, %207 : vector<96x2xf32>
    %224 = arith.negf %223 : vector<96x2xf32>
    %225 = math.exp %224 : vector<96x2xf32>
    %cst_68 = arith.constant 1.000000e+00 : f32
    %226 = vector.broadcast %cst_68 : f32 to vector<96x2xf32>
    %227 = arith.addf %226, %225 : vector<96x2xf32>
    %228 = arith.divf %226, %227 : vector<96x2xf32>
    %229 = tpu.concatenate %228, %191, %121, %120 in 1 : vector<96x2xf32>, vector<96x2xf32>, vector<96x2xf32>, vector<96x122xf32> -> vector<96x128xf32>
    %c0_69 = arith.constant 0 : index
    %c96_70 = arith.constant 96 : index
    %c0_71 = arith.constant 0 : index
    %230 = vector.load %arg7[%c0_69, %c96_70, %c0_71] : memref<2x288x128xf32, #tpu.memory_space<vmem>>, vector<1x96x128xf32>
    %231 = vector.shape_cast %230 : vector<1x96x128xf32> to vector<96x128xf32>
    %232 = vector.shape_cast %229 : vector<96x128xf32> to vector<1x96x128xf32>
    tpu.vector_store %arg7[%c0_69, %c96_70, %c0_71], %232 {strides = array<i32>} : memref<2x288x128xf32, #tpu.memory_space<vmem>>, vector<1x96x128xf32>,
    %c0_72 = arith.constant 0 : index
    %c192 = arith.constant 192 : index
    %c0_73 = arith.constant 0 : index
    %233 = vector.load %arg1[%c0_72, %c192, %c0_73] : memref<2x288x32xf32, #tpu.memory_space<vmem>>, vector<1x96x32xf32>
    %234 = vector.shape_cast %233 : vector<1x96x32xf32> to vector<96x32xf32>
    %cst_74 = arith.constant dense<0.000000e+00> : vector<96x34xf32>
    %235 = tpu.matmul %234, %126, %cst_74 {dimension_numbers = #tpu.dot_dimension_numbers<[1], [0], [0], [1], [0, 0, 1, 1], [], []>} : vector<96x32xf32>, vector<32x34xf32>, vector<96x34xf32> -> vector<96x34xf32>
    %236 = vector.broadcast %128 : vector<1x34xf32> to vector<96x34xf32>
    %237 = arith.addf %235, %236 : vector<96x34xf32>
    %238 = vector.extract_strided_slice %237 {offsets = [0, 0], sizes = [96, 32], strides = [1, 1]} : vector<96x34xf32> to vector<96x32xf32>
    %cst_75 = arith.constant 0.000000e+00 : f32
    %239 = vector.broadcast %cst_75 : f32 to vector<96x32xf32>
    %240 = arith.maximumf %238, %239 : vector<96x32xf32>
    %241 = vector.extract_strided_slice %237 {offsets = [0, 32], sizes = [96, 2], strides = [1, 1]} : vector<96x34xf32> to vector<96x2xf32>
    %cst_76 = arith.constant dense<0.000000e+00> : vector<96x32xf32>
    %242 = tpu.matmul %240, %127, %cst_76 {dimension_numbers = #tpu.dot_dimension_numbers<[1], [0], [0], [1], [0, 0, 1, 1], [], []>} : vector<96x32xf32>, vector<32x32xf32>, vector<96x32xf32> -> vector<96x32xf32>
    %243 = vector.broadcast %129 : vector<1x32xf32> to vector<96x32xf32>
    %244 = arith.addf %242, %243 : vector<96x32xf32>
    %cst_77 = arith.constant 0.000000e+00 : f32
    %245 = vector.broadcast %cst_77 : f32 to vector<96x32xf32>
    %246 = arith.maximumf %244, %245 : vector<96x32xf32>
    %247 = vector.broadcast %131 : vector<1x32xf32> to vector<96x32xf32>
    %248 = arith.mulf %246, %247 : vector<96x32xf32>
    %cst_78 = arith.constant dense<0.000000e+00> : vector<96xf32>
    %249 = vector.multi_reduction <add>, %248, %cst_78 [1] : vector<96x32xf32> to vector<96xf32>
    %250 = vector.shape_cast %249 : vector<96xf32> to vector<96x1xf32>
    %251 = vector.broadcast %132 : vector<1x32xf32> to vector<96x32xf32>
    %252 = arith.mulf %246, %251 : vector<96x32xf32>
    %cst_79 = arith.constant dense<0.000000e+00> : vector<96xf32>
    %253 = vector.multi_reduction <add>, %252, %cst_79 [1] : vector<96x32xf32> to vector<96xf32>
    %254 = vector.shape_cast %253 : vector<96xf32> to vector<96x1xf32>
    %255 = tpu.concatenate %250, %254 in 1 : vector<96x1xf32>, vector<96x1xf32> -> vector<96x2xf32>
    %256 = vector.broadcast %130 : vector<1x2xf32> to vector<96x2xf32>
    %257 = arith.addf %255, %256 : vector<96x2xf32>
    %c0_80 = arith.constant 0 : index
    %c192_81 = arith.constant 192 : index
    %c0_82 = arith.constant 0 : index
    %258 = vector.load %arg2[%c0_80, %c192_81, %c0_82] : memref<2x288x2xf32, #tpu.memory_space<vmem>>, vector<1x96x2xf32>
    %259 = vector.shape_cast %258 : vector<1x96x2xf32> to vector<96x2xf32>
    %cst_83 = arith.constant 0.000000e+00 : f32
    %cst_84 = arith.constant 1.000000e+00 : f32
    %260 = vector.broadcast %cst_83 : f32 to vector<96x2xf32>
    %261 = arith.maximumf %260, %259 : vector<96x2xf32>
    %262 = vector.broadcast %cst_84 : f32 to vector<96x2xf32>
    %263 = arith.minimumf %262, %261 : vector<96x2xf32>
    %cst_85 = arith.constant 1.000000e-03 : f32
    %264 = vector.broadcast %cst_85 : f32 to vector<96x2xf32>
    %265 = arith.maximumf %263, %264 : vector<96x2xf32>
    %266 = math.log %265 : vector<96x2xf32>
    %cst_86 = arith.constant 1.000000e+00 : f32
    %267 = vector.broadcast %cst_86 : f32 to vector<96x2xf32>
    %268 = arith.subf %267, %263 : vector<96x2xf32>
    %cst_87 = arith.constant 1.000000e-03 : f32
    %269 = vector.broadcast %cst_87 : f32 to vector<96x2xf32>
    %270 = arith.maximumf %268, %269 : vector<96x2xf32>
    %271 = math.log %270 : vector<96x2xf32>
    %272 = arith.subf %266, %271 : vector<96x2xf32>
    %273 = arith.addf %272, %257 : vector<96x2xf32>
    %274 = arith.negf %273 : vector<96x2xf32>
    %275 = math.exp %274 : vector<96x2xf32>
    %cst_88 = arith.constant 1.000000e+00 : f32
    %276 = vector.broadcast %cst_88 : f32 to vector<96x2xf32>
    %277 = arith.addf %276, %275 : vector<96x2xf32>
    %278 = arith.divf %276, %277 : vector<96x2xf32>
    %279 = tpu.concatenate %278, %241, %121, %120 in 1 : vector<96x2xf32>, vector<96x2xf32>, vector<96x2xf32>, vector<96x122xf32> -> vector<96x128xf32>
    %c0_89 = arith.constant 0 : index
    %c192_90 = arith.constant 192 : index
    %c0_91 = arith.constant 0 : index
    %280 = vector.load %arg7[%c0_89, %c192_90, %c0_91] : memref<2x288x128xf32, #tpu.memory_space<vmem>>, vector<1x96x128xf32>
    %281 = vector.shape_cast %280 : vector<1x96x128xf32> to vector<96x128xf32>
    %282 = vector.shape_cast %279 : vector<96x128xf32> to vector<1x96x128xf32>
    tpu.vector_store %arg7[%c0_89, %c192_90, %c0_91], %282 {strides = array<i32>} : memref<2x288x128xf32, #tpu.memory_space<vmem>>, vector<1x96x128xf32>,
    %c1_92 = arith.constant 1 : index
    %c0_93 = arith.constant 0 : index
    %c0_94 = arith.constant 0 : index
    %283 = vector.load %arg4[%c1_92, %c0_93, %c0_94] : memref<2x68x34xf32, #tpu.memory_space<vmem>>, vector<1x68x34xf32>
    %284 = vector.shape_cast %283 : vector<1x68x34xf32> to vector<68x34xf32>
    %285 = vector.extract_strided_slice %284 {offsets = [0, 0], sizes = [32, 34], strides = [1, 1]} : vector<68x34xf32> to vector<32x34xf32>
    %286 = vector.extract_strided_slice %284 {offsets = [32, 0], sizes = [32, 32], strides = [1, 1]} : vector<68x34xf32> to vector<32x32xf32>
    %287 = vector.extract_strided_slice %284 {offsets = [64, 0], sizes = [1, 34], strides = [1, 1]} : vector<68x34xf32> to vector<1x34xf32>
    %288 = vector.extract_strided_slice %284 {offsets = [65, 0], sizes = [1, 32], strides = [1, 1]} : vector<68x34xf32> to vector<1x32xf32>
    %289 = vector.extract_strided_slice %284 {offsets = [65, 32], sizes = [1, 2], strides = [1, 1]} : vector<68x34xf32> to vector<1x2xf32>
    %290 = vector.extract_strided_slice %284 {offsets = [66, 0], sizes = [1, 32], strides = [1, 1]} : vector<68x34xf32> to vector<1x32xf32>
    %291 = vector.extract_strided_slice %284 {offsets = [67, 0], sizes = [1, 32], strides = [1, 1]} : vector<68x34xf32> to vector<1x32xf32>
    %c1_95 = arith.constant 1 : index
    %c0_96 = arith.constant 0 : index
    %c0_97 = arith.constant 0 : index
    %292 = vector.load %arg1[%c1_95, %c0_96, %c0_97] : memref<2x288x32xf32, #tpu.memory_space<vmem>>, vector<1x96x32xf32>
    %293 = vector.shape_cast %292 : vector<1x96x32xf32> to vector<96x32xf32>
    %cst_98 = arith.constant dense<0.000000e+00> : vector<96x34xf32>
    %294 = tpu.matmul %293, %285, %cst_98 {dimension_numbers = #tpu.dot_dimension_numbers<[1], [0], [0], [1], [0, 0, 1, 1], [], []>} : vector<96x32xf32>, vector<32x34xf32>, vector<96x34xf32> -> vector<96x34xf32>
    %295 = vector.broadcast %287 : vector<1x34xf32> to vector<96x34xf32>
    %296 = arith.addf %294, %295 : vector<96x34xf32>
    %297 = vector.extract_strided_slice %296 {offsets = [0, 0], sizes = [96, 32], strides = [1, 1]} : vector<96x34xf32> to vector<96x32xf32>
    %cst_99 = arith.constant 0.000000e+00 : f32
    %298 = vector.broadcast %cst_99 : f32 to vector<96x32xf32>
    %299 = arith.maximumf %297, %298 : vector<96x32xf32>
    %300 = vector.extract_strided_slice %296 {offsets = [0, 32], sizes = [96, 2], strides = [1, 1]} : vector<96x34xf32> to vector<96x2xf32>
    %cst_100 = arith.constant dense<0.000000e+00> : vector<96x32xf32>
    %301 = tpu.matmul %299, %286, %cst_100 {dimension_numbers = #tpu.dot_dimension_numbers<[1], [0], [0], [1], [0, 0, 1, 1], [], []>} : vector<96x32xf32>, vector<32x32xf32>, vector<96x32xf32> -> vector<96x32xf32>
    %302 = vector.broadcast %288 : vector<1x32xf32> to vector<96x32xf32>
    %303 = arith.addf %301, %302 : vector<96x32xf32>
    %cst_101 = arith.constant 0.000000e+00 : f32
    %304 = vector.broadcast %cst_101 : f32 to vector<96x32xf32>
    %305 = arith.maximumf %303, %304 : vector<96x32xf32>
    %306 = vector.broadcast %290 : vector<1x32xf32> to vector<96x32xf32>
    %307 = arith.mulf %305, %306 : vector<96x32xf32>
    %cst_102 = arith.constant dense<0.000000e+00> : vector<96xf32>
    %308 = vector.multi_reduction <add>, %307, %cst_102 [1] : vector<96x32xf32> to vector<96xf32>
    %309 = vector.shape_cast %308 : vector<96xf32> to vector<96x1xf32>
    %310 = vector.broadcast %291 : vector<1x32xf32> to vector<96x32xf32>
    %311 = arith.mulf %305, %310 : vector<96x32xf32>
    %cst_103 = arith.constant dense<0.000000e+00> : vector<96xf32>
    %312 = vector.multi_reduction <add>, %311, %cst_103 [1] : vector<96x32xf32> to vector<96xf32>
    %313 = vector.shape_cast %312 : vector<96xf32> to vector<96x1xf32>
    %314 = tpu.concatenate %309, %313 in 1 : vector<96x1xf32>, vector<96x1xf32> -> vector<96x2xf32>
    %315 = vector.broadcast %289 : vector<1x2xf32> to vector<96x2xf32>
    %316 = arith.addf %314, %315 : vector<96x2xf32>
    %c1_104 = arith.constant 1 : index
    %c0_105 = arith.constant 0 : index
    %c0_106 = arith.constant 0 : index
    %317 = vector.load %arg2[%c1_104, %c0_105, %c0_106] : memref<2x288x2xf32, #tpu.memory_space<vmem>>, vector<1x96x2xf32>
    %318 = vector.shape_cast %317 : vector<1x96x2xf32> to vector<96x2xf32>
    %cst_107 = arith.constant 0.000000e+00 : f32
    %cst_108 = arith.constant 1.000000e+00 : f32
    %319 = vector.broadcast %cst_107 : f32 to vector<96x2xf32>
    %320 = arith.maximumf %319, %318 : vector<96x2xf32>
    %321 = vector.broadcast %cst_108 : f32 to vector<96x2xf32>
    %322 = arith.minimumf %321, %320 : vector<96x2xf32>
    %cst_109 = arith.constant 1.000000e-03 : f32
    %323 = vector.broadcast %cst_109 : f32 to vector<96x2xf32>
    %324 = arith.maximumf %322, %323 : vector<96x2xf32>
    %325 = math.log %324 : vector<96x2xf32>
    %cst_110 = arith.constant 1.000000e+00 : f32
    %326 = vector.broadcast %cst_110 : f32 to vector<96x2xf32>
    %327 = arith.subf %326, %322 : vector<96x2xf32>
    %cst_111 = arith.constant 1.000000e-03 : f32
    %328 = vector.broadcast %cst_111 : f32 to vector<96x2xf32>
    %329 = arith.maximumf %327, %328 : vector<96x2xf32>
    %330 = math.log %329 : vector<96x2xf32>
    %331 = arith.subf %325, %330 : vector<96x2xf32>
    %332 = arith.addf %331, %316 : vector<96x2xf32>
    %333 = arith.negf %332 : vector<96x2xf32>
    %334 = math.exp %333 : vector<96x2xf32>
    %cst_112 = arith.constant 1.000000e+00 : f32
    %335 = vector.broadcast %cst_112 : f32 to vector<96x2xf32>
    %336 = arith.addf %335, %334 : vector<96x2xf32>
    %337 = arith.divf %335, %336 : vector<96x2xf32>
    %338 = tpu.concatenate %337, %300, %121, %120 in 1 : vector<96x2xf32>, vector<96x2xf32>, vector<96x2xf32>, vector<96x122xf32> -> vector<96x128xf32>
    %c1_113 = arith.constant 1 : index
    %c0_114 = arith.constant 0 : index
    %c0_115 = arith.constant 0 : index
    %339 = vector.load %arg7[%c1_113, %c0_114, %c0_115] : memref<2x288x128xf32, #tpu.memory_space<vmem>>, vector<1x96x128xf32>
    %340 = vector.shape_cast %339 : vector<1x96x128xf32> to vector<96x128xf32>
    %341 = vector.shape_cast %338 : vector<96x128xf32> to vector<1x96x128xf32>
    tpu.vector_store %arg7[%c1_113, %c0_114, %c0_115], %341 {strides = array<i32>} : memref<2x288x128xf32, #tpu.memory_space<vmem>>, vector<1x96x128xf32>,
    %c1_116 = arith.constant 1 : index
    %c96_117 = arith.constant 96 : index
    %c0_118 = arith.constant 0 : index
    %342 = vector.load %arg1[%c1_116, %c96_117, %c0_118] : memref<2x288x32xf32, #tpu.memory_space<vmem>>, vector<1x96x32xf32>
    %343 = vector.shape_cast %342 : vector<1x96x32xf32> to vector<96x32xf32>
    %cst_119 = arith.constant dense<0.000000e+00> : vector<96x34xf32>
    %344 = tpu.matmul %343, %285, %cst_119 {dimension_numbers = #tpu.dot_dimension_numbers<[1], [0], [0], [1], [0, 0, 1, 1], [], []>} : vector<96x32xf32>, vector<32x34xf32>, vector<96x34xf32> -> vector<96x34xf32>
    %345 = vector.broadcast %287 : vector<1x34xf32> to vector<96x34xf32>
    %346 = arith.addf %344, %345 : vector<96x34xf32>
    %347 = vector.extract_strided_slice %346 {offsets = [0, 0], sizes = [96, 32], strides = [1, 1]} : vector<96x34xf32> to vector<96x32xf32>
    %cst_120 = arith.constant 0.000000e+00 : f32
    %348 = vector.broadcast %cst_120 : f32 to vector<96x32xf32>
    %349 = arith.maximumf %347, %348 : vector<96x32xf32>
    %350 = vector.extract_strided_slice %346 {offsets = [0, 32], sizes = [96, 2], strides = [1, 1]} : vector<96x34xf32> to vector<96x2xf32>
    %cst_121 = arith.constant dense<0.000000e+00> : vector<96x32xf32>
    %351 = tpu.matmul %349, %286, %cst_121 {dimension_numbers = #tpu.dot_dimension_numbers<[1], [0], [0], [1], [0, 0, 1, 1], [], []>} : vector<96x32xf32>, vector<32x32xf32>, vector<96x32xf32> -> vector<96x32xf32>
    %352 = vector.broadcast %288 : vector<1x32xf32> to vector<96x32xf32>
    %353 = arith.addf %351, %352 : vector<96x32xf32>
    %cst_122 = arith.constant 0.000000e+00 : f32
    %354 = vector.broadcast %cst_122 : f32 to vector<96x32xf32>
    %355 = arith.maximumf %353, %354 : vector<96x32xf32>
    %356 = vector.broadcast %290 : vector<1x32xf32> to vector<96x32xf32>
    %357 = arith.mulf %355, %356 : vector<96x32xf32>
    %cst_123 = arith.constant dense<0.000000e+00> : vector<96xf32>
    %358 = vector.multi_reduction <add>, %357, %cst_123 [1] : vector<96x32xf32> to vector<96xf32>
    %359 = vector.shape_cast %358 : vector<96xf32> to vector<96x1xf32>
    %360 = vector.broadcast %291 : vector<1x32xf32> to vector<96x32xf32>
    %361 = arith.mulf %355, %360 : vector<96x32xf32>
    %cst_124 = arith.constant dense<0.000000e+00> : vector<96xf32>
    %362 = vector.multi_reduction <add>, %361, %cst_124 [1] : vector<96x32xf32> to vector<96xf32>
    %363 = vector.shape_cast %362 : vector<96xf32> to vector<96x1xf32>
    %364 = tpu.concatenate %359, %363 in 1 : vector<96x1xf32>, vector<96x1xf32> -> vector<96x2xf32>
    %365 = vector.broadcast %289 : vector<1x2xf32> to vector<96x2xf32>
    %366 = arith.addf %364, %365 : vector<96x2xf32>
    %c1_125 = arith.constant 1 : index
    %c96_126 = arith.constant 96 : index
    %c0_127 = arith.constant 0 : index
    %367 = vector.load %arg2[%c1_125, %c96_126, %c0_127] : memref<2x288x2xf32, #tpu.memory_space<vmem>>, vector<1x96x2xf32>
    %368 = vector.shape_cast %367 : vector<1x96x2xf32> to vector<96x2xf32>
    %cst_128 = arith.constant 0.000000e+00 : f32
    %cst_129 = arith.constant 1.000000e+00 : f32
    %369 = vector.broadcast %cst_128 : f32 to vector<96x2xf32>
    %370 = arith.maximumf %369, %368 : vector<96x2xf32>
    %371 = vector.broadcast %cst_129 : f32 to vector<96x2xf32>
    %372 = arith.minimumf %371, %370 : vector<96x2xf32>
    %cst_130 = arith.constant 1.000000e-03 : f32
    %373 = vector.broadcast %cst_130 : f32 to vector<96x2xf32>
    %374 = arith.maximumf %372, %373 : vector<96x2xf32>
    %375 = math.log %374 : vector<96x2xf32>
    %cst_131 = arith.constant 1.000000e+00 : f32
    %376 = vector.broadcast %cst_131 : f32 to vector<96x2xf32>
    %377 = arith.subf %376, %372 : vector<96x2xf32>
    %cst_132 = arith.constant 1.000000e-03 : f32
    %378 = vector.broadcast %cst_132 : f32 to vector<96x2xf32>
    %379 = arith.maximumf %377, %378 : vector<96x2xf32>
    %380 = math.log %379 : vector<96x2xf32>
    %381 = arith.subf %375, %380 : vector<96x2xf32>
    %382 = arith.addf %381, %366 : vector<96x2xf32>
    %383 = arith.negf %382 : vector<96x2xf32>
    %384 = math.exp %383 : vector<96x2xf32>
    %cst_133 = arith.constant 1.000000e+00 : f32
    %385 = vector.broadcast %cst_133 : f32 to vector<96x2xf32>
    %386 = arith.addf %385, %384 : vector<96x2xf32>
    %387 = arith.divf %385, %386 : vector<96x2xf32>
    %388 = tpu.concatenate %387, %350, %121, %120 in 1 : vector<96x2xf32>, vector<96x2xf32>, vector<96x2xf32>, vector<96x122xf32> -> vector<96x128xf32>
    %c1_134 = arith.constant 1 : index
    %c96_135 = arith.constant 96 : index
    %c0_136 = arith.constant 0 : index
    %389 = vector.load %arg7[%c1_134, %c96_135, %c0_136] : memref<2x288x128xf32, #tpu.memory_space<vmem>>, vector<1x96x128xf32>
    %390 = vector.shape_cast %389 : vector<1x96x128xf32> to vector<96x128xf32>
    %391 = vector.shape_cast %388 : vector<96x128xf32> to vector<1x96x128xf32>
    tpu.vector_store %arg7[%c1_134, %c96_135, %c0_136], %391 {strides = array<i32>} : memref<2x288x128xf32, #tpu.memory_space<vmem>>, vector<1x96x128xf32>,
    %c1_137 = arith.constant 1 : index
    %c192_138 = arith.constant 192 : index
    %c0_139 = arith.constant 0 : index
    %392 = vector.load %arg1[%c1_137, %c192_138, %c0_139] : memref<2x288x32xf32, #tpu.memory_space<vmem>>, vector<1x96x32xf32>
    %393 = vector.shape_cast %392 : vector<1x96x32xf32> to vector<96x32xf32>
    %cst_140 = arith.constant dense<0.000000e+00> : vector<96x34xf32>
    %394 = tpu.matmul %393, %285, %cst_140 {dimension_numbers = #tpu.dot_dimension_numbers<[1], [0], [0], [1], [0, 0, 1, 1], [], []>} : vector<96x32xf32>, vector<32x34xf32>, vector<96x34xf32> -> vector<96x34xf32>
    %395 = vector.broadcast %287 : vector<1x34xf32> to vector<96x34xf32>
    %396 = arith.addf %394, %395 : vector<96x34xf32>
    %397 = vector.extract_strided_slice %396 {offsets = [0, 0], sizes = [96, 32], strides = [1, 1]} : vector<96x34xf32> to vector<96x32xf32>
    %cst_141 = arith.constant 0.000000e+00 : f32
    %398 = vector.broadcast %cst_141 : f32 to vector<96x32xf32>
    %399 = arith.maximumf %397, %398 : vector<96x32xf32>
    %400 = vector.extract_strided_slice %396 {offsets = [0, 32], sizes = [96, 2], strides = [1, 1]} : vector<96x34xf32> to vector<96x2xf32>
    %cst_142 = arith.constant dense<0.000000e+00> : vector<96x32xf32>
    %401 = tpu.matmul %399, %286, %cst_142 {dimension_numbers = #tpu.dot_dimension_numbers<[1], [0], [0], [1], [0, 0, 1, 1], [], []>} : vector<96x32xf32>, vector<32x32xf32>, vector<96x32xf32> -> vector<96x32xf32>
    %402 = vector.broadcast %288 : vector<1x32xf32> to vector<96x32xf32>
    %403 = arith.addf %401, %402 : vector<96x32xf32>
    %cst_143 = arith.constant 0.000000e+00 : f32
    %404 = vector.broadcast %cst_143 : f32 to vector<96x32xf32>
    %405 = arith.maximumf %403, %404 : vector<96x32xf32>
    %406 = vector.broadcast %290 : vector<1x32xf32> to vector<96x32xf32>
    %407 = arith.mulf %405, %406 : vector<96x32xf32>
    %cst_144 = arith.constant dense<0.000000e+00> : vector<96xf32>
    %408 = vector.multi_reduction <add>, %407, %cst_144 [1] : vector<96x32xf32> to vector<96xf32>
    %409 = vector.shape_cast %408 : vector<96xf32> to vector<96x1xf32>
    %410 = vector.broadcast %291 : vector<1x32xf32> to vector<96x32xf32>
    %411 = arith.mulf %405, %410 : vector<96x32xf32>
    %cst_145 = arith.constant dense<0.000000e+00> : vector<96xf32>
    %412 = vector.multi_reduction <add>, %411, %cst_145 [1] : vector<96x32xf32> to vector<96xf32>
    %413 = vector.shape_cast %412 : vector<96xf32> to vector<96x1xf32>
    %414 = tpu.concatenate %409, %413 in 1 : vector<96x1xf32>, vector<96x1xf32> -> vector<96x2xf32>
    %415 = vector.broadcast %289 : vector<1x2xf32> to vector<96x2xf32>
    %416 = arith.addf %414, %415 : vector<96x2xf32>
    %c1_146 = arith.constant 1 : index
    %c192_147 = arith.constant 192 : index
    %c0_148 = arith.constant 0 : index
    %417 = vector.load %arg2[%c1_146, %c192_147, %c0_148] : memref<2x288x2xf32, #tpu.memory_space<vmem>>, vector<1x96x2xf32>
    %418 = vector.shape_cast %417 : vector<1x96x2xf32> to vector<96x2xf32>
    %cst_149 = arith.constant 0.000000e+00 : f32
    %cst_150 = arith.constant 1.000000e+00 : f32
    %419 = vector.broadcast %cst_149 : f32 to vector<96x2xf32>
    %420 = arith.maximumf %419, %418 : vector<96x2xf32>
    %421 = vector.broadcast %cst_150 : f32 to vector<96x2xf32>
    %422 = arith.minimumf %421, %420 : vector<96x2xf32>
    %cst_151 = arith.constant 1.000000e-03 : f32
    %423 = vector.broadcast %cst_151 : f32 to vector<96x2xf32>
    %424 = arith.maximumf %422, %423 : vector<96x2xf32>
    %425 = math.log %424 : vector<96x2xf32>
    %cst_152 = arith.constant 1.000000e+00 : f32
    %426 = vector.broadcast %cst_152 : f32 to vector<96x2xf32>
    %427 = arith.subf %426, %422 : vector<96x2xf32>
    %cst_153 = arith.constant 1.000000e-03 : f32
    %428 = vector.broadcast %cst_153 : f32 to vector<96x2xf32>
    %429 = arith.maximumf %427, %428 : vector<96x2xf32>
    %430 = math.log %429 : vector<96x2xf32>
    %431 = arith.subf %425, %430 : vector<96x2xf32>
    %432 = arith.addf %431, %416 : vector<96x2xf32>
    %433 = arith.negf %432 : vector<96x2xf32>
    %434 = math.exp %433 : vector<96x2xf32>
    %cst_154 = arith.constant 1.000000e+00 : f32
    %435 = vector.broadcast %cst_154 : f32 to vector<96x2xf32>
    %436 = arith.addf %435, %434 : vector<96x2xf32>
    %437 = arith.divf %435, %436 : vector<96x2xf32>
    %438 = tpu.concatenate %437, %400, %121, %120 in 1 : vector<96x2xf32>, vector<96x2xf32>, vector<96x2xf32>, vector<96x122xf32> -> vector<96x128xf32>
    %c1_155 = arith.constant 1 : index
    %c192_156 = arith.constant 192 : index
    %c0_157 = arith.constant 0 : index
    %439 = vector.load %arg7[%c1_155, %c192_156, %c0_157] : memref<2x288x128xf32, #tpu.memory_space<vmem>>, vector<1x96x128xf32>
    %440 = vector.shape_cast %439 : vector<1x96x128xf32> to vector<96x128xf32>
    %441 = vector.shape_cast %438 : vector<96x128xf32> to vector<1x96x128xf32>
    tpu.vector_store %arg7[%c1_155, %c192_156, %c0_157], %441 {strides = array<i32>} : memref<2x288x128xf32, #tpu.memory_space<vmem>>, vector<1x96x128xf32>,
    return
  }
}

</mosaic_0001>

<bundles_post_ra>
// kernel: group_pose_forward.1
= control target key start
LH: loop header
LB: loop body
LE: loop exit
PB: predicated region body
PF: predicated region fallthrough
CT: control target
= control target key end

     0   :  { %v7023_v0 = vmov 0   ;;  %vm609_vm0 = vcmask 261120   ;;  %v52_v12 = vlaneseq  ;;  %v7024_v13 = vmov 1   ;;  %s7030_s29 = smov 96   ;;  %s7033_s11 = smov 98   ;;  %s11342_s5 = inlined_call_operand.vmem [shape: f32[35,32], index: 5, kind: input, shape index: {}]   ;;  %s11343_s4 = inlined_call_operand.vmem [shape: f32[2,68,34], index: 4, kind: input, shape index: {}]   ;;  %s11344_s1 = inlined_call_operand.vmem [shape: f32[2,288,32], index: 1, kind: input, shape index: {}]   ;;  %s11345_s0 = inlined_call_operand.vmem [shape: f32[2,4,256], index: 0, kind: input, shape index: {}]   ;;  %s11346_s3 = inlined_call_operand.vmem [shape: f32[16,32], index: 3, kind: input, shape index: {}]   ;;  %s11347_s2 = inlined_call_operand.vmem [shape: f32[2,288,2], index: 2, kind: input, shape index: {}]   ;;  %s11348_s6 = inlined_call_operand.vmem [shape: f32[2,32,256], index: 6, kind: output, shape index: {0}]   ;;  %s11349_s7 = inlined_call_operand.vmem [shape: f32[2,288,128], index: 7, kind: output, shape index: {1}]  }
   0x1   :  { %6416 = vset.pattern.permute.xlu1 %v7023_v0  ;;  %6415 = vset.pattern.permute.xlu0 %v7023_v0  ;;  %v7077_v1 = vld [vmem:[%s11342_s5 + $0x10] sm:$0xff]  ;;  %v7082_v2 = vld [vmem:[%s11342_s5] sm:$0xff]  ;;  %v638_v4 = vld [vmem:[%s11343_s4 + $0x8] sm:$0xff]  ;;  %v7025_v21 = vmov 2   ;;  %v7026_v25 = vmov 3   ;;  %v7027_v30 = vmov 4  }
   0x2   :  { %43 = vperm.xlu1 %6416, %v7077_v1   ;;  %33 = vperm.xlu0 %6415, %v7082_v2   ;;  %v637_v3 = vld [vmem:[%s11343_s4] sm:$0xff]  ;;  %v7095_v5 = vld [vmem:[%s11342_s5 + $0x18] sm:$0xff]  ;;  %v7100_v6 = vld [vmem:[%s11342_s5 + $0x8] sm:$0xff]  ;;  %v7123_v14 = vshrl.u32 %v52_v12, 7  ;;  %v7028_v33 = vmov 5   ;;  %v7029_v42 = vmov 6  }
   0x3   :  { %v7102_v7 = vpack.c.bf16 %v638_v4, %v637_v3  ;;  %v639_v8 = vld [vmem:[%s11343_s4 + $0x10] sm:$0xff]  ;;  %v640_v9 = vld [vmem:[%s11343_s4 + $0x18] sm:$0xff]  ;;  %v646_v10 = vld [vmem:[%s11344_s1] sm:$0xff]  ;;  %vm628_vm1 = vcmask 7168   ;;  %vm1420_vm2 = vcmask 15360   ;;  %vm1433_vm3 = vcmask 31744  }
   0x4   :  { %v7114_v11 = vpack.c.bf16 %v640_v9, %v639_v8  ;;  %6004 = vmatprep.mubr.msk.f32.mxu0 %vm609_vm0, %v646_v10  ;;  %v647_v15 = vld [vmem:[%s11344_s1 + $0x8] sm:$0xff]  ;;  %v7131_v16 = vsub.s32 1, %v7123_v14  ;;  %v648_v18 = vld [vmem:[%s11344_s1 + $0x10] sm:$0xff]  ;;  %v649_v20 = vld [vmem:[%s11344_s1 + $0x18] sm:$0xff]  ;;  %v7204_v35 = vsub.s32 3, %v7123_v14  ;;  %vm1446_vm4 = vcmask 48128  }
   0x5   :  { %6309 = vmatprep.subr.bf16.mxu0 %v7102_v7  ;;  %v5587_v17 = vld [vmem:[%s11343_s4 + $0x88] sm:$0xf]  ;;  %v650_v22 = vld [vmem:[%s11344_s1 + $0x20] sm:$0xff]  ;;  %v652_v24 = vld [vmem:[%s11344_s1 + $0x30] sm:$0xff] }
   0x6   :  { %48 = vperm.xlu1 %6416, %v7095_v5   ;;  %38 = vperm.xlu0 %6415, %v7100_v6   ;;  %v7142_v19 = vrot.slane %v5587_v17, %v7131_v16  ;;  %v651_v23 = vld [vmem:[%s11344_s1 + $0x28] sm:$0xff]  ;;  %v653_v26 = vld [vmem:[%s11344_s1 + $0x38] sm:$0xff]  ;;  %v654_v27 = vld [vmem:[%s11344_s1 + $0x40] sm:$0xff]  ;;  %v7219_v39 = vrot.slane %v5587_v17, %v7204_v35 }
   0x7   :  { %6311 = vmatpush3.bf16.msra.mxu0 %v7102_v7  ;;  %v655_v28 = vld [vmem:[%s11344_s1 + $0x48] sm:$0xff]  ;;  %v656_v29 = vld [vmem:[%s11344_s1 + $0x50] sm:$0xff]  ;;  %v657_v31 = vld [vmem:[%s11344_s1 + $0x58] sm:$0xff] }
   0x8   :  { %6313 = vmatprep.subr.bf16.mxu0 %v7114_v11  ;;  %11462 = vst [vmem:[#allocation2_spill] sm:$0xff] %v7142_v19  ;;  %v1471_v32 = vld [vmem:[%s11344_s1 + $0x60] sm:$0xff]  ;;  %v1472_v34 = vld [vmem:[%s11344_s1 + $0x68] sm:$0xff]  ;;  %v1473_v37 = vld [vmem:[%s11344_s1 + $0x70] sm:$0xff] }
   0x9   :  { %v7209_v36 = vld [vmem:[%s11343_s4 + $0x40] sm:$0xf]  ;;  %11464 = vst [vmem:[#allocation4_spill] sm:$0xff] %v7219_v39  ;;  %v1474_v40 = vld [vmem:[%s11344_s1 + $0x78] sm:$0xff]  ;;  %v1476_v43 = vld [vmem:[%s11344_s1 + $0x88] sm:$0xff] }
   0xa   :  { %6418 = vset.pattern.permute.xlu1 %v7024_v13  ;;  %6417 = vset.pattern.permute.xlu0 %v7024_v13  ;;  %v7216_v38 = vrot.slane %v7209_v36, %v7204_v35  ;;  %v1475_v41 = vld [vmem:[%s11344_s1 + $0x80] sm:$0xff]  ;;  %v1477_v44 = vld [vmem:[%s11344_s1 + $0x90] sm:$0xff]  ;;  %v1478_v45 = vld [vmem:[%s11344_s1 + $0x98] sm:$0xff] }
   0xb   :  { %83 = vperm.xlu1 %6418, %v7100_v6   ;;  %79 = vperm.xlu0 %6417, %v7082_v2   ;;  %v1479_v46 = vld [vmem:[%s11344_s1 + $0xa0] sm:$0xff]  ;;  %v1480_v47 = vld [vmem:[%s11344_s1 + $0xa8] sm:$0xff]  ;;  %v1481_v48 = vld [vmem:[%s11344_s1 + $0xb0] sm:$0xff] }
   0xc   :  { %6315 = vmatpush3.bf16.msra.mxu0 %v7114_v11  ;;  %11463 = vst [vmem:[#allocation3_spill] sm:$0xff] %v7216_v38  ;;  %v1482_v49 = vld [vmem:[%s11344_s1 + $0xb8] sm:$0xff]  ;;  %v5579_v50 = vld [vmem:[%s11343_s4 + $0x48] sm:$0xff]  ;;  %v5580_v51 = vld [vmem:[%s11343_s4 + $0x50] sm:$0xff] }
   0xd   :  { %6325 = vmatprep.subr.bf16.mxu0 %v7102_v7  ;;  %v2261_v52 = vld [vmem:[%s11344_s1 + $0xc0] sm:$0xff]  ;;  %v7275_v53 = vpack.c.bf16 %v5580_v51, %v5579_v50  ;;  %v2262_v54 = vld [vmem:[%s11344_s1 + $0xc8] sm:$0xff]  ;;  %v2263_v55 = vld [vmem:[%s11344_s1 + $0xd0] sm:$0xff] }
   0xe   :  { %v2264_v56 = vld [vmem:[%s11344_s1 + $0xd8] sm:$0xff]  ;;  %v2265_v57 = vld [vmem:[%s11344_s1 + $0xe0] sm:$0xff]  ;;  %v2266_v58 = vld [vmem:[%s11344_s1 + $0xe8] sm:$0xff] }
   0xf   :  { %87 = vperm.xlu1 %6418, %v7077_v1   ;;  %91 = vperm.xlu0 %6417, %v7095_v5   ;;  %v5581_v59 = vld [vmem:[%s11343_s4 + $0x58] sm:$0xff]  ;;  %v5582_v60 = vld [vmem:[%s11343_s4 + $0x60] sm:$0xff]  ;;  %v2267_v61 = vld [vmem:[%s11344_s1 + $0xf0] sm:$0xff] }
  0x10   :  { %6005 = vmatmul.mubr.msk.f32.vlgmr.msra.gmra.mrb[0].mxu0 %vm609_vm0, %v647_v15  ;;  %v7312_v62 = vpack.c.bf16 %v5582_v60, %v5581_v59  ;;  %v2268_v63 = vld [vmem:[%s11344_s1 + $0xf8] sm:$0xff]  ;;  %v2269_v0 = vld [vmem:[%s11344_s1 + $0x100] sm:$0xff]  ;;  %v2271_v4 = vld [vmem:[%s11344_s1 + $0x110] sm:$0xff] }
  0x11   :  { %6007 = vmatprep.mubr.msk.f32.mxu0 %vm609_vm0, %v648_v18  ;;  %6327 = vmatpush3.bf16.msra.mxu0 %v7102_v7  ;;  %v641_v3 = vld [vmem:[%s11343_s4 + $0x20] sm:$0xff]  ;;  %v5589_v8 = vld [vmem:[%s11344_s1 + $0x128] sm:$0xff]  ;;  %v5590_v9 = vld [vmem:[%s11344_s1 + $0x130] sm:$0xff] }
  0x12   :  { %6329 = vmatprep.subr.bf16.mxu0 %v7114_v11  ;;  %11465 = vst [vmem:[#allocation5_spill] sm:$0xff] %v7312_v62  ;;  %v5591_v10 = vld [vmem:[%s11344_s1 + $0x138] sm:$0xff]  ;;  %v5593_v12 = vld [vmem:[%s11344_s1 + $0x148] sm:$0xff]  ;;  %v5594_v13 = vld [vmem:[%s11344_s1 + $0x150] sm:$0xff] }
  0x13   :  { %6419 = vset.pattern.permute.xlu1 %v7025_v21  ;;  %6420 = vset.pattern.permute.xlu0 %v7025_v21  ;;  %v5595_v15 = vld [vmem:[%s11344_s1 + $0x158] sm:$0xff]  ;;  %v5596_v17 = vld [vmem:[%s11344_s1 + $0x160] sm:$0xff]  ;;  %v643_v18 = vld [vmem:[%s11343_s4 + $0x30] sm:$0xff] }
  0x14   :  { %129 = vperm.xlu1 %6419, %v7082_v2   ;;  %133 = vperm.xlu0 %6420, %v7100_v6   ;;  %v5597_v21 = vld [vmem:[%s11344_s1 + $0x168] sm:$0xff] }
  0x15   :  { %6008 = vmatmul.mubr.msk.f32.gmra.mrb[2].mxu0 %vm609_vm0, %v649_v20  ;;  %v644_v20 = vld [vmem:[%s11343_s4 + $0x38] sm:$0xff] }
  0x16   :  { %6010 = vmatprep.mubr.msk.f32.mxu0 %vm609_vm0, %v650_v22  ;;  %6331 = vmatpush3.bf16.msra.mxu0 %v7114_v11  ;;  %v7400_v22 = vpack.c.bf16 %v644_v20, %v643_v18 }
  0x17   :  { %6341 = vmatprep.subr.bf16.mxu0 %v7102_v7 }
  0x18   :  { %137 = vperm.xlu1 %6419, %v7077_v1   ;;  %6421 = vset.pattern.permute.xlu0 %v7026_v25  ;;  %11467 = vst [vmem:[#allocation7_spill] sm:$0xff] %v7400_v22 }
  0x19   :  { %179 = vperm.xlu0 %6421, %v7082_v2   ;;  %6011 = vmatmul.mubr.msk.f32.gmra.mrb[4].mxu0 %vm609_vm0, %v651_v23  ;;  %v5598_v23 = vld [vmem:[%s11344_s1 + $0x170] sm:$0xff] }
  0x1a   :  { %6013 = vmatprep.mubr.msk.f32.mxu0 %vm609_vm0, %v652_v24  ;;  %v5599_v24 = vld [vmem:[%s11344_s1 + $0x178] sm:$0xff] }
  0x1c   :  { %141 = vperm.xlu1 %6419, %v7095_v5  }
  0x1d   :  { %191 = vperm.xlu0 %6421, %v7095_v5   ;;  %6014 = vmatmul.mubr.msk.f32.gmra.mrb[6].mxu0 %vm609_vm0, %v653_v26 }
  0x1e   :  { %6016 = vmatprep.mubr.msk.f32.mxu0 %vm609_vm0, %v654_v27  ;;  %v7417_v27 = vsub.s32 0, %v7123_v14 }
  0x20   :  { %6422 = vset.pattern.permute.xlu1 %v7026_v25  ;;  %11468 = vst [vmem:[#allocation8_spill] sm:$0xff] %v7417_v27 }
  0x21   :  { %183 = vperm.xlu1 %6422, %v7100_v6   ;;  %6424 = vset.pattern.permute.xlu0 %v7027_v30 }
  0x22   :  { %233 = vperm.xlu0 %6424, %v7100_v6   ;;  %6017 = vmatmul.mubr.msk.f32.gmra.mrb[8].mxu0 %vm609_vm0, %v655_v28  ;;  %v30_v28 = vld [vmem:[%s11345_s0] sm:$0xff] }
  0x23   :  { %6019 = vmatprep.mubr.msk.f32.mxu0 %vm609_vm0, %v656_v29  ;;  %v197_v59 = vrot.slane %v30_v28, %v7204_v35 }
  0x25   :  { %187 = vperm.xlu1 %6422, %v7077_v1  }
  0x26   :  { %6020 = vmatmul.mubr.msk.f32.gmra.mrb[10].mxu0 %vm609_vm0, %v657_v31  ;;  %6426 = vset.pattern.permute.xlu0 %v7028_v33  ;;  %v58_v31 = vsub.s32 4, %v7123_v14 }
  0x27   :  { %6056 = vmatprep.mubr.msk.f32.mxu0 %vm609_vm0, %v1471_v32  ;;  %322 = vperm.xlu0 %6426, %v7100_v6   ;;  %v55_v32 = vrot.slane %v30_v28, %v7417_v27 }
  0x29   :  { %6423 = vset.pattern.permute.xlu1 %v7027_v30 }
  0x2a   :  { %229 = vperm.xlu1 %6423, %v7082_v2   ;;  %6057 = vmatmul.mubr.msk.f32.vlgmr.msra.gmra.mrb[12].mxu0 %vm609_vm0, %v1472_v34  ;;  %v100_v34 = vsub.s32 5, %v7123_v14 }
  0x2b   :  { %6059 = vmatprep.mubr.msk.f32.mxu0 %vm609_vm0, %v1473_v37  ;;  %6343 = vmatpush3.bf16.msra.mxu0 %v7102_v7  ;;  %v2272_v7 = vld [vmem:[%s11344_s1 + $0x118] sm:$0xff]  ;;  %v7433_v37 = vsub.s32 2, %v7123_v14 }
  0x2c   :  { %6345 = vmatprep.subr.bf16.mxu0 %v7114_v11  ;;  %6428 = vset.pattern.permute.xlu0 %v7029_v42 }
  0x2d   :  { %11469 = vst [vmem:[#allocation9_spill] sm:$0xff] %v7433_v37 }
  0x2e   :  { %237 = vperm.xlu1 %6423, %v7077_v1   ;;  %6060 = vmatmul.mubr.msk.f32.gmra.mrb[14].mxu0 %vm609_vm0, %v1474_v40  ;;  %v150_v40 = vsub.s32 6, %v7123_v14 }
  0x2f   :  { %6062 = vmatprep.mubr.msk.f32.mxu0 %vm609_vm0, %v1475_v41  ;;  %6347 = vmatpush3.bf16.msra.mxu0 %v7114_v11  ;;  %v5592_v11 = vld [vmem:[%s11344_s1 + $0x140] sm:$0xff] }
  0x30   :  { %6357 = vmatprep.subr.bf16.mxu0 %v7275_v53 }
  0x32   :  { %241 = vperm.xlu1 %6423, %v7095_v5   ;;  %6063 = vmatmul.mubr.msk.f32.gmra.mrb[16].mxu0 %vm609_vm0, %v1476_v43  ;;  %v200_v43 = vsub.s32 7, %v7123_v14  ;;  %v151_v14 = vrot.slane %v30_v28, %v150_v40 }
  0x33   :  { %6065 = vmatprep.mubr.msk.f32.mxu0 %vm609_vm0, %v1477_v44  ;;  %v59_v44 = vrot.slane %v30_v28, %v58_v31 }
  0x34   :  { %v201_v60 = vrot.slane %v30_v28, %v200_v43 }
  0x36   :  { %6425 = vset.pattern.permute.xlu1 %v7028_v33  ;;  %6066 = vmatmul.mubr.msk.f32.gmra.mrb[18].mxu0 %vm609_vm0, %v1478_v45  ;;  %v5462_v33 = vld [vmem:[%s11345_s0 + $0x8] sm:$0xff] }
  0x37   :  { %318 = vperm.xlu1 %6425, %v7082_v2   ;;  %6068 = vmatprep.mubr.msk.f32.mxu0 %vm609_vm0, %v1479_v46  ;;  %v379_v45 = vrot.slane %v5462_v33, %v7417_v27  ;;  %v383_v46 = vrot.slane %v5462_v33, %v58_v31  ;;  %v405_v50 = vrot.slane %v5462_v33, %v7131_v16 }
  0x38   :  { %v409_v51 = vrot.slane %v5462_v33, %v100_v34 }
  0x3a   :  { %6069 = vmatmul.mubr.msk.f32.gmra.mrb[20].mxu0 %vm609_vm0, %v1480_v47  ;;  %v97_v47 = vrot.slane %v30_v28, %v7131_v16 }
  0x3b   :  { %326 = vperm.xlu1 %6425, %v7077_v1   ;;  %6071 = vmatprep.mubr.msk.f32.mxu0 %vm609_vm0, %v1481_v48  ;;  %v65_v48 = vrot.slane %v55_v32, %v7417_v27 }
  0x3e   :  { %6072 = vmatmul.mubr.msk.f32.gmra.mrb[22].mxu0 %vm609_vm0, %v1482_v49  ;;  %v101_v49 = vrot.slane %v30_v28, %v100_v34 }
  0x3f   :  { %330 = vperm.xlu1 %6425, %v7095_v5   ;;  %6108 = vmatprep.mubr.msk.f32.mxu0 %vm609_vm0, %v2261_v52  ;;  %v7446_v52 = vld [vmem:[%s11342_s5 + $0x20] sm:$0x7] }
  0x40   :  { %11470 = vst [vmem:[#allocation10_spill] sm:$0xff] %v7446_v52  ;;  %v7500_v32 = vrot.slane %v7446_v52, %v7131_v16 }
  0x42   :  { %6109 = vmatmul.mubr.msk.f32.vlgmr.msra.gmra.mrb[24].mxu0 %vm609_vm0, %v2262_v54  ;;  %v147_v54 = vrot.slane %v30_v28, %v7433_v37 }
  0x43   :  { %6427 = vset.pattern.permute.xlu1 %v7029_v42  ;;  %6111 = vmatprep.mubr.msk.f32.mxu0 %vm609_vm0, %v2263_v55  ;;  %v439_v55 = vrot.slane %v5462_v33, %v7433_v37 }
  0x44   :  { %342 = vperm.xlu1 %6427, %v7082_v2   ;;  %6359 = vmatpush3.bf16.msra.mxu0 %v7275_v53  ;;  %v2270_v2 = vld [vmem:[%s11344_s1 + $0x108] sm:$0xff] }
  0x45   :  { %6361 = vmatprep.subr.bf16.mxu0 %v7312_v62 }
  0x46   :  { %6112 = vmatmul.mubr.msk.f32.gmra.mrb[26].mxu0 %vm609_vm0, %v2264_v56  ;;  %v443_v56 = vrot.slane %v5462_v33, %v150_v40 }
  0x47   :  { %6114 = vmatprep.mubr.msk.f32.mxu0 %vm609_vm0, %v2265_v57 }
  0x48   :  { %346 = vperm.xlu1 %6427, %v7100_v6   ;;  %6363 = vmatpush3.bf16.msra.mxu0 %v7312_v62 }
  0x49   :  { %6373 = vmatprep.subr.bf16.mxu0 %v7275_v53 }
  0x4a   :  { %6115 = vmatmul.mubr.msk.f32.gmra.mrb[28].mxu0 %vm609_vm0, %v2266_v58 }
  0x4b   :  { %6117 = vmatprep.mubr.msk.f32.mxu0 %vm609_vm0, %v2267_v61  ;;  %v473_v61 = vrot.slane %v5462_v33, %v7204_v35 }
  0x4c   :  { %350 = vperm.xlu1 %6427, %v7077_v1   ;;  %v642_v1 = vld [vmem:[%s11343_s4 + $0x28] sm:$0xff] }
  0x4d   :  { %v7341_v6 = vpack.c.bf16 %v642_v1, %v641_v3  ;;  %v393_v3 = vrot.slane %v383_v46, %v7417_v27  ;;  %v7459_v1 = vrot.slane %v7446_v52, %v7417_v27  ;;  %v7489_v18 = vrot.slane %v473_v61, %v7204_v35 }
  0x4e   :  { %6118 = vmatmul.mubr.msk.f32.gmra.mrb[30].mxu0 %vm609_vm0, %v2268_v63  ;;  %v477_v63 = vrot.slane %v5462_v33, %v200_v43 }
  0x4f   :  { %6120 = vmatprep.mubr.msk.f32.mxu0 %vm609_vm0, %v2269_v0  ;;  %11466 = vst [vmem:[#allocation6_spill] sm:$0xff] %v7341_v6  ;;  %6317 = vmatprep.subr.bf16.mxu1 %v7341_v6  ;;  %v69_v0 = vrot.slane %v59_v44, %v7417_v27 }
  0x50   :  { %354 = vperm.xlu1 %6427, %v7095_v5   ;;  %6319 = vmatpush3.bf16.msra.mxu1 %v7341_v6  ;;  %v5588_v5 = vld [vmem:[%s11344_s1 + $0x120] sm:$0xff]  ;;  %v7492_v20 = vrot.slane %v477_v63, %v7204_v35 }
  0x51   :  { %6321 = vmatprep.subr.bf16.mxu1 %v7400_v22 }
  0x52   :  { %6121 = vmatmul.mubr.msk.f32.gmra.mrb[32].mxu0 %vm609_vm0, %v2270_v2  ;;  %v389_v2 = vrot.slane %v379_v45, %v7417_v27 }
  0x53   :  { %6123 = vmatprep.mubr.msk.f32.mxu0 %vm609_vm0, %v2271_v4  ;;  %v107_v4 = vrot.slane %v97_v47, %v7131_v16 }
  0x54   :  { %6323 = vmatpush3.bf16.msra.mxu1 %v7400_v22 }
  0x55   :  { %6333 = vmatprep.subr.bf16.mxu1 %v7341_v6 }
  0x56   :  { %6124 = vmatmul.mubr.msk.f32.gmra.mrb[34].mxu0 %vm609_vm0, %v2272_v7  ;;  %v111_v7 = vrot.slane %v101_v49, %v7131_v16 }
  0x57   :  { %6160 = vmatprep.mubr.msk.f32.mxu0 %vm609_vm0, %v5588_v5  ;;  %v415_v5 = vrot.slane %v405_v50, %v7131_v16 }
  0x5a   :  { %6161 = vmatmul.mubr.msk.f32.vlgmr.msra.gmra.mrb[36].mxu0 %vm609_vm0, %v5589_v8  ;;  %v419_v8 = vrot.slane %v409_v51, %v7131_v16 }
  0x5b   :  { %6163 = vmatprep.mubr.msk.f32.mxu0 %vm609_vm0, %v5590_v9  ;;  %6375 = vmatpush3.bf16.msra.mxu0 %v7275_v53  ;;  %v7468_v9 = vld [vmem:[%s11346_s3] sm:$0xff] }
  0x5c   :  { %6377 = vmatprep.subr.bf16.mxu0 %v7312_v62  ;;  %v7496_v31 = vmul.f32 %v7459_v1, %v7468_v9 }
  0x5e   :  { %6164 = vmatmul.mubr.msk.f32.gmra.mrb[38].mxu0 %vm609_vm0, %v5591_v10  ;;  %v7471_v10 = vrot.slane %v147_v54, %v7433_v37 }
  0x5f   :  { %6166 = vmatprep.mubr.msk.f32.mxu0 %vm609_vm0, %v5592_v11  ;;  %6379 = vmatpush3.bf16.msra.mxu0 %v7312_v62  ;;  %v7474_v11 = vrot.slane %v151_v14, %v7433_v37 }
  0x60   :  { %6389 = vmatprep.subr.bf16.mxu0 %v7275_v53 }
  0x62   :  { %6167 = vmatmul.mubr.msk.f32.gmra.mrb[40].mxu0 %vm609_vm0, %v5593_v12  ;;  %v7477_v12 = vrot.slane %v439_v55, %v7433_v37 }
  0x63   :  { %6169 = vmatprep.mubr.msk.f32.mxu0 %vm609_vm0, %v5594_v13  ;;  %v7480_v13 = vrot.slane %v443_v56, %v7433_v37 }
  0x66   :  { %6170 = vmatmul.mubr.msk.f32.gmra.mrb[42].mxu0 %vm609_vm0, %v5595_v15  ;;  %v7483_v15 = vrot.slane %v197_v59, %v7204_v35 }
  0x67   :  { %6172 = vmatprep.mubr.msk.f32.mxu0 %vm609_vm0, %v5596_v17  ;;  %v7486_v17 = vrot.slane %v201_v60, %v7204_v35 }
  0x6a   :  { %6173 = vmatmul.mubr.msk.f32.gmra.mrb[44].mxu0 %vm609_vm0, %v5597_v21 }
  0x6b   :  { %6175 = vmatprep.mubr.msk.f32.mxu0 %vm609_vm0, %v5598_v23 }
  0x6e   :  { %6176 = vmatmul.mubr.msk.f32.gmra.mrb[46].mxu0 %vm609_vm0, %v5599_v24 }
  0x81   :  { %v44_v25 = vpop.permute.xlu1 %43  ;;  %v7414_v26 = vpop.permute.xlu0 %33 }
  0x82   :  { %v74_v21 = vmul.f32 %v65_v48, %v44_v25  ;;  %v75_v23 = vmul.f32 %v69_v0, %v44_v25  ;;  %v398_v33 = vmul.f32 %v389_v2, %v44_v25  ;;  %v399_v34 = vmul.f32 %v393_v3, %v44_v25 }
  0x83   :  { %v70_v40 = vmul.f32 %v65_v48, %v7414_v26  ;;  %v71_v43 = vmul.f32 %v69_v0, %v7414_v26  ;;  %v394_v47 = vmul.f32 %v389_v2, %v7414_v26  ;;  %v395_v49 = vmul.f32 %v393_v3, %v7414_v26 }
  0x85   :  { %v7422_v29 = vpop.permute.xlu1 %48  ;;  %v7424_v30 = vpop.permute.xlu0 %38 }
  0x86   :  { %v72_v35 = vmul.f32 %v65_v48, %v7424_v30  ;;  %v73_v44 = vmul.f32 %v69_v0, %v7424_v30  ;;  %v76_v50 = vmul.f32 %v65_v48, %v7422_v29  ;;  %v77_v51 = vmul.f32 %v69_v0, %v7422_v29 }
  0x87   :  { %v396_v25 = vmul.f32 %v389_v2, %v7424_v30  ;;  %v397_v54 = vmul.f32 %v393_v3, %v7424_v30  ;;  %v7517_v48 = vmul.f32 %v389_v2, %v7422_v29  ;;  %v7520_v0 = vmul.f32 %v393_v3, %v7422_v29 }
  0x8a   :  { %v84_v41 = vpop.permute.xlu1 %83  ;;  %v7436_v42 = vpop.permute.xlu0 %79 }
  0x8b   :  { %v114_v45 = vmul.f32 %v107_v4, %v84_v41  ;;  %v115_v46 = vmul.f32 %v111_v7, %v84_v41  ;;  %v422_v14 = vmul.f32 %v415_v5, %v84_v41  ;;  %v423_v55 = vmul.f32 %v419_v8, %v84_v41 }
  0x8c   :  { %v112_v59 = vmul.f32 %v107_v4, %v7436_v42  ;;  %v113_v60 = vmul.f32 %v111_v7, %v7436_v42  ;;  %v420_v61 = vmul.f32 %v415_v5, %v7436_v42  ;;  %v421_v63 = vmul.f32 %v419_v8, %v7436_v42 }
  0x8d   :  { %v122_v39 = vadd.f32 %v114_v45, %v72_v35  ;;  %v123_v30 = vadd.f32 %v115_v46, %v73_v44  ;;  %v7526_v42 = vadd.f32 %v422_v14, %v396_v25  ;;  %v7528_v27 = vadd.f32 %v423_v55, %v397_v54 }
  0x8e   :  { %v88_v57 = vpop.permute.xlu1 %87  ;;  %v7450_v58 = vpop.permute.xlu0 %91  ;;  %v428_v2 = vadd.f32 %v420_v61, %v394_v47  ;;  %v429_v62 = vadd.f32 %v421_v63, %v395_v49  ;;  %v120_v29 = vadd.f32 %v112_v59, %v70_v40  ;;  %v121_v3 = vadd.f32 %v113_v60, %v71_v43 }
  0x8f   :  { %v116_v19 = vmul.f32 %v107_v4, %v88_v57  ;;  %v117_v41 = vmul.f32 %v111_v7, %v88_v57  ;;  %v424_v38 = vmul.f32 %v415_v5, %v88_v57  ;;  %v425_v52 = vmul.f32 %v419_v8, %v88_v57 }
  0x90   :  { %v118_v37 = vmul.f32 %v107_v4, %v7450_v58  ;;  %v119_v22 = vmul.f32 %v111_v7, %v7450_v58  ;;  %v7531_v35 = vmul.f32 %v415_v5, %v7450_v58  ;;  %v7534_v44 = vmul.f32 %v419_v8, %v7450_v58 }
  0x91   :  { %v432_v45 = vadd.f32 %v424_v38, %v398_v33  ;;  %v433_v46 = vadd.f32 %v425_v52, %v399_v34  ;;  %v124_v25 = vadd.f32 %v116_v19, %v74_v21  ;;  %v125_v54 = vadd.f32 %v117_v41, %v75_v23 }
  0x92   :  { %v126_v43 = vadd.f32 %v118_v37, %v76_v50  ;;  %v127_v5 = vadd.f32 %v119_v22, %v77_v51 }
  0x93   :  { %v130_v24 = vpop.permute.xlu1 %129  ;;  %v134_v28 = vpop.permute.xlu0 %133 }
  0x94   :  { %v164_v57 = vmul.f32 %v7471_v10, %v134_v28  ;;  %v165_v4 = vmul.f32 %v7474_v11, %v134_v28  ;;  %v454_v47 = vmul.f32 %v7477_v12, %v130_v24  ;;  %v455_v40 = vmul.f32 %v7480_v13, %v130_v24 }
  0x95   :  { %v162_v49 = vmul.f32 %v7471_v10, %v130_v24  ;;  %v163_v58 = vmul.f32 %v7474_v11, %v130_v24  ;;  %v456_v8 = vmul.f32 %v7477_v12, %v134_v28  ;;  %v7546_v14 = vmul.f32 %v7480_v13, %v134_v28 }
  0x96   :  { %v172_v38 = vadd.f32 %v164_v57, %v122_v39  ;;  %v173_v52 = vadd.f32 %v165_v4, %v123_v30  ;;  %v462_v50 = vadd.f32 %v454_v47, %v428_v2  ;;  %v463_v51 = vadd.f32 %v455_v40, %v429_v62 }
  0x97   :  { %v138_v56 = vpop.permute.xlu1 %137  ;;  %v170_v59 = vadd.f32 %v162_v49, %v120_v29  ;;  %v171_v60 = vadd.f32 %v163_v58, %v121_v3 }
  0x98   :  { %v180_v26 = vpop.permute.xlu0 %179  ;;  %v458_v23 = vmul.f32 %v7477_v12, %v138_v56  ;;  %v459_v22 = vmul.f32 %v7480_v13, %v138_v56  ;;  %v166_v30 = vmul.f32 %v7471_v10, %v138_v56  ;;  %v167_v41 = vmul.f32 %v7474_v11, %v138_v56 }
  0x99   :  { %v488_v24 = vmul.f32 %v7489_v18, %v180_v26  ;;  %v489_v33 = vmul.f32 %v7492_v20, %v180_v26  ;;  %v212_v61 = vmul.f32 %v7483_v15, %v180_v26  ;;  %v213_v63 = vmul.f32 %v7486_v17, %v180_v26 }
  0x9a   :  { %v466_v62 = vadd.f32 %v458_v23, %v432_v45  ;;  %v467_v47 = vadd.f32 %v459_v22, %v433_v46  ;;  %v174_v45 = vadd.f32 %v166_v30, %v124_v25  ;;  %v175_v46 = vadd.f32 %v167_v41, %v125_v54 }
  0x9b   :  { %v7524_v6 = vpop.permute.xlu1 %141  ;;  %v497_v2 = vadd.f32 %v489_v33, %v463_v51  ;;  %v220_v40 = vadd.f32 %v212_v61, %v170_v59  ;;  %v221_v49 = vadd.f32 %v213_v63, %v171_v60  ;;  %v464_v60 = vadd.f32 %v456_v8, %v7526_v42 }
  0x9c   :  { %v7538_v7 = vpop.permute.xlu0 %191  ;;  %v168_v29 = vmul.f32 %v7471_v10, %v7524_v6  ;;  %v169_v26 = vmul.f32 %v7474_v11, %v7524_v6  ;;  %v460_v30 = vmul.f32 %v7477_v12, %v7524_v6  ;;  %v461_v41 = vmul.f32 %v7480_v13, %v7524_v6 }
  0x9d   :  { %v218_v11 = vmul.f32 %v7483_v15, %v7538_v7  ;;  %v219_v25 = vmul.f32 %v7486_v17, %v7538_v7  ;;  %v465_v42 = vadd.f32 %v7546_v14, %v7528_v27  ;;  %v435_v6 = vadd.f32 %v7534_v44, %v7520_v0 }
  0x9e   :  { %v610_v27 = vsel %vm609_vm0, %v7496_v31, 0.0  ;;  %v495_v0 = vmul.f32 %v7492_v20, %v7538_v7 }
  0xa0   :  { %v184_v55 = vpop.permute.xlu1 %183 }
  0xa1   :  { %v214_v19 = vmul.f32 %v7483_v15, %v184_v55  ;;  %v215_v21 = vmul.f32 %v7486_v17, %v184_v55  ;;  %v7552_v37 = vpop.permute.xlu0 %233  ;;  %v490_v61 = vmul.f32 %v7489_v18, %v184_v55 }
  0xa3   :  { %v222_v34 = vadd.f32 %v214_v19, %v172_v38  ;;  %v223_v28 = vadd.f32 %v215_v21, %v173_v52  ;;  %v496_v38 = vadd.f32 %v488_v24, %v462_v50 }
  0xa4   :  { %v188_v39 = vpop.permute.xlu1 %187 }
  0xa5   :  { %v7561_v57 = vadd.f32 %v7552_v37, %v222_v34  ;;  %v7564_v4 = vadd.f32 %v7552_v37, %v223_v28  ;;  %v492_v56 = vmul.f32 %v7489_v18, %v188_v39  ;;  %v493_v58 = vmul.f32 %v7492_v20, %v188_v39 }
  0xa6   :  { %v216_v52 = vmul.f32 %v7483_v15, %v188_v39  ;;  %v217_v10 = vmul.f32 %v7486_v17, %v188_v39  ;;  %v176_v34 = vadd.f32 %v168_v29, %v126_v43  ;;  %v177_v28 = vadd.f32 %v169_v26, %v127_v5 }
  0xa7   :  { %v255_v3 = vadd.f32 %v7564_v4, %v7561_v57  ;;  %v500_v33 = vadd.f32 %v492_v56, %v466_v62  ;;  %v501_v50 = vadd.f32 %v493_v58, %v467_v47  ;;  %v491_v43 = vmul.f32 %v7492_v20, %v184_v55 }
  0xa8   :  { %v224_v51 = vadd.f32 %v216_v52, %v174_v45  ;;  %v225_v59 = vadd.f32 %v217_v10, %v175_v46  ;;  %v226_v55 = vadd.f32 %v218_v11, %v176_v34  ;;  %v434_v62 = vadd.f32 %v7531_v35, %v7517_v48  ;;  %v5660_v11 = vld [vmem:[%s11344_s1 + $0x180] sm:$0xff]  ;;  %v5663_v34 = vld [vmem:[%s11344_s1 + $0x198] sm:$0xff] }
  0xa9   :  { %v230_v19 = vpop.permute.xlu1 %229  ;;  %256 = vadd.xlane.f32.xlu1 %v255_v3  ;;  %v498_v29 = vadd.f32 %v490_v61, %v464_v60  ;;  %v499_v26 = vadd.f32 %v491_v43, %v465_v42  ;;  %v620_v48 = vmul.f32 %v7500_v32, %v7468_v9  ;;  %v469_v3 = vadd.f32 %v461_v41, %v435_v6  ;;  %v11476_v6 = vld [vmem:[#allocation7_spill] sm:$0xff] }
  0xaa   :  { %v7578_v21 = vadd.f32 %v496_v38, %v230_v19  ;;  %v7580_v23 = vadd.f32 %v497_v2, %v230_v19  ;;  %v7582_v22 = vadd.f32 %v230_v19, %v220_v40  ;;  %v7584_v24 = vadd.f32 %v230_v19, %v221_v49  ;;  %6212 = vmatprep.mubr.msk.f32.mxu0 %vm609_vm0, %v5660_v11 }
  0xab   :  { %v227_v2 = vadd.f32 %v219_v25, %v177_v28  ;;  %v468_v35 = vadd.f32 %v460_v30, %v434_v62  ;;  %v494_v56 = vmul.f32 %v7489_v18, %v7538_v7  ;;  %v7632_v31 = vadd.f32 %v498_v29, %v7552_v37  ;;  %v602_v7 = vld [vmem:[%s11346_s3 + $0x8] sm:$0xff]  ;;  %v5666_v25 = vld [vmem:[%s11344_s1 + $0x1b0] sm:$0xff] }
  0xac   :  { %v512_v54 = vadd.f32 %v7580_v23, %v7578_v21  ;;  %v252_v15 = vadd.f32 %v7584_v24, %v7582_v22  ;;  %v7635_v40 = vadd.f32 %v499_v26, %v7552_v37  ;;  %v622_v9 = vsel %vm609_vm0, %v620_v48, 0.0  ;;  %v5665_v28 = vld [vmem:[%s11344_s1 + $0x1a8] sm:$0xff] }
  0xad   :  { %v238_v39 = vpop.permute.xlu1 %237  ;;  %v502_v49 = vadd.f32 %v494_v56, %v468_v35  ;;  %v503_v58 = vadd.f32 %v495_v0, %v469_v3  ;;  %v608_v37 = vmul.f32 %v7459_v1, %v602_v7  ;;  %v621_v46 = vmul.f32 %v7500_v32, %v602_v7  ;;  %v5661_v1 = vld [vmem:[%s11344_s1 + $0x188] sm:$0xff]  ;;  %v11473_v32 = vld [vmem:[#allocation5_spill] sm:$0xff] }
  0xae   :  { %513 = vadd.xlane.f32.xlu1 %v512_v54  ;;  %253 = vadd.xlane.f32.xlu0 %v252_v15  ;;  %v7595_v5 = vadd.f32 %v500_v33, %v238_v39  ;;  %v7597_v17 = vadd.f32 %v501_v50, %v238_v39  ;;  %v7599_v63 = vadd.f32 %v238_v39, %v224_v51  ;;  %v5667_v54 = vld [vmem:[%s11344_s1 + $0x1b8] sm:$0xff]  ;;  %v5668_v15 = vld [vmem:[%s11344_s1 + $0x1c0] sm:$0xff]  ;;  %v5669_v50 = vld [vmem:[%s11344_s1 + $0x1c8] sm:$0xff] }
  0xaf   :  { %v7605_v38 = vadd.f32 %v238_v39, %v225_v59  ;;  %v515_v18 = vadd.f32 %v7635_v40, %v7632_v31  ;;  %v613_v45 = vsel %vm609_vm0, %v608_v37, 0.0  ;;  %v625_v10 = vsel %vm609_vm0, %v621_v46, 0.0  ;;  %6213 = vmatmul.mubr.msk.f32.vlgmr.msra.gmra.mrb[48].mxu0 %vm609_vm0, %v5661_v1  ;;  %v5670_v51 = vld [vmem:[%s11344_s1 + $0x1d0] sm:$0xff]  ;;  %v5671_v39 = vld [vmem:[%s11344_s1 + $0x1d8] sm:$0xff] }
  0xb0   :  { %11471 = vst [vmem:[#allocation11_spill] sm:$0xff] %v7597_v17  ;;  %v518_v8 = vadd.f32 %v7597_v17, %v7595_v5  ;;  %v7658_v33 = vrot.slane %v7209_v36, %v7131_v16  ;;  %6391 = vmatpush3.bf16.msra.mxu0 %v7275_v53  ;;  %v5662_v16 = vld [vmem:[%s11344_s1 + $0x190] sm:$0xff]  ;;  %v5664_v53 = vld [vmem:[%s11344_s1 + $0x1a0] sm:$0xff] }
  0xb1   :  { %v242_v47 = vpop.permute.xlu1 %241  ;;  %v258_v12 = vadd.f32 %v7605_v38, %v7599_v63  ;;  %6393 = vmatprep.subr.bf16.mxu0 %v11473_v32  ;;  %6215 = vmatprep.mubr.msk.f32.mxu0 %vm609_vm0, %v5662_v16  ;;  %v11474_v59 = vld [vmem:[#allocation8_spill] sm:$0xff] }
  0xb2   :  { %519 = vadd.xlane.f32.xlu1 %v518_v8  ;;  %v7619_v13 = vadd.f32 %v242_v47, %v226_v55  ;;  %v7621_v14 = vadd.f32 %v242_v47, %v227_v2  ;;  %v7640_v52 = vadd.f32 %v502_v49, %v242_v47  ;;  %v7642_v20 = vadd.f32 %v503_v58, %v242_v47 }
  0xb3   :  { %259 = vadd.xlane.f32.xlu0 %v258_v12  ;;  %11472 = vst [vmem:[#allocation12_spill] sm:$0xff] %v7658_v33  ;;  %6216 = vmatmul.mubr.msk.f32.gmra.mrb[50].mxu0 %vm609_vm0, %v5663_v34  ;;  %v7712_v60 = vrot.slane %v7209_v36, %v11474_v59  ;;  %v11475_v12 = vld [vmem:[#allocation6_spill] sm:$0xff] }
  0xb4   :  { %v261_v44 = vadd.f32 %v7621_v14, %v7619_v13  ;;  %v521_v19 = vadd.f32 %v7642_v20, %v7640_v52  ;;  %6395 = vmatpush3.bf16.msra.mxu0 %v11473_v32  ;;  %6218 = vmatprep.mubr.msk.f32.mxu0 %vm609_vm0, %v5664_v53 }
  0xb6   :  { %611 = vadd.xlane.f32.xlu1 %v610_v27 }
  0xb7   :  { %262 = vadd.xlane.f32.xlu0 %v261_v44  ;;  %6219 = vmatmul.mubr.msk.f32.gmra.mrb[52].mxu0 %vm609_vm0, %v5665_v28 }
  0xb8   :  { %6221 = vmatprep.mubr.msk.f32.mxu0 %vm609_vm0, %v5666_v25 }
  0xba   :  { %623 = vadd.xlane.f32.xlu1 %v622_v9 }
  0xbb   :  { %516 = vadd.xlane.f32.xlu0 %v515_v18  ;;  %6222 = vmatmul.mubr.msk.f32.gmra.mrb[54].mxu0 %vm609_vm0, %v5667_v54 }
  0xbc   :  { %6224 = vmatprep.mubr.msk.f32.mxu0 %vm609_vm0, %v5668_v15 }
  0xbf   :  { %522 = vadd.xlane.f32.xlu0 %v521_v19  ;;  %6225 = vmatmul.mubr.msk.f32.gmra.mrb[56].mxu0 %vm609_vm0, %v5669_v50 }
  0xc0   :  { %6227 = vmatprep.mubr.msk.f32.mxu0 %vm609_vm0, %v5670_v51 }
  0xc3   :  { %614 = vadd.xlane.f32.xlu0 %v613_v45  ;;  %6228 = vmatmul.mubr.msk.f32.gmra.mrb[58].mxu0 %vm609_vm0, %v5671_v39 }
  0xc7   :  { %626 = vadd.xlane.f32.xlu0 %v625_v10 }
  0xcb   :  { %1129 = vrot.lane.b32.xlu1 %v7658_v33, %s7030_s29 }
  0xe3   :  { %v6006_v61 = vpop.f32.mrb[0].mxu0 }
  0xe4   :  { %v7715_v43 = vadd.f32 %v6006_v61, %v7712_v60  ;;  %v764_v30 = vpop.f32.mrb[1].mxu0 }
  0xe5   :  { %v7718_v41 = vadd.f32 %v764_v30, %v7712_v60 }
  0xe6   :  { %v824_v42 = vmax.f32 %v7715_v43, 0.0 }
  0xe7   :  { %v823_v8 = vmax.f32 %v7718_v41, 0.0 }
  0xe8   :  { %v6009_v55 = vpop.f32.mrb[2].mxu0 }
  0xe9   :  { %6030 = vmatprep.mubr.msk.f32.mxu1 %vm609_vm0, %v823_v8  ;;  %v7724_v2 = vadd.f32 %v6009_v55, %v7712_v60  ;;  %v774_v36 = vpop.f32.mrb[3].mxu0 }
  0xea   :  { %6031 = vmatmul.mubr.msk.f32.vlgmr.msra.gmra.mrb[0].mxu1 %vm609_vm0, %v824_v42  ;;  %v7728_v62 = vadd.f32 %v774_v36, %v7712_v60 }
  0xeb   :  { %v826_v47 = vmax.f32 %v7724_v2, 0.0  ;;  %6335 = vmatpush3.bf16.msra.mxu1 %v11475_v12 }
  0xec   :  { %v825_v29 = vmax.f32 %v7728_v62, 0.0  ;;  %v6012_v26 = vpop.f32.mrb[4].mxu0  ;;  %6337 = vmatprep.subr.bf16.mxu1 %v11476_v6 }
  0xed   :  { %v7735_v27 = vadd.f32 %v6012_v26, %v7712_v60  ;;  %v784_v48 = vpop.f32.mrb[5].mxu0 }
  0xee   :  { %6033 = vmatprep.mubr.msk.f32.mxu1 %vm609_vm0, %v825_v29  ;;  %v7739_v35 = vadd.f32 %v784_v48, %v7712_v60 }
  0xef   :  { %6034 = vmatmul.mubr.msk.f32.gmra.mrb[2].mxu1 %vm609_vm0, %v826_v47  ;;  %v828_v3 = vmax.f32 %v7735_v27, 0.0 }
  0xf0   :  { %v827_v56 = vmax.f32 %v7739_v35, 0.0  ;;  %v6015_v0 = vpop.f32.mrb[6].mxu0  ;;  %6339 = vmatpush3.bf16.msra.mxu1 %v11476_v6 }
  0xf1   :  { %v7746_v44 = vadd.f32 %v6015_v0, %v7712_v60  ;;  %v794_v9 = vpop.f32.mrb[7].mxu0  ;;  %6349 = vmatprep.subr.bf16.mxu1 %v11475_v12 }
  0xf2   :  { %6036 = vmatprep.mubr.msk.f32.mxu1 %vm609_vm0, %v827_v56  ;;  %v7751_v49 = vadd.f32 %v794_v9, %v7712_v60 }
  0xf3   :  { %6037 = vmatmul.mubr.msk.f32.gmra.mrb[4].mxu1 %vm609_vm0, %v828_v3  ;;  %v830_v58 = vmax.f32 %v7746_v44, 0.0  ;;  %v5583_v3 = vld [vmem:[%s11343_s4 + $0x68] sm:$0xff] }
  0xf4   :  { %v829_v18 = vmax.f32 %v7751_v49, 0.0 }
  0xf5   :  { %v6018_v7 = vpop.f32.mrb[8].mxu0 }
  0xf6   :  { %6039 = vmatprep.mubr.msk.f32.mxu1 %vm609_vm0, %v829_v18  ;;  %v7758_v37 = vadd.f32 %v6018_v7, %v7712_v60  ;;  %v804_v19 = vpop.f32.mrb[9].mxu0 }
  0xf7   :  { %6040 = vmatmul.mubr.msk.f32.gmra.mrb[6].mxu1 %vm609_vm0, %v830_v58  ;;  %v7762_v45 = vadd.f32 %v804_v19, %v7712_v60 }
  0xf8   :  { %v832_v46 = vmax.f32 %v7758_v37, 0.0 }
  0xf9   :  { %v831_v10 = vmax.f32 %v7762_v45, 0.0  ;;  %v6021_v11 = vpop.f32.mrb[10].mxu0 }
  0xfa   :  { %v7767_v1 = vadd.f32 %v6021_v11, %v7712_v60  ;;  %v814_v32 = vpop.f32.mrb[11].mxu0 }
  0xfb   :  { %6042 = vmatprep.mubr.msk.f32.mxu1 %vm609_vm0, %v831_v10  ;;  %v7771_v16 = vadd.f32 %v814_v32, %v7712_v60  ;;  %v7828_v10 = vpop.permute.xlu1 %318 }
  0xfc   :  { %6043 = vmatmul.mubr.msk.f32.gmra.mrb[8].mxu1 %vm609_vm0, %v832_v46  ;;  %v834_v34 = vmax.f32 %v7767_v1, 0.0  ;;  %11477 = vst [vmem:[#allocation5_spill] sm:$0xff] %v7828_v10 }
  0xfd   :  { %v833_v53 = vmax.f32 %v7771_v16, 0.0  ;;  %v6058_v28 = vpop.f32.mrb[12].mxu0 }
  0xfe   :  { %v7777_v25 = vadd.f32 %v6058_v28, %v7712_v60  ;;  %v1585_v54 = vpop.f32.mrb[13].mxu0 }
  0xff   :  { %6045 = vmatprep.mubr.msk.f32.mxu1 %vm609_vm0, %v833_v53  ;;  %v7781_v15 = vadd.f32 %v1585_v54, %v7712_v60 }
 0x100   :  { %6046 = vmatmul.mubr.msk.f32.gmra.mrb[10].mxu1 %vm609_vm0, %v834_v34  ;;  %v1645_v50 = vmax.f32 %v7777_v25, 0.0 }
 0x101   :  { %v1644_v51 = vmax.f32 %v7781_v15, 0.0  ;;  %v6061_v39 = vpop.f32.mrb[14].mxu0 }
 0x102   :  { %v7787_v61 = vadd.f32 %v6061_v39, %v7712_v60  ;;  %v1595_v30 = vpop.f32.mrb[15].mxu0 }
 0x103   :  { %6082 = vmatprep.mubr.msk.f32.mxu1 %vm609_vm0, %v1644_v51  ;;  %v7791_v42 = vadd.f32 %v1595_v30, %v7712_v60  ;;  %v7847_v30 = vpop.permute.xlu1 %326 }
 0x104   :  { %6083 = vmatmul.mubr.msk.f32.vlgmr.msra.gmra.mrb[12].mxu1 %vm609_vm0, %v1645_v50  ;;  %v1647_v8 = vmax.f32 %v7787_v61, 0.0  ;;  %11478 = vst [vmem:[#allocation8_spill] sm:$0xff] %v7847_v30 }
 0x105   :  { %v1646_v55 = vmax.f32 %v7791_v42, 0.0  ;;  %v6064_v36 = vpop.f32.mrb[16].mxu0  ;;  %6351 = vmatpush3.bf16.msra.mxu1 %v11475_v12  ;;  %v5584_v12 = vld [vmem:[%s11343_s4 + $0x70] sm:$0xff] }
 0x106   :  { %v7798_v47 = vadd.f32 %v6064_v36, %v7712_v60  ;;  %v1605_v29 = vpop.f32.mrb[17].mxu0  ;;  %6353 = vmatprep.subr.bf16.mxu1 %v11476_v6  ;;  %v7815_v9 = vpack.c.bf16 %v5584_v12, %v5583_v3  ;;  %v5585_v12 = vld [vmem:[%s11343_s4 + $0x78] sm:$0xff] }
 0x107   :  { %6085 = vmatprep.mubr.msk.f32.mxu1 %vm609_vm0, %v1646_v55  ;;  %v7803_v26 = vadd.f32 %v1605_v29, %v7712_v60 }
 0x108   :  { %6086 = vmatmul.mubr.msk.f32.gmra.mrb[14].mxu1 %vm609_vm0, %v1647_v8  ;;  %v1649_v48 = vmax.f32 %v7798_v47, 0.0 }
 0x109   :  { %v1648_v56 = vmax.f32 %v7803_v26, 0.0  ;;  %v6067_v0 = vpop.f32.mrb[18].mxu0  ;;  %6355 = vmatpush3.bf16.msra.mxu1 %v11476_v6 }
 0x10a   :  { %v7818_v58 = vadd.f32 %v6067_v0, %v7712_v60  ;;  %v1615_v18 = vpop.f32.mrb[19].mxu0  ;;  %6365 = vmatprep.subr.bf16.mxu1 %v7815_v9 }
 0x10b   :  { %6088 = vmatprep.mubr.msk.f32.mxu1 %vm609_vm0, %v1648_v56  ;;  %v7822_v7 = vadd.f32 %v1615_v18, %v7712_v60  ;;  %v5586_v56 = vld [vmem:[%s11343_s4 + $0x80] sm:$0xff] }
 0x10c   :  { %6089 = vmatmul.mubr.msk.f32.gmra.mrb[16].mxu1 %vm609_vm0, %v1649_v48  ;;  %v1651_v19 = vmax.f32 %v7818_v58, 0.0 }
 0x10d   :  { %v1650_v46 = vmax.f32 %v7822_v7, 0.0  ;;  %v6070_v6 = vpop.f32.mrb[20].mxu0 }
 0x10e   :  { %v7831_v11 = vadd.f32 %v6070_v6, %v7712_v60  ;;  %v1625_v32 = vpop.f32.mrb[21].mxu0 }
 0x10f   :  { %6091 = vmatprep.mubr.msk.f32.mxu1 %vm609_vm0, %v1650_v46  ;;  %v7835_v34 = vadd.f32 %v1625_v32, %v7712_v60  ;;  %v7868_v46 = vpop.permute.xlu1 %330 }
 0x110   :  { %6092 = vmatmul.mubr.msk.f32.gmra.mrb[18].mxu1 %vm609_vm0, %v1651_v19  ;;  %v1653_v53 = vmax.f32 %v7831_v11, 0.0  ;;  %11479 = vst [vmem:[#allocation6_spill] sm:$0xff] %v7868_v46  ;;  %v7923_v46 = vld [vmem:[%s11343_s4 + $0x88] sm:$0xf] }
 0x111   :  { %v1652_v28 = vmax.f32 %v7835_v34, 0.0  ;;  %v6073_v54 = vpop.f32.mrb[22].mxu0  ;;  %11490 = vst [vmem:[#allocation22_spill] sm:$0xff] %v7923_v46 }
 0x112   :  { %v7841_v50 = vadd.f32 %v6073_v54, %v7712_v60  ;;  %v1635_v51 = vpop.f32.mrb[23].mxu0 }
 0x113   :  { %6094 = vmatprep.mubr.msk.f32.mxu1 %vm609_vm0, %v1652_v28  ;;  %v7845_v39 = vadd.f32 %v1635_v51, %v7712_v60 }
 0x114   :  { %6095 = vmatmul.mubr.msk.f32.gmra.mrb[20].mxu1 %vm609_vm0, %v1653_v53  ;;  %v1655_v8 = vmax.f32 %v7841_v50, 0.0  ;;  %v7873_v53 = vpack.c.bf16 %v5586_v56, %v5585_v12  ;;  %v7891_v12 = vpop.permute.xlu1 %342 }
 0x115   :  { %v1654_v55 = vmax.f32 %v7845_v39, 0.0  ;;  %v6110_v36 = vpop.f32.mrb[24].mxu0  ;;  %11484 = vst [vmem:[#allocation16_spill] sm:$0xff] %v7891_v12 }
 0x116   :  { %v7853_v29 = vadd.f32 %v6110_v36, %v7712_v60  ;;  %v2375_v48 = vpop.f32.mrb[25].mxu0 }
 0x117   :  { %6097 = vmatprep.mubr.msk.f32.mxu1 %vm609_vm0, %v1654_v55  ;;  %v7857_v3 = vadd.f32 %v2375_v48, %v7712_v60 }
 0x118   :  { %6098 = vmatmul.mubr.msk.f32.gmra.mrb[22].mxu1 %vm609_vm0, %v1655_v8  ;;  %v2435_v0 = vmax.f32 %v7853_v29, 0.0  ;;  %v7908_v30 = vpop.permute.xlu1 %346 }
 0x119   :  { %v2434_v18 = vmax.f32 %v7857_v3, 0.0  ;;  %v6113_v19 = vpop.f32.mrb[26].mxu0  ;;  %11487 = vst [vmem:[#allocation19_spill] sm:$0xff] %v7908_v30 }
 0x11a   :  { %v7871_v6 = vadd.f32 %v6113_v19, %v7712_v60  ;;  %v2385_v32 = vpop.f32.mrb[27].mxu0 }
 0x11b   :  { %6134 = vmatprep.mubr.msk.f32.mxu1 %vm609_vm0, %v2434_v18  ;;  %v7877_v28 = vadd.f32 %v2385_v32, %v7712_v60 }
 0x11c   :  { %11480 = vst [vmem:[#allocation7_spill] sm:$0xff] %v7871_v6  ;;  %6135 = vmatmul.mubr.msk.f32.vlgmr.msra.gmra.mrb[24].mxu1 %vm609_vm0, %v2435_v0  ;;  %v2437_v54 = vmax.f32 %v7871_v6, 0.0  ;;  %v7936_v30 = vpop.permute.xlu1 %350  ;;  %v11509_v6 = vld [vmem:[#allocation10_spill] sm:$0xff] }
 0x11d   :  { %11481 = vst [vmem:[#allocation13_spill] sm:$0xff] %v7877_v28  ;;  %v2436_v51 = vmax.f32 %v7877_v28, 0.0  ;;  %v6116_v8 = vpop.f32.mrb[28].mxu0  ;;  %6367 = vmatpush3.bf16.msra.mxu1 %v7815_v9  ;;  %11493 = vst [vmem:[#allocation25_spill] sm:$0xff] %v7936_v30 }
 0x11e   :  { %v7884_v55 = vadd.f32 %v6116_v8, %v7712_v60  ;;  %v2395_v36 = vpop.f32.mrb[29].mxu0  ;;  %6369 = vmatprep.subr.bf16.mxu1 %v7873_v53 }
 0x11f   :  { %6137 = vmatprep.mubr.msk.f32.mxu1 %vm609_vm0, %v2436_v51  ;;  %v7889_v48 = vadd.f32 %v2395_v36, %v7712_v60 }
 0x120   :  { %11482 = vst [vmem:[#allocation14_spill] sm:$0xff] %v7884_v55  ;;  %6138 = vmatmul.mubr.msk.f32.gmra.mrb[26].mxu1 %vm609_vm0, %v2437_v54  ;;  %v2439_v56 = vmax.f32 %v7884_v55, 0.0 }
 0x121   :  { %11483 = vst [vmem:[#allocation15_spill] sm:$0xff] %v7889_v48  ;;  %v2438_v0 = vmax.f32 %v7889_v48, 0.0  ;;  %v6119_v18 = vpop.f32.mrb[30].mxu0  ;;  %6371 = vmatpush3.bf16.msra.mxu1 %v7873_v53 }
 0x122   :  { %v7898_v19 = vadd.f32 %v6119_v18, %v7712_v60  ;;  %v2405_v32 = vpop.f32.mrb[31].mxu0  ;;  %6381 = vmatprep.subr.bf16.mxu1 %v7815_v9 }
 0x123   :  { %6140 = vmatprep.mubr.msk.f32.mxu1 %vm609_vm0, %v2438_v0  ;;  %v7903_v51 = vadd.f32 %v2405_v32, %v7712_v60 }
 0x124   :  { %11485 = vst [vmem:[#allocation17_spill] sm:$0xff] %v7898_v19  ;;  %6141 = vmatmul.mubr.msk.f32.gmra.mrb[28].mxu1 %vm609_vm0, %v2439_v56  ;;  %v2441_v54 = vmax.f32 %v7898_v19, 0.0 }
 0x125   :  { %11486 = vst [vmem:[#allocation18_spill] sm:$0xff] %v7903_v51  ;;  %v2440_v8 = vmax.f32 %v7903_v51, 0.0  ;;  %v6122_v36 = vpop.f32.mrb[32].mxu0 }
 0x126   :  { %v7911_v18 = vadd.f32 %v6122_v36, %v7712_v60  ;;  %v2415_v12 = vpop.f32.mrb[33].mxu0  ;;  %v7927_v36 = vrot.slane %v7923_v46, %v11474_v59 }
 0x127   :  { %6143 = vmatprep.mubr.msk.f32.mxu1 %vm609_vm0, %v2440_v8  ;;  %v7915_v0 = vadd.f32 %v2415_v12, %v7712_v60 }
 0x128   :  { %11488 = vst [vmem:[#allocation20_spill] sm:$0xff] %v7911_v18  ;;  %6144 = vmatmul.mubr.msk.f32.gmra.mrb[30].mxu1 %vm609_vm0, %v2441_v54  ;;  %v2443_v56 = vmax.f32 %v7911_v18, 0.0 }
 0x129   :  { %11489 = vst [vmem:[#allocation21_spill] sm:$0xff] %v7915_v0  ;;  %v2442_v32 = vmax.f32 %v7915_v0, 0.0  ;;  %v6125_v10 = vpop.f32.mrb[34].mxu0 }
 0x12a   :  { %v7930_v8 = vadd.f32 %v6125_v10, %v7712_v60  ;;  %v2425_v12 = vpop.f32.mrb[35].mxu0 }
 0x12b   :  { %6146 = vmatprep.mubr.msk.f32.mxu1 %vm609_vm0, %v2442_v32  ;;  %v7934_v54 = vadd.f32 %v2425_v12, %v7712_v60  ;;  %v5732_v60 = vld [vmem:[%s11344_s1 + $0x1e0] sm:$0xff] }
 0x12c   :  { %11491 = vst [vmem:[#allocation23_spill] sm:$0xff] %v7930_v8  ;;  %6147 = vmatmul.mubr.msk.f32.gmra.mrb[32].mxu1 %vm609_vm0, %v2443_v56  ;;  %v2445_v33 = vmax.f32 %v7930_v8, 0.0  ;;  %v5733_v56 = vld [vmem:[%s11344_s1 + $0x1e8] sm:$0xff]  ;;  %6264 = vmatprep.mubr.msk.f32.mxu0 %vm609_vm0, %v5732_v60  ;;  %v5735_v60 = vld [vmem:[%s11344_s1 + $0x1f8] sm:$0xff] }
 0x12d   :  { %11492 = vst [vmem:[#allocation24_spill] sm:$0xff] %v7934_v54  ;;  %v2444_v18 = vmax.f32 %v7934_v54, 0.0  ;;  %v6162_v19 = vpop.f32.mrb[36].mxu0  ;;  %6265 = vmatmul.mubr.msk.f32.vlgmr.msra.gmra.mrb[60].mxu0 %vm609_vm0, %v5733_v56  ;;  %v5736_v56 = vld [vmem:[%s11344_s1 + $0x200] sm:$0xff] }
 0x12e   :  { %v7942_v59 = vadd.f32 %v6162_v19, %v7927_v36  ;;  %v3180_v10 = vpop.f32.mrb[37].mxu0  ;;  %v5740_v54 = vld [vmem:[%s11344_s1 + $0x220] sm:$0xff] }
 0x12f   :  { %v7945_v46 = vadd.f32 %v3180_v10, %v7927_v36  ;;  %6149 = vmatprep.mubr.msk.f32.mxu1 %vm609_vm0, %v2444_v18  ;;  %v7959_v18 = vpop.permute.xlu1 %354 }
 0x130   :  { %11494 = vst [vmem:[#allocation26_spill] sm:$0xff] %v7942_v59  ;;  %v3240_v32 = vmax.f32 %v7942_v59, 0.0  ;;  %6150 = vmatmul.mubr.msk.f32.gmra.mrb[34].mxu1 %vm609_vm0, %v2445_v33  ;;  %11496 = vst [vmem:[#allocation28_spill] sm:$0xff] %v7959_v18  ;;  %v5734_v33 = vld [vmem:[%s11344_s1 + $0x1f0] sm:$0xff] }
 0x131   :  { %11495 = vst [vmem:[#allocation27_spill] sm:$0xff] %v7945_v46  ;;  %v3239_v19 = vmax.f32 %v7945_v46, 0.0  ;;  %v6165_v12 = vpop.f32.mrb[38].mxu0  ;;  %6267 = vmatprep.mubr.msk.f32.mxu0 %vm609_vm0, %v5734_v33 }
 0x132   :  { %v7962_v10 = vadd.f32 %v6165_v12, %v7927_v36  ;;  %v3190_v30 = vpop.f32.mrb[39].mxu0  ;;  %6268 = vmatmul.mubr.msk.f32.gmra.mrb[62].mxu0 %vm609_vm0, %v5735_v60  ;;  %v5737_v60 = vld [vmem:[%s11344_s1 + $0x208] sm:$0xff] }
 0x133   :  { %v7965_v8 = vadd.f32 %v3190_v30, %v7927_v36  ;;  %6186 = vmatprep.mubr.msk.f32.mxu1 %vm609_vm0, %v3239_v19  ;;  %6270 = vmatprep.mubr.msk.f32.mxu0 %vm609_vm0, %v5736_v56 }
 0x134   :  { %11497 = vst [vmem:[#allocation29_spill] sm:$0xff] %v7962_v10  ;;  %v3242_v12 = vmax.f32 %v7962_v10, 0.0  ;;  %6187 = vmatmul.mubr.msk.f32.vlgmr.msra.gmra.mrb[36].mxu1 %vm609_vm0, %v3240_v32  ;;  %v7990_v32 = vpop.permute.xlu0 %322 }
 0x135   :  { %11498 = vst [vmem:[#allocation30_spill] sm:$0xff] %v7965_v8  ;;  %v3241_v30 = vmax.f32 %v7965_v8, 0.0  ;;  %v6168_v19 = vpop.f32.mrb[40].mxu0  ;;  %6383 = vmatpush3.bf16.msra.mxu1 %v7815_v9  ;;  %11500 = vst [vmem:[#allocation32_spill] sm:$0xff] %v7990_v32  ;;  %v5739_v32 = vld [vmem:[%s11344_s1 + $0x218] sm:$0xff] }
 0x136   :  { %v7983_v46 = vpop.xlane.xlu1 %256  ;;  %v7986_v59 = vadd.f32 %v6168_v19, %v7927_v36  ;;  %v3200_v18 = vpop.f32.mrb[41].mxu0  ;;  %6385 = vmatprep.subr.bf16.mxu1 %v7873_v53  ;;  %v5738_v19 = vld [vmem:[%s11344_s1 + $0x210] sm:$0xff]  ;;  %6271 = vmatmul.mubr.msk.f32.gmra.mrb[64].mxu0 %vm609_vm0, %v5737_v60 }
 0x137   :  { %v7993_v33 = vadd.f32 %v3200_v18, %v7927_v36  ;;  %6189 = vmatprep.mubr.msk.f32.mxu1 %vm609_vm0, %v3241_v30  ;;  %6273 = vmatprep.mubr.msk.f32.mxu0 %vm609_vm0, %v5738_v19 }
 0x138   :  { %11499 = vst [vmem:[#allocation31_spill] sm:$0xff] %v7986_v59  ;;  %v3244_v10 = vmax.f32 %v7986_v59, 0.0  ;;  %6190 = vmatmul.mubr.msk.f32.gmra.mrb[38].mxu1 %vm609_vm0, %v3242_v12 }
 0x139   :  { %11501 = vst [vmem:[#allocation33_spill] sm:$0xff] %v7993_v33  ;;  %v3243_v56 = vmax.f32 %v7993_v33, 0.0  ;;  %v6171_v8 = vpop.f32.mrb[42].mxu0  ;;  %6387 = vmatpush3.bf16.msra.mxu1 %v7873_v53 }
 0x13a   :  { %v8008_v18 = vadd.f32 %v6171_v8, %v7927_v36  ;;  %v3210_v30 = vpop.f32.mrb[43].mxu0  ;;  %6397 = vmatprep.subr.bf16.mxu1 %v7815_v9  ;;  %6274 = vmatmul.mubr.msk.f32.gmra.mrb[66].mxu0 %vm609_vm0, %v5739_v32 }
 0x13b   :  { %v8015_v12 = vpop.xlane.xlu1 %513  ;;  %v8017_v59 = vpop.xlane.xlu0 %253  ;;  %v8020_v60 = vadd.f32 %v3210_v30, %v7927_v36  ;;  %6192 = vmatprep.mubr.msk.f32.mxu1 %vm609_vm0, %v3243_v56  ;;  %6276 = vmatprep.mubr.msk.f32.mxu0 %vm609_vm0, %v5740_v54  ;;  %v5741_v56 = vld [vmem:[%s11344_s1 + $0x228] sm:$0xff] }
 0x13c   :  { %11502 = vst [vmem:[#allocation34_spill] sm:$0xff] %v8008_v18  ;;  %v3246_v8 = vmax.f32 %v8008_v18, 0.0  ;;  %6193 = vmatmul.mubr.msk.f32.gmra.mrb[40].mxu1 %vm609_vm0, %v3244_v10 }
 0x13d   :  { %11503 = vst [vmem:[#allocation35_spill] sm:$0xff] %v8020_v60  ;;  %v3245_v19 = vmax.f32 %v8020_v60, 0.0  ;;  %v6174_v33 = vpop.f32.mrb[44].mxu0 }
 0x13e   :  { %v3220_v0 = vpop.f32.mrb[45].mxu0  ;;  %v8037_v10 = vadd.f32 %v6174_v33, %v7927_v36  ;;  %6277 = vmatmul.mubr.msk.f32.gmra.mrb[68].mxu0 %vm609_vm0, %v5741_v56  ;;  %v5742_v33 = vld [vmem:[%s11344_s1 + $0x230] sm:$0xff] }
 0x13f   :  { %v8034_v30 = vpop.xlane.xlu1 %519  ;;  %v8040_v18 = vadd.f32 %v3220_v0, %v7927_v36  ;;  %6195 = vmatprep.mubr.msk.f32.mxu1 %vm609_vm0, %v3245_v19  ;;  %6279 = vmatprep.mubr.msk.f32.mxu0 %vm609_vm0, %v5742_v33 }
 0x140   :  { %11504 = vst [vmem:[#allocation36_spill] sm:$0xff] %v8037_v10  ;;  %v8043_v32 = vpop.xlane.xlu0 %259  ;;  %6196 = vmatmul.mubr.msk.f32.gmra.mrb[42].mxu1 %vm609_vm0, %v3246_v8  ;;  %v3248_v54 = vmax.f32 %v8037_v10, 0.0  ;;  %v5743_v8 = vld [vmem:[%s11344_s1 + $0x238] sm:$0xff]  ;;  %s7031_s1 = smov 4  }
 0x141   :  { %11505 = vst [vmem:[#allocation37_spill] sm:$0xff] %v8040_v18  ;;  %v3247_v60 = vmax.f32 %v8040_v18, 0.0  ;;  %v6177_v55 = vpop.f32.mrb[46].mxu0 }
 0x142   :  { %v8053_v0 = vadd.f32 %v6177_v55, %v7927_v36  ;;  %v3230_v51 = vpop.f32.mrb[47].mxu0  ;;  %v11508_v55 = vld [vmem:[#allocation9_spill] sm:$0xff]  ;;  %6280 = vmatmul.mubr.msk.f32.gmra.mrb[70].mxu0 %vm609_vm0, %v5743_v8 }
 0x143   :  { %v612_v19 = vpop.xlane.xlu1 %611  ;;  %v8060_v10 = vadd.f32 %v3230_v51, %v7927_v36  ;;  %6198 = vmatprep.mubr.msk.f32.mxu1 %vm609_vm0, %v3247_v60  ;;  %v634_v48 = vrot.slane %v11509_v6, %v11508_v55 }
 0x144   :  { %11506 = vst [vmem:[#allocation38_spill] sm:$0xff] %v8053_v0  ;;  %v263_v56 = vpop.xlane.xlu0 %262  ;;  %v3250_v18 = vmax.f32 %v8053_v0, 0.0  ;;  %6199 = vmatmul.mubr.msk.f32.gmra.mrb[44].mxu1 %vm609_vm0, %v3248_v54  ;;  %v7032_v0 = vmov 0.0  }
 0x145   :  { %11507 = vst [vmem:[#allocation39_spill] sm:$0xff] %v8060_v10  ;;  %v3249_v33 = vmax.f32 %v8060_v10, 0.0 }
 0x147   :  { %v624_v28 = vpop.xlane.xlu1 %623  ;;  %6201 = vmatprep.mubr.msk.f32.mxu1 %vm609_vm0, %v3249_v33 }
 0x148   :  { %v629_v51 = vsel %vm628_vm1, %v612_v19, %v624_v28  ;;  %v517_v17 = vpop.xlane.xlu0 %516  ;;  %6202 = vmatmul.mubr.msk.f32.gmra.mrb[46].mxu1 %vm609_vm0, %v3250_v18 }
 0x149   :  { %v635_v60 = vadd.f32 %v634_v48, %v629_v51 }
 0x14b   :  { %1411 = vrot.lane.b32.xlu1 %v635_v60, %s7031_s1 }
 0x14c   :  { %v8072_v54 = vpop.xlane.xlu0 %522 }
 0x14f   :  { %1415 = vrot.lane.b32.xlu1 %v7032_v0, %s7031_s1 }
 0x150   :  { %v615_v6 = vpop.xlane.xlu0 %614 }
 0x153   :  { %1374 = vrot.lane.b32.xlu1 %v7715_v43, %s7033_s11  ;;  %v266_v43 = vmul.f32 0.00390625, %v7983_v46  ;;  %v527_v46 = vmul.f32 0.00390625, %v8072_v54 }
 0x154   :  { %v627_v8 = vpop.xlane.xlu0 %626 }
 0x155   :  { %v630_v33 = vsel %vm628_vm1, %v615_v6, %v627_v8  ;;  %v8222_v51 = vsub.f32 %v7642_v20, %v527_v46 }
 0x156   :  { %v636_v10 = vadd.f32 %v634_v48, %v630_v33  ;;  %v11533_v33 = vld [vmem:[#allocation11_spill] sm:$0xff] }
 0x157   :  { %1376 = vrot.lane.b32.xlu1 %v7728_v62, %s7033_s11  ;;  %v268_v62 = vmul.f32 0.00390625, %v263_v56  ;;  %11529 = vst [vmem:[#allocation57_spill] sm:$0xff] %v8222_v51 }
 0x158   :  { %1413 = vrot.lane.b32.xlu0 %v636_v10, %s7031_s1 }
 0x15b   :  { %1380 = vrot.lane.b32.xlu1 %v7739_v35, %s7033_s11 }
 0x15c   :  { %1372 = vrot.lane.b32.xlu0 %v7718_v41, %s7033_s11  ;;  %v265_v41 = vmul.f32 0.00390625, %v8017_v59 }
 0x15f   :  { %1384 = vrot.lane.b32.xlu1 %v7751_v49, %s7033_s11  ;;  %v8136_v49 = vsub.f32 %v7564_v4, %v266_v43  ;;  %v8154_v4 = vsub.f32 %v7621_v14, %v268_v62 }
 0x160   :  { %1378 = vrot.lane.b32.xlu0 %v7724_v2, %s7033_s11 }
 0x161   :  { %11512 = vst [vmem:[#allocation40_spill] sm:$0xff] %v8136_v49  ;;  %11517 = vst [vmem:[#allocation45_spill] sm:$0xff] %v8154_v4 }
 0x163   :  { %1388 = vrot.lane.b32.xlu1 %v7762_v45, %s7033_s11  ;;  %v8142_v45 = vsub.f32 %v7582_v22, %v265_v41 }
 0x164   :  { %1382 = vrot.lane.b32.xlu0 %v7735_v27, %s7033_s11 }
 0x165   :  { %11514 = vst [vmem:[#allocation42_spill] sm:$0xff] %v8142_v45  ;;  %v277_v14 = vmul.f32 %v8142_v45, %v8142_v45 }
 0x167   :  { %1392 = vrot.lane.b32.xlu1 %v7771_v16, %s7033_s11  ;;  %v8146_v16 = vsub.f32 %v7584_v24, %v265_v41 }
 0x168   :  { %1386 = vrot.lane.b32.xlu0 %v7746_v44, %s7033_s11  ;;  %v8133_v44 = vsub.f32 %v7561_v57, %v266_v43  ;;  %v8151_v57 = vsub.f32 %v7619_v13, %v268_v62  ;;  %v524_v13 = vmul.f32 0.00390625, %v8015_v12 }
 0x169   :  { %11515 = vst [vmem:[#allocation43_spill] sm:$0xff] %v8146_v16 }
 0x16a   :  { %11511 = vst [vmem:[#allocation10_spill] sm:$0xff] %v8133_v44  ;;  %11516 = vst [vmem:[#allocation44_spill] sm:$0xff] %v8151_v57  ;;  %v279_v22 = vmul.f32 %v8133_v44, %v8133_v44  ;;  %v8198_v48 = vsub.f32 %v7578_v21, %v524_v13  ;;  %v8201_v59 = vsub.f32 %v7580_v23, %v524_v13 }
 0x16b   :  { %2177 = vrot.lane.b32.xlu1 %v7781_v15, %s7033_s11 }
 0x16c   :  { %1390 = vrot.lane.b32.xlu0 %v7758_v37, %s7033_s11  ;;  %11525 = vst [vmem:[#allocation53_spill] sm:$0xff] %v8198_v48  ;;  %11526 = vst [vmem:[#allocation54_spill] sm:$0xff] %v8201_v59  ;;  %v537_v20 = vmul.f32 %v8201_v59, %v8201_v59 }
 0x16f   :  { %2183 = vrot.lane.b32.xlu1 %v7787_v61, %s7033_s11  ;;  %v525_v61 = vmul.f32 0.00390625, %v517_v17 }
 0x170   :  { %1394 = vrot.lane.b32.xlu0 %v7767_v1, %s7033_s11 }
 0x173   :  { %2181 = vrot.lane.b32.xlu1 %v7791_v42, %s7033_s11 }
 0x174   :  { %2179 = vrot.lane.b32.xlu0 %v7777_v25, %s7033_s11  ;;  %v267_v25 = vmul.f32 0.00390625, %v8043_v32 }
 0x177   :  { %2187 = vrot.lane.b32.xlu1 %v7798_v47, %s7033_s11  ;;  %v280_v47 = vmul.f32 %v8136_v49, %v8136_v49 }
 0x178   :  { %2185 = vrot.lane.b32.xlu0 %v7803_v26, %s7033_s11 }
 0x17b   :  { %2191 = vrot.lane.b32.xlu1 %v7818_v58, %s7033_s11  ;;  %v8172_v58 = vsub.f32 %v7599_v63, %v267_v25  ;;  %v284_v63 = vmul.f32 %v8154_v4, %v8154_v4 }
 0x17c   :  { %2189 = vrot.lane.b32.xlu0 %v7822_v7, %s7033_s11  ;;  %v8175_v7 = vsub.f32 %v7605_v38, %v267_v25  ;;  %v543_v25 = vmul.f32 %v8222_v51, %v8222_v51 }
 0x17d   :  { %11520 = vst [vmem:[#allocation48_spill] sm:$0xff] %v8172_v58  ;;  %v281_v10 = vmul.f32 %v8172_v58, %v8172_v58 }
 0x17e   :  { %11521 = vst [vmem:[#allocation49_spill] sm:$0xff] %v8175_v7  ;;  %v282_v32 = vmul.f32 %v8175_v7, %v8175_v7 }
 0x17f   :  { %2195 = vrot.lane.b32.xlu1 %v7831_v11, %s7033_s11  ;;  %v278_v11 = vmul.f32 %v8146_v16, %v8146_v16 }
 0x180   :  { %2193 = vrot.lane.b32.xlu0 %v7835_v34, %s7033_s11  ;;  %v291_v41 = vadd.f32 %v282_v32, %v281_v10 }
 0x181   :  { %v285_v12 = vadd.f32 %v278_v11, %v277_v14 }
 0x182   :  { %v6214_v2 = vpop.f32.mrb[48].mxu0 }
 0x183   :  { %2199 = vrot.lane.b32.xlu1 %v7841_v50, %s7033_s11  ;;  %v8130_v27 = vadd.f32 %v6214_v2, %v7927_v36  ;;  %v3988_v35 = vpop.f32.mrb[49].mxu0  ;;  %v8182_v50 = vsub.f32 %v7632_v31, %v525_v61 }
 0x184   :  { %2197 = vrot.lane.b32.xlu0 %v7845_v39, %s7033_s11  ;;  %v8139_v37 = vadd.f32 %v3988_v35, %v7927_v36  ;;  %v283_v39 = vmul.f32 %v8151_v57, %v8151_v57 }
 0x185   :  { %11510 = vst [vmem:[#allocation9_spill] sm:$0xff] %v8130_v27  ;;  %v4048_v1 = vmax.f32 %v8130_v27, 0.0  ;;  %11522 = vst [vmem:[#allocation50_spill] sm:$0xff] %v8182_v50  ;;  %v538_v23 = vmul.f32 %v8182_v50, %v8182_v50 }
 0x186   :  { %11513 = vst [vmem:[#allocation41_spill] sm:$0xff] %v8139_v37  ;;  %v4047_v15 = vmax.f32 %v8139_v37, 0.0  ;;  %v6217_v42 = vpop.f32.mrb[50].mxu0  ;;  %v294_v21 = vadd.f32 %v284_v63, %v283_v39 }
 0x187   :  { %2967 = vrot.lane.b32.xlu1 %v7857_v3, %s7033_s11  ;;  %v8161_v24 = vadd.f32 %v6217_v42, %v7927_v36  ;;  %v3998_v26 = vpop.f32.mrb[51].mxu0  ;;  %v8191_v3 = vsub.f32 %v7635_v40, %v525_v61  ;;  %v526_v40 = vmul.f32 0.00390625, %v8034_v30  ;;  %v8219_v30 = vsub.f32 %v7640_v52, %v527_v46 }
 0x188   :  { %2969 = vrot.lane.b32.xlu0 %v7853_v29, %s7033_s11  ;;  %6238 = vmatprep.mubr.msk.f32.mxu1 %vm609_vm0, %v4047_v15  ;;  %v8168_v17 = vadd.f32 %v3998_v26, %v7927_v36  ;;  %v536_v52 = vmul.f32 %v8198_v48, %v8198_v48 }
 0x189   :  { %11518 = vst [vmem:[#allocation46_spill] sm:$0xff] %v8161_v24  ;;  %6239 = vmatmul.mubr.msk.f32.vlgmr.msra.gmra.mrb[48].mxu1 %vm609_vm0, %v4048_v1  ;;  %v4050_v34 = vmax.f32 %v8161_v24, 0.0  ;;  %11523 = vst [vmem:[#allocation51_spill] sm:$0xff] %v8191_v3  ;;  %v539_v60 = vmul.f32 %v8191_v3, %v8191_v3  ;;  %v8241_v43 = vsub.f32 %v11533_v33, %v526_v40 }
 0x18a   :  { %11519 = vst [vmem:[#allocation47_spill] sm:$0xff] %v8168_v17  ;;  %6399 = vmatpush3.bf16.msra.mxu1 %v7815_v9  ;;  %v4049_v29 = vmax.f32 %v8168_v17, 0.0  ;;  %v6220_v38 = vpop.f32.mrb[52].mxu0  ;;  %v288_v9 = vadd.f32 %v280_v47, %v279_v22  ;;  %11528 = vst [vmem:[#allocation56_spill] sm:$0xff] %v8219_v30  ;;  %v542_v1 = vmul.f32 %v8219_v30, %v8219_v30  ;;  %v11559_v17 = vld [vmem:[#allocation3_spill] sm:$0xff] }
 0x18b   :  { %6401 = vmatprep.subr.bf16.mxu1 %v7873_v53  ;;  %v8195_v31 = vadd.f32 %v6220_v38, %v7927_v36  ;;  %v4008_v28 = vpop.f32.mrb[53].mxu0  ;;  %11534 = vst [vmem:[#allocation11_spill] sm:$0xff] %v8241_v43  ;;  %v547_v35 = vadd.f32 %v539_v60, %v538_v23  ;;  %v544_v22 = vadd.f32 %v537_v20, %v536_v52  ;;  %v11539_v23 = vld [vmem:[#allocation13_spill] sm:$0xff]  ;;  %v11541_v60 = vld [vmem:[#allocation7_spill] sm:$0xff]  ;;  %v11543_v20 = vld [vmem:[#allocation14_spill] sm:$0xff] }
 0x18c   :  { %v8204_v18 = vadd.f32 %v4008_v28, %v7927_v36  ;;  %6241 = vmatprep.mubr.msk.f32.mxu1 %vm609_vm0, %v4049_v29  ;;  %v553_v14 = vadd.f32 %v543_v25, %v542_v1  ;;  %v11547_v1 = vld [vmem:[#allocation24_spill] sm:$0xff] }
 0x18d   :  { %11524 = vst [vmem:[#allocation52_spill] sm:$0xff] %v8195_v31  ;;  %6242 = vmatmul.mubr.msk.f32.gmra.mrb[50].mxu1 %vm609_vm0, %v4050_v34  ;;  %v4052_v0 = vmax.f32 %v8195_v31, 0.0  ;;  %v541_v34 = vmul.f32 %v8241_v43, %v8241_v43 }
 0x18e   :  { %11527 = vst [vmem:[#allocation55_spill] sm:$0xff] %v8204_v18  ;;  %v4051_v19 = vmax.f32 %v8204_v18, 0.0  ;;  %v6223_v56 = vpop.f32.mrb[54].mxu0  ;;  %6403 = vmatpush3.bf16.msra.mxu1 %v7873_v53  ;;  %v8234_v53 = vsub.f32 %v7595_v5, %v526_v40 }
 0x18f   :  { %v8227_v54 = vadd.f32 %v6223_v56, %v7927_v36  ;;  %v4018_v6 = vpop.f32.mrb[55].mxu0 }
 0x190   :  { %v8230_v8 = vadd.f32 %v4018_v6, %v7927_v36  ;;  %6244 = vmatprep.mubr.msk.f32.mxu1 %vm609_vm0, %v4051_v19  ;;  %11532 = vst [vmem:[#allocation60_spill] sm:$0xff] %v8234_v53  ;;  %v540_v11 = vmul.f32 %v8234_v53, %v8234_v53  ;;  %v11542_v6 = vld [vmem:[#allocation18_spill] sm:$0xff] }
 0x191   :  { %11530 = vst [vmem:[#allocation58_spill] sm:$0xff] %v8227_v54  ;;  %v4054_v2 = vmax.f32 %v8227_v54, 0.0  ;;  %6245 = vmatmul.mubr.msk.f32.gmra.mrb[52].mxu1 %vm609_vm0, %v4052_v0  ;;  %v11540_v0 = vld [vmem:[#allocation15_spill] sm:$0xff] }
 0x192   :  { %11531 = vst [vmem:[#allocation59_spill] sm:$0xff] %v8230_v8  ;;  %v4053_v62 = vmax.f32 %v8230_v8, 0.0  ;;  %v6226_v5 = vpop.f32.mrb[56].mxu0 }
 0x193   :  { %v8251_v15 = vadd.f32 %v6226_v5, %v7927_v36  ;;  %v4028_v61 = vpop.f32.mrb[57].mxu0  ;;  %v11546_v5 = vld [vmem:[#allocation17_spill] sm:$0xff] }
 0x194   :  { %v8254_v42 = vadd.f32 %v4028_v61, %v7927_v36  ;;  %6247 = vmatprep.mubr.msk.f32.mxu1 %vm609_vm0, %v4053_v62  ;;  %v11548_v61 = vld [vmem:[#allocation20_spill] sm:$0xff] }
 0x195   :  { %11535 = vst [vmem:[#allocation61_spill] sm:$0xff] %v8251_v15  ;;  %v4056_v47 = vmax.f32 %v8251_v15, 0.0  ;;  %6248 = vmatmul.mubr.msk.f32.gmra.mrb[54].mxu1 %vm609_vm0, %v4054_v2  ;;  %v8290_v2 = vpop.permute.xlu1 %1129 }
 0x196   :  { %11536 = vst [vmem:[#allocation62_spill] sm:$0xff] %v8254_v42  ;;  %v4055_v26 = vmax.f32 %v8254_v42, 0.0  ;;  %v6229_v13 = vpop.f32.mrb[58].mxu0  ;;  %11545 = vst [vmem:[#allocation13_spill] sm:$0xff] %v8290_v2 }
 0x197   :  { %v8265_v39 = vadd.f32 %v6229_v13, %v7927_v36  ;;  %v4038_v63 = vpop.f32.mrb[59].mxu0  ;;  %v11550_v13 = vld [vmem:[#allocation23_spill] sm:$0xff] }
 0x198   :  { %v8268_v29 = vadd.f32 %v4038_v63, %v7927_v36  ;;  %6250 = vmatprep.mubr.msk.f32.mxu1 %vm609_vm0, %v4055_v26 }
 0x199   :  { %11537 = vst [vmem:[#allocation63_spill] sm:$0xff] %v8265_v39  ;;  %v4058_v38 = vmax.f32 %v8265_v39, 0.0  ;;  %6251 = vmatmul.mubr.msk.f32.gmra.mrb[56].mxu1 %vm609_vm0, %v4056_v47 }
 0x19a   :  { %11538 = vst [vmem:[#allocation64_spill] sm:$0xff] %v8268_v29  ;;  %v4057_v46 = vmax.f32 %v8268_v29, 0.0 }
 0x19c   :  { %6253 = vmatprep.mubr.msk.f32.mxu1 %vm609_vm0, %v4057_v46 }
 0x19d   :  { %6254 = vmatmul.mubr.msk.f32.gmra.mrb[58].mxu1 %vm609_vm0, %v4058_v38 }
 0x1a7   :  { %289 = vadd.xlane.f32.xlu0 %v288_v9  ;;  %v550_v9 = vadd.f32 %v541_v34, %v540_v11 }
 0x1ab   :  { %295 = vadd.xlane.f32.xlu0 %v294_v21  ;;  %286 = vadd.xlane.f32.xlu1 %v285_v12 }
 0x1af   :  { %548 = vadd.xlane.f32.xlu0 %v547_v35  ;;  %292 = vadd.xlane.f32.xlu1 %v291_v41  ;;  %v11544_v41 = vld [vmem:[#allocation21_spill] sm:$0xff] }
 0x1b3   :  { %554 = vadd.xlane.f32.xlu0 %v553_v14  ;;  %545 = vadd.xlane.f32.xlu1 %v544_v22 }
 0x1b7   :  { %551 = vadd.xlane.f32.xlu1 %v550_v9 }
 0x1bd   :  { %v6032_v28 = vpop.f32.mrb[0].mxu1  ;;  %v8306_v47 = vpop.permute.xlu1 %1411 }
 0x1be   :  { %v941_v40 = vpop.f32.mrb[1].mxu1  ;;  %11549 = vst [vmem:[#allocation15_spill] sm:$0xff] %v8306_v47 }
 0x1c1   :  { %v8314_v11 = vpop.permute.xlu1 %1415 }
 0x1c2   :  { %v6035_v12 = vpop.f32.mrb[2].mxu1  ;;  %11551 = vst [vmem:[#allocation7_spill] sm:$0xff] %v8314_v11 }
 0x1c3   :  { %v951_v10 = vpop.f32.mrb[3].mxu1 }
 0x1c5   :  { %v8324_v9 = vpop.permute.xlu1 %1374 }
 0x1c6   :  { %v6038_v32 = vpop.f32.mrb[4].mxu1  ;;  %11552 = vst [vmem:[#allocation18_spill] sm:$0xff] %v8324_v9 }
 0x1c7   :  { %v961_v21 = vpop.f32.mrb[5].mxu1 }
 0x1c8   :  { %2971 = vrot.lane.b32.xlu1 %v11539_v23, %s7033_s11 }
 0x1c9   :  { %2975 = vrot.lane.b32.xlu0 %v11540_v0, %s7033_s11  ;;  %v11554_v0 = vld [vmem:[#allocation12_spill] sm:$0xff] }
 0x1ca   :  { %v6041_v19 = vpop.f32.mrb[6].mxu1  ;;  %v8326_v23 = vpop.permute.xlu0 %1413  ;;  %v957_v29 = vadd.f32 %v6035_v12, %v11554_v0  ;;  %v967_v12 = vadd.f32 %v6038_v32, %v11554_v0 }
 0x1cb   :  { %v971_v56 = vpop.f32.mrb[7].mxu1  ;;  %11553 = vst [vmem:[#allocation14_spill] sm:$0xff] %v8326_v23  ;;  %v11562_v23 = vld [vmem:[#allocation22_spill] sm:$0xff] }
 0x1cc   :  { %2973 = vrot.lane.b32.xlu1 %v11541_v60, %s7033_s11  ;;  %v947_v60 = vadd.f32 %v6032_v28, %v11554_v0  ;;  %v942_v28 = vadd.f32 %v941_v40, %v11554_v0  ;;  %v1003_v8 = vmax.f32 %v957_v29, 0.0 }
 0x1cd   :  { %2979 = vrot.lane.b32.xlu0 %v11542_v6, %s7033_s11 }
 0x1ce   :  { %v8345_v42 = vpop.permute.xlu0 %1372  ;;  %v1000_v24 = vmax.f32 %v942_v28, 0.0  ;;  %v977_v28 = vadd.f32 %v6041_v19, %v11554_v0 }
 0x1cf   :  { %v6044_v52 = vpop.f32.mrb[8].mxu1  ;;  %11556 = vst [vmem:[#allocation17_spill] sm:$0xff] %v8345_v42 }
 0x1d0   :  { %2977 = vrot.lane.b32.xlu1 %v11543_v20, %s7033_s11  ;;  %v8286_v33 = vpop.f32.mrb[9].mxu1  ;;  %v1068_v32 = vmul.f32 %v11559_v17, %v1000_v24  ;;  %v1007_v9 = vmax.f32 %v977_v28, 0.0 }
 0x1d1   :  { %2983 = vrot.lane.b32.xlu0 %v11544_v41, %s7033_s11  ;;  %v7022_v41 = vld [vmem:[%s11343_s4 + $0x40] sm:$0xf] }
 0x1d2   :  { %v8357_v37 = vpop.permute.xlu0 %1378 }
 0x1d3   :  { %v8292_v62 = vpop.f32.mrb[10].mxu1  ;;  %11558 = vst [vmem:[#allocation20_spill] sm:$0xff] %v8357_v37 }
 0x1d4   :  { %2981 = vrot.lane.b32.xlu1 %v11546_v5, %s7033_s11  ;;  %v8296_v35 = vpop.f32.mrb[11].mxu1  ;;  %v8337_v5 = vrot.slane %v7022_v41, %v11508_v55 }
 0x1d5   :  { %2987 = vrot.lane.b32.xlu0 %v11547_v1, %s7033_s11  ;;  %v8339_v1 = vpop.permute.xlu1 %1376 }
 0x1d6   :  { %11555 = vst [vmem:[#allocation21_spill] sm:$0xff] %v8339_v1  ;;  %v1019_v29 = vmul.f32 %v8337_v5, %v1003_v8  ;;  %v8380_v37 = vpop.permute.xlu0 %1382 }
 0x1d7   :  { %v8300_v25 = vpop.f32.mrb[12].mxu1  ;;  %11561 = vst [vmem:[#allocation12_spill] sm:$0xff] %v8380_v37  ;;  %v982_v37 = vadd.f32 %v8286_v33, %v11554_v0 }
 0x1d8   :  { %2985 = vrot.lane.b32.xlu1 %v11548_v61, %s7033_s11  ;;  %v8304_v22 = vpop.f32.mrb[13].mxu1  ;;  %v1001_v61 = vmax.f32 %v947_v60, 0.0  ;;  %v952_v60 = vadd.f32 %v951_v10, %v11554_v0  ;;  %v1016_v10 = vmul.f32 %v8337_v5, %v1000_v24 }
 0x1d9   :  { %v8354_v41 = vpop.permute.xlu1 %1380  ;;  %v1008_v53 = vmax.f32 %v982_v37, 0.0 }
 0x1da   :  { %v1017_v15 = vmul.f32 %v8337_v5, %v1001_v61  ;;  %11557 = vst [vmem:[#allocation24_spill] sm:$0xff] %v8354_v41  ;;  %v1069_v40 = vmul.f32 %v11559_v17, %v1001_v61  ;;  %v1002_v47 = vmax.f32 %v952_v60, 0.0  ;;  %v962_v41 = vadd.f32 %v961_v21, %v11554_v0  ;;  %v8412_v43 = vpop.permute.xlu0 %1386 }
 0x1db   :  { %v8308_v26 = vpop.f32.mrb[14].mxu1  ;;  %v972_v61 = vadd.f32 %v971_v56, %v11554_v0  ;;  %v1005_v60 = vmax.f32 %v967_v12, 0.0  ;;  %v987_v21 = vadd.f32 %v6044_v52, %v11554_v0  ;;  %v8386_v56 = vrot.slane %v11562_v23, %v11508_v55  ;;  %11565 = vst [vmem:[#allocation65_spill] sm:$0xff] %v8412_v43 }
 0x1dc   :  { %2989 = vrot.lane.b32.xlu1 %v11550_v13, %s7033_s11  ;;  %v8312_v14 = vpop.f32.mrb[15].mxu1  ;;  %v1031_v18 = vsel %vm609_vm0, %v1017_v15, 0.0  ;;  %v1083_v15 = vsel %vm609_vm0, %v1069_v40, 0.0  ;;  %v1018_v19 = vmul.f32 %v8337_v5, %v1002_v47  ;;  %v1071_v40 = vmul.f32 %v11559_v17, %v1003_v8 }
 0x1dd   :  { %v8369_v42 = vpop.permute.xlu1 %1384  ;;  %11563 = vst [vmem:[#allocation3_spill] sm:$0xff] %v8386_v56  ;;  %v1028_v24 = vsel %vm609_vm0, %v1016_v10, 0.0  ;;  %v1070_v12 = vmul.f32 %v11559_v17, %v1002_v47  ;;  %v1037_v52 = vsel %vm609_vm0, %v1019_v29, 0.0  ;;  %v1021_v8 = vmul.f32 %v8337_v5, %v1005_v60 }
 0x1de   :  { %11560 = vst [vmem:[#allocation23_spill] sm:$0xff] %v8369_v42  ;;  %v1004_v42 = vmax.f32 %v962_v41, 0.0  ;;  %v1080_v41 = vsel %vm609_vm0, %v1068_v32, 0.0  ;;  %v1073_v55 = vmul.f32 %v11559_v17, %v1005_v60  ;;  %v1009_v23 = vmax.f32 %v987_v21, 0.0  ;;  %v8462_v51 = vpop.permute.xlu0 %1390 }
 0x1df   :  { %v8316_v34 = vpop.f32.mrb[16].mxu1  ;;  %v1089_v29 = vsel %vm609_vm0, %v1071_v40, 0.0  ;;  %v1034_v33 = vsel %vm609_vm0, %v1018_v19, 0.0  ;;  %v1023_v32 = vmul.f32 %v8337_v5, %v1007_v9  ;;  %v1075_v60 = vmul.f32 %v11559_v17, %v1007_v9  ;;  %11567 = vst [vmem:[#allocation67_spill] sm:$0xff] %v8462_v51 }
 0x1e0   :  { %v8318_v63 = vpop.f32.mrb[17].mxu1  ;;  %v1020_v47 = vmul.f32 %v8337_v5, %v1004_v42  ;;  %v992_v21 = vadd.f32 %v8296_v35, %v11554_v0  ;;  %v8417_v19 = vsel %vm609_vm0, %v1070_v12, 0.0  ;;  %v1095_v9 = vsel %vm609_vm0, %v1073_v55, 0.0 }
 0x1e1   :  { %v8400_v10 = vpop.permute.xlu1 %1388  ;;  %v1025_v35 = vmul.f32 %v8337_v5, %v1009_v23  ;;  %v1764_v43 = vadd.f32 %v8300_v25, %v11554_v0  ;;  %v1077_v12 = vmul.f32 %v11559_v17, %v1009_v23  ;;  %v8436_v55 = vsel %vm609_vm0, %v1075_v60, 0.0 }
 0x1e2   :  { %11564 = vst [vmem:[#allocation22_spill] sm:$0xff] %v8400_v10  ;;  %v8429_v37 = vsel %vm609_vm0, %v1020_v47, 0.0 }
 0x1e3   :  { %v8320_v38 = vpop.f32.mrb[18].mxu1  ;;  %v8456_v60 = vsel %vm609_vm0, %v1025_v35, 0.0 }
 0x1e4   :  { %v8322_v46 = vpop.f32.mrb[19].mxu1 }
 0x1e5   :  { %v8441_v25 = vpop.permute.xlu1 %1392 }
 0x1e6   :  { %11566 = vst [vmem:[#allocation66_spill] sm:$0xff] %v8441_v25 }
 0x1e7   :  { %v8329_v6 = vpop.f32.mrb[20].mxu1 }
 0x1e8   :  { %v8331_v20 = vpop.f32.mrb[21].mxu1  ;;  %v1804_v49 = vadd.f32 %v8329_v6, %v11554_v0 }
 0x1e9   :  { %v8493_v50 = vpop.permute.xlu1 %2177 }
 0x1ea   :  { %11570 = vst [vmem:[#allocation70_spill] sm:$0xff] %v8493_v50  ;;  %v1794_v50 = vadd.f32 %v8320_v38, %v11554_v0 }
 0x1eb   :  { %v8341_v13 = vpop.f32.mrb[22].mxu1 }
 0x1ec   :  { %v8343_v39 = vpop.f32.mrb[23].mxu1  ;;  %v1824_v4 = vmax.f32 %v1794_v50, 0.0 }
 0x1ef   :  { %v8350_v54 = vpop.f32.mrb[24].mxu1 }
 0x1f0   :  { %v8352_v31 = vpop.f32.mrb[25].mxu1 }
 0x1f3   :  { %v8361_v27 = vpop.f32.mrb[26].mxu1 }
 0x1f4   :  { %1032 = vadd.xlane.f32.xlu0 %v1031_v18  ;;  %v8364_v1 = vpop.f32.mrb[27].mxu1 }
 0x1f7   :  { %v8374_v18 = vpop.f32.mrb[28].mxu1 }
 0x1f8   :  { %1084 = vadd.xlane.f32.xlu0 %v1083_v15  ;;  %v8378_v11 = vpop.f32.mrb[29].mxu1  ;;  %v1006_v15 = vmax.f32 %v972_v61, 0.0  ;;  %v997_v61 = vadd.f32 %v8292_v62, %v11554_v0 }
 0x1fa   :  { %v1022_v10 = vmul.f32 %v8337_v5, %v1006_v15  ;;  %v1074_v40 = vmul.f32 %v11559_v17, %v1006_v15  ;;  %v1011_v15 = vmax.f32 %v997_v61, 0.0  ;;  %v1024_v61 = vmul.f32 %v8337_v5, %v1008_v53 }
 0x1fb   :  { %v8393_v2 = vpop.f32.mrb[30].mxu1 }
 0x1fc   :  { %1038 = vadd.xlane.f32.xlu0 %v1037_v52  ;;  %v8398_v28 = vpop.f32.mrb[31].mxu1  ;;  %v1072_v52 = vmul.f32 %v11559_v17, %v1004_v42  ;;  %v1043_v42 = vsel %vm609_vm0, %v1021_v8, 0.0  ;;  %v1049_v8 = vsel %vm609_vm0, %v1023_v32, 0.0  ;;  %v8445_v47 = vsel %vm609_vm0, %v1022_v10, 0.0 }
 0x1fd   :  { %v8448_v23 = vsel %vm609_vm0, %v1074_v40, 0.0  ;;  %v1769_v10 = vadd.f32 %v8312_v14, %v11554_v0  ;;  %v1079_v35 = vmul.f32 %v11559_v17, %v1011_v15  ;;  %v1784_v14 = vadd.f32 %v8316_v34, %v11554_v0 }
 0x1fe   :  { %v8439_v48 = vsel %vm609_vm0, %v1072_v52, 0.0  ;;  %v1076_v52 = vmul.f32 %v11559_v17, %v1008_v53  ;;  %v8488_v34 = vsel %vm609_vm0, %v1024_v61, 0.0 }
 0x1ff   :  { %v8419_v62 = vpop.f32.mrb[32].mxu1 }
 0x200   :  { %1090 = vadd.xlane.f32.xlu0 %v1089_v29  ;;  %1029 = vadd.xlane.f32.xlu1 %v1028_v24  ;;  %v8426_v59 = vpop.f32.mrb[33].mxu1  ;;  %v1759_v24 = vadd.f32 %v8304_v22, %v11554_v0  ;;  %v1010_v29 = vmax.f32 %v992_v21, 0.0  ;;  %v1774_v22 = vadd.f32 %v8308_v26, %v11554_v0  ;;  %v1818_v21 = vmax.f32 %v1764_v43, 0.0  ;;  %v6266_v40 = vpop.f32.mrb[60].mxu0 }
 0x201   :  { %v8465_v26 = vsel %vm609_vm0, %v1077_v12, 0.0  ;;  %v8469_v53 = vadd.f32 %v6266_v40, %v7927_v36 }
 0x202   :  { %v1817_v30 = vmax.f32 %v1759_v24, 0.0  ;;  %v1026_v43 = vmul.f32 %v8337_v5, %v1010_v29  ;;  %v1078_v12 = vmul.f32 %v11559_v17, %v1010_v29  ;;  %v1820_v51 = vmax.f32 %v1774_v22, 0.0 }
 0x203   :  { %v8452_v32 = vpop.f32.mrb[34].mxu1  ;;  %11568 = vst [vmem:[#allocation68_spill] sm:$0xff] %v8469_v53  ;;  %v8481_v24 = vadd.f32 %v8318_v63, %v11554_v0  ;;  %v4838_v58 = vmax.f32 %v8469_v53, 0.0  ;;  %v1830_v63 = vmul.f32 %v1818_v21, %v8337_v5 }
 0x204   :  { %1044 = vadd.xlane.f32.xlu0 %v1043_v42  ;;  %1081 = vadd.xlane.f32.xlu1 %v1080_v41  ;;  %v8460_v25 = vpop.f32.mrb[35].mxu1  ;;  %v1027_v41 = vmul.f32 %v8337_v5, %v1011_v15  ;;  %v4778_v42 = vpop.f32.mrb[61].mxu0  ;;  %v1878_v15 = vmul.f32 %v1818_v21, %v11559_v17  ;;  %v1829_v16 = vmul.f32 %v1817_v30, %v8337_v5  ;;  %v8517_v45 = vsel %vm609_vm0, %v1078_v12, 0.0 }
 0x205   :  { %v8476_v7 = vadd.f32 %v4778_v42, %v7927_v36  ;;  %v1819_v42 = vmax.f32 %v1769_v10, 0.0  ;;  %v6269_v22 = vpop.f32.mrb[62].mxu0  ;;  %v8505_v10 = vsel %vm609_vm0, %v1079_v35, 0.0  ;;  %v8510_v21 = vpop.permute.xlu0 %1394  ;;  %v1880_v38 = vmul.f32 %v1820_v51, %v11559_v17 }
 0x206   :  { %v4788_v53 = vpop.f32.mrb[63].mxu0  ;;  %v8502_v61 = vsel %vm609_vm0, %v1027_v41, 0.0  ;;  %11571 = vst [vmem:[#allocation71_spill] sm:$0xff] %v8510_v21  ;;  %v1821_v41 = vmax.f32 %v8481_v24, 0.0 }
 0x207   :  { %11569 = vst [vmem:[#allocation69_spill] sm:$0xff] %v8476_v7  ;;  %v8483_v40 = vpop.f32.mrb[36].mxu1  ;;  %v4837_v29 = vmax.f32 %v8476_v7, 0.0  ;;  %v1822_v7 = vmax.f32 %v1784_v14, 0.0  ;;  %v1831_v14 = vmul.f32 %v1819_v42, %v8337_v5  ;;  %v1879_v21 = vmul.f32 %v1819_v42, %v11559_v17  ;;  %v8550_v42 = vpop.permute.xlu1 %2183 }
 0x208   :  { %1096 = vadd.xlane.f32.xlu0 %v1095_v9  ;;  %1035 = vadd.xlane.f32.xlu1 %v1034_v33  ;;  %v8490_v3 = vpop.f32.mrb[37].mxu1  ;;  %v1877_v9 = vmul.f32 %v1817_v30, %v11559_v17  ;;  %v8499_v33 = vsel %vm609_vm0, %v1076_v52, 0.0  ;;  %v1832_v30 = vmul.f32 %v1820_v51, %v8337_v5  ;;  %v8514_v52 = vsel %vm609_vm0, %v1026_v43, 0.0  ;;  %11574 = vst [vmem:[#allocation74_spill] sm:$0xff] %v8550_v42 }
 0x209   :  { %6290 = vmatprep.mubr.msk.f32.mxu1 %vm609_vm0, %v4837_v29  ;;  %v8527_v29 = vsel %vm609_vm0, %v1878_v15, 0.0  ;;  %v1789_v43 = vadd.f32 %v8322_v46, %v11554_v0  ;;  %v6272_v24 = vpop.f32.mrb[64].mxu0  ;;  %v1834_v15 = vmul.f32 %v1822_v7, %v8337_v5  ;;  %v8545_v46 = vadd.f32 %v6269_v22, %v7927_v36  ;;  %v8573_v6 = vpop.permute.xlu0 %2179 }
 0x20a   :  { %6291 = vmatmul.mubr.msk.f32.vlgmr.msra.gmra.mrb[60].mxu1 %vm609_vm0, %v4838_v58  ;;  %v8535_v58 = vsel %vm609_vm0, %v1829_v16, 0.0  ;;  %v8541_v51 = vsel %vm609_vm0, %v1877_v9, 0.0  ;;  %v8548_v57 = vadd.f32 %v4788_v53, %v7927_v36  ;;  %v8553_v16 = vsel %vm609_vm0, %v1832_v30, 0.0  ;;  %11576 = vst [vmem:[#allocation76_spill] sm:$0xff] %v8573_v6 }
 0x20b   :  { %v8520_v35 = vpop.f32.mrb[38].mxu1  ;;  %11572 = vst [vmem:[#allocation72_spill] sm:$0xff] %v8545_v46  ;;  %v1833_v9 = vmul.f32 %v1821_v41, %v8337_v5  ;;  %v8564_v50 = vsel %vm609_vm0, %v1880_v38, 0.0  ;;  %v8567_v53 = vsel %vm609_vm0, %v1831_v14, 0.0  ;;  %v1823_v22 = vmax.f32 %v1789_v43, 0.0 }
 0x20c   :  { %1050 = vadd.xlane.f32.xlu0 %v1049_v8  ;;  %1087 = vadd.xlane.f32.xlu1 %v8417_v19  ;;  %v8531_v12 = vpop.f32.mrb[39].mxu1  ;;  %v8538_v19 = vsel %vm609_vm0, %v1830_v63, 0.0  ;;  %v4798_v8 = vpop.f32.mrb[65].mxu0  ;;  %11573 = vst [vmem:[#allocation73_spill] sm:$0xff] %v8548_v57  ;;  %v1882_v63 = vmul.f32 %v1822_v7, %v11559_v17  ;;  %v1799_v7 = vadd.f32 %v8331_v20, %v11554_v0  ;;  %v8583_v56 = vsel %vm609_vm0, %v1834_v15, 0.0  ;;  %v1145_v15 = vld [vmem:[%s11347_s2 + $0x8] sm:$0xff] }
 0x20d   :  { %v6275_v42 = vpop.f32.mrb[66].mxu0  ;;  %v8579_v38 = vadd.f32 %v6272_v24, %v7927_v36  ;;  %v1836_v43 = vmul.f32 %v1824_v4, %v8337_v5  ;;  %11578 = vst [vmem:[#allocation78_spill] sm:$0xff] %v8583_v56  ;;  %v8586_v20 = vsel %vm609_vm0, %v1879_v21, 0.0  ;;  %v8589_v6 = vadd.f32 %v4798_v8, %v7927_v36 }
 0x20e   :  { %v4808_v14 = vpop.f32.mrb[67].mxu0  ;;  %v1814_v24 = vadd.f32 %v8341_v13, %v11554_v0  ;;  %v1835_v21 = vmul.f32 %v1823_v22, %v8337_v5  ;;  %v1825_v8 = vmax.f32 %v1799_v7, 0.0 }
 0x20f   :  { %v8559_v44 = vpop.f32.mrb[40].mxu1  ;;  %11577 = vst [vmem:[#allocation77_spill] sm:$0xff] %v8579_v38  ;;  %11579 = vst [vmem:[#allocation79_spill] sm:$0xff] %v8589_v6  ;;  %v4841_v13 = vmax.f32 %v8589_v6, 0.0  ;;  %v8624_v7 = vsel %vm609_vm0, %v1836_v43, 0.0  ;;  %v1809_v6 = vadd.f32 %v8343_v39, %v11554_v0  ;;  %v2554_v43 = vadd.f32 %v8350_v54, %v11554_v0 }
 0x210   :  { %11575 = vst [vmem:[#allocation75_spill] sm:$0xff] %v8559_v44  ;;  %1102 = vadd.xlane.f32.xlu0 %v8436_v55  ;;  %1041 = vadd.xlane.f32.xlu1 %v8429_v37  ;;  %v8571_v30 = vpop.f32.mrb[41].mxu1  ;;  %v1881_v44 = vmul.f32 %v1821_v41, %v11559_v17  ;;  %v4840_v55 = vmax.f32 %v8545_v46, 0.0  ;;  %v4839_v37 = vmax.f32 %v8548_v57, 0.0  ;;  %v8592_v41 = vsel %vm609_vm0, %v1882_v63, 0.0 }
 0x211   :  { %11580 = vst [vmem:[#allocation80_spill] sm:$0xff] %v8592_v41  ;;  %v1826_v46 = vmax.f32 %v1804_v49, 0.0  ;;  %v8595_v57 = vsel %vm609_vm0, %v1833_v9, 0.0  ;;  %v1884_v49 = vmul.f32 %v1824_v4, %v11559_v17  ;;  %v6278_v9 = vpop.f32.mrb[68].mxu0  ;;  %v1837_v39 = vmul.f32 %v1825_v8, %v8337_v5 }
 0x212   :  { %11581 = vst [vmem:[#allocation81_spill] sm:$0xff] %v8595_v57  ;;  %6293 = vmatprep.mubr.msk.f32.mxu1 %vm609_vm0, %v4839_v37  ;;  %v1883_v57 = vmul.f32 %v1823_v22, %v11559_v17  ;;  %v8614_v41 = vsel %vm609_vm0, %v1881_v44, 0.0  ;;  %v4842_v37 = vmax.f32 %v8579_v38, 0.0  ;;  %v4818_v4 = vpop.f32.mrb[69].mxu0  ;;  %v1157_v22 = vmax.f32 %v1145_v15, 0.0  ;;  %v8632_v38 = vpop.permute.xlu0 %2185 }
 0x213   :  { %v8602_v56 = vpop.f32.mrb[42].mxu1  ;;  %11582 = vst [vmem:[#allocation82_spill] sm:$0xff] %v8614_v41  ;;  %6294 = vmatmul.mubr.msk.f32.gmra.mrb[62].mxu1 %vm609_vm0, %v4840_v55  ;;  %v8629_v44 = vadd.f32 %v4808_v14, %v7927_v36  ;;  %11586 = vst [vmem:[#allocation86_spill] sm:$0xff] %v8632_v38  ;;  %v1886_v55 = vmul.f32 %v1826_v46, %v11559_v17  ;;  %v1828_v41 = vmax.f32 %v1814_v24, 0.0  ;;  %v8644_v14 = vsel %vm609_vm0, %v1884_v49, 0.0 }
 0x214   :  { %1056 = vadd.xlane.f32.xlu0 %v8456_v60  ;;  %1093 = vadd.xlane.f32.xlu1 %v8439_v48  ;;  %v8609_v63 = vpop.f32.mrb[43].mxu1  ;;  %v8619_v48 = vadd.f32 %v6275_v42, %v7927_v36  ;;  %v8621_v60 = vpop.permute.xlu1 %2181  ;;  %v1838_v42 = vmul.f32 %v1826_v46, %v8337_v5  ;;  %11587 = vst [vmem:[#allocation87_spill] sm:$0xff] %v8644_v14  ;;  %v8647_v15 = vsel %vm609_vm0, %v1835_v21, 0.0  ;;  %v8654_v38 = vsel %vm609_vm0, %v1883_v57, 0.0 }
 0x215   :  { %11584 = vst [vmem:[#allocation84_spill] sm:$0xff] %v8621_v60  ;;  %11585 = vst [vmem:[#allocation85_spill] sm:$0xff] %v8629_v44  ;;  %6296 = vmatprep.mubr.msk.f32.mxu1 %vm609_vm0, %v4841_v13  ;;  %v4843_v46 = vmax.f32 %v8629_v44, 0.0  ;;  %v6281_v24 = vpop.f32.mrb[70].mxu0  ;;  %v1885_v54 = vmul.f32 %v1825_v8, %v11559_v17  ;;  %v1827_v21 = vmax.f32 %v1809_v6, 0.0  ;;  %v1169_v14 = vmin.f32 %v1157_v22, 1.0 }
 0x216   :  { %11583 = vst [vmem:[#allocation83_spill] sm:$0xff] %v8619_v48  ;;  %11588 = vst [vmem:[#allocation88_spill] sm:$0xff] %v8647_v15  ;;  %v4828_v49 = vpop.f32.mrb[71].mxu0  ;;  %v2549_v15 = vadd.f32 %v8352_v31, %v11554_v0  ;;  %v8664_v44 = vadd.f32 %v4818_v4, %v7927_v36  ;;  %v1840_v57 = vmul.f32 %v1828_v41, %v8337_v5  ;;  %v8669_v8 = vsel %vm609_vm0, %v1838_v42, 0.0 }
 0x217   :  { %v8638_v60 = vpop.f32.mrb[44].mxu1  ;;  %6297 = vmatmul.mubr.msk.f32.gmra.mrb[64].mxu1 %vm609_vm0, %v4842_v37  ;;  %v8672_v37 = vsel %vm609_vm0, %v1886_v55, 0.0  ;;  %v1888_v31 = vmul.f32 %v1828_v41, %v11559_v17  ;;  %v8682_v4 = vsel %vm609_vm0, %v1837_v39, 0.0  ;;  %v2564_v22 = vadd.f32 %v8361_v27, %v11554_v0  ;;  %v8699_v39 = vpop.permute.xlu0 %2189 }
 0x218   :  { %1108 = vadd.xlane.f32.xlu0 %v8465_v26  ;;  %1047 = vadd.xlane.f32.xlu1 %v8445_v47  ;;  %v8649_v13 = vpop.f32.mrb[45].mxu1  ;;  %v4844_v47 = vmax.f32 %v8619_v48, 0.0  ;;  %v8659_v26 = vadd.f32 %v6278_v9, %v7927_v36  ;;  %11590 = vst [vmem:[#allocation90_spill] sm:$0xff] %v8664_v44  ;;  %v2608_v9 = vmax.f32 %v2554_v43, 0.0  ;;  %v8676_v6 = vpop.permute.xlu1 %2187  ;;  %v2559_v42 = vadd.f32 %v8364_v1, %v11554_v0 }
 0x219   :  { %6299 = vmatprep.mubr.msk.f32.mxu1 %vm609_vm0, %v4843_v46  ;;  %11591 = vst [vmem:[#allocation91_spill] sm:$0xff] %v8676_v6  ;;  %v8691_v43 = vsel %vm609_vm0, %v1885_v54, 0.0  ;;  %v8697_v41 = vadd.f32 %v6281_v24, %v7927_v36  ;;  %11593 = vst [vmem:[#allocation93_spill] sm:$0xff] %v8699_v39  ;;  %v1839_v27 = vmul.f32 %v1827_v21, %v8337_v5  ;;  %v2607_v46 = vmax.f32 %v2549_v15, 0.0 }
 0x21a   :  { %11589 = vst [vmem:[#allocation89_spill] sm:$0xff] %v8659_v26  ;;  %v2574_v1 = vadd.f32 %v8374_v18, %v11554_v0  ;;  %v1217_v6 = vsub.f32 1.0, %v1169_v14  ;;  %v1887_v54 = vmul.f32 %v1827_v21, %v11559_v17  ;;  %v2620_v15 = vmul.f32 %v2608_v9, %v8337_v5 }
 0x21b   :  { %v8674_v48 = vpop.f32.mrb[46].mxu1  ;;  %6300 = vmatmul.mubr.msk.f32.gmra.mrb[66].mxu1 %vm609_vm0, %v4844_v47  ;;  %11592 = vst [vmem:[#allocation92_spill] sm:$0xff] %v8697_v41  ;;  %v8710_v47 = vadd.f32 %v4828_v49, %v7927_v36  ;;  %v8717_v18 = vsel %vm609_vm0, %v1888_v31, 0.0  ;;  %v2610_v24 = vmax.f32 %v2564_v22, 0.0  ;;  %v2609_v21 = vmax.f32 %v2559_v42, 0.0 }
 0x21c   :  { %1062 = vadd.xlane.f32.xlu0 %v8502_v61  ;;  %1099 = vadd.xlane.f32.xlu1 %v8448_v23  ;;  %v8688_v55 = vpop.f32.mrb[47].mxu1  ;;  %v4846_v61 = vmax.f32 %v8659_v26, 0.0  ;;  %v4845_v23 = vmax.f32 %v8664_v44, 0.0  ;;  %v2668_v26 = vmul.f32 %v2608_v9, %v11559_v17  ;;  %v8707_v44 = vsel %vm609_vm0, %v1840_v57, 0.0 }
 0x21d   :  { %11594 = vst [vmem:[#allocation94_spill] sm:$0xff] %v8710_v47  ;;  %v2569_v57 = vadd.f32 %v8378_v11, %v11554_v0  ;;  %v1181_v39 = vmax.f32 %v1169_v14, 0.001  ;;  %v4848_v36 = vmax.f32 %v8697_v41, 0.0  ;;  %v4847_v49 = vmax.f32 %v8710_v47, 0.0  ;;  %v1147_v11 = vld [vmem:[%s11347_s2 + $0x18] sm:$0xff] }
 0x21e   :  { %6302 = vmatprep.mubr.msk.f32.mxu1 %vm609_vm0, %v4845_v23  ;;  %v8728_v9 = vsel %vm609_vm0, %v1839_v27, 0.0  ;;  %v2612_v31 = vmax.f32 %v2574_v1, 0.0  ;;  %v1229_v22 = vmax.f32 %v1217_v6, 0.001  ;;  %v2667_v14 = vmul.f32 %v2607_v46, %v11559_v17  ;;  %v8743_v27 = vpop.permute.xlu0 %2193 }
 0x21f   :  { %6303 = vmatmul.mubr.msk.f32.gmra.mrb[68].mxu1 %vm609_vm0, %v4846_v61  ;;  %v8735_v42 = vsel %vm609_vm0, %v2668_v26, 0.0  ;;  %v8738_v61 = vsel %vm609_vm0, %v1887_v54, 0.0  ;;  %v2584_v23 = vadd.f32 %v8393_v2, %v11554_v0  ;;  %11596 = vst [vmem:[#allocation96_spill] sm:$0xff] %v8743_v27  ;;  %v2622_v6 = vmul.f32 %v2610_v24, %v8337_v5 }
 0x220   :  { %1114 = vadd.xlane.f32.xlu0 %v8505_v10  ;;  %1053 = vadd.xlane.f32.xlu1 %v8488_v34  ;;  %v8724_v10 = vpop.permute.xlu1 %2191  ;;  %v2619_v34 = vmul.f32 %v2607_v46, %v8337_v5  ;;  %v2670_v46 = vmul.f32 %v2610_v24, %v11559_v17  ;;  %v8750_v26 = vsel %vm609_vm0, %v2620_v15, 0.0  ;;  %v2579_v1 = vadd.f32 %v8398_v28, %v11554_v0 }
 0x221   :  { %11595 = vst [vmem:[#allocation95_spill] sm:$0xff] %v8724_v10  ;;  %6305 = vmatprep.mubr.msk.f32.mxu1 %vm609_vm0, %v4847_v49  ;;  %v2669_v2 = vmul.f32 %v2609_v21, %v11559_v17  ;;  %v2611_v54 = vmax.f32 %v2569_v57, 0.0  ;;  %6429 = vlog2.f32 %v1181_v39  ;;  %v1159_v49 = vmax.f32 %v1147_v11, 0.0 }
 0x222   :  { %v2624_v24 = vmul.f32 %v2612_v31, %v8337_v5  ;;  %6431 = vlog2.f32 %v1229_v22  ;;  %v2672_v15 = vmul.f32 %v2612_v31, %v11559_v17  ;;  %v2614_v41 = vmax.f32 %v2584_v23, 0.0 }
 0x223   :  { %6306 = vmatmul.mubr.msk.f32.gmra.mrb[70].mxu1 %vm609_vm0, %v4848_v36  ;;  %v2594_v28 = vadd.f32 %v8419_v62, %v11554_v0  ;;  %v2589_v39 = vadd.f32 %v8426_v59, %v11554_v0  ;;  %v8774_v36 = vsel %vm609_vm0, %v2667_v14, 0.0  ;;  %v2613_v31 = vmax.f32 %v2579_v1, 0.0 }
 0x224   :  { %1893 = vadd.xlane.f32.xlu0 %v8527_v29  ;;  %1105 = vadd.xlane.f32.xlu1 %v8499_v33  ;;  %v2621_v29 = vmul.f32 %v2609_v21, %v8337_v5  ;;  %v8758_v33 = vsel %vm609_vm0, %v2619_v34, 0.0  ;;  %v8766_v57 = vpop.permute.xlu1 %2195  ;;  %v8771_v21 = vsel %vm609_vm0, %v2622_v6, 0.0  ;;  %v8777_v34 = vsel %vm609_vm0, %v2670_v46, 0.0 }
 0x225   :  { %11597 = vst [vmem:[#allocation97_spill] sm:$0xff] %v8766_v57  ;;  %v2623_v62 = vmul.f32 %v2611_v54, %v8337_v5  ;;  %v8781_v59 = vsel %vm609_vm0, %v2669_v2, 0.0  ;;  %v1171_v22 = vmin.f32 %v1159_v49, 1.0  ;;  %v2671_v11 = vmul.f32 %v2611_v54, %v11559_v17  ;;  %v1144_v54 = vld [vmem:[%s11347_s2] sm:$0xff] }
 0x226   :  { %v8789_v14 = vsel %vm609_vm0, %v2621_v29, 0.0  ;;  %v8792_v23 = vsel %vm609_vm0, %v2624_v24, 0.0  ;;  %v2599_v6 = vadd.f32 %v8460_v25, %v11554_v0  ;;  %v2626_v46 = vmul.f32 %v2614_v41, %v8337_v5 }
 0x227   :  { %v2616_v1 = vmax.f32 %v2594_v28, 0.0  ;;  %v8798_v2 = vsel %vm609_vm0, %v2672_v15, 0.0  ;;  %v2674_v49 = vmul.f32 %v2614_v41, %v11559_v17  ;;  %v2625_v29 = vmul.f32 %v2613_v31, %v8337_v5  ;;  %v11600_v28 = vld [vmem:[#allocation2_spill] sm:$0xff] }
 0x228   :  { %1842 = vadd.xlane.f32.xlu0 %v8535_v58  ;;  %1059 = vadd.xlane.f32.xlu1 %v8514_v52  ;;  %v2604_v58 = vadd.f32 %v8452_v32, %v11554_v0  ;;  %v8785_v52 = vpop.permute.xlu0 %2197  ;;  %11599 = vst [vmem:[#allocation99_spill] sm:$0xff] %v8798_v2  ;;  %v2615_v32 = vmax.f32 %v2589_v39, 0.0  ;;  %v2673_v0 = vmul.f32 %v2613_v31, %v11559_v17  ;;  %v1183_v25 = vmax.f32 %v1171_v22, 0.001  ;;  %v11653_v2 = vld [vmem:[#allocation57_spill] sm:$0xff] }
 0x229   :  { %11598 = vst [vmem:[#allocation98_spill] sm:$0xff] %v8785_v52  ;;  %v8809_v24 = vsel %vm609_vm0, %v2623_v62, 0.0  ;;  %v3363_v39 = vadd.f32 %v8483_v40, %v11600_v28  ;;  %v1219_v47 = vsub.f32 1.0, %v1171_v22  ;;  %v8813_v52 = vpop.permute.xlu1 %2199  ;;  %v3358_v41 = vadd.f32 %v8490_v3, %v11600_v28 }
 0x22a   :  { %v2618_v15 = vmax.f32 %v2604_v58, 0.0  ;;  %11601 = vst [vmem:[#allocation2_spill] sm:$0xff] %v8813_v52  ;;  %v1156_v27 = vmax.f32 %v1144_v54, 0.0  ;;  %v2628_v57 = vmul.f32 %v2616_v1, %v8337_v5  ;;  %v2676_v62 = vmul.f32 %v2616_v1, %v11559_v17 }
 0x22b   :  { %v6430_v31 = vpop.eup %6429  ;;  %v2627_v58 = vmul.f32 %v2615_v32, %v8337_v5  ;;  %v8824_v40 = vsel %vm609_vm0, %v2626_v46, 0.0  ;;  %v8831_v3 = vsel %vm609_vm0, %v2625_v29, 0.0  ;;  %6433 = vlog2.f32 %v1183_v25 }
 0x22c   :  { %1851 = vadd.xlane.f32.xlu0 %v8553_v16  ;;  %1111 = vadd.xlane.f32.xlu1 %v8517_v45  ;;  %v8816_v16 = vsel %vm609_vm0, %v2671_v11, 0.0  ;;  %v2617_v45 = vmax.f32 %v2599_v6, 0.0  ;;  %11603 = vst [vmem:[#allocation101_spill] sm:$0xff] %v8824_v40  ;;  %v6432_v22 = vpop.eup %6431  ;;  %v8826_v52 = vpop.permute.xlu0 %2969  ;;  %11605 = vst [vmem:[#allocation103_spill] sm:$0xff] %v8831_v3  ;;  %v8834_v11 = vsel %vm609_vm0, %v2673_v0, 0.0  ;;  %v8837_v6 = vsel %vm609_vm0, %v2674_v49, 0.0 }
 0x22d   :  { %11602 = vst [vmem:[#allocation100_spill] sm:$0xff] %v8816_v16  ;;  %11604 = vst [vmem:[#allocation102_spill] sm:$0xff] %v8826_v52  ;;  %v2675_v46 = vmul.f32 %v2615_v32, %v11559_v17  ;;  %v2630_v1 = vmul.f32 %v2618_v15, %v8337_v5  ;;  %v3417_v54 = vmax.f32 %v3363_v39, 0.0  ;;  %v1231_v52 = vmax.f32 %v1219_v47, 0.001  ;;  %v8856_v47 = vpop.permute.xlu1 %2967  ;;  %v11650_v3 = vld [vmem:[#allocation49_spill] sm:$0xff] }
 0x22e   :  { %11606 = vst [vmem:[#allocation104_spill] sm:$0xff] %v8834_v11  ;;  %11607 = vst [vmem:[#allocation105_spill] sm:$0xff] %v8837_v6  ;;  %v3416_v10 = vmax.f32 %v3358_v41, 0.0  ;;  %v8844_v29 = vmin.f32 %v1156_v27, 1.0  ;;  %v2677_v0 = vmul.f32 %v2617_v45, %v11559_v17  ;;  %v8848_v49 = vsel %vm609_vm0, %v2627_v58, 0.0  ;;  %v11638_v6 = vld [vmem:[#allocation44_spill] sm:$0xff] }
 0x22f   :  { %11608 = vst [vmem:[#allocation106_spill] sm:$0xff] %v8848_v49  ;;  %v8851_v25 = vsel %vm609_vm0, %v2628_v57, 0.0  ;;  %v8854_v32 = vsel %vm609_vm0, %v2676_v62, 0.0  ;;  %11611 = vst [vmem:[#allocation109_spill] sm:$0xff] %v8856_v47  ;;  %v3373_v27 = vadd.f32 %v8520_v35, %v11600_v28  ;;  %v8863_v39 = vmul.f32 0.6931472, %v6430_v31 }
 0x230   :  { %1899 = vadd.xlane.f32.xlu0 %v8564_v50  ;;  %1845 = vadd.xlane.f32.xlu1 %v8538_v19  ;;  %v2629_v50 = vmul.f32 %v2617_v45, %v8337_v5  ;;  %v3368_v19 = vadd.f32 %v8531_v12, %v11600_v28  ;;  %11609 = vst [vmem:[#allocation107_spill] sm:$0xff] %v8851_v25  ;;  %11610 = vst [vmem:[#allocation108_spill] sm:$0xff] %v8854_v32  ;;  %v8865_v45 = vmul.f32 0.6931472, %v6432_v22  ;;  %v11615_v62 = vld [vmem:[#allocation3_spill] sm:$0xff]  ;;  %v11618_v22 = vld [vmem:[#allocation4_spill] sm:$0xff] }
 0x231   :  { %v2678_v12 = vmul.f32 %v2618_v15, %v11559_v17  ;;  %11612 = vst [vmem:[#allocation110_spill] sm:$0xff] %v8863_v39  ;;  %v8868_v41 = vsel %vm609_vm0, %v2675_v46, 0.0  ;;  %v3433_v58 = vmul.f32 %v11615_v62, %v3417_v54  ;;  %v3378_v35 = vadd.f32 %v8571_v30, %v11600_v28  ;;  %v11619_v46 = vld [vmem:[#allocation75_spill] sm:$0xff]  ;;  %v11656_v16 = vld [vmem:[#allocation54_spill] sm:$0xff] }
 0x232   :  { %11613 = vst [vmem:[#allocation111_spill] sm:$0xff] %v8865_v45  ;;  %11614 = vst [vmem:[#allocation112_spill] sm:$0xff] %v8868_v41  ;;  %v8876_v17 = vsel %vm609_vm0, %v2629_v50, 0.0  ;;  %v3418_v15 = vmax.f32 %v3368_v19, 0.0  ;;  %v3383_v47 = vadd.f32 %v11619_v46, %v11600_v28  ;;  %v8886_v32 = vsel %vm609_vm0, %v2677_v0, 0.0 }
 0x233   :  { %11617 = vst [vmem:[#allocation114_spill] sm:$0xff] %v8876_v17  ;;  %11620 = vst [vmem:[#allocation75_spill] sm:$0xff] %v8886_v32  ;;  %v8891_v50 = vmul.f32 %v11618_v22, %v3416_v10  ;;  %v3419_v30 = vmax.f32 %v3373_v27, 0.0  ;;  %v8896_v19 = vsel %vm609_vm0, %v2678_v12, 0.0  ;;  %v8899_v46 = vsel %vm609_vm0, %v3433_v58, 0.0 }
 0x234   :  { %1848 = vadd.xlane.f32.xlu0 %v8567_v53  ;;  %v290_v5 = vpop.xlane.xlu0 %289  ;;  %1890 = vadd.xlane.f32.xlu1 %v8541_v51  ;;  %v8872_v53 = vsel %vm609_vm0, %v2630_v1, 0.0  ;;  %v3432_v51 = vmul.f32 %v11615_v62, %v3416_v10  ;;  %v11621_v1 = vld [vmem:[#allocation78_spill] sm:$0xff]  ;;  %11623 = vst [vmem:[#allocation115_spill] sm:$0xff] %v8899_v46  ;;  %v3434_v32 = vmul.f32 %v11615_v62, %v3418_v15  ;;  %v3421_v12 = vmax.f32 %v3383_v47, 0.0 }
 0x235   :  { %v298_v57 = vmul.f32 0.00390625, %v290_v5  ;;  %11616 = vst [vmem:[#allocation113_spill] sm:$0xff] %v8872_v53  ;;  %v8881_v5 = vmul.f32 %v11618_v22, %v3417_v54  ;;  %11622 = vst [vmem:[#allocation78_spill] sm:$0xff] %v8896_v19  ;;  %v3393_v10 = vadd.f32 %v8602_v56, %v11600_v28  ;;  %v8913_v39 = vmul.f32 %v11618_v22, %v3419_v30  ;;  %v11633_v19 = vld [vmem:[#allocation87_spill] sm:$0xff] }
 0x236   :  { %v8905_v27 = vsel %vm609_vm0, %v3432_v51, 0.0  ;;  %v8916_v56 = vmul.f32 %v11618_v22, %v3418_v15 }
 0x237   :  { %v302_v31 = vadd.f32 1e-05, %v298_v57  ;;  %11624 = vst [vmem:[#allocation116_spill] sm:$0xff] %v8905_v27 }
 0x238   :  { %1857 = vadd.xlane.f32.xlu0 %v11621_v1  ;;  %v296_v53 = vpop.xlane.xlu0 %295  ;;  %v287_v41 = vpop.xlane.xlu1 %286  ;;  %1896 = vadd.xlane.f32.xlu1 %v8586_v20  ;;  %v3420_v20 = vmax.f32 %v3378_v35, 0.0  ;;  %v3435_v35 = vmul.f32 %v11615_v62, %v3419_v30  ;;  %v8925_v30 = vmul.f32 %v11615_v62, %v3421_v12 }
 0x239   :  { %6435 = vrsqrt.f32 %v302_v31  ;;  %v300_v57 = vmul.f32 0.00390625, %v296_v53  ;;  %v297_v0 = vmul.f32 0.00390625, %v287_v41  ;;  %v6434_v1 = vpop.eup %6433  ;;  %v3388_v53 = vadd.f32 %v8609_v63, %v11600_v28  ;;  %v11625_v41 = vld [vmem:[#allocation80_spill] sm:$0xff]  ;;  %v11626_v31 = vld [vmem:[#allocation81_spill] sm:$0xff] }
 0x23a   :  { %6437 = vlog2.f32 %v1231_v52  ;;  %v3436_v63 = vmul.f32 %v11615_v62, %v3420_v20 }
 0x23b   :  { %v304_v54 = vadd.f32 1e-05, %v300_v57  ;;  %v301_v45 = vadd.f32 1e-05, %v297_v0  ;;  %v8918_v57 = vmul.f32 0.6931472, %v6434_v1  ;;  %v8933_v1 = vmul.f32 %v11618_v22, %v3420_v20 }
 0x23c   :  { %1905 = vadd.xlane.f32.xlu0 %v11625_v41  ;;  %v549_v58 = vpop.xlane.xlu0 %548  ;;  %1854 = vadd.xlane.f32.xlu1 %v11626_v31  ;;  %v293_v46 = vpop.xlane.xlu1 %292  ;;  %v3423_v0 = vmax.f32 %v3393_v10, 0.0  ;;  %v8922_v41 = vsel %vm609_vm0, %v3434_v32, 0.0  ;;  %v3422_v15 = vmax.f32 %v3388_v53, 0.0  ;;  %v1180_v32 = vmax.f32 %v8844_v29, 0.001 }
 0x23d   :  { %6439 = vrsqrt.f32 %v304_v54  ;;  %v557_v47 = vmul.f32 0.00390625, %v549_v58  ;;  %v299_v51 = vmul.f32 0.00390625, %v293_v46  ;;  %11627 = vst [vmem:[#allocation80_spill] sm:$0xff] %v8922_v41  ;;  %v11628_v54 = vld [vmem:[#allocation82_spill] sm:$0xff]  ;;  %v1216_v10 = vsub.f32 1.0, %v8844_v29 }
 0x23e   :  { %6441 = vrsqrt.f32 %v301_v45  ;;  %v8930_v45 = vmul.f32 %v11618_v22, %v3421_v12  ;;  %v8940_v53 = vmul.f32 %v11615_v62, %v3423_v0  ;;  %v8943_v12 = vsel %vm609_vm0, %v3436_v63, 0.0  ;;  %v11634_v63 = vld [vmem:[#allocation88_spill] sm:$0xff] }
 0x23f   :  { %v561_v31 = vadd.f32 1e-05, %v557_v47  ;;  %v303_v27 = vadd.f32 1e-05, %v299_v51  ;;  %11629 = vst [vmem:[#allocation81_spill] sm:$0xff] %v8943_v12  ;;  %v8946_v20 = vsel %vm609_vm0, %v3435_v35, 0.0  ;;  %v3438_v29 = vmul.f32 %v11615_v62, %v3422_v15 }
 0x240   :  { %1863 = vadd.xlane.f32.xlu0 %v8624_v7  ;;  %v555_v52 = vpop.xlane.xlu0 %554  ;;  %1902 = vadd.xlane.f32.xlu1 %v11628_v54  ;;  %v546_v46 = vpop.xlane.xlu1 %545  ;;  %v3403_v7 = vadd.f32 %v8638_v60, %v11600_v28  ;;  %11630 = vst [vmem:[#allocation82_spill] sm:$0xff] %v8946_v20  ;;  %v11631_v60 = vld [vmem:[#allocation10_spill] sm:$0xff]  ;;  %v8958_v35 = vmul.f32 %v11618_v22, %v3423_v0  ;;  %v1228_v0 = vmax.f32 %v1216_v10, 0.001 }
 0x241   :  { %6443 = vrsqrt.f32 %v561_v31  ;;  %v559_v58 = vmul.f32 0.00390625, %v555_v52  ;;  %v556_v47 = vmul.f32 0.00390625, %v546_v46  ;;  %v8951_v31 = vadd.f32 %v8649_v13, %v11600_v28  ;;  %v11632_v52 = vld [vmem:[#allocation40_spill] sm:$0xff] }
 0x242   :  { %6445 = vrsqrt.f32 %v303_v27  ;;  %v8972_v25 = vsel %vm609_vm0, %v3438_v29, 0.0 }
 0x243   :  { %v6436_v51 = vpop.eup %6435  ;;  %v563_v54 = vadd.f32 1e-05, %v559_v58  ;;  %v560_v41 = vadd.f32 1e-05, %v556_v47  ;;  %6447 = vlog2.f32 %v1180_v32  ;;  %v1149_v58 = vld [vmem:[%s11347_s2 + $0x28] sm:$0xff]  ;;  %v8964_v47 = vmul.f32 %v11618_v22, %v3422_v15  ;;  %11636 = vst [vmem:[#allocation10_spill] sm:$0xff] %v8972_v25 }
 0x244   :  { %v311_v27 = vmul.f32 %v6436_v51, %v11631_v60  ;;  %v312_v46 = vmul.f32 %v6436_v51, %v11632_v52  ;;  %1911 = vadd.xlane.f32.xlu0 %v11633_v19  ;;  %1860 = vadd.xlane.f32.xlu1 %v11634_v63  ;;  %v552_v12 = vpop.xlane.xlu1 %551  ;;  %v3425_v60 = vmax.f32 %v3403_v7, 0.0  ;;  %v8966_v51 = vpop.eup %6437  ;;  %v11635_v19 = vld [vmem:[#allocation32_spill] sm:$0xff]  ;;  %v3424_v17 = vmax.f32 %v8951_v31, 0.0  ;;  %v11637_v15 = vld [vmem:[#allocation19_spill] sm:$0xff] }
 0x245   :  { %6449 = vrsqrt.f32 %v563_v54  ;;  %v558_v13 = vmul.f32 0.00390625, %v552_v12  ;;  %v1161_v12 = vmax.f32 %v1149_v58, 0.0  ;;  %v11649_v25 = vld [vmem:[#allocation48_spill] sm:$0xff] }
 0x246   :  { %v335_v52 = vmul.f32 %v11635_v19, %v311_v27  ;;  %v336_v63 = vmul.f32 %v11635_v19, %v312_v46  ;;  %6451 = vrsqrt.f32 %v560_v41  ;;  %v11639_v27 = vld [vmem:[#allocation45_spill] sm:$0xff]  ;;  %v11640_v41 = vld [vmem:[#allocation42_spill] sm:$0xff]  ;;  %v11641_v46 = vld [vmem:[#allocation43_spill] sm:$0xff]  ;;  %v8983_v29 = vmul.f32 %v11615_v62, %v3425_v60 }
 0x247   :  { %v6440_v20 = vpop.eup %6439  ;;  %v562_v32 = vadd.f32 1e-05, %v558_v13  ;;  %v8994_v31 = vmul.f32 %v11618_v22, %v3425_v60  ;;  %v11646_v60 = vld [vmem:[#allocation50_spill] sm:$0xff] }
 0x248   :  { %v6442_v54 = vpop.eup %6441  ;;  %v359_v49 = vadd.f32 %v11637_v15, %v335_v52  ;;  %v360_v7 = vadd.f32 %v11637_v15, %v336_v63  ;;  %v315_v11 = vmul.f32 %v6440_v20, %v11638_v6  ;;  %v316_v40 = vmul.f32 %v6440_v20, %v11639_v27  ;;  %1869 = vadd.xlane.f32.xlu0 %v8669_v8  ;;  %v11642_v6 = vld [vmem:[#allocation6_spill] sm:$0xff]  ;;  %v11644_v52 = vld [vmem:[#allocation5_spill] sm:$0xff] }
 0x249   :  { %v309_v10 = vmul.f32 %v6442_v54, %v11640_v41  ;;  %v310_v13 = vmul.f32 %v6442_v54, %v11641_v46  ;;  %6453 = vrsqrt.f32 %v562_v32  ;;  %1908 = vadd.xlane.f32.xlu1 %v8654_v38  ;;  %11643 = vst [vmem:[#allocation40_spill] sm:$0xff] %v8994_v31  ;;  %v8998_v38 = vadd.f32 %v8674_v48, %v11600_v28  ;;  %v11647_v41 = vld [vmem:[#allocation51_spill] sm:$0xff]  ;;  %v1146_v48 = vld [vmem:[%s11347_s2 + $0x10] sm:$0xff] }
 0x24a   :  { %367 = vst [vmem:[%s11348_s6 + $0x10] sm:$0xff] %v359_v49  ;;  %368 = vst [vmem:[%s11348_s6 + $0x18] sm:$0xff] %v360_v7  ;;  %v339_v8 = vmul.f32 %v11642_v6, %v315_v11  ;;  %v340_v20 = vmul.f32 %v11642_v6, %v316_v40  ;;  %v9003_v32 = vmul.f32 %v11615_v62, %v3424_v17  ;;  %6455 = vlog2.f32 %v1228_v0  ;;  %v11645_v11 = vld [vmem:[#allocation28_spill] sm:$0xff] }
 0x24b   :  { %v6444_v58 = vpop.eup %6443  ;;  %v333_v63 = vmul.f32 %v11644_v52, %v309_v10  ;;  %v334_v49 = vmul.f32 %v11644_v52, %v310_v13  ;;  %v1151_v10 = vld [vmem:[%s11347_s2 + $0x38] sm:$0xff]  ;;  %v11648_v0 = vld [vmem:[#allocation16_spill] sm:$0xff] }
 0x24c   :  { %v6446_v54 = vpop.eup %6445  ;;  %v363_v7 = vadd.f32 %v11645_v11, %v339_v8  ;;  %v364_v40 = vadd.f32 %v11645_v11, %v340_v20  ;;  %v570_v27 = vmul.f32 %v6444_v58, %v11646_v60  ;;  %v571_v46 = vmul.f32 %v6444_v58, %v11647_v41  ;;  %1917 = vadd.xlane.f32.xlu0 %v8672_v37  ;;  %v11652_v41 = vld [vmem:[#allocation56_spill] sm:$0xff] }
 0x24d   :  { %v357_v13 = vadd.f32 %v11648_v0, %v333_v63  ;;  %v358_v8 = vadd.f32 %v11648_v0, %v334_v49  ;;  %v313_v20 = vmul.f32 %v6446_v54, %v11649_v25  ;;  %v314_v60 = vmul.f32 %v6446_v54, %v11650_v3  ;;  %1866 = vadd.xlane.f32.xlu1 %v8682_v4  ;;  %v9021_v58 = vpop.eup %6447  ;;  %v11651_v49 = vld [vmem:[#allocation8_spill] sm:$0xff] }
 0x24e   :  { %371 = vst [vmem:[%s11348_s6 + $0x30] sm:$0xff] %v363_v7  ;;  %372 = vst [vmem:[%s11348_s6 + $0x38] sm:$0xff] %v364_v40  ;;  %v578_v37 = vmul.f32 %v570_v27, %v11635_v19  ;;  %v579_v63 = vmul.f32 %v571_v46, %v11635_v19  ;;  %v9032_v25 = vmul.f32 %v11618_v22, %v3424_v17  ;;  %v9034_v3 = vmin.f32 %v1161_v12, 1.0 }
 0x24f   :  { %v6450_v4 = vpop.eup %6449  ;;  %365 = vst [vmem:[%s11348_s6] sm:$0xff] %v357_v13  ;;  %366 = vst [vmem:[%s11348_s6 + $0x8] sm:$0xff] %v358_v8  ;;  %v337_v54 = vmul.f32 %v11651_v49, %v313_v20  ;;  %v338_v7 = vmul.f32 %v11651_v49, %v314_v60  ;;  %v1158_v40 = vmax.f32 %v1146_v48, 0.0  ;;  %v1163_v19 = vmax.f32 %v1151_v10, 0.0  ;;  %v1148_v13 = vld [vmem:[%s11347_s2 + $0x20] sm:$0xff]  ;;  %v11654_v8 = vld [vmem:[#allocation25_spill] sm:$0xff] }
 0x250   :  { %v6452_v27 = vpop.eup %6451  ;;  %v586_v17 = vadd.f32 %v578_v37, %v11637_v15  ;;  %v587_v12 = vadd.f32 %v579_v63, %v11637_v15  ;;  %v574_v46 = vmul.f32 %v6450_v4, %v11652_v41  ;;  %v575_v31 = vmul.f32 %v6450_v4, %v11653_v2  ;;  %1875 = vadd.xlane.f32.xlu0 %v8707_v44  ;;  %v11655_v10 = vld [vmem:[#allocation53_spill] sm:$0xff] }
 0x251   :  { %v361_v20 = vadd.f32 %v11654_v8, %v337_v54  ;;  %v362_v48 = vadd.f32 %v11654_v8, %v338_v7  ;;  %v568_v60 = vmul.f32 %v6452_v27, %v11655_v10  ;;  %v569_v37 = vmul.f32 %v6452_v27, %v11656_v16  ;;  %1914 = vadd.xlane.f32.xlu1 %v8691_v43  ;;  %v1153_v43 = vld [vmem:[%s11347_s2 + $0x48] sm:$0xff]  ;;  %v11657_v27 = vld [vmem:[#allocation60_spill] sm:$0xff] }
 0x252   :  { %5465 = vst [vmem:[%s11348_s6 + $0x50] sm:$0xff] %v586_v17  ;;  %5466 = vst [vmem:[%s11348_s6 + $0x58] sm:$0xff] %v587_v12  ;;  %v582_v44 = vmul.f32 %v574_v46, %v11642_v6  ;;  %v583_v2 = vmul.f32 %v575_v31, %v11642_v6  ;;  %v9067_v15 = vadd.f32 %v8688_v55, %v11600_v28  ;;  %v1221_v16 = vsub.f32 1.0, %v9034_v3  ;;  %v11658_v12 = vld [vmem:[#allocation11_spill] sm:$0xff]  ;;  %v1150_v46 = vld [vmem:[%s11347_s2 + $0x30] sm:$0xff] }
 0x253   :  { %v6454_v63 = vpop.eup %6453  ;;  %369 = vst [vmem:[%s11348_s6 + $0x20] sm:$0xff] %v361_v20  ;;  %370 = vst [vmem:[%s11348_s6 + $0x28] sm:$0xff] %v362_v48  ;;  %v576_v6 = vmul.f32 %v568_v60, %v11644_v52  ;;  %v577_v55 = vmul.f32 %v569_v37, %v11644_v52  ;;  %v1170_v31 = vmin.f32 %v1158_v40, 1.0  ;;  %v1160_v4 = vmax.f32 %v1148_v13, 0.0 }
 0x254   :  { %v590_v54 = vadd.f32 %v582_v44, %v11645_v11  ;;  %v591_v7 = vadd.f32 %v583_v2, %v11645_v11  ;;  %v572_v17 = vmul.f32 %v6454_v63, %v11657_v27  ;;  %v573_v41 = vmul.f32 %v6454_v63, %v11658_v12  ;;  %1923 = vadd.xlane.f32.xlu0 %v8717_v18  ;;  %v9089_v20 = vpop.eup %6455 }
 0x255   :  { %v584_v52 = vadd.f32 %v576_v6, %v11648_v0  ;;  %v585_v40 = vadd.f32 %v577_v55, %v11648_v0  ;;  %1872 = vadd.xlane.f32.xlu1 %v8728_v9  ;;  %v1175_v13 = vmin.f32 %v1163_v19, 1.0  ;;  %v1165_v11 = vmax.f32 %v1153_v43, 0.0  ;;  %v1155_v9 = vld [vmem:[%s11347_s2 + $0x58] sm:$0xff] }
 0x256   :  { %5469 = vst [vmem:[%s11348_s6 + $0x70] sm:$0xff] %v590_v54  ;;  %5470 = vst [vmem:[%s11348_s6 + $0x78] sm:$0xff] %v591_v7  ;;  %v580_v18 = vmul.f32 %v572_v17, %v11651_v49  ;;  %v581_v48 = vmul.f32 %v573_v41, %v11651_v49  ;;  %v9103_v10 = vmul.f32 0.6931472, %v8966_v51  ;;  %v3427_v0 = vmax.f32 %v8998_v38, 0.0  ;;  %v1154_v7 = vld [vmem:[%s11347_s2 + $0x50] sm:$0xff] }
 0x257   :  { %5463 = vst [vmem:[%s11348_s6 + $0x40] sm:$0xff] %v584_v52  ;;  %5464 = vst [vmem:[%s11348_s6 + $0x48] sm:$0xff] %v585_v40  ;;  %v3426_v19 = vmax.f32 %v9067_v15, 0.0  ;;  %v9118_v51 = vsel %vm609_vm0, %v9003_v32, 0.0  ;;  %v1172_v49 = vmin.f32 %v1160_v4, 1.0  ;;  %v1162_v38 = vmax.f32 %v1150_v46, 0.0 }
 0x258   :  { %v588_v60 = vadd.f32 %v580_v18, %v11654_v8  ;;  %v589_v37 = vadd.f32 %v581_v48, %v11654_v8  ;;  %2683 = vadd.xlane.f32.xlu0 %v8735_v42  ;;  %v1185_v44 = vmax.f32 %v9034_v3, 0.001  ;;  %v1218_v2 = vsub.f32 1.0, %v1170_v31  ;;  %v1152_v32 = vld [vmem:[%s11347_s2 + $0x40] sm:$0xff]  ;;  %v1952_v46 = vld [vmem:[%s11347_s2 + $0x78] sm:$0xff] }
 0x259   :  { %1920 = vadd.xlane.f32.xlu1 %v8738_v61  ;;  %v1233_v43 = vmax.f32 %v1221_v16, 0.001  ;;  %v1223_v63 = vsub.f32 1.0, %v1175_v13  ;;  %v1177_v15 = vmin.f32 %v1165_v11, 1.0  ;;  %v1167_v6 = vmax.f32 %v1155_v9, 0.0 }
 0x25a   :  { %5467 = vst [vmem:[%s11348_s6 + $0x60] sm:$0xff] %v588_v60  ;;  %5468 = vst [vmem:[%s11348_s6 + $0x68] sm:$0xff] %v589_v37  ;;  %v3443_v61 = vmul.f32 %v11615_v62, %v3427_v0  ;;  %v9139_v3 = vsel %vm609_vm0, %v8925_v30, 0.0  ;;  %v1182_v8 = vmax.f32 %v1170_v31, 0.001  ;;  %v9142_v16 = vmul.f32 %v11618_v22, %v3427_v0 }
 0x25b   :  { %v1187_v55 = vmax.f32 %v1175_v13, 0.001  ;;  %v1220_v4 = vsub.f32 1.0, %v1172_v49  ;;  %v1174_v54 = vmin.f32 %v1162_v38, 1.0  ;;  %v3442_v27 = vmul.f32 %v11615_v62, %v3426_v19 }
 0x25c   :  { %2632 = vadd.xlane.f32.xlu0 %v8758_v33  ;;  %6457 = vlog2.f32 %v1185_v44  ;;  %v1230_v17 = vmax.f32 %v1218_v2, 0.001  ;;  %v1164_v12 = vmax.f32 %v1152_v32, 0.0  ;;  %v1235_v30 = vmax.f32 %v1223_v63, 0.001 }
 0x25d   :  { %2635 = vadd.xlane.f32.xlu1 %v8750_v26  ;;  %6459 = vlog2.f32 %v1233_v43  ;;  %v1225_v31 = vsub.f32 1.0, %v1177_v15  ;;  %v1179_v41 = vmin.f32 %v1167_v6, 1.0  ;;  %v9154_v52 = vmul.f32 %v11618_v22, %v3426_v19 }
 0x25e   :  { %6461 = vlog2.f32 %v1182_v8  ;;  %v1184_v33 = vmax.f32 %v1172_v49, 0.001  ;;  %v1166_v40 = vmax.f32 %v1154_v7, 0.0  ;;  %v9158_v13 = vsel %vm609_vm0, %v8940_v53, 0.0 }
 0x25f   :  { %6463 = vlog2.f32 %v1187_v55  ;;  %v1232_v26 = vmax.f32 %v1220_v4, 0.001  ;;  %v1222_v11 = vsub.f32 1.0, %v1174_v54  ;;  %v1189_v18 = vmax.f32 %v1177_v15, 0.001 }
 0x260   :  { %2641 = vadd.xlane.f32.xlu0 %v8771_v21  ;;  %6465 = vlog2.f32 %v1230_v17  ;;  %v1176_v48 = vmin.f32 %v1164_v12, 1.0  ;;  %v1964_v0 = vmax.f32 %v1952_v46, 0.0  ;;  %v9164_v9 = vsel %vm609_vm0, %v8891_v50, 0.0  ;;  %v1950_v50 = vld [vmem:[%s11347_s2 + $0x68] sm:$0xff]  ;;  %v9218_v12 = vpop.permute.xlu0 %2975 }
 0x261   :  { %2680 = vadd.xlane.f32.xlu1 %v8774_v36  ;;  %6467 = vlog2.f32 %v1235_v30  ;;  %v1237_v19 = vmax.f32 %v1225_v31, 0.001  ;;  %v1227_v49 = vsub.f32 1.0, %v1179_v41  ;;  %v9167_v53 = vsel %vm609_vm0, %v3442_v27, 0.0  ;;  %11659 = vst [vmem:[#allocation87_spill] sm:$0xff] %v9218_v12 }
 0x262   :  { %6469 = vlog2.f32 %v1184_v33  ;;  %v1186_v38 = vmax.f32 %v1174_v54, 0.001  ;;  %v1178_v60 = vmin.f32 %v1166_v40, 1.0  ;;  %v9170_v21 = vmul.f32 0.6931472, %v9021_v58  ;;  %v9228_v33 = vpop.permute.xlu1 %2971 }
 0x263   :  { %v9174_v37 = vsel %vm609_vm0, %v8983_v29, 0.0  ;;  %6471 = vlog2.f32 %v1232_v26  ;;  %v1234_v36 = vmax.f32 %v1222_v11, 0.001  ;;  %v1191_v44 = vmax.f32 %v1179_v41, 0.001  ;;  %11660 = vst [vmem:[#allocation88_spill] sm:$0xff] %v9228_v33 }
 0x264   :  { %2689 = vadd.xlane.f32.xlu0 %v8777_v34  ;;  %6473 = vlog2.f32 %v1189_v18  ;;  %v1224_v2 = vsub.f32 1.0, %v1176_v48  ;;  %v9180_v43 = vmin.f32 %v1964_v0, 1.0  ;;  %v9185_v58 = vsel %vm609_vm0, %v8916_v56, 0.0 }
 0x265   :  { %2686 = vadd.xlane.f32.xlu1 %v8781_v59  ;;  %v9188_v29 = vsel %vm609_vm0, %v3443_v61, 0.0  ;;  %6475 = vlog2.f32 %v1237_v19  ;;  %v1239_v63 = vmax.f32 %v1227_v49, 0.001  ;;  %v9192_v34 = vsel %vm609_vm0, %v8933_v1, 0.0  ;;  %v1949_v59 = vld [vmem:[%s11347_s2 + $0x60] sm:$0xff]  ;;  %v11664_v49 = vld [vmem:[#allocation40_spill] sm:$0xff] }
 0x266   :  { %v6458_v15 = vpop.eup %6457  ;;  %6477 = vlog2.f32 %v1186_v38  ;;  %v1226_v6 = vsub.f32 1.0, %v1178_v60  ;;  %v1962_v32 = vmax.f32 %v1950_v50, 0.0  ;;  %v9198_v56 = vmul.f32 0.6931472, %v9089_v20  ;;  %v1951_v20 = vld [vmem:[%s11347_s2 + $0x70] sm:$0xff] }
 0x267   :  { %v6460_v8 = vpop.eup %6459  ;;  %v9202_v61 = vsel %vm609_vm0, %v8881_v5, 0.0  ;;  %6479 = vlog2.f32 %v1234_v36  ;;  %v1188_v55 = vmax.f32 %v1176_v48, 0.001  ;;  %v9207_v1 = vsel %vm609_vm0, %v8964_v47, 0.0 }
 0x268   :  { %v6462_v4 = vpop.eup %6461  ;;  %2638 = vadd.xlane.f32.xlu0 %v8789_v14  ;;  %6481 = vlog2.f32 %v1191_v44  ;;  %v1236_v54 = vmax.f32 %v1224_v2, 0.001  ;;  %v2024_v7 = vsub.f32 1.0, %v9180_v43  ;;  %v9216_v5 = vsel %vm609_vm0, %v8913_v39, 0.0 }
 0x269   :  { %v6464_v27 = vpop.eup %6463  ;;  %2644 = vadd.xlane.f32.xlu1 %v8809_v24  ;;  %6483 = vlog2.f32 %v1239_v63  ;;  %v1190_v14 = vmax.f32 %v1178_v60, 0.001  ;;  %v1961_v17 = vmax.f32 %v1949_v59, 0.0  ;;  %v9220_v30 = vmul.f32 0.6931472, %v6458_v15 }
 0x26a   :  { %v6466_v47 = vpop.eup %6465  ;;  %v9224_v31 = vsel %vm609_vm0, %v9032_v25, 0.0  ;;  %v1238_v41 = vmax.f32 %v1226_v6, 0.001  ;;  %v9226_v46 = vmin.f32 %v1962_v32, 1.0  ;;  %v9232_v39 = vsel %vm609_vm0, %v8930_v45, 0.0  ;;  %v11663_v45 = vld [vmem:[#allocation100_spill] sm:$0xff]  ;;  %v9269_v6 = vpop.permute.xlu0 %2979 }
 0x26b   :  { %v6468_v24 = vpop.eup %6467  ;;  %6485 = vlog2.f32 %v1188_v55  ;;  %v1988_v40 = vmax.f32 %v9180_v43, 0.001  ;;  %v1963_v26 = vmax.f32 %v1951_v20, 0.0  ;;  %v9238_v25 = vsel %vm609_vm0, %v9154_v52, 0.0  ;;  %v1954_v52 = vld [vmem:[%s11347_s2 + $0x88] sm:$0xff]  ;;  %11667 = vst [vmem:[#allocation42_spill] sm:$0xff] %v9269_v6 }
 0x26c   :  { %v6470_v11 = vpop.eup %6469  ;;  %2647 = vadd.xlane.f32.xlu0 %v8792_v23  ;;  %11661 = vst [vmem:[#allocation32_spill] sm:$0xff] %v9238_v25  ;;  %6487 = vlog2.f32 %v1236_v54  ;;  %v9242_v18 = vsel %vm609_vm0, %v8958_v35, 0.0  ;;  %v2036_v48 = vmax.f32 %v2024_v7, 0.001  ;;  %v9245_v19 = vmul.f32 0.6931472, %v6460_v8  ;;  %v9279_v54 = vpop.permute.xlu1 %2973 }
 0x26d   :  { %11662 = vst [vmem:[#allocation19_spill] sm:$0xff] %v9242_v18  ;;  %v6472_v0 = vpop.eup %6471  ;;  %2692 = vadd.xlane.f32.xlu1 %v11663_v45  ;;  %v9249_v38 = vsel %vm609_vm0, %v11664_v49, 0.0  ;;  %6489 = vlog2.f32 %v1190_v14  ;;  %v9251_v23 = vmin.f32 %v1961_v17, 1.0  ;;  %v9256_v35 = vmul.f32 0.6931472, %v6462_v4  ;;  %v11668_v32 = vld [vmem:[#allocation99_spill] sm:$0xff] }
 0x26e   :  { %11665 = vst [vmem:[#allocation44_spill] sm:$0xff] %v9249_v38  ;;  %v6474_v60 = vpop.eup %6473  ;;  %6491 = vlog2.f32 %v1238_v41  ;;  %v9260_v36 = vsel %vm609_vm0, %v9142_v16, 0.0  ;;  %v2022_v50 = vsub.f32 1.0, %v9226_v46  ;;  %v9263_v2 = vmul.f32 0.6931472, %v6466_v47  ;;  %v1953_v55 = vld [vmem:[%s11347_s2 + $0x80] sm:$0xff]  ;;  %v9319_v42 = vpop.permute.xlu0 %2983 }
 0x26f   :  { %11666 = vst [vmem:[#allocation45_spill] sm:$0xff] %v9260_v36  ;;  %v6476_v44 = vpop.eup %6475  ;;  %v9265_v43 = vmul.f32 0.6931472, %v6464_v27  ;;  %6493 = vlog2.f32 %v1988_v40  ;;  %v9267_v63 = vmin.f32 %v1963_v26, 1.0  ;;  %v9272_v59 = vmul.f32 0.6931472, %v6468_v24 }
 0x270   :  { %v6478_v15 = vpop.eup %6477  ;;  %2695 = vadd.xlane.f32.xlu0 %v11668_v32  ;;  %v9274_v8 = vmul.f32 0.6931472, %v6470_v11  ;;  %6495 = vlog2.f32 %v2036_v48  ;;  %v1966_v16 = vmax.f32 %v1954_v52, 0.0  ;;  %11669 = vst [vmem:[#allocation43_spill] sm:$0xff] %v9279_v54  ;;  %v11670_v7 = vld [vmem:[#allocation103_spill] sm:$0xff]  ;;  %v2021_v17 = vsub.f32 1.0, %v9251_v23 }
 0x271   :  { %v6480_v4 = vpop.eup %6479  ;;  %2650 = vadd.xlane.f32.xlu1 %v11670_v7  ;;  %v9284_v27 = vmul.f32 0.6931472, %v6472_v0  ;;  %v1986_v14 = vmax.f32 %v9226_v46, 0.001  ;;  %v1956_v47 = vld [vmem:[%s11347_s2 + $0x98] sm:$0xff]  ;;  %v2023_v45 = vsub.f32 1.0, %v9267_v63 }
 0x272   :  { %v6482_v41 = vpop.eup %6481  ;;  %v9293_v40 = vmul.f32 0.6931472, %v6474_v60  ;;  %v9295_v26 = vmul.f32 0.6931472, %v6476_v44  ;;  %v2034_v11 = vmax.f32 %v2022_v50, 0.001 }
 0x273   :  { %v6484_v48 = vpop.eup %6483  ;;  %v9299_v46 = vmul.f32 0.6931472, %v6478_v15  ;;  %v1965_v49 = vmax.f32 %v1953_v55, 0.0  ;;  %v1955_v52 = vld [vmem:[%s11347_s2 + $0x90] sm:$0xff]  ;;  %v11671_v32 = vld [vmem:[#allocation101_spill] sm:$0xff]  ;;  %v9309_v50 = vmin.f32 %v1966_v16, 1.0  ;;  %6497 = vlog2.f32 %v1986_v14 }
 0x274   :  { %2653 = vadd.xlane.f32.xlu0 %v11671_v32  ;;  %v9306_v60 = vmul.f32 0.6931472, %v6480_v4  ;;  %v1985_v44 = vmax.f32 %v9251_v23, 0.001  ;;  %v1968_v7 = vmax.f32 %v1956_v47, 0.0  ;;  %v11672_v0 = vld [vmem:[#allocation104_spill] sm:$0xff]  ;;  %6499 = vlog2.f32 %v2034_v11 }
 0x275   :  { %v6486_v24 = vpop.eup %6485  ;;  %2698 = vadd.xlane.f32.xlu1 %v11672_v0  ;;  %v9314_v55 = vmul.f32 0.6931472, %v6482_v41  ;;  %v2033_v20 = vmax.f32 %v2021_v17, 0.001  ;;  %v1958_v4 = vld [vmem:[%s11347_s2 + $0xa8] sm:$0xff]  ;;  %11674 = vst [vmem:[#allocation5_spill] sm:$0xff] %v9319_v42  ;;  %v9326_v41 = vpop.permute.xlu1 %2977 }
 0x276   :  { %v6488_v32 = vpop.eup %6487  ;;  %v9321_v23 = vmul.f32 0.6931472, %v6484_v48  ;;  %v1987_v16 = vmax.f32 %v9267_v63, 0.001  ;;  %v1967_v47 = vmax.f32 %v1955_v52, 0.0  ;;  %v9324_v0 = vpop.f32.mrb[48].mxu1  ;;  %6501 = vlog2.f32 %v1985_v44 }
 0x277   :  { %11673 = vst [vmem:[#allocation6_spill] sm:$0xff] %v9314_v55  ;;  %11676 = vst [vmem:[#allocation50_spill] sm:$0xff] %v9324_v0  ;;  %v6490_v15 = vpop.eup %6489  ;;  %v2035_v6 = vmax.f32 %v2023_v45, 0.001  ;;  %v1977_v12 = vmin.f32 %v1965_v49, 1.0  ;;  %v1957_v11 = vld [vmem:[%s11347_s2 + $0xa0] sm:$0xff]  ;;  %6503 = vlog2.f32 %v2033_v20 }
 0x278   :  { %11675 = vst [vmem:[#allocation28_spill] sm:$0xff] %v9321_v23  ;;  %11677 = vst [vmem:[#allocation51_spill] sm:$0xff] %v9326_v41  ;;  %v9335_v48 = vpop.f32.mrb[49].mxu1  ;;  %v6492_v63 = vpop.eup %6491  ;;  %v11678_v52 = vld [vmem:[#allocation105_spill] sm:$0xff]  ;;  %v2026_v42 = vsub.f32 1.0, %v9309_v50  ;;  %v1980_v41 = vmin.f32 %v1968_v7, 1.0  ;;  %6505 = vlog2.f32 %v1987_v16 }
 0x279   :  { %2701 = vadd.xlane.f32.xlu0 %v11678_v52  ;;  %v1970_v33 = vmax.f32 %v1958_v4, 0.0  ;;  %v6494_v14 = vpop.eup %6493  ;;  %v11679_v54 = vld [vmem:[#allocation106_spill] sm:$0xff]  ;;  %v9342_v49 = vmul.f32 0.6931472, %v6486_v24  ;;  %v9344_v17 = vmul.f32 0.6931472, %v6488_v32  ;;  %6507 = vlog2.f32 %v2035_v6 }
 0x27a   :  { %2656 = vadd.xlane.f32.xlu1 %v11679_v54  ;;  %v1960_v52 = vld [vmem:[%s11347_s2 + $0xb8] sm:$0xff]  ;;  %v6496_v44 = vpop.eup %6495  ;;  %v9349_v36 = vmul.f32 0.6931472, %v6490_v15  ;;  %v9351_v7 = vmin.f32 %v1967_v47, 1.0  ;;  %v1969_v4 = vmax.f32 %v1957_v11, 0.0  ;;  %v2025_v45 = vsub.f32 1.0, %v1977_v12  ;;  %v9364_v47 = vpop.permute.xlu0 %2987 }
 0x27b   :  { %11680 = vst [vmem:[#allocation16_spill] sm:$0xff] %v9342_v49  ;;  %11681 = vst [vmem:[#allocation48_spill] sm:$0xff] %v9344_v17  ;;  %v9353_v54 = vmul.f32 0.6931472, %v6492_v63  ;;  %v1990_v24 = vmax.f32 %v9309_v50, 0.001  ;;  %v9366_v11 = vpop.permute.xlu1 %2981 }
 0x27c   :  { %11682 = vst [vmem:[#allocation49_spill] sm:$0xff] %v9349_v36  ;;  %v9356_v32 = vpop.f32.mrb[50].mxu1  ;;  %v11685_v20 = vld [vmem:[#allocation107_spill] sm:$0xff]  ;;  %v2038_v22 = vmax.f32 %v2026_v42, 0.001  ;;  %v2028_v38 = vsub.f32 1.0, %v1980_v41 }
 0x27d   :  { %11683 = vst [vmem:[#allocation8_spill] sm:$0xff] %v9353_v54  ;;  %11684 = vst [vmem:[#allocation56_spill] sm:$0xff] %v9356_v32  ;;  %2659 = vadd.xlane.f32.xlu0 %v11685_v20  ;;  %v9359_v18 = vmin.f32 %v1970_v33, 1.0  ;;  %v1972_v15 = vmax.f32 %v1960_v52, 0.0  ;;  %v1959_v16 = vld [vmem:[%s11347_s2 + $0xb0] sm:$0xff]  ;;  %v2027_v62 = vsub.f32 1.0, %v9351_v7  ;;  %v6498_v50 = vpop.eup %6497  ;;  %6509 = vlog2.f32 %v1990_v24 }
 0x27e   :  { %11686 = vst [vmem:[#allocation57_spill] sm:$0xff] %v9364_v47  ;;  %11687 = vst [vmem:[#allocation25_spill] sm:$0xff] %v9366_v11  ;;  %v11688_v6 = vld [vmem:[#allocation112_spill] sm:$0xff]  ;;  %v9371_v63 = vmul.f32 0.6931472, %v6494_v14  ;;  %v9378_v25 = vmin.f32 %v1969_v4, 1.0  ;;  %6511 = vlog2.f32 %v2038_v22 }
 0x27f   :  { %2704 = vadd.xlane.f32.xlu1 %v11688_v6  ;;  %v9373_v42 = vmul.f32 0.6931472, %v6496_v44  ;;  %v1989_v33 = vmax.f32 %v1977_v12, 0.001  ;;  %v1992_v20 = vmax.f32 %v1980_v41, 0.001  ;;  %v6500_v41 = vpop.eup %6499  ;;  %v9405_v36 = vpop.permute.xlu1 %2985 }
 0x280   :  { %11689 = vst [vmem:[#allocation53_spill] sm:$0xff] %v9371_v63  ;;  %v2740_v6 = vld [vmem:[%s11347_s2 + $0xc8] sm:$0xff]  ;;  %v9383_v47 = vpop.f32.mrb[51].mxu1  ;;  %v2037_v12 = vmax.f32 %v2025_v45, 0.001  ;;  %v1971_v44 = vmax.f32 %v1959_v16, 0.0  ;;  %v6502_v22 = vpop.eup %6501 }
 0x281   :  { %11690 = vst [vmem:[#allocation54_spill] sm:$0xff] %v9373_v42  ;;  %11691 = vst [vmem:[#allocation60_spill] sm:$0xff] %v9383_v47  ;;  %v9387_v11 = vpop.f32.mrb[52].mxu1  ;;  %v11693_v52 = vld [vmem:[#allocation108_spill] sm:$0xff]  ;;  %v2040_v4 = vmax.f32 %v2028_v38, 0.001  ;;  %v1033_v47 = vpop.xlane.xlu0 %1032  ;;  %6513 = vlog2.f32 %v1989_v33 }
 0x282   :  { %11692 = vst [vmem:[#allocation11_spill] sm:$0xff] %v9387_v11  ;;  %2707 = vadd.xlane.f32.xlu0 %v11693_v52  ;;  %v2030_v17 = vsub.f32 1.0, %v9359_v18  ;;  %v9391_v49 = vmin.f32 %v1972_v15, 1.0  ;;  %v11694_v23 = vld [vmem:[#allocation114_spill] sm:$0xff]  ;;  %v1991_v45 = vmax.f32 %v9351_v7, 0.001  ;;  %6515 = vlog2.f32 %v1992_v20  ;;  %v6504_v54 = vpop.eup %6503 }
 0x283   :  { %2662 = vadd.xlane.f32.xlu1 %v11694_v23  ;;  %v2752_v24 = vmax.f32 %v2740_v6, 0.0  ;;  %v2739_v16 = vld [vmem:[%s11347_s2 + $0xc0] sm:$0xff]  ;;  %v9400_v38 = vmul.f32 0.6931472, %v6498_v50  ;;  %v2039_v15 = vmax.f32 %v2027_v62, 0.001  ;;  %6517 = vlog2.f32 %v2037_v12  ;;  %v6506_v50 = vpop.eup %6505 }
 0x284   :  { %v2029_v52 = vsub.f32 1.0, %v9378_v25  ;;  %v9403_v23 = vpop.f32.mrb[53].mxu1  ;;  %11696 = vst [vmem:[#allocation40_spill] sm:$0xff] %v9405_v36  ;;  %v9407_v33 = vmul.f32 0.6931472, %v6500_v41  ;;  %v9410_v6 = vmin.f32 %v1971_v44, 1.0  ;;  %6519 = vlog2.f32 %v2040_v4  ;;  %v6508_v63 = vpop.eup %6507 }
 0x285   :  { %11695 = vst [vmem:[#allocation100_spill] sm:$0xff] %v9403_v23  ;;  %v1994_v7 = vmax.f32 %v9359_v18, 0.001  ;;  %v9412_v14 = vpop.f32.mrb[54].mxu1  ;;  %v11699_v42 = vld [vmem:[#allocation113_spill] sm:$0xff]  ;;  %v2032_v20 = vsub.f32 1.0, %v9391_v49  ;;  %v1085_v41 = vpop.xlane.xlu0 %1084  ;;  %6521 = vlog2.f32 %v1991_v45 }
 0x286   :  { %11697 = vst [vmem:[#allocation99_spill] sm:$0xff] %v9407_v33  ;;  %11698 = vst [vmem:[#allocation103_spill] sm:$0xff] %v9412_v14  ;;  %2665 = vadd.xlane.f32.xlu0 %v11699_v42  ;;  %v2042_v62 = vmax.f32 %v2030_v17, 0.001  ;;  %v2751_v23 = vmax.f32 %v2739_v16, 0.0  ;;  %v11700_v11 = vld [vmem:[#allocation75_spill] sm:$0xff]  ;;  %v1117_v44 = vsel %vm628_vm1, %v1033_v47, %v1085_v41  ;;  %6523 = vlog2.f32 %v2039_v15 }
 0x287   :  { %2710 = vadd.xlane.f32.xlu1 %v11700_v11  ;;  %v9417_v36 = vmul.f32 0.6931472, %v6502_v22  ;;  %v1993_v18 = vmax.f32 %v9378_v25, 0.001  ;;  %v9420_v12 = vmin.f32 %v2752_v24, 1.0  ;;  %v9425_v42 = vpop.f32.mrb[55].mxu1  ;;  %6525 = vlog2.f32 %v1994_v7  ;;  %v9440_v7 = vpop.permute.xlu1 %2989 }
 0x288   :  { %v9423_v14 = vmul.f32 0.6931472, %v6504_v54  ;;  %v2041_v17 = vmax.f32 %v2029_v52, 0.001  ;;  %11703 = vst [vmem:[#allocation105_spill] sm:$0xff] %v9425_v42  ;;  %v11704_v4 = vld [vmem:[#allocation13_spill] sm:$0xff]  ;;  %6527 = vlog2.f32 %v2042_v62  ;;  %v6510_v52 = vpop.eup %6509 }
 0x289   :  { %11701 = vst [vmem:[#allocation101_spill] sm:$0xff] %v9417_v36  ;;  %v1133_v16 = vadd.f32 %v11704_v4, %v1117_v44  ;;  %v1996_v11 = vmax.f32 %v9391_v49, 0.001  ;;  %v2031_v22 = vsub.f32 1.0, %v9410_v6  ;;  %v9430_v45 = vpop.f32.mrb[56].mxu1  ;;  %v11706_v25 = vld [vmem:[#allocation78_spill] sm:$0xff]  ;;  %6529 = vlog2.f32 %v1993_v18 }
 0x28a   :  { %11702 = vst [vmem:[#allocation104_spill] sm:$0xff] %v9423_v14  ;;  %11705 = vst [vmem:[#allocation106_spill] sm:$0xff] %v9430_v45  ;;  %2713 = vadd.xlane.f32.xlu0 %v11706_v25  ;;  %v9433_v24 = vmul.f32 0.6931472, %v6506_v50  ;;  %v2044_v54 = vmax.f32 %v2032_v20, 0.001  ;;  %v1039_v25 = vpop.xlane.xlu0 %1038  ;;  %v6512_v20 = vpop.eup %6511  ;;  %6531 = vlog2.f32 %v2041_v17 }
 0x28b   :  { %v9435_v47 = vmin.f32 %v2751_v23, 1.0  ;;  %v2742_v15 = vld [vmem:[%s11347_s2 + $0xd8] sm:$0xff]  ;;  %11708 = vst [vmem:[#allocation112_spill] sm:$0xff] %v9440_v7  ;;  %v11709_v49 = vld [vmem:[#allocation110_spill] sm:$0xff]  ;;  %v11710_v41 = vld [vmem:[#allocation111_spill] sm:$0xff]  ;;  %v2812_v23 = vsub.f32 1.0, %v9420_v12  ;;  %6533 = vlog2.f32 %v1996_v11 }
 0x28c   :  { %11707 = vst [vmem:[#allocation107_spill] sm:$0xff] %v9433_v24  ;;  %v11711_v44 = vsub.f32 %v11709_v49, %v11710_v41  ;;  %v11712_v45 = vld [vmem:[#allocation115_spill] sm:$0xff]  ;;  %v9446_v50 = vmul.f32 0.6931472, %v6508_v63  ;;  %v2741_v62 = vld [vmem:[%s11347_s2 + $0xd0] sm:$0xff]  ;;  %v6514_v63 = vpop.eup %6513  ;;  %6535 = vlog2.f32 %v2044_v54  ;;  %v11721_v33 = vld [vmem:[#allocation10_spill] sm:$0xff] }
 0x28d   :  { %3448 = vadd.xlane.f32.xlu1 %v11712_v45  ;;  %v9457_v45 = vpop.f32.mrb[57].mxu1  ;;  %v2043_v41 = vmax.f32 %v2031_v22, 0.001  ;;  %v6516_v32 = vpop.eup %6515  ;;  %v11716_v0 = vld [vmem:[#allocation116_spill] sm:$0xff]  ;;  %v2776_v7 = vmax.f32 %v9420_v12, 0.001 }
 0x28e   :  { %v1277_v42 = vadd.f32 %v11711_v44, %v1133_v16  ;;  %11713 = vst [vmem:[#allocation108_spill] sm:$0xff] %v9446_v50  ;;  %v1995_v16 = vmax.f32 %v9410_v6, 0.001  ;;  %11714 = vst [vmem:[#allocation114_spill] sm:$0xff] %v9457_v45  ;;  %v2754_v44 = vmax.f32 %v2742_v15, 0.0  ;;  %v9459_v55 = vpop.f32.mrb[58].mxu1  ;;  %3445 = vadd.xlane.f32.xlu0 %v11716_v0  ;;  %v6518_v14 = vpop.eup %6517 }
 0x28f   :  { %11715 = vst [vmem:[#allocation113_spill] sm:$0xff] %v9459_v55  ;;  %v2811_v49 = vsub.f32 1.0, %v9435_v47  ;;  %v2753_v17 = vmax.f32 %v2741_v62, 0.0  ;;  %v11717_v6 = vld [vmem:[#allocation81_spill] sm:$0xff]  ;;  %v1091_v45 = vpop.xlane.xlu0 %1090  ;;  %v9467_v22 = vmul.f32 0.6931472, %v6510_v52  ;;  %v6520_v12 = vpop.eup %6519 }
 0x290   :  { %v5496_v18 = vmul.f32 -1.442695, %v1277_v42  ;;  %v1030_v42 = vpop.xlane.xlu1 %1029  ;;  %v2824_v15 = vmax.f32 %v2812_v23, 0.001  ;;  %v2743_v0 = vld [vmem:[%s11347_s2 + $0xe0] sm:$0xff]  ;;  %v1119_v54 = vsel %vm628_vm1, %v1039_v25, %v1091_v45  ;;  %v2766_v52 = vmin.f32 %v2754_v44, 1.0 }
 0x291   :  { %3457 = vadd.xlane.f32.xlu1 %v11717_v6  ;;  %v9473_v62 = vmul.f32 0.6931472, %v6512_v20  ;;  %v6522_v6 = vpop.eup %6521  ;;  %v1135_v55 = vadd.f32 %v11704_v4, %v1119_v54  ;;  %v9477_v36 = vmul.f32 0.6931472, %v6514_v63  ;;  %v9479_v23 = vpop.f32.mrb[59].mxu1  ;;  %v11719_v50 = vld [vmem:[#allocation80_spill] sm:$0xff] }
 0x292   :  { %6537 = vpow2.f32 %v5496_v18  ;;  %v2775_v18 = vmax.f32 %v9435_v47, 0.001  ;;  %11718 = vst [vmem:[#allocation75_spill] sm:$0xff] %v9479_v23  ;;  %v6524_v11 = vpop.eup %6523  ;;  %3451 = vadd.xlane.f32.xlu0 %v11719_v50  ;;  %v2823_v24 = vmax.f32 %v2811_v49, 0.001  ;;  %v2765_v25 = vmin.f32 %v2753_v17, 1.0 }
 0x293   :  { %6539 = vlog2.f32 %v1995_v16  ;;  %v2755_v20 = vmax.f32 %v2743_v0, 0.0  ;;  %v6526_v45 = vpop.eup %6525  ;;  %v11720_v47 = vsub.f32 %v8918_v57, %v9103_v10  ;;  %v1045_v63 = vpop.xlane.xlu0 %1044  ;;  %v9488_v44 = vmul.f32 0.6931472, %v6516_v32 }
 0x294   :  { %6541 = vlog2.f32 %v2043_v41  ;;  %v1082_v54 = vpop.xlane.xlu1 %1081  ;;  %v9486_v41 = vmul.f32 0.6931472, %v6518_v14  ;;  %v6528_v23 = vpop.eup %6527  ;;  %v9491_v50 = vmul.f32 0.6931472, %v6520_v12  ;;  %v2778_v49 = vmax.f32 %v2766_v52, 0.001 }
 0x295   :  { %6543 = vlog2.f32 %v2776_v7  ;;  %v1279_v16 = vadd.f32 %v11720_v47, %v1135_v55  ;;  %3463 = vadd.xlane.f32.xlu1 %v11721_v33  ;;  %v1116_v7 = vsel %vm628_vm1, %v1030_v42, %v1082_v54  ;;  %v6530_v17 = vpop.eup %6529  ;;  %v2814_v10 = vsub.f32 1.0, %v2766_v52  ;;  %v11722_v47 = vld [vmem:[#allocation82_spill] sm:$0xff] }
 0x296   :  { %6545 = vlog2.f32 %v2824_v15  ;;  %v1132_v57 = vadd.f32 %v11704_v4, %v1116_v7  ;;  %v2777_v55 = vmax.f32 %v2765_v25, 0.001  ;;  %v6532_v33 = vpop.eup %6531  ;;  %3454 = vadd.xlane.f32.xlu0 %v11722_v47  ;;  %v2813_v14 = vsub.f32 1.0, %v2765_v25 }
 0x297   :  { %6547 = vlog2.f32 %v2775_v18  ;;  %v5498_v0 = vmul.f32 -1.442695, %v1279_v16  ;;  %v9497_v15 = vmin.f32 %v2755_v20, 1.0  ;;  %v6534_v42 = vpop.eup %6533  ;;  %v11723_v12 = vsub.f32 %v9170_v21, %v9198_v56  ;;  %v1097_v52 = vpop.xlane.xlu0 %1096 }
 0x298   :  { %6549 = vlog2.f32 %v2823_v24  ;;  %v1036_v16 = vpop.xlane.xlu1 %1035  ;;  %v9505_v7 = vmul.f32 0.6931472, %v6522_v6  ;;  %v2744_v24 = vld [vmem:[%s11347_s2 + $0xe8] sm:$0xff]  ;;  %v6536_v25 = vpop.eup %6535  ;;  %v1121_v20 = vsel %vm628_vm1, %v1045_v63, %v1097_v52  ;;  %v9513_v56 = vmul.f32 0.6931472, %v6524_v11 }
 0x299   :  { %6551 = vpow2.f32 %v5498_v0  ;;  %v1276_v18 = vadd.f32 %v11723_v12, %v1132_v57  ;;  %3469 = vadd.xlane.f32.xlu1 %v9118_v51  ;;  %v1137_v57 = vadd.f32 %v11704_v4, %v1121_v20  ;;  %v2826_v47 = vmax.f32 %v2814_v10, 0.001 }
 0x29a   :  { %6553 = vlog2.f32 %v2778_v49  ;;  %3460 = vadd.xlane.f32.xlu0 %v9139_v3  ;;  %v2825_v54 = vmax.f32 %v2813_v14, 0.001  ;;  %v2815_v63 = vsub.f32 1.0, %v9497_v15  ;;  %v2756_v52 = vmax.f32 %v2744_v24, 0.0 }
 0x29b   :  { %v5495_v0 = vmul.f32 -1.442695, %v1276_v18  ;;  %6555 = vlog2.f32 %v2777_v55  ;;  %v11724_v11 = vsub.f32 %v9220_v30, %v9245_v19  ;;  %v1051_v18 = vpop.xlane.xlu0 %1050  ;;  %v9524_v55 = vmul.f32 0.6931472, %v6526_v45 }
 0x29c   :  { %v6538_v51 = vpop.eup %6537  ;;  %v1088_v10 = vpop.xlane.xlu1 %1087  ;;  %v9526_v20 = vmul.f32 0.6931472, %v6528_v23  ;;  %v9529_v14 = vmul.f32 0.6931472, %v6530_v17  ;;  %v9531_v24 = vmul.f32 0.6931472, %v6532_v33 }
 0x29d   :  { %v9516_v6 = vpop.eup %6539  ;;  %v1325_v12 = vadd.f32 1.0, %v6538_v51  ;;  %6557 = vpow2.f32 %v5495_v0  ;;  %v1281_v49 = vadd.f32 %v11724_v11, %v1137_v57  ;;  %3475 = vadd.xlane.f32.xlu1 %v9167_v53  ;;  %v1118_v3 = vsel %vm628_vm1, %v1036_v16, %v1088_v10  ;;  %v2745_v23 = vld [vmem:[%s11347_s2 + $0xf0] sm:$0xff]  ;;  %v2746_v57 = vld [vmem:[%s11347_s2 + $0xf8] sm:$0xff] }
 0x29e   :  { %v6542_v32 = vpop.eup %6541  ;;  %v1134_v53 = vadd.f32 %v11704_v4, %v1118_v3  ;;  %v2779_v19 = vmax.f32 %v9497_v15, 0.001  ;;  %3466 = vadd.xlane.f32.xlu0 %v9158_v13  ;;  %v2827_v33 = vmax.f32 %v2815_v63, 0.001  ;;  %v2768_v16 = vmin.f32 %v2756_v52, 1.0  ;;  %v11753_v52 = vld [vmem:[#allocation11_spill] sm:$0xff] }
 0x29f   :  { %v6544_v51 = vpop.eup %6543  ;;  %6559 = vrcp.f32 %v1325_v12  ;;  %v5500_v30 = vmul.f32 -1.442695, %v1281_v49  ;;  %v11725_v15 = vsub.f32 %v9256_v35, %v9263_v2  ;;  %v1103_v12 = vpop.xlane.xlu0 %1102  ;;  %v9550_v49 = vmul.f32 0.6931472, %v6534_v42  ;;  %v11758_v17 = vld [vmem:[#allocation8_spill] sm:$0xff] }
 0x2a0   :  { %v6546_v0 = vpop.eup %6545  ;;  %6561 = vlog2.f32 %v2826_v47  ;;  %v1042_v11 = vpop.xlane.xlu1 %1041  ;;  %v1123_v63 = vsel %vm628_vm1, %v1051_v18, %v1103_v12  ;;  %v9555_v10 = vmul.f32 0.6931472, %v6536_v25  ;;  %v2757_v3 = vmax.f32 %v2745_v23, 0.0 }
 0x2a1   :  { %v6548_v45 = vpop.eup %6547  ;;  %6563 = vlog2.f32 %v2825_v54  ;;  %v1278_v47 = vadd.f32 %v11725_v15, %v1134_v53  ;;  %3497 = vadd.xlane.f32.xlu1 %v9164_v9  ;;  %v1139_v9 = vadd.f32 %v11704_v4, %v1123_v63  ;;  %v2780_v42 = vmax.f32 %v2768_v16, 0.001 }
 0x2a2   :  { %6565 = vpow2.f32 %v5500_v30  ;;  %v6550_v54 = vpop.eup %6549  ;;  %v2758_v30 = vmax.f32 %v2746_v57, 0.0  ;;  %3472 = vadd.xlane.f32.xlu0 %v9174_v37  ;;  %v2816_v18 = vsub.f32 1.0, %v2768_v16  ;;  %v11726_v25 = vsub.f32 %v9265_v43, %v9272_v59 }
 0x2a3   :  { %v6552_v35 = vpop.eup %6551  ;;  %v5497_v2 = vmul.f32 -1.442695, %v1278_v47  ;;  %6567 = vlog2.f32 %v2779_v19  ;;  %v1057_v47 = vpop.xlane.xlu0 %1056  ;;  %v9568_v57 = vmul.f32 0.6931472, %v9516_v6  ;;  %v9570_v63 = vmul.f32 0.6931472, %v6542_v32 }
 0x2a4   :  { %v9558_v53 = vpop.eup %6553  ;;  %v1327_v15 = vadd.f32 1.0, %v6552_v35  ;;  %6569 = vlog2.f32 %v2827_v33  ;;  %v1283_v23 = vadd.f32 %v11726_v25, %v1139_v9  ;;  %v1094_v19 = vpop.xlane.xlu1 %1093  ;;  %v9573_v33 = vmul.f32 0.6931472, %v6544_v51  ;;  %v11727_v51 = vld [vmem:[#allocation18_spill] sm:$0xff] }
 0x2a5   :  { %v9561_v12 = vpop.eup %6555  ;;  %6571 = vpow2.f32 %v5497_v2  ;;  %3503 = vadd.xlane.f32.xlu1 %v9185_v58  ;;  %v1120_v37 = vsel %vm628_vm1, %v1042_v11, %v1094_v19  ;;  %v2769_v16 = vmin.f32 %v2757_v3, 1.0  ;;  %v9576_v59 = vmul.f32 0.6931472, %v6546_v0 }
 0x2a6   :  { %6573 = vrcp.f32 %v1327_v15  ;;  %v5502_v2 = vmul.f32 -1.442695, %v1283_v23  ;;  %v1136_v43 = vadd.f32 %v11704_v4, %v1120_v37  ;;  %v9578_v58 = vmin.f32 %v2758_v30, 1.0  ;;  %3478 = vadd.xlane.f32.xlu0 %v9188_v29 }
 0x2a7   :  { %v6558_v35 = vpop.eup %6557  ;;  %v9581_v32 = vmul.f32 0.6931472, %v6548_v45  ;;  %6575 = vlog2.f32 %v2780_v42  ;;  %v2828_v6 = vmax.f32 %v2816_v18, 0.001  ;;  %v11728_v0 = vsub.f32 %v9274_v8, %v9284_v27  ;;  %v1109_v30 = vpop.xlane.xlu0 %1108  ;;  %v11729_v42 = vld [vmem:[#allocation14_spill] sm:$0xff] }
 0x2a8   :  { %v1324_v25 = vadd.f32 1.0, %v6558_v35  ;;  %6577 = vpow2.f32 %v5502_v2  ;;  %v1048_v23 = vpop.xlane.xlu1 %1047  ;;  %v9593_v29 = vadd.f32 %v9335_v48, %v11600_v28  ;;  %v1125_v19 = vsel %vm628_vm1, %v1057_v47, %v1109_v30 }
 0x2a9   :  { %v6560_v9 = vpop.eup %6559  ;;  %v1280_v15 = vadd.f32 %v11728_v0, %v1136_v43  ;;  %3509 = vadd.xlane.f32.xlu1 %v9192_v34  ;;  %v2781_v37 = vmax.f32 %v2769_v16, 0.001  ;;  %v1141_v34 = vadd.f32 %v11704_v4, %v1125_v19  ;;  %v2817_v2 = vsub.f32 1.0, %v2769_v16 }
 0x2aa   :  { %v9583_v11 = vpop.eup %6561  ;;  %v1422_v3 = vsel %vm1420_vm2, %v6560_v9, %v11727_v51  ;;  %6579 = vrcp.f32 %v1324_v25  ;;  %3500 = vadd.xlane.f32.xlu0 %v9202_v61  ;;  %v9606_v43 = vmul.f32 0.6931472, %v6550_v54  ;;  %v2782_v47 = vmax.f32 %v9578_v58, 0.001 }
 0x2ab   :  { %v9595_v45 = vpop.eup %6563  ;;  %v1435_v18 = vsel %vm1433_vm3, %v1422_v3, %v11729_v42  ;;  %v5499_v27 = vmul.f32 -1.442695, %v1280_v15  ;;  %6581 = vlog2.f32 %v2828_v6  ;;  %v11730_v25 = vsub.f32 %v9293_v40, %v9295_v26  ;;  %v1063_v16 = vpop.xlane.xlu0 %1062 }
 0x2ac   :  { %v6566_v35 = vpop.eup %6565  ;;  %v1448_v8 = vsel %vm1446_vm4, %v1435_v18, 0.0  ;;  %v1100_v3 = vpop.xlane.xlu1 %1099  ;;  %v9625_v40 = vmul.f32 0.6931472, %v9558_v53  ;;  %v4220_v42 = vmax.f32 %v9593_v29, 0.0  ;;  %v11752_v29 = vld [vmem:[#allocation60_spill] sm:$0xff]  ;;  %v9751_v13 = vadd.f32 %v11753_v52, %v11600_v28 }
 0x2ad   :  { %1460 = vst [vmem:[%s11349_s7 + $0x8] sm:$0xff] %v1448_v8  ;;  %v1329_v48 = vadd.f32 1.0, %v6566_v35  ;;  %v9609_v9 = vpop.eup %6567  ;;  %6583 = vpow2.f32 %v5499_v27  ;;  %v1285_v51 = vadd.f32 %v11730_v25, %v1141_v34  ;;  %3515 = vadd.xlane.f32.xlu1 %v9207_v1  ;;  %v1122_v6 = vsel %vm628_vm1, %v1048_v23, %v1100_v3  ;;  %v11731_v8 = vld [vmem:[#allocation20_spill] sm:$0xff] }
 0x2ae   :  { %v9619_v54 = vpop.eup %6569  ;;  %v1138_v30 = vadd.f32 %v11704_v4, %v1122_v6  ;;  %3506 = vadd.xlane.f32.xlu0 %v9216_v5  ;;  %v2829_v35 = vmax.f32 %v2817_v2, 0.001  ;;  %v11732_v27 = vsub.f32 %v9299_v46, %v9306_v60  ;;  %v9639_v25 = vmul.f32 0.6931472, %v9561_v12 }
 0x2af   :  { %6585 = vrcp.f32 %v1329_v48  ;;  %v6572_v1 = vpop.eup %6571  ;;  %v5504_v26 = vmul.f32 -1.442695, %v1285_v51  ;;  %v11733_v51 = vld [vmem:[#allocation7_spill] sm:$0xff]  ;;  %v2818_v3 = vsub.f32 1.0, %v9578_v58 }
 0x2b0   :  { %6587 = vlog2.f32 %v2781_v37  ;;  %v6574_v18 = vpop.eup %6573  ;;  %v1326_v19 = vadd.f32 1.0, %v6572_v1  ;;  %v1282_v34 = vadd.f32 %v11732_v27, %v1138_v30  ;;  %v1115_v37 = vpop.xlane.xlu0 %1114  ;;  %v9650_v1 = vmul.f32 0.6931472, %v9583_v11  ;;  %v11735_v30 = vld [vmem:[#allocation56_spill] sm:$0xff] }
 0x2b1   :  { %6589 = vlog2.f32 %v2782_v47  ;;  %v1424_v53 = vsel %vm1420_vm2, %v6574_v18, %v11731_v8  ;;  %3521 = vadd.xlane.f32.xlu1 %v9224_v31  ;;  %v1054_v48 = vpop.xlane.xlu1 %1053  ;;  %v9641_v5 = vpop.eup %6575  ;;  %v1127_v47 = vsel %vm628_vm1, %v1063_v16, %v1115_v37  ;;  %v11734_v16 = vld [vmem:[#allocation50_spill] sm:$0xff]  ;;  %v9660_v18 = vadd.f32 %v11735_v30, %v11600_v28  ;;  %v11740_v37 = vld [vmem:[#allocation32_spill] sm:$0xff] }
 0x2b2   :  { %6591 = vpow2.f32 %v5504_v26  ;;  %v1437_v2 = vsel %vm1433_vm3, %v1424_v53, %v11733_v51  ;;  %v6578_v6 = vpop.eup %6577  ;;  %v5501_v60 = vmul.f32 -1.442695, %v1282_v34  ;;  %v1143_v31 = vadd.f32 %v11704_v4, %v1127_v47  ;;  %3512 = vadd.xlane.f32.xlu0 %v9232_v39  ;;  %v11737_v8 = vld [vmem:[#allocation6_spill] sm:$0xff]  ;;  %v11738_v53 = vld [vmem:[#allocation28_spill] sm:$0xff]  ;;  %v11741_v47 = vld [vmem:[#allocation3_spill] sm:$0xff] }
 0x2b3   :  { %6593 = vrcp.f32 %v1326_v19  ;;  %v1450_v46 = vsel %vm1446_vm4, %v1437_v2, 0.0  ;;  %v1331_v26 = vadd.f32 1.0, %v6578_v6  ;;  %v4167_v58 = vadd.f32 %v11734_v16, %v11600_v28  ;;  %v11736_v19 = vld [vmem:[#allocation17_spill] sm:$0xff] }
 0x2b4   :  { %v6580_v12 = vpop.eup %6579  ;;  %1462 = vst [vmem:[%s11349_s7 + $0x18] sm:$0xff] %v1450_v46  ;;  %6595 = vlog2.f32 %v2829_v35  ;;  %v11739_v27 = vsub.f32 %v11737_v8, %v11738_v53  ;;  %v9668_v2 = vpop.xlane.xlu0 %1893  ;;  %v4232_v6 = vmul.f32 %v4220_v42, %v11741_v47  ;;  %v2747_v35 = vld [vmem:[%s11347_s2 + $0x100] sm:$0xff]  ;;  %v9682_v16 = vmul.f32 0.6931472, %v9595_v45 }
 0x2b5   :  { %v1421_v11 = vsel %vm1420_vm2, %v6580_v12, %v11736_v19  ;;  %6597 = vpow2.f32 %v5501_v60  ;;  %3527 = vadd.xlane.f32.xlu1 %v11740_v37  ;;  %v1106_v39 = vpop.xlane.xlu1 %1105  ;;  %v9676_v46 = vpop.eup %6581  ;;  %v11742_v60 = vld [vmem:[#allocation15_spill] sm:$0xff]  ;;  %v2759_v45 = vmax.f32 %v2747_v35, 0.0 }
 0x2b6   :  { %v1287_v34 = vadd.f32 %v11739_v27, %v1143_v31  ;;  %v1434_v12 = vsel %vm1433_vm3, %v1421_v11, %v11742_v60  ;;  %6599 = vrcp.f32 %v1331_v26  ;;  %v1124_v31 = vsel %vm628_vm1, %v1054_v48, %v1106_v39  ;;  %v11743_v11 = vld [vmem:[#allocation19_spill] sm:$0xff]  ;;  %v11744_v60 = vld [vmem:[#allocation12_spill] sm:$0xff] }
 0x2b7   :  { %v6584_v30 = vpop.eup %6583  ;;  %v1447_v19 = vsel %vm1446_vm4, %v1434_v12, 0.0  ;;  %v1140_v53 = vadd.f32 %v11704_v4, %v1124_v31  ;;  %v2830_v27 = vmax.f32 %v2818_v3, 0.001  ;;  %3518 = vadd.xlane.f32.xlu0 %v11743_v11  ;;  %v4221_v26 = vmax.f32 %v4167_v58, 0.0  ;;  %v11745_v12 = vld [vmem:[#allocation16_spill] sm:$0xff] }
 0x2b8   :  { %v5506_v8 = vmul.f32 -1.442695, %v1287_v34  ;;  %1459 = vst [vmem:[%s11349_s7] sm:$0xff] %v1447_v19  ;;  %v1328_v23 = vadd.f32 1.0, %v6584_v30  ;;  %v11458_v48 = vmax.f32 %v9660_v18, 0.0  ;;  %v11746_v3 = vld [vmem:[#allocation48_spill] sm:$0xff]  ;;  %v9698_v61 = vpop.xlane.xlu0 %1842 }
 0x2b9   :  { %v6586_v37 = vpop.eup %6585  ;;  %v11747_v31 = vsub.f32 %v11745_v12, %v11746_v3  ;;  %v1060_v19 = vpop.xlane.xlu1 %1059  ;;  %v9713_v12 = vmul.f32 0.6931472, %v9609_v9  ;;  %v11751_v30 = vld [vmem:[#allocation4_spill] sm:$0xff] }
 0x2ba   :  { %v9691_v39 = vpop.eup %6587  ;;  %v1426_v34 = vsel %vm1420_vm2, %v6586_v37, %v11744_v60  ;;  %6601 = vpow2.f32 %v5506_v8  ;;  %v9709_v8 = vsel %vm609_vm0, %v4232_v6, 0.0  ;;  %v4235_v6 = vmul.f32 %v11458_v48, %v11741_v47 }
 0x2bb   :  { %v1284_v15 = vadd.f32 %v11747_v31, %v1140_v53  ;;  %v9702_v58 = vpop.eup %6589  ;;  %v1439_v35 = vsel %vm1433_vm3, %v1426_v34, %v11733_v51  ;;  %6603 = vrcp.f32 %v1328_v23  ;;  %11748 = vst [vmem:[#allocation13_spill] sm:$0xff] %v9709_v8  ;;  %v11749_v34 = vld [vmem:[#allocation44_spill] sm:$0xff]  ;;  %v4233_v31 = vmul.f32 %v4221_v26, %v11741_v47 }
 0x2bc   :  { %v6592_v11 = vpop.eup %6591  ;;  %v1452_v53 = vsel %vm1446_vm4, %v1439_v35, 0.0  ;;  %6605 = vlog2.f32 %v2830_v27  ;;  %3524 = vadd.xlane.f32.xlu0 %v11749_v34  ;;  %v9723_v35 = vmin.f32 %v2759_v45, 1.0  ;;  %v1852_v27 = vpop.xlane.xlu0 %1851  ;;  %v9728_v0 = vmul.f32 %v4221_v26, %v11751_v30 }
 0x2bd   :  { %v5503_v60 = vmul.f32 -1.442695, %v1284_v15  ;;  %v6594_v3 = vpop.eup %6593  ;;  %1464 = vst [vmem:[%s11349_s7 + $0x28] sm:$0xff] %v1452_v53  ;;  %v1333_v23 = vadd.f32 1.0, %v6592_v11  ;;  %v11750_v15 = vld [vmem:[#allocation21_spill] sm:$0xff]  ;;  %v1112_v37 = vpop.xlane.xlu1 %1111  ;;  %v9733_v11 = vmul.f32 %v4220_v42, %v11751_v30  ;;  %v9747_v42 = vadd.f32 %v11752_v29, %v11600_v28 }
 0x2be   :  { %v1423_v9 = vsel %vm1420_vm2, %v6594_v3, %v11750_v15  ;;  %v9735_v53 = vpop.eup %6595  ;;  %v1126_v34 = vsel %vm628_vm1, %v1060_v19, %v1112_v37  ;;  %v11754_v19 = vld [vmem:[#allocation45_spill] sm:$0xff]  ;;  %v9758_v37 = vmul.f32 0.6931472, %v9641_v5  ;;  %v11765_v5 = vld [vmem:[#allocation99_spill] sm:$0xff] }
 0x2bf   :  { %6607 = vpow2.f32 %v5503_v60  ;;  %v1436_v45 = vsel %vm1433_vm3, %v1423_v9, %v11733_v51  ;;  %v9741_v60 = vmul.f32 0.6931472, %v9619_v54  ;;  %v6598_v3 = vpop.eup %6597  ;;  %v1142_v15 = vadd.f32 %v11704_v4, %v1126_v34  ;;  %v11756_v34 = vld [vmem:[#allocation65_spill] sm:$0xff] }
 0x2c0   :  { %6609 = vrcp.f32 %v1333_v23  ;;  %v1449_v26 = vsel %vm1446_vm4, %v1436_v45, 0.0  ;;  %v6600_v9 = vpop.eup %6599  ;;  %v1330_v54 = vadd.f32 1.0, %v6598_v3  ;;  %3530 = vadd.xlane.f32.xlu0 %v11754_v19  ;;  %v9761_v23 = vsel %vm609_vm0, %v4235_v6, 0.0  ;;  %v11757_v29 = vld [vmem:[#allocation49_spill] sm:$0xff]  ;;  %v1900_v8 = vpop.xlane.xlu0 %1899 }
 0x2c1   :  { %1461 = vst [vmem:[%s11349_s7 + $0x10] sm:$0xff] %v1449_v26  ;;  %11755 = vst [vmem:[#allocation78_spill] sm:$0xff] %v9761_v23  ;;  %v2783_v45 = vmax.f32 %v9723_v35, 0.001  ;;  %v1428_v52 = vsel %vm1420_vm2, %v6600_v9, %v11756_v34  ;;  %v11759_v21 = vsub.f32 %v11757_v29, %v11758_v17  ;;  %v1846_v26 = vpop.xlane.xlu1 %1845  ;;  %v9770_v3 = vsel %vm609_vm0, %v4233_v31, 0.0 }
 0x2c2   :  { %11760 = vst [vmem:[#allocation110_spill] sm:$0xff] %v9770_v3  ;;  %v1441_v6 = vsel %vm1433_vm3, %v1428_v52, %v11733_v51  ;;  %6611 = vrcp.f32 %v1330_v54  ;;  %v1928_v19 = vsel %vm628_vm1, %v1852_v27, %v1900_v8  ;;  %v1926_v9 = vsel %vm628_vm1, %v1846_v26, %v9668_v2  ;;  %v11761_v54 = vld [vmem:[#allocation24_spill] sm:$0xff]  ;;  %v11762_v26 = vld [vmem:[#allocation53_spill] sm:$0xff] }
 0x2c3   :  { %v1286_v48 = vadd.f32 %v11759_v21, %v1142_v15  ;;  %v1454_v17 = vsel %vm1446_vm4, %v1441_v6, 0.0  ;;  %v1940_v15 = vadd.f32 %v1928_v19, %v11704_v4  ;;  %v1938_v31 = vadd.f32 %v1926_v9, %v11704_v4  ;;  %v11763_v6 = vld [vmem:[#allocation54_spill] sm:$0xff] }
 0x2c4   :  { %v6602_v34 = vpop.eup %6601  ;;  %1466 = vst [vmem:[%s11349_s7 + $0x38] sm:$0xff] %v1454_v17  ;;  %v4222_v27 = vmax.f32 %v9747_v42, 0.0  ;;  %6613 = vlog2.f32 %v2783_v45  ;;  %v11764_v19 = vsub.f32 %v11762_v26, %v11763_v6  ;;  %v11766_v17 = vsub.f32 %v9400_v38, %v11765_v5  ;;  %v1849_v3 = vpop.xlane.xlu0 %1848  ;;  %v11769_v6 = vld [vmem:[#allocation67_spill] sm:$0xff] }
 0x2c5   :  { %v5505_v21 = vmul.f32 -1.442695, %v1286_v48  ;;  %v6604_v29 = vpop.eup %6603  ;;  %v1335_v52 = vadd.f32 1.0, %v6602_v34  ;;  %v1891_v23 = vpop.xlane.xlu1 %1890 }
 0x2c6   :  { %v9787_v2 = vpop.eup %6605  ;;  %v1425_v48 = vsel %vm1420_vm2, %v6604_v29, %v11761_v54  ;;  %v2084_v9 = vadd.f32 %v11764_v19, %v1940_v15  ;;  %v2082_v34 = vadd.f32 %v11766_v17, %v1938_v31  ;;  %3545 = vrot.lane.b32.xlu1 %v11600_v28, %s7030_s29  ;;  %v1925_v45 = vsel %vm628_vm1, %v9698_v61, %v1891_v23  ;;  %v11768_v61 = vld [vmem:[#allocation100_spill] sm:$0xff] }
 0x2c7   :  { %6615 = vpow2.f32 %v5505_v21  ;;  %v1438_v42 = vsel %vm1433_vm3, %v1425_v48, %v11733_v51  ;;  %v4225_v21 = vmax.f32 %v9751_v13, 0.0  ;;  %v1937_v5 = vadd.f32 %v1925_v45, %v11704_v4  ;;  %v11771_v17 = vld [vmem:[#allocation104_spill] sm:$0xff] }
 0x2c8   :  { %6617 = vrcp.f32 %v1335_v52  ;;  %v1451_v15 = vsel %vm1446_vm4, %v1438_v42, 0.0  ;;  %v5534_v54 = vmul.f32 -1.442695, %v2084_v9  ;;  %v5532_v38 = vmul.f32 -1.442695, %v2082_v34  ;;  %v11770_v9 = vld [vmem:[#allocation101_spill] sm:$0xff]  ;;  %v1858_v45 = vpop.xlane.xlu0 %1857 }
 0x2c9   :  { %v6608_v29 = vpop.eup %6607  ;;  %1463 = vst [vmem:[%s11349_s7 + $0x20] sm:$0xff] %v1451_v15  ;;  %v11767_v48 = vmax.f32 %v9660_v18, 0.0  ;;  %v9815_v13 = vmul.f32 0.6931472, %v9676_v46  ;;  %v4182_v23 = vadd.f32 %v11768_v61, %v11600_v28  ;;  %v11772_v34 = vsub.f32 %v11770_v9, %v11771_v17  ;;  %v11773_v18 = vld [vmem:[#allocation103_spill] sm:$0xff] }
 0x2ca   :  { %v6610_v31 = vpop.eup %6609  ;;  %v1332_v52 = vadd.f32 1.0, %v6608_v29  ;;  %6619 = vpow2.f32 %v5534_v54  ;;  %v1897_v29 = vpop.xlane.xlu1 %1896  ;;  %v9826_v15 = vadd.f32 %v11773_v18, %v11600_v28  ;;  %v4237_v54 = vmul.f32 %v4225_v21, %v11741_v47 }
 0x2cb   :  { %v9812_v26 = vmul.f32 %v11767_v48, %v11751_v30  ;;  %v1430_v19 = vsel %vm1420_vm2, %v6610_v31, %v11769_v6  ;;  %v2081_v42 = vadd.f32 %v11772_v34, %v1937_v5  ;;  %v11774_v48 = vld [vmem:[#allocation26_spill] sm:$0xff]  ;;  %v1927_v31 = vsel %vm628_vm1, %v1849_v3, %v1897_v29  ;;  %v11776_v34 = vld [vmem:[#allocation23_spill] sm:$0xff]  ;;  %v11778_v29 = vld [vmem:[#allocation108_spill] sm:$0xff] }
 0x2cc   :  { %v1443_v46 = vsel %vm1433_vm3, %v1430_v19, %v11733_v51  ;;  %6621 = vrcp.f32 %v1332_v52  ;;  %3791 = vrot.lane.b32.xlu1 %v11774_v48, %s7033_s11  ;;  %v1939_v6 = vadd.f32 %v1927_v31, %v11704_v4  ;;  %v6612_v9 = vpop.eup %6611  ;;  %v4234_v52 = vmul.f32 %v4222_v27, %v11741_v47  ;;  %v1906_v48 = vpop.xlane.xlu0 %1905 }
 0x2cd   :  { %v1456_v61 = vsel %vm1446_vm4, %v1443_v46, 0.0  ;;  %6623 = vpow2.f32 %v5532_v38  ;;  %v5531_v5 = vmul.f32 -1.442695, %v2081_v42  ;;  %v9841_v19 = vmul.f32 %v4222_v27, %v11751_v30  ;;  %v11777_v42 = vld [vmem:[#allocation107_spill] sm:$0xff] }
 0x2ce   :  { %1468 = vst [vmem:[%s11349_s7 + $0x48] sm:$0xff] %v1456_v61  ;;  %v4224_v17 = vmax.f32 %v4182_v23, 0.0  ;;  %v9844_v3 = vmul.f32 0.6931472, %v9691_v39  ;;  %v1427_v38 = vsel %vm1420_vm2, %v6612_v9, %v11776_v34  ;;  %v11779_v18 = vsub.f32 %v11777_v42, %v11778_v29  ;;  %v1855_v31 = vpop.xlane.xlu1 %1854  ;;  %v9853_v8 = vpop.eup %6613  ;;  %v11780_v23 = vld [vmem:[#allocation30_spill] sm:$0xff] }
 0x2cf   :  { %11775 = vst [vmem:[#allocation111_spill] sm:$0xff] %v9841_v19  ;;  %6625 = vpow2.f32 %v5531_v5  ;;  %v1440_v27 = vsel %vm1433_vm3, %v1427_v38, %v11733_v51  ;;  %v1930_v39 = vsel %vm628_vm1, %v1858_v45, %v1906_v48  ;;  %v9862_v9 = vmul.f32 0.6931472, %v9702_v58 }
 0x2d0   :  { %v2083_v46 = vadd.f32 %v11779_v18, %v1939_v6  ;;  %3793 = vrot.lane.b32.xlu1 %v11780_v23, %s7033_s11  ;;  %v1453_v34 = vsel %vm1446_vm4, %v1440_v27, 0.0  ;;  %v1942_v29 = vadd.f32 %v1930_v39, %v11704_v4  ;;  %v9867_v18 = vsel %vm609_vm0, %v4237_v54, 0.0  ;;  %v1864_v61 = vpop.xlane.xlu0 %1863 }
 0x2d1   :  { %v6616_v6 = vpop.eup %6615  ;;  %1465 = vst [vmem:[%s11349_s7 + $0x30] sm:$0xff] %v1453_v34  ;;  %v9873_v48 = vmul.f32 %v4225_v21, %v11751_v30  ;;  %v9876_v58 = vmul.f32 %v4224_v17, %v11741_v47  ;;  %v9879_v27 = vsel %vm609_vm0, %v4234_v52, 0.0  ;;  %v11784_v54 = vsub.f32 %v9467_v22, %v9473_v62  ;;  %v11786_v52 = vld [vmem:[#allocation33_spill] sm:$0xff]  ;;  %v2748_v22 = vld [vmem:[%s11347_s2 + $0x108] sm:$0xff] }
 0x2d2   :  { %v5533_v42 = vmul.f32 -1.442695, %v2083_v46  ;;  %v6618_v38 = vpop.eup %6617  ;;  %v1334_v45 = vadd.f32 1.0, %v6616_v6  ;;  %11782 = vst [vmem:[#allocation116_spill] sm:$0xff] %v9879_v27  ;;  %v11783_v46 = vld [vmem:[#allocation71_spill] sm:$0xff]  ;;  %v1903_v34 = vpop.xlane.xlu1 %1902  ;;  %v9887_v6 = vmul.f32 %v4224_v17, %v11751_v30 }
 0x2d3   :  { %11781 = vst [vmem:[#allocation115_spill] sm:$0xff] %v9873_v48  ;;  %v1432_v39 = vsel %vm1420_vm2, %v6618_v38, %v11783_v46  ;;  %v2086_v23 = vadd.f32 %v11784_v54, %v1942_v29  ;;  %v1929_v5 = vsel %vm628_vm1, %v1855_v31, %v1903_v34  ;;  %v11788_v54 = vld [vmem:[#allocation105_spill] sm:$0xff] }
 0x2d4   :  { %6627 = vpow2.f32 %v5533_v42  ;;  %11785 = vst [vmem:[#allocation81_spill] sm:$0xff] %v9887_v6  ;;  %v1445_v21 = vsel %vm1433_vm3, %v1432_v39, %v11733_v51  ;;  %3797 = vrot.lane.b32.xlu1 %v11786_v52, %s7033_s11  ;;  %v11787_v42 = vmax.f32 %v9826_v15, 0.0  ;;  %v6620_v62 = vpop.eup %6619  ;;  %v1941_v46 = vadd.f32 %v1929_v5, %v11704_v4  ;;  %v1912_v6 = vpop.xlane.xlu0 %1911 }
 0x2d5   :  { %6629 = vrcp.f32 %v1334_v45  ;;  %v1458_v17 = vsel %vm1446_vm4, %v1445_v21, 0.0  ;;  %v5536_v29 = vmul.f32 -1.442695, %v2086_v23  ;;  %v9903_v45 = vmul.f32 0.6931472, %v9735_v53  ;;  %v11789_v23 = vld [vmem:[#allocation106_spill] sm:$0xff] }
 0x2d6   :  { %v4239_v38 = vmul.f32 %v11787_v42, %v11741_v47  ;;  %v6622_v39 = vpop.eup %6621  ;;  %1470 = vst [vmem:[%s11349_s7 + $0x58] sm:$0xff] %v1458_v17  ;;  %v2132_v31 = vadd.f32 1.0, %v6620_v62  ;;  %v9910_v34 = vadd.f32 %v11788_v54, %v11600_v28  ;;  %v9913_v52 = vmul.f32 0.6931472, %v9787_v2  ;;  %v11790_v53 = vld [vmem:[#allocation22_spill] sm:$0xff]  ;;  %v1861_v19 = vpop.xlane.xlu1 %1860  ;;  %v2749_v2 = vld [vmem:[%s11347_s2 + $0x110] sm:$0xff] }
 0x2d7   :  { %v9917_v21 = vadd.f32 %v11789_v23, %v11600_v28  ;;  %v6624_v5 = vpop.eup %6623  ;;  %v1429_v42 = vsel %vm1420_vm2, %v6622_v39, %v11790_v53  ;;  %6631 = vpow2.f32 %v5536_v29  ;;  %v11791_v17 = vsub.f32 %v9477_v36, %v9486_v41  ;;  %v11792_v29 = vld [vmem:[#allocation35_spill] sm:$0xff] }
 0x2d8   :  { %v2760_v54 = vmax.f32 %v2748_v22, 0.0  ;;  %v1442_v23 = vsel %vm1433_vm3, %v1429_v42, %v11733_v51  ;;  %6633 = vrcp.f32 %v2132_v31  ;;  %v2130_v48 = vadd.f32 1.0, %v6624_v5  ;;  %3801 = vrot.lane.b32.xlu1 %v11792_v29, %s7033_s11  ;;  %v11793_v36 = vld [vmem:[#allocation27_spill] sm:$0xff]  ;;  %v11797_v29 = vld [vmem:[#allocation29_spill] sm:$0xff] }
 0x2d9   :  { %v2085_v62 = vadd.f32 %v11791_v17, %v1941_v46  ;;  %v1932_v27 = vsel %vm628_vm1, %v1864_v61, %v1912_v6  ;;  %3789 = vrot.lane.b32.xlu0 %v11793_v36, %s7033_s11  ;;  %v6626_v41 = vpop.eup %6625  ;;  %v1455_v22 = vsel %vm1446_vm4, %v1442_v23, 0.0  ;;  %v9937_v53 = vsel %vm609_vm0, %v4239_v38, 0.0  ;;  %v11796_v23 = vld [vmem:[#allocation37_spill] sm:$0xff] }
 0x2da   :  { %v1944_v39 = vadd.f32 %v1932_v27, %v11704_v4  ;;  %1467 = vst [vmem:[%s11349_s7 + $0x40] sm:$0xff] %v1455_v22  ;;  %6635 = vrcp.f32 %v2130_v48  ;;  %v2129_v61 = vadd.f32 1.0, %v6626_v41  ;;  %v11794_v6 = vsub.f32 1.0, %v9723_v35  ;;  %v1909_v48 = vpop.xlane.xlu1 %1908 }
 0x2db   :  { %v5535_v46 = vmul.f32 -1.442695, %v2085_v62  ;;  %v2761_v5 = vmax.f32 %v2749_v2, 0.0  ;;  %v11795_v42 = vsub.f32 %v9488_v44, %v9491_v50  ;;  %v1870_v62 = vpop.xlane.xlu0 %1869  ;;  %v2772_v38 = vmin.f32 %v2760_v54, 1.0  ;;  %v2750_v54 = vld [vmem:[%s11347_s2 + $0x118] sm:$0xff] }
 0x2dc   :  { %v2831_v31 = vmax.f32 %v11794_v6, 0.001  ;;  %3805 = vrot.lane.b32.xlu1 %v11796_v23, %s7033_s11  ;;  %v11798_v35 = vmax.f32 %v9826_v15, 0.0  ;;  %v11461_v44 = vmax.f32 %v9910_v34, 0.0  ;;  %v1931_v22 = vsel %vm628_vm1, %v1861_v19, %v1909_v48 }
 0x2dd   :  { %6637 = vpow2.f32 %v5535_v46  ;;  %v2088_v17 = vadd.f32 %v11795_v42, %v1944_v39  ;;  %3795 = vrot.lane.b32.xlu0 %v11797_v29, %s7033_s11  ;;  %v11799_v39 = vld [vmem:[#allocation114_spill] sm:$0xff]  ;;  %v1943_v42 = vadd.f32 %v1931_v22, %v11704_v4  ;;  %v2784_v23 = vmax.f32 %v2772_v38, 0.001 }
 0x2de   :  { %6639 = vrcp.f32 %v2129_v61  ;;  %v9956_v2 = vmul.f32 %v11798_v35, %v11751_v30  ;;  %v6628_v36 = vpop.eup %6627  ;;  %v9968_v15 = vadd.f32 %v11799_v39, %v11600_v28  ;;  %v9971_v29 = vmin.f32 %v2761_v5, 1.0  ;;  %v11800_v35 = vld [vmem:[#allocation66_spill] sm:$0xff]  ;;  %v11802_v5 = vld [vmem:[#allocation39_spill] sm:$0xff]  ;;  %v1867_v50 = vpop.xlane.xlu1 %1866 }
 0x2df   :  { %v5538_v41 = vmul.f32 -1.442695, %v2088_v17  ;;  %v6630_v61 = vpop.eup %6629  ;;  %v2131_v6 = vadd.f32 1.0, %v6628_v36  ;;  %v1918_v17 = vpop.xlane.xlu0 %1917  ;;  %v2820_v19 = vsub.f32 1.0, %v2772_v38  ;;  %v2762_v48 = vmax.f32 %v2750_v54, 0.0 }
 0x2e0   :  { %v1431_v27 = vsel %vm1420_vm2, %v6630_v61, %v11800_v35  ;;  %v11801_v39 = vsub.f32 %v9505_v7, %v9513_v56  ;;  %v1934_v22 = vsel %vm628_vm1, %v1870_v62, %v1918_v17  ;;  %3809 = vrot.lane.b32.xlu1 %v11802_v5, %s7033_s11  ;;  %v11803_v61 = vld [vmem:[#allocation31_spill] sm:$0xff]  ;;  %v11805_v35 = vld [vmem:[#allocation74_spill] sm:$0xff]  ;;  %v11806_v17 = vsub.f32 %v9524_v55, %v9526_v20 }
 0x2e1   :  { %6641 = vpow2.f32 %v5538_v41  ;;  %v1444_v46 = vsel %vm1433_vm3, %v1431_v27, %v11733_v51  ;;  %3799 = vrot.lane.b32.xlu0 %v11803_v61, %s7033_s11  ;;  %v6632_v41 = vpop.eup %6631  ;;  %v1946_v54 = vadd.f32 %v1934_v22, %v11704_v4  ;;  %v11804_v27 = vld [vmem:[#allocation113_spill] sm:$0xff]  ;;  %v2832_v5 = vmax.f32 %v2820_v19, 0.001 }
 0x2e2   :  { %6643 = vrcp.f32 %v2131_v6  ;;  %v2087_v36 = vadd.f32 %v11801_v39, %v1943_v42  ;;  %v1457_v38 = vsel %vm1446_vm4, %v1444_v46, 0.0  ;;  %v9990_v7 = vadd.f32 %v11804_v27, %v11600_v28  ;;  %v6634_v56 = vpop.eup %6633 }
 0x2e3   :  { %1469 = vst [vmem:[%s11349_s7 + $0x50] sm:$0xff] %v1457_v38  ;;  %v2134_v62 = vadd.f32 1.0, %v6632_v41  ;;  %6645 = vlog2.f32 %v2831_v31  ;;  %v2821_v42 = vsub.f32 1.0, %v9971_v29  ;;  %v2216_v46 = vsel %vm1420_vm2, %v6634_v56, %v11805_v35  ;;  %v1876_v22 = vpop.xlane.xlu0 %1875  ;;  %v1915_v38 = vpop.xlane.xlu1 %1914  ;;  %v11808_v35 = vld [vmem:[#allocation76_spill] sm:$0xff] }
 0x2e4   :  { %v5537_v6 = vmul.f32 -1.442695, %v2087_v36  ;;  %v2090_v39 = vadd.f32 %v11806_v17, %v1946_v54  ;;  %6647 = vlog2.f32 %v2784_v23  ;;  %v6636_v61 = vpop.eup %6635  ;;  %v2228_v27 = vsel %vm1433_vm3, %v2216_v46, 0.0  ;;  %v11807_v36 = vld [vmem:[#allocation34_spill] sm:$0xff] }
 0x2e5   :  { %6649 = vrcp.f32 %v2134_v62  ;;  %3803 = vrot.lane.b32.xlu0 %v11807_v36, %s7033_s11  ;;  %v2785_v31 = vmax.f32 %v9971_v29, 0.001  ;;  %v2774_v41 = vmin.f32 %v2762_v48, 1.0  ;;  %v2240_v56 = vsel %vm1446_vm4, %v2228_v27, 0.0  ;;  %v11809_v46 = vld [vmem:[#allocation70_spill] sm:$0xff] }
 0x2e6   :  { %v2214_v55 = vsel %vm1420_vm2, %v6636_v61, %v11808_v35  ;;  %6651 = vpow2.f32 %v5537_v6  ;;  %v5540_v20 = vmul.f32 -1.442695, %v2090_v39  ;;  %2252 = vst [vmem:[%s11349_s7 + $0x78] sm:$0xff] %v2240_v56  ;;  %v1933_v62 = vsel %vm628_vm1, %v1867_v50, %v1915_v38 }
 0x2e7   :  { %v6638_v51 = vpop.eup %6637  ;;  %v2226_v19 = vsel %vm1433_vm3, %v2214_v55, 0.0  ;;  %v2833_v29 = vmax.f32 %v2821_v42, 0.001  ;;  %v1945_v6 = vadd.f32 %v1933_v62, %v11704_v4  ;;  %v1924_v39 = vpop.xlane.xlu0 %1923  ;;  %v11810_v42 = vld [vmem:[#allocation36_spill] sm:$0xff]  ;;  %v2822_v27 = vsub.f32 1.0, %v2774_v41 }
 0x2e8   :  { %v6640_v23 = vpop.eup %6639  ;;  %v2133_v54 = vadd.f32 1.0, %v6638_v51  ;;  %v2238_v48 = vsel %vm1446_vm4, %v2226_v19, 0.0  ;;  %6653 = vpow2.f32 %v5540_v20  ;;  %v1936_v51 = vsel %vm628_vm1, %v1876_v22, %v1924_v39  ;;  %v1873_v50 = vpop.xlane.xlu1 %1872  ;;  %v11813_v62 = vld [vmem:[#allocation84_spill] sm:$0xff] }
 0x2e9   :  { %v2213_v17 = vsel %vm1420_vm2, %v6640_v23, %v11809_v46  ;;  %2250 = vst [vmem:[%s11349_s7 + $0x68] sm:$0xff] %v2238_v48  ;;  %3807 = vrot.lane.b32.xlu0 %v11810_v42, %s7033_s11  ;;  %v11811_v56 = vsub.f32 %v9529_v14, %v9531_v24  ;;  %v1948_v55 = vadd.f32 %v1936_v51, %v11704_v4  ;;  %v11812_v23 = vld [vmem:[#allocation75_spill] sm:$0xff] }
 0x2ea   :  { %v2225_v61 = vsel %vm1433_vm3, %v2213_v17, 0.0  ;;  %6655 = vrcp.f32 %v2133_v54  ;;  %v10034_v19 = vadd.f32 %v11812_v23, %v11600_v28  ;;  %v2786_v54 = vmax.f32 %v2774_v41, 0.001 }
 0x2eb   :  { %v6642_v38 = vpop.eup %6641  ;;  %v2237_v36 = vsel %vm1446_vm4, %v2225_v61, 0.0  ;;  %v2089_v35 = vadd.f32 %v11811_v56, %v1945_v6  ;;  %6657 = vlog2.f32 %v2832_v5  ;;  %v11814_v24 = vsub.f32 %v9550_v49, %v9555_v10  ;;  %v2684_v46 = vpop.xlane.xlu0 %2683  ;;  %v11815_v61 = vld [vmem:[#allocation38_spill] sm:$0xff] }
 0x2ec   :  { %v6644_v20 = vpop.eup %6643  ;;  %2249 = vst [vmem:[%s11349_s7 + $0x60] sm:$0xff] %v2237_v36  ;;  %v2136_v22 = vadd.f32 1.0, %v6642_v38  ;;  %6659 = vlog2.f32 %v2785_v31  ;;  %v1921_v39 = vpop.xlane.xlu1 %1920  ;;  %v11460_v31 = vmax.f32 %v9990_v7, 0.0  ;;  %v2834_v41 = vmax.f32 %v2822_v27, 0.001 }
 0x2ed   :  { %v2215_v48 = vsel %vm1420_vm2, %v6644_v20, %v11813_v62  ;;  %v5539_v14 = vmul.f32 -1.442695, %v2089_v35  ;;  %v2092_v5 = vadd.f32 %v11814_v24, %v1948_v55  ;;  %6661 = vlog2.f32 %v2833_v29  ;;  %v10041_v17 = vpop.eup %6645  ;;  %3811 = vrot.lane.b32.xlu0 %v11815_v61, %s7033_s11  ;;  %v11817_v55 = vld [vmem:[#allocation91_spill] sm:$0xff] }
 0x2ee   :  { %v2227_v6 = vsel %vm1433_vm3, %v2215_v48, 0.0  ;;  %6663 = vrcp.f32 %v2136_v22  ;;  %v10047_v51 = vpop.eup %6647  ;;  %v1935_v10 = vsel %vm628_vm1, %v1873_v50, %v1921_v39  ;;  %v4238_v36 = vmul.f32 %v11461_v44, %v11741_v47 }
 0x2ef   :  { %v2239_v42 = vsel %vm1446_vm4, %v2227_v6, 0.0  ;;  %6665 = vpow2.f32 %v5539_v14  ;;  %v5542_v49 = vmul.f32 -1.442695, %v2092_v5  ;;  %v6650_v29 = vpop.eup %6649  ;;  %v1947_v38 = vadd.f32 %v1935_v10, %v11704_v4  ;;  %v2633_v20 = vpop.xlane.xlu0 %2632 }
 0x2f0   :  { %2251 = vst [vmem:[%s11349_s7 + $0x70] sm:$0xff] %v2239_v42  ;;  %v11816_v27 = vmax.f32 %v9917_v21, 0.0  ;;  %6667 = vlog2.f32 %v2786_v54  ;;  %v6652_v35 = vpop.eup %6651  ;;  %v2218_v50 = vsel %vm1420_vm2, %v6650_v29, %v11817_v55  ;;  %v10064_v22 = vmul.f32 0.6931472, %v9853_v8  ;;  %v2636_v5 = vpop.xlane.xlu1 %2635 }
 0x2f1   :  { %6669 = vpow2.f32 %v5542_v49  ;;  %v11459_v23 = vmax.f32 %v10034_v19, 0.0  ;;  %v2230_v62 = vsel %vm1433_vm3, %v2218_v50, 0.0  ;;  %v2135_v48 = vadd.f32 1.0, %v6652_v35  ;;  %v10095_v50 = vpop.f32.mrb[60].mxu1 }
 0x2f2   :  { %v4241_v56 = vmul.f32 %v11816_v27, %v11741_v47  ;;  %v11818_v14 = vsub.f32 %v9568_v57, %v9570_v63  ;;  %6671 = vlog2.f32 %v2834_v41  ;;  %v6654_v54 = vpop.eup %6653  ;;  %v2242_v6 = vsel %vm1446_vm4, %v2230_v62, 0.0 }
 0x2f3   :  { %v2716_v39 = vsel %vm628_vm1, %v2636_v5, %v2684_v46  ;;  %v11819_v8 = vmax.f32 %v9968_v15, 0.0  ;;  %v4243_v42 = vmul.f32 %v11460_v31, %v11741_v47  ;;  %2254 = vst [vmem:[%s11349_s7 + $0x88] sm:$0xff] %v2242_v6  ;;  %6673 = vrcp.f32 %v2135_v48  ;;  %v11820_v46 = vld [vmem:[#allocation86_spill] sm:$0xff] }
 0x2f4   :  { %v2091_v24 = vadd.f32 %v11818_v14, %v1947_v38  ;;  %v6656_v49 = vpop.eup %6655  ;;  %v2138_v57 = vadd.f32 1.0, %v6654_v54  ;;  %v2728_v41 = vadd.f32 %v2716_v39, %v11704_v4  ;;  %v2642_v38 = vpop.xlane.xlu0 %2641  ;;  %v10087_v27 = vsel %vm609_vm0, %v9876_v58, 0.0 }
 0x2f5   :  { %v4240_v61 = vmul.f32 %v11819_v8, %v11741_v47  ;;  %v6658_v10 = vpop.eup %6657  ;;  %v2217_v29 = vsel %vm1420_vm2, %v6656_v49, %v11820_v46  ;;  %v4242_v35 = vmul.f32 %v11459_v23, %v11741_v47  ;;  %v10093_v55 = vsel %vm609_vm0, %v4241_v56, 0.0  ;;  %v2681_v5 = vpop.xlane.xlu1 %2680 }
 0x2f6   :  { %v5541_v63 = vmul.f32 -1.442695, %v2091_v24  ;;  %v6660_v62 = vpop.eup %6659  ;;  %v2229_v48 = vsel %vm1433_vm3, %v2217_v29, 0.0  ;;  %6675 = vrcp.f32 %v2138_v57  ;;  %v11821_v14 = vsub.f32 %v9573_v33, %v9576_v59  ;;  %v10104_v54 = vpop.f32.mrb[61].mxu1 }
 0x2f7   :  { %v10102_v58 = vsel %vm609_vm0, %v4238_v36, 0.0  ;;  %v6662_v6 = vpop.eup %6661  ;;  %v2241_v56 = vsel %vm1446_vm4, %v2229_v48, 0.0  ;;  %v2715_v39 = vsel %vm628_vm1, %v2633_v20, %v2681_v5  ;;  %v10109_v8 = vsel %vm609_vm0, %v4243_v42, 0.0  ;;  %v10111_v49 = vpop.f32.mrb[62].mxu1 }
 0x2f8   :  { %v2872_v24 = vadd.f32 %v11821_v14, %v2728_v41  ;;  %6677 = vpow2.f32 %v5541_v63  ;;  %v6664_v57 = vpop.eup %6663  ;;  %2253 = vst [vmem:[%s11349_s7 + $0x80] sm:$0xff] %v2241_v56  ;;  %v2727_v59 = vadd.f32 %v2715_v39, %v11704_v4  ;;  %v10118_v36 = vsel %vm609_vm0, %v4240_v61, 0.0  ;;  %v10124_v20 = vpop.f32.mrb[63].mxu1  ;;  %v11822_v41 = vld [vmem:[#allocation95_spill] sm:$0xff] }
 0x2f9   :  { %v10122_v63 = vsel %vm609_vm0, %v9728_v0, 0.0  ;;  %v6666_v42 = vpop.eup %6665  ;;  %v2220_v46 = vsel %vm1420_vm2, %v6664_v57, %v11822_v41  ;;  %v2690_v29 = vpop.xlane.xlu0 %2689  ;;  %v10129_v48 = vmul.f32 0.6931472, %v10041_v17  ;;  %v10132_v14 = vsel %vm609_vm0, %v4242_v35, 0.0 }
 0x2fa   :  { %v5568_v33 = vmul.f32 -1.442695, %v2872_v24  ;;  %v10136_v61 = vsel %vm609_vm0, %v9812_v26, 0.0  ;;  %v10138_v24 = vpop.f32.mrb[64].mxu1  ;;  %v6668_v0 = vpop.eup %6667  ;;  %v2232_v5 = vsel %vm1433_vm3, %v2220_v46, 0.0  ;;  %v2137_v56 = vadd.f32 1.0, %v6666_v42 }
 0x2fb   :  { %11823 = vst [vmem:[#allocation80_spill] sm:$0xff] %v10138_v24  ;;  %v11824_v39 = vsub.f32 %v9581_v32, %v9606_v43  ;;  %v2687_v17 = vpop.xlane.xlu1 %2686  ;;  %v10144_v41 = vpop.f32.mrb[65].mxu1  ;;  %v2244_v23 = vsel %vm1446_vm4, %v2232_v5, 0.0  ;;  %v2718_v26 = vsel %vm628_vm1, %v2642_v38, %v2690_v29  ;;  %v10149_v31 = vmul.f32 0.6931472, %v10047_v51 }
 0x2fc   :  { %6679 = vpow2.f32 %v5568_v33  ;;  %v6670_v35 = vpop.eup %6669  ;;  %v10151_v44 = vmul.f32 0.6931472, %v6658_v10  ;;  %v10153_v46 = vpop.f32.mrb[66].mxu1  ;;  %2256 = vst [vmem:[%s11349_s7 + $0x98] sm:$0xff] %v2244_v23  ;;  %v11827_v51 = vmax.f32 %v9917_v21, 0.0  ;;  %v5625_v23 = vld [vmem:[%s11347_s2 + $0x128] sm:$0xff]  ;;  %v11829_v21 = vsub.f32 %v9625_v40, %v9650_v1 }
 0x2fd   :  { %v2871_v57 = vadd.f32 %v11824_v39, %v2727_v59  ;;  %11825 = vst [vmem:[#allocation10_spill] sm:$0xff] %v10153_v46  ;;  %v6672_v33 = vpop.eup %6671  ;;  %6681 = vrcp.f32 %v2137_v56  ;;  %v2140_v32 = vadd.f32 1.0, %v6670_v35  ;;  %v2730_v59 = vadd.f32 %v2718_v26, %v11704_v4  ;;  %v10159_v42 = vpop.f32.mrb[67].mxu1  ;;  %v11831_v46 = vld [vmem:[#allocation93_spill] sm:$0xff]  ;;  %v5626_v40 = vld [vmem:[%s11347_s2 + $0x130] sm:$0xff] }
 0x2fe   :  { %11826 = vst [vmem:[#allocation82_spill] sm:$0xff] %v10159_v42  ;;  %v2639_v38 = vpop.xlane.xlu0 %2638  ;;  %v10164_v10 = vmul.f32 %v11827_v51, %v11751_v30  ;;  %v10168_v5 = vmul.f32 0.6931472, %v6660_v62  ;;  %v10170_v39 = vmul.f32 0.6931472, %v6662_v6  ;;  %v10175_v56 = vpop.f32.mrb[68].mxu1 }
 0x2ff   :  { %v5567_v43 = vmul.f32 -1.442695, %v2871_v57  ;;  %11828 = vst [vmem:[#allocation18_spill] sm:$0xff] %v10175_v56  ;;  %v6674_v57 = vpop.eup %6673  ;;  %6683 = vrcp.f32 %v2140_v32  ;;  %v2874_v35 = vadd.f32 %v11829_v21, %v2730_v59  ;;  %v2717_v26 = vsel %vm628_vm1, %v2639_v38, %v2687_v17  ;;  %v2645_v51 = vpop.xlane.xlu1 %2644  ;;  %v5633_v62 = vld [vmem:[%s11347_s2 + $0x168] sm:$0xff] }
 0x300   :  { %v10181_v29 = vmul.f32 0.6931472, %v6668_v0  ;;  %v10186_v6 = vpop.f32.mrb[69].mxu1  ;;  %v2219_v56 = vsel %vm1420_vm2, %v6674_v57, %v11831_v46  ;;  %v2729_v32 = vadd.f32 %v2717_v26, %v11704_v4  ;;  %v10191_v24 = vmul.f32 0.6931472, %v6672_v33  ;;  %v6676_v1 = vpop.eup %6675  ;;  %v11833_v33 = vld [vmem:[#allocation97_spill] sm:$0xff] }
 0x301   :  { %11830 = vst [vmem:[#allocation14_spill] sm:$0xff] %v10186_v6  ;;  %6685 = vpow2.f32 %v5567_v43  ;;  %v2231_v0 = vsel %vm1433_vm3, %v2219_v56, 0.0  ;;  %v5570_v17 = vmul.f32 -1.442695, %v2874_v35  ;;  %v10199_v59 = vsel %vm609_vm0, %v9733_v11, 0.0  ;;  %v10201_v21 = vpop.f32.mrb[70].mxu1 }
 0x302   :  { %v3574_v38 = vmax.f32 %v5625_v23, 0.0  ;;  %11832 = vst [vmem:[#allocation20_spill] sm:$0xff] %v10201_v21  ;;  %v6678_v46 = vpop.eup %6677  ;;  %v2243_v43 = vsel %vm1446_vm4, %v2231_v0, 0.0  ;;  %v2222_v57 = vsel %vm1420_vm2, %v6676_v1, %v11833_v33  ;;  %v11834_v26 = vsub.f32 %v9639_v25, %v9682_v16  ;;  %v2648_v42 = vpop.xlane.xlu0 %2647 }
 0x303   :  { %v3582_v56 = vmax.f32 %v5633_v62, 0.0  ;;  %v10209_v35 = vpop.f32.mrb[71].mxu1  ;;  %2255 = vst [vmem:[%s11349_s7 + $0x90] sm:$0xff] %v2243_v43  ;;  %v2234_v11 = vsel %vm1433_vm3, %v2222_v57, 0.0  ;;  %v2139_v23 = vadd.f32 1.0, %v6678_v46  ;;  %6687 = vpow2.f32 %v5570_v17  ;;  %v2693_v0 = vpop.xlane.xlu1 %2692  ;;  %v10222_v62 = vld [vmem:[%s11347_s2 + $0x120] sm:$0xff] }
 0x304   :  { %v2873_v6 = vadd.f32 %v11834_v26, %v2729_v32  ;;  %11835 = vst [vmem:[#allocation7_spill] sm:$0xff] %v10209_v35  ;;  %v3575_v21 = vmax.f32 %v5626_v40, 0.0  ;;  %v2246_v1 = vsel %vm1446_vm4, %v2234_v11, 0.0  ;;  %v2719_v25 = vsel %vm628_vm1, %v2645_v51, %v2693_v0  ;;  %v5635_v26 = vld [vmem:[%s11347_s2 + $0x178] sm:$0xff]  ;;  %v11838_v43 = vld [vmem:[#allocation96_spill] sm:$0xff] }
 0x305   :  { %2258 = vst [vmem:[%s11349_s7 + $0xa8] sm:$0xff] %v2246_v1  ;;  %6689 = vrcp.f32 %v2139_v23  ;;  %v2731_v40 = vadd.f32 %v2719_v25, %v11704_v4  ;;  %v10230_v51 = vmin.f32 %v3574_v38, 1.0  ;;  %v3594_v57 = vmin.f32 %v3582_v56, 1.0  ;;  %v11837_v38 = vld [vmem:[#allocation13_spill] sm:$0xff] }
 0x306   :  { %v5569_v33 = vmul.f32 -1.442695, %v2873_v6  ;;  %v6680_v32 = vpop.eup %6679  ;;  %v2696_v46 = vpop.xlane.xlu0 %2695  ;;  %v11836_v23 = vsub.f32 %v9713_v12, %v9741_v60  ;;  %4245 = vadd.xlane.f32.xlu1 %v11837_v38  ;;  %v10260_v38 = vld [vmem:[%s11347_s2 + $0x140] sm:$0xff] }
 0x307   :  { %v2920_v17 = vadd.f32 1.0, %v6680_v32  ;;  %v6682_v11 = vpop.eup %6681  ;;  %v2720_v1 = vsel %vm628_vm1, %v2648_v42, %v2696_v46  ;;  %v2651_v25 = vpop.xlane.xlu1 %2650  ;;  %v3573_v32 = vmax.f32 %v10222_v62, 0.0  ;;  %v3598_v16 = vmax.f32 %v10230_v51, 0.001 }
 0x308   :  { %6691 = vpow2.f32 %v5569_v33  ;;  %v2875_v0 = vadd.f32 %v11836_v23, %v2731_v40  ;;  %v10242_v33 = vmin.f32 %v3575_v21, 1.0  ;;  %v2221_v56 = vsel %vm1420_vm2, %v6682_v11, %v11838_v43  ;;  %v11839_v23 = vld [vmem:[#allocation2_spill] sm:$0xff] }
 0x309   :  { %6693 = vrcp.f32 %v2920_v17  ;;  %v2732_v6 = vadd.f32 %v2720_v1, %v11704_v4  ;;  %v6684_v35 = vpop.eup %6683  ;;  %v2233_v12 = vsel %vm1433_vm3, %v2221_v56, 0.0  ;;  %v3634_v42 = vsub.f32 1.0, %v10230_v51 }
 0x30a   :  { %v5571_v60 = vmul.f32 -1.442695, %v2875_v0  ;;  %v3584_v40 = vmax.f32 %v5635_v26, 0.0  ;;  %v2245_v21 = vsel %vm1446_vm4, %v2233_v12, 0.0  ;;  %v2224_v62 = vsel %vm1420_vm2, %v6684_v35, %v11839_v23  ;;  %v2654_v11 = vpop.xlane.xlu0 %2653  ;;  %v11841_v35 = vld [vmem:[#allocation78_spill] sm:$0xff] }
 0x30b   :  { %v6686_v46 = vpop.eup %6685  ;;  %v11840_v17 = vsub.f32 %v9758_v37, %v9815_v13  ;;  %v3642_v1 = vsub.f32 1.0, %v3594_v57  ;;  %2257 = vst [vmem:[%s11349_s7 + $0xa0] sm:$0xff] %v2245_v21  ;;  %v2236_v51 = vsel %vm1433_vm3, %v2224_v62, 0.0  ;;  %4254 = vadd.xlane.f32.xlu1 %v11841_v35  ;;  %v2699_v0 = vpop.xlane.xlu1 %2698  ;;  %v3606_v37 = vmax.f32 %v3594_v57, 0.001  ;;  %v11842_v57 = vld [vmem:[#allocation110_spill] sm:$0xff] }
 0x30c   :  { %v2919_v26 = vadd.f32 1.0, %v6686_v46  ;;  %6695 = vpow2.f32 %v5571_v60  ;;  %v2248_v13 = vsel %vm1446_vm4, %v2236_v51, 0.0  ;;  %v2721_v56 = vsel %vm628_vm1, %v2651_v25, %v2699_v0  ;;  %4248 = vadd.xlane.f32.xlu0 %v11842_v57  ;;  %v11846_v57 = vld [vmem:[#allocation116_spill] sm:$0xff] }
 0x30d   :  { %v2876_v43 = vadd.f32 %v11840_v17, %v2732_v6  ;;  %6697 = vlog2.f32 %v3598_v16  ;;  %v6688_v12 = vpop.eup %6687  ;;  %2260 = vst [vmem:[%s11349_s7 + $0xb8] sm:$0xff] %v2248_v13  ;;  %v2733_v21 = vadd.f32 %v2721_v56, %v11704_v4  ;;  %v3596_v46 = vmin.f32 %v3584_v40, 1.0  ;;  %v11844_v13 = vld [vmem:[#allocation98_spill] sm:$0xff] }
 0x30e   :  { %6699 = vrcp.f32 %v2919_v26  ;;  %v3577_v60 = vmax.f32 %v10260_v38, 0.0  ;;  %v2922_v23 = vadd.f32 1.0, %v6688_v12  ;;  %v2702_v62 = vpop.xlane.xlu0 %2701  ;;  %v3654_v17 = vmax.f32 %v3642_v1, 0.001 }
 0x30f   :  { %v5572_v6 = vmul.f32 -1.442695, %v2876_v43  ;;  %v3635_v25 = vsub.f32 1.0, %v10242_v33  ;;  %v6690_v16 = vpop.eup %6689  ;;  %v11843_v43 = vsub.f32 %v9844_v3, %v9903_v45  ;;  %v2722_v26 = vsel %vm628_vm1, %v2654_v11, %v2702_v62  ;;  %4260 = vadd.xlane.f32.xlu1 %v9867_v18  ;;  %v2657_v40 = vpop.xlane.xlu1 %2656 }
 0x310   :  { %v10281_v35 = vmin.f32 %v3573_v32, 1.0  ;;  %v2734_v1 = vadd.f32 %v2722_v26, %v11704_v4  ;;  %v3646_v56 = vmax.f32 %v3634_v42, 0.001  ;;  %v11845_v32 = vsub.f32 %v9862_v9, %v9913_v52  ;;  %4251 = vadd.xlane.f32.xlu0 %v11846_v57  ;;  %v11847_v42 = vld [vmem:[#allocation102_spill] sm:$0xff] }
 0x311   :  { %6701 = vpow2.f32 %v5572_v6  ;;  %v2877_v51 = vadd.f32 %v11843_v43, %v2733_v21  ;;  %v2223_v6 = vsel %vm1420_vm2, %v6690_v16, %v11844_v13  ;;  %v3644_v21 = vsub.f32 1.0, %v3596_v46 }
 0x312   :  { %6703 = vlog2.f32 %v3606_v37  ;;  %v6692_v0 = vpop.eup %6691  ;;  %v2235_v12 = vsel %vm1433_vm3, %v2223_v6, 0.0  ;;  %v2878_v37 = vadd.f32 %v11845_v32, %v2734_v1  ;;  %v2660_v62 = vpop.xlane.xlu0 %2659  ;;  %v3647_v9 = vmax.f32 %v3635_v25, 0.001 }
 0x313   :  { %6705 = vrcp.f32 %v2922_v23  ;;  %v2921_v3 = vadd.f32 1.0, %v6692_v0  ;;  %v5573_v45 = vmul.f32 -1.442695, %v2877_v51  ;;  %v6694_v11 = vpop.eup %6693  ;;  %v2247_v18 = vsel %vm1446_vm4, %v2235_v12, 0.0  ;;  %4266 = vadd.xlane.f32.xlu1 %v9937_v53  ;;  %v2705_v43 = vpop.xlane.xlu1 %2704 }
 0x314   :  { %6707 = vlog2.f32 %v3654_v17  ;;  %v3599_v23 = vmax.f32 %v10242_v33, 0.001  ;;  %2259 = vst [vmem:[%s11349_s7 + $0xb0] sm:$0xff] %v2247_v18  ;;  %v3004_v16 = vsel %vm1420_vm2, %v6694_v11, %v11847_v42  ;;  %v3608_v51 = vmax.f32 %v3596_v46, 0.001  ;;  %v5627_v33 = vld [vmem:[%s11347_s2 + $0x138] sm:$0xff]  ;;  %4257 = vadd.xlane.f32.xlu0 %v10087_v27 }
 0x315   :  { %6709 = vrcp.f32 %v2921_v3  ;;  %v3016_v52 = vsel %vm1433_vm3, %v3004_v16, 0.0  ;;  %v5574_v26 = vmul.f32 -1.442695, %v2878_v37  ;;  %v2723_v17 = vsel %vm628_vm1, %v2657_v40, %v2705_v43  ;;  %v11849_v37 = vld [vmem:[#allocation109_spill] sm:$0xff] }
 0x316   :  { %6711 = vpow2.f32 %v5573_v45  ;;  %v6696_v0 = vpop.eup %6695  ;;  %v3028_v13 = vsel %vm1446_vm4, %v3016_v52, 0.0  ;;  %v2735_v6 = vadd.f32 %v2723_v17, %v11704_v4  ;;  %v3656_v53 = vmax.f32 %v3644_v21, 0.001  ;;  %v2708_v25 = vpop.xlane.xlu0 %2707  ;;  %v11851_v17 = vld [vmem:[#allocation43_spill] sm:$0xff] }
 0x317   :  { %6713 = vlog2.f32 %v3646_v56  ;;  %v10306_v1 = vpop.eup %6697  ;;  %3040 = vst [vmem:[%s11349_s7 + $0xc8] sm:$0xff] %v3028_v13  ;;  %v2923_v46 = vadd.f32 1.0, %v6696_v0  ;;  %v3597_v40 = vmax.f32 %v10281_v35, 0.001  ;;  %v3633_v12 = vsub.f32 1.0, %v10281_v35  ;;  %4272 = vadd.xlane.f32.xlu1 %v10093_v55  ;;  %v2663_v11 = vpop.xlane.xlu1 %2662 }
 0x318   :  { %6715 = vpow2.f32 %v5574_v26  ;;  %v6700_v3 = vpop.eup %6699  ;;  %v11848_v56 = vsub.f32 %v10064_v22, %v10129_v48  ;;  %v2724_v21 = vsel %vm628_vm1, %v2660_v62, %v2708_v25  ;;  %v3576_v18 = vmax.f32 %v5627_v33, 0.0  ;;  %4263 = vadd.xlane.f32.xlu0 %v10102_v58 }
 0x319   :  { %6717 = vlog2.f32 %v3608_v51  ;;  %v3003_v27 = vsel %vm1420_vm2, %v6700_v3, %v11849_v37  ;;  %v2736_v57 = vadd.f32 %v2724_v21, %v11704_v4  ;;  %v10324_v42 = vmin.f32 %v3577_v60, 1.0  ;;  %v5630_v60 = vld [vmem:[%s11347_s2 + $0x150] sm:$0xff] }
 0x31a   :  { %v2879_v45 = vadd.f32 %v11848_v56, %v2735_v6  ;;  %6719 = vrcp.f32 %v2923_v46  ;;  %v3015_v48 = vsel %vm1433_vm3, %v3003_v27, 0.0  ;;  %v11850_v51 = vsub.f32 %v10149_v31, %v10151_v44  ;;  %v2666_v26 = vpop.xlane.xlu0 %2665  ;;  %v11852_v56 = vld [vmem:[#allocation88_spill] sm:$0xff] }
 0x31b   :  { %v6702_v32 = vpop.eup %6701  ;;  %6721 = vlog2.f32 %v3656_v53  ;;  %v3027_v43 = vsel %vm1446_vm4, %v3015_v48, 0.0  ;;  %v3645_v38 = vmax.f32 %v3633_v12, 0.001  ;;  %4278 = vadd.xlane.f32.xlu1 %v10109_v8  ;;  %v2711_v44 = vpop.xlane.xlu1 %2710  ;;  %v3601_v31 = vmax.f32 %v10324_v42, 0.001 }
 0x31c   :  { %v10326_v22 = vpop.eup %6703  ;;  %v2924_v62 = vadd.f32 1.0, %v6702_v32  ;;  %v5575_v55 = vmul.f32 -1.442695, %v2879_v45  ;;  %v2880_v52 = vadd.f32 %v11850_v51, %v2736_v57  ;;  %6723 = vlog2.f32 %v3599_v23  ;;  %3039 = vst [vmem:[%s11349_s7 + $0xc0] sm:$0xff] %v3027_v43  ;;  %v5629_v23 = vld [vmem:[%s11347_s2 + $0x148] sm:$0xff]  ;;  %4269 = vadd.xlane.f32.xlu0 %v10118_v36 }
 0x31d   :  { %v6706_v16 = vpop.eup %6705  ;;  %v10344_v58 = vmin.f32 %v3576_v18, 1.0  ;;  %v2725_v53 = vsel %vm628_vm1, %v2663_v11, %v2711_v44  ;;  %v3579_v12 = vmax.f32 %v5630_v60, 0.0  ;;  %v3637_v11 = vsub.f32 1.0, %v10324_v42  ;;  %v11856_v44 = vld [vmem:[#allocation87_spill] sm:$0xff] }
 0x31e   :  { %v3006_v33 = vsel %vm1420_vm2, %v6706_v16, %v11851_v17  ;;  %6725 = vrcp.f32 %v2924_v62  ;;  %v10349_v0 = vpop.eup %6707  ;;  %v5576_v6 = vmul.f32 -1.442695, %v2880_v52  ;;  %v2737_v25 = vadd.f32 %v2725_v53, %v11704_v4  ;;  %v2714_v21 = vpop.xlane.xlu0 %2713 }
 0x31f   :  { %v3018_v13 = vsel %vm1433_vm3, %v3006_v33, 0.0  ;;  %6727 = vpow2.f32 %v5575_v55  ;;  %v6710_v46 = vpop.eup %6709  ;;  %v3578_v18 = vmax.f32 %v5629_v23, 0.0  ;;  %v11853_v27 = vsub.f32 %v10168_v5, %v10170_v39  ;;  %4296 = vadd.xlane.f32.xlu1 %v10122_v63  ;;  %v10370_v62 = vpop.xlane.xlu1 %3448 }
 0x320   :  { %v3030_v8 = vsel %vm1446_vm4, %v3018_v13, 0.0  ;;  %6729 = vlog2.f32 %v3647_v9  ;;  %v6712_v3 = vpop.eup %6711  ;;  %v3005_v45 = vsel %vm1420_vm2, %v6710_v46, %v11852_v56  ;;  %v2726_v48 = vsel %vm628_vm1, %v2666_v26, %v2714_v21  ;;  %4275 = vadd.xlane.f32.xlu0 %v10132_v14  ;;  %v11855_v26 = vld [vmem:[#allocation115_spill] sm:$0xff] }
 0x321   :  { %3042 = vst [vmem:[%s11349_s7 + $0xd8] sm:$0xff] %v3030_v8  ;;  %6731 = vpow2.f32 %v5576_v6  ;;  %v10362_v32 = vpop.eup %6713  ;;  %v3017_v9 = vsel %vm1433_vm3, %v3005_v45, 0.0  ;;  %v2925_v37 = vadd.f32 1.0, %v6712_v3  ;;  %v2881_v57 = vadd.f32 %v11853_v27, %v2737_v25  ;;  %v11857_v56 = vld [vmem:[#allocation51_spill] sm:$0xff] }
 0x322   :  { %v6716_v36 = vpop.eup %6715  ;;  %v3029_v55 = vsel %vm1446_vm4, %v3017_v9, 0.0  ;;  %v2738_v42 = vadd.f32 %v2726_v48, %v11704_v4  ;;  %6733 = vlog2.f32 %v3597_v40  ;;  %v3636_v16 = vsub.f32 1.0, %v10344_v58  ;;  %v5632_v4 = vld [vmem:[%s11347_s2 + $0x160] sm:$0xff]  ;;  %v10391_v52 = vpop.xlane.xlu0 %3445 }
 0x323   :  { %v10377_v43 = vpop.eup %6717  ;;  %3041 = vst [vmem:[%s11349_s7 + $0xd0] sm:$0xff] %v3029_v55  ;;  %6735 = vrcp.f32 %v2925_v37  ;;  %v2926_v63 = vadd.f32 1.0, %v6716_v36  ;;  %v5577_v5 = vmul.f32 -1.442695, %v2881_v57  ;;  %v10382_v39 = vmin.f32 %v3579_v12, 1.0  ;;  %4302 = vadd.xlane.f32.xlu1 %v10136_v61  ;;  %v10400_v13 = vpop.xlane.xlu1 %3457  ;;  %v5634_v12 = vld [vmem:[%s11347_s2 + $0x170] sm:$0xff] }
 0x324   :  { %v6720_v51 = vpop.eup %6719  ;;  %v11854_v35 = vsub.f32 %v10181_v29, %v10191_v24  ;;  %v4307_v60 = vsel %vm609_vm0, %v11855_v26, 0.0  ;;  %6737 = vlog2.f32 %v3645_v38  ;;  %v3649_v17 = vmax.f32 %v3637_v11, 0.001  ;;  %v5631_v29 = vld [vmem:[%s11347_s2 + $0x158] sm:$0xff]  ;;  %4293 = vadd.xlane.f32.xlu0 %v10199_v59 }
 0x325   :  { %v10395_v33 = vpop.eup %6721  ;;  %v3007_v23 = vsel %vm1420_vm2, %v6720_v51, %v11856_v44  ;;  %6739 = vrcp.f32 %v2926_v63  ;;  %v3600_v24 = vmax.f32 %v10344_v58, 0.001  ;;  %v10403_v14 = vmin.f32 %v3578_v18, 1.0 }
 0x326   :  { %v2882_v40 = vadd.f32 %v11854_v35, %v2738_v42  ;;  %v10408_v38 = vpop.eup %6723  ;;  %v3019_v6 = vsel %vm1433_vm3, %v3007_v23, 0.0  ;;  %6741 = vpow2.f32 %v5577_v5  ;;  %v3581_v46 = vmax.f32 %v5632_v4, 0.0  ;;  %v10422_v21 = vpop.xlane.xlu0 %3451 }
 0x327   :  { %v3031_v61 = vsel %vm1446_vm4, %v3019_v6, 0.0  ;;  %6743 = vlog2.f32 %v3601_v31  ;;  %v3648_v25 = vmax.f32 %v3636_v16, 0.001  ;;  %v3639_v58 = vsub.f32 1.0, %v10382_v39  ;;  %4308 = vadd.xlane.f32.xlu1 %v4307_v60  ;;  %v10428_v27 = vpop.xlane.xlu1 %3463  ;;  %v11858_v16 = vld [vmem:[#allocation111_spill] sm:$0xff]  ;;  %v11861_v6 = vld [vmem:[#allocation42_spill] sm:$0xff] }
 0x328   :  { %v5578_v53 = vmul.f32 -1.442695, %v2882_v40  ;;  %v6726_v8 = vpop.eup %6725  ;;  %3043 = vst [vmem:[%s11349_s7 + $0xe0] sm:$0xff] %v3031_v61  ;;  %v3603_v31 = vmax.f32 %v10382_v39, 0.001  ;;  %v3580_v11 = vmax.f32 %v5631_v29, 0.0 }
 0x329   :  { %v6728_v3 = vpop.eup %6727  ;;  %v3008_v45 = vsel %vm1420_vm2, %v6726_v8, %v11857_v56  ;;  %v3638_v57 = vsub.f32 1.0, %v10403_v14  ;;  %v3593_v59 = vmin.f32 %v3581_v46, 1.0  ;;  %v3583_v55 = vmax.f32 %v5634_v12, 0.0 }
 0x32a   :  { %6745 = vpow2.f32 %v5578_v53  ;;  %v10425_v18 = vpop.eup %6729  ;;  %v3020_v9 = vsel %vm1433_vm3, %v3008_v45, 0.0  ;;  %v2927_v37 = vadd.f32 1.0, %v6728_v3  ;;  %v4298_v63 = vsel %vm609_vm0, %v11858_v16, 0.0  ;;  %v10442_v35 = vpop.xlane.xlu0 %3454  ;;  %v11863_v3 = vld [vmem:[#allocation25_spill] sm:$0xff] }
 0x32b   :  { %6747 = vlog2.f32 %v3649_v17  ;;  %v6732_v48 = vpop.eup %6731  ;;  %v3032_v36 = vsel %vm1446_vm4, %v3020_v9, 0.0  ;;  %v3651_v5 = vmax.f32 %v3639_v58, 0.001  ;;  %v11859_v4 = vmax.f32 %v9910_v34, 0.0  ;;  %4299 = vadd.xlane.f32.xlu0 %v4298_v63  ;;  %v10451_v23 = vpop.xlane.xlu1 %3469 }
 0x32c   :  { %6749 = vlog2.f32 %v3600_v24  ;;  %3044 = vst [vmem:[%s11349_s7 + $0xe8] sm:$0xff] %v3032_v36  ;;  %v2928_v42 = vadd.f32 1.0, %v6732_v48  ;;  %v10437_v39 = vpop.eup %6733  ;;  %v4313_v40 = vsel %vm609_vm0, %v9956_v2, 0.0  ;;  %v10446_v26 = vmin.f32 %v3580_v11, 1.0 }
 0x32d   :  { %6751 = vrcp.f32 %v2927_v37  ;;  %v4286_v51 = vmul.f32 %v11859_v4, %v11751_v30  ;;  %v6736_v60 = vpop.eup %6735  ;;  %v11860_v17 = vmax.f32 %v9990_v7, 0.0  ;;  %4314 = vadd.xlane.f32.xlu1 %v4313_v40  ;;  %v3602_v34 = vmax.f32 %v10403_v14, 0.001  ;;  %v11862_v7 = vld [vmem:[#allocation81_spill] sm:$0xff] }
 0x32e   :  { %6753 = vlog2.f32 %v3648_v25  ;;  %v3650_v24 = vmax.f32 %v3638_v57, 0.001  ;;  %v10454_v29 = vpop.eup %6737  ;;  %v3009_v2 = vsel %vm1420_vm2, %v6736_v60, %v11861_v6  ;;  %v3641_v53 = vsub.f32 1.0, %v3593_v59  ;;  %v10466_v45 = vpop.xlane.xlu0 %3460 }
 0x32f   :  { %v4291_v44 = vmul.f32 %v11860_v17, %v11751_v30  ;;  %6755 = vrcp.f32 %v2928_v42  ;;  %v3595_v46 = vmin.f32 %v3583_v55, 1.0  ;;  %v6740_v8 = vpop.eup %6739  ;;  %v3021_v61 = vsel %vm1433_vm3, %v3009_v2, 0.0  ;;  %v10478_v36 = vpop.xlane.xlu1 %3475 }
 0x330   :  { %6757 = vlog2.f32 %v3603_v31  ;;  %v4304_v25 = vsel %vm609_vm0, %v11862_v7, 0.0  ;;  %v4319_v58 = vsel %vm609_vm0, %v10164_v10, 0.0  ;;  %v6742_v14 = vpop.eup %6741  ;;  %v3033_v12 = vsel %vm1446_vm4, %v3021_v61, 0.0 }
 0x331   :  { %6759 = vlog2.f32 %v3651_v5  ;;  %v3010_v56 = vsel %vm1420_vm2, %v6740_v8, %v11863_v3  ;;  %4305 = vadd.xlane.f32.xlu0 %v4304_v25  ;;  %v3605_v31 = vmax.f32 %v3593_v59, 0.001  ;;  %v3640_v11 = vsub.f32 1.0, %v10446_v26  ;;  %v10469_v9 = vpop.eup %6743  ;;  %3045 = vst [vmem:[%s11349_s7 + $0xf0] sm:$0xff] %v3033_v12  ;;  %4320 = vadd.xlane.f32.xlu1 %v4319_v58  ;;  %v11865_v8 = vld [vmem:[#allocation5_spill] sm:$0xff] }
 0x332   :  { %v3022_v10 = vsel %vm1433_vm3, %v3010_v56, 0.0  ;;  %v11864_v37 = vmax.f32 %v9968_v15, 0.0  ;;  %v2929_v48 = vadd.f32 1.0, %v6742_v14  ;;  %6761 = vlog2.f32 %v3602_v34  ;;  %v10490_v60 = vpop.xlane.xlu0 %3466 }
 0x333   :  { %v3034_v55 = vsel %vm1446_vm4, %v3022_v10, 0.0  ;;  %6763 = vlog2.f32 %v3650_v24  ;;  %v3653_v42 = vmax.f32 %v3641_v53, 0.001  ;;  %v3643_v16 = vsub.f32 1.0, %v3595_v46  ;;  %v10493_v6 = vpop.xlane.xlu1 %3497 }
 0x334   :  { %v4288_v57 = vmul.f32 %v11864_v37, %v11751_v30  ;;  %v6746_v59 = vpop.eup %6745  ;;  %3046 = vst [vmem:[%s11349_s7 + $0xf8] sm:$0xff] %v3034_v55  ;;  %6765 = vrcp.f32 %v2929_v48  ;;  %v4310_v5 = vsel %vm609_vm0, %v4286_v51, 0.0  ;;  %v3604_v4 = vmax.f32 %v10446_v26, 0.001 }
 0x335   :  { %v10481_v63 = vpop.eup %6747  ;;  %v2930_v15 = vadd.f32 1.0, %v6746_v59  ;;  %4311 = vadd.xlane.f32.xlu0 %v4310_v5  ;;  %v4325_v17 = vsel %vm609_vm0, %v4291_v44, 0.0  ;;  %6767 = vlog2.f32 %v3605_v31  ;;  %v3652_v34 = vmax.f32 %v3640_v11, 0.001 }
 0x336   :  { %v10488_v40 = vpop.eup %6749  ;;  %4326 = vadd.xlane.f32.xlu1 %v4325_v17  ;;  %v3607_v2 = vmax.f32 %v3595_v46, 0.001  ;;  %v3655_v26 = vmax.f32 %v3643_v16, 0.001  ;;  %v11866_v44 = vmax.f32 %v10034_v19, 0.0  ;;  %v4316_v58 = vsel %vm609_vm0, %v4288_v57, 0.0  ;;  %v10505_v56 = vpop.xlane.xlu0 %3472 }
 0x337   :  { %v6752_v24 = vpop.eup %6751  ;;  %6769 = vrcp.f32 %v2930_v15  ;;  %v11867_v46 = vld [vmem:[#allocation40_spill] sm:$0xff]  ;;  %v10511_v11 = vpop.xlane.xlu1 %3503  ;;  %v11868_v15 = vld [vmem:[#allocation57_spill] sm:$0xff] }
 0x338   :  { %v6754_v53 = vpop.eup %6753  ;;  %v3011_v51 = vsel %vm1420_vm2, %v6752_v24, %v11865_v8  ;;  %6771 = vlog2.f32 %v3653_v42  ;;  %v4290_v25 = vmul.f32 %v11866_v44, %v11751_v30  ;;  %v10529_v24 = vmul.f32 0.6931472, %v10326_v22 }
 0x339   :  { %v6756_v61 = vpop.eup %6755  ;;  %v3023_v7 = vsel %vm1433_vm3, %v3011_v51, 0.0  ;;  %6773 = vlog2.f32 %v3604_v4  ;;  %4317 = vadd.xlane.f32.xlu0 %v4316_v58  ;;  %v10525_v4 = vmul.f32 0.6931472, %v10306_v1  ;;  %v10538_v44 = vmul.f32 0.6931472, %v10362_v32 }
 0x33a   :  { %v6758_v14 = vpop.eup %6757  ;;  %v3035_v12 = vsel %vm1446_vm4, %v3023_v7, 0.0  ;;  %v3012_v3 = vsel %vm1420_vm2, %v6756_v61, %v11867_v46  ;;  %6775 = vlog2.f32 %v3652_v34  ;;  %v4322_v57 = vsel %vm609_vm0, %v4290_v25, 0.0  ;;  %v10518_v59 = vpop.xlane.xlu0 %3478 }
 0x33b   :  { %v6760_v31 = vpop.eup %6759  ;;  %3047 = vst [vmem:[%s11349_s7 + $0x100] sm:$0xff] %v3035_v12  ;;  %v3024_v19 = vsel %vm1433_vm3, %v3012_v3, 0.0  ;;  %6777 = vlog2.f32 %v3607_v2  ;;  %v10520_v42 = vpop.xlane.xlu1 %3509  ;;  %v10532_v2 = vmul.f32 0.6931472, %v10349_v0  ;;  %v10541_v1 = vmul.f32 0.6931472, %v10377_v43 }
 0x33c   :  { %v3036_v10 = vsel %vm1446_vm4, %v3024_v19, 0.0  ;;  %6779 = vlog2.f32 %v3655_v26  ;;  %v6762_v37 = vpop.eup %6761  ;;  %v11869_v26 = vld [vmem:[#allocation112_spill] sm:$0xff]  ;;  %v10548_v58 = vmul.f32 0.6931472, %v10395_v33  ;;  %v10551_v12 = vmul.f32 0.6931472, %v10408_v38 }
 0x33d   :  { %3048 = vst [vmem:[%s11349_s7 + $0x108] sm:$0xff] %v3036_v10  ;;  %v6764_v48 = vpop.eup %6763  ;;  %4323 = vadd.xlane.f32.xlu0 %v4322_v57  ;;  %v3662_v43 = vmul.f32 0.6931472, %v10425_v18  ;;  %v3610_v3 = vmul.f32 0.6931472, %v10437_v39 }
 0x33e   :  { %v6766_v55 = vpop.eup %6765  ;;  %v3501_v7 = vpop.xlane.xlu0 %3500  ;;  %v3658_v10 = vmul.f32 0.6931472, %v10454_v29  ;;  %v3618_v33 = vmul.f32 0.6931472, %v10469_v9  ;;  %v3666_v57 = vmul.f32 0.6931472, %v10481_v63 }
 0x33f   :  { %v6768_v16 = vpop.eup %6767  ;;  %v3013_v5 = vsel %vm1420_vm2, %v6766_v55, %v11868_v15  ;;  %v3516_v0 = vpop.xlane.xlu1 %3515  ;;  %v3616_v15 = vmul.f32 0.6931472, %v10488_v40  ;;  %v3620_v39 = vmul.f32 0.6931472, %v6762_v37  ;;  %v3682_v37 = vsub.f32 %v10525_v4, %v10538_v44 }
 0x340   :  { %v3025_v34 = vsel %vm1433_vm3, %v3013_v5, 0.0  ;;  %v3664_v5 = vmul.f32 0.6931472, %v6754_v53  ;;  %v3534_v44 = vsel %vm628_vm1, %v10422_v21, %v10511_v11 }
 0x341   :  { %v6770_v17 = vpop.eup %6769  ;;  %v3037_v51 = vsel %vm1446_vm4, %v3025_v34, 0.0  ;;  %v3670_v34 = vmul.f32 0.6931472, %v6760_v31  ;;  %v3690_v31 = vsub.f32 %v10529_v24, %v10532_v2  ;;  %v3532_v2 = vsel %vm628_vm1, %v10391_v52, %v10493_v6 }
 0x342   :  { %v6772_v8 = vpop.eup %6771  ;;  %v3014_v61 = vsel %vm1420_vm2, %v6770_v17, %v11869_v26  ;;  %3049 = vst [vmem:[%s11349_s7 + $0x110] sm:$0xff] %v3037_v51  ;;  %v3507_v55 = vpop.xlane.xlu0 %3506  ;;  %v3622_v17 = vmul.f32 0.6931472, %v6758_v14  ;;  %v3668_v51 = vmul.f32 0.6931472, %v6764_v48  ;;  %v11870_v26 = vld [vmem:[#allocation9_spill] sm:$0xff]  ;;  %v3692_v48 = vsub.f32 %v10541_v1, %v10548_v58 }
 0x343   :  { %v6774_v25 = vpop.eup %6773  ;;  %v3026_v22 = vsel %vm1433_vm3, %v3014_v61, 0.0  ;;  %v3522_v18 = vpop.xlane.xlu1 %3521  ;;  %v10565_v61 = vmul.f32 0.6931472, %v6768_v16  ;;  %v10567_v29 = vmul.f32 0.6931472, %v6772_v8  ;;  %v3683_v16 = vsub.f32 %v10551_v12, %v3662_v43  ;;  %v11871_v8 = vld [vmem:[#allocation47_spill] sm:$0xff] }
 0x344   :  { %v6776_v46 = vpop.eup %6775  ;;  %v3038_v32 = vsel %vm1446_vm4, %v3026_v22, 0.0  ;;  %v10569_v9 = vmul.f32 0.6931472, %v6774_v25  ;;  %v3681_v25 = vsub.f32 %v3610_v3, %v3658_v10  ;;  %v3536_v12 = vsel %vm628_vm1, %v10400_v13, %v10520_v42  ;;  %v11872_v13 = vld [vmem:[#allocation55_spill] sm:$0xff] }
 0x345   :  { %v6778_v19 = vpop.eup %6777  ;;  %3050 = vst [vmem:[%s11349_s7 + $0x118] sm:$0xff] %v3038_v32  ;;  %v10571_v63 = vmul.f32 0.6931472, %v6776_v46  ;;  %v3685_v46 = vsub.f32 %v3618_v33, %v3666_v57  ;;  %v3684_v32 = vsub.f32 %v3616_v15, %v3664_v5  ;;  %v3533_v43 = vsel %vm628_vm1, %v10370_v62, %v3501_v7 }
 0x346   :  { %v6780_v38 = vpop.eup %6779  ;;  %v10573_v22 = vmul.f32 0.6931472, %v6778_v19  ;;  %v3513_v53 = vpop.xlane.xlu0 %3512  ;;  %v3687_v19 = vsub.f32 %v3622_v17, %v3670_v34  ;;  %v3538_v10 = vsel %vm628_vm1, %v10428_v27, %v3516_v0  ;;  %v3535_v33 = vsel %vm628_vm1, %v10442_v35, %v3507_v55 }
 0x347   :  { %4582 = vrot.lane.b32.xlu1 %v11870_v26, %s7033_s11  ;;  %v10575_v40 = vmul.f32 0.6931472, %v6780_v38  ;;  %v3528_v14 = vpop.xlane.xlu1 %3527  ;;  %v3686_v38 = vsub.f32 %v3620_v39, %v3668_v51  ;;  %v3689_v26 = vsub.f32 %v10565_v61, %v10567_v29  ;;  %v3688_v24 = vsub.f32 %v10569_v9, %v10571_v63  ;;  %v11873_v61 = vld [vmem:[#allocation59_spill] sm:$0xff]  ;;  %v11874_v29 = vld [vmem:[#allocation41_spill] sm:$0xff] }
 0x348   :  { %v3540_v52 = vsel %vm628_vm1, %v10451_v23, %v3522_v18  ;;  %v3537_v21 = vsel %vm628_vm1, %v10466_v45, %v3513_v53 }
 0x349   :  { %v3691_v4 = vsub.f32 %v10573_v22, %v10575_v40  ;;  %v3542_v22 = vsel %vm628_vm1, %v10478_v36, %v3528_v14  ;;  %v11875_v36 = vld [vmem:[#allocation46_spill] sm:$0xff] }
 0x34a   :  { %v3519_v3 = vpop.xlane.xlu0 %3518 }
 0x34b   :  { %4584 = vrot.lane.b32.xlu1 %v11871_v8, %s7033_s11  ;;  %v10611_v6 = vpop.permute.xlu1 %3545  ;;  %v3539_v35 = vsel %vm628_vm1, %v10490_v60, %v3519_v3 }
 0x34c   :  { %v3549_v62 = vadd.f32 %v10611_v6, %v3533_v43  ;;  %v3550_v11 = vadd.f32 %v10611_v6, %v3534_v44  ;;  %v3548_v27 = vadd.f32 %v10611_v6, %v3532_v2  ;;  %v3552_v42 = vadd.f32 %v10611_v6, %v3536_v12 }
 0x34d   :  { %v3551_v23 = vadd.f32 %v10611_v6, %v3535_v33  ;;  %v3554_v45 = vadd.f32 %v10611_v6, %v3538_v10  ;;  %v3553_v7 = vadd.f32 %v10611_v6, %v3537_v21  ;;  %v3556_v39 = vadd.f32 %v10611_v6, %v3540_v52  ;;  %v11876_v10 = vld [vmem:[#allocation52_spill] sm:$0xff] }
 0x34e   :  { %v3525_v0 = vpop.xlane.xlu0 %3524  ;;  %v3694_v57 = vadd.f32 %v3682_v37, %v3549_v62  ;;  %v3695_v55 = vadd.f32 %v3683_v16, %v3550_v11  ;;  %v3693_v15 = vadd.f32 %v3681_v25, %v3548_v27  ;;  %v3697_v5 = vadd.f32 %v3685_v46, %v3552_v42 }
 0x34f   :  { %4588 = vrot.lane.b32.xlu1 %v11872_v13, %s7033_s11  ;;  %v3541_v17 = vsel %vm628_vm1, %v10505_v56, %v3525_v0  ;;  %v3696_v18 = vadd.f32 %v3684_v32, %v3551_v23  ;;  %v3699_v34 = vadd.f32 %v3687_v19, %v3554_v45  ;;  %v3698_v53 = vadd.f32 %v3686_v38, %v3553_v7  ;;  %v10641_v12 = vpop.permute.xlu1 %3791 }
 0x350   :  { %v3557_v60 = vadd.f32 %v10611_v6, %v3541_v17  ;;  %v5637_v51 = vmul.f32 -1.442695, %v3694_v57  ;;  %v5638_v9 = vmul.f32 -1.442695, %v3695_v55  ;;  %v5636_v63 = vmul.f32 -1.442695, %v3693_v15 }
 0x351   :  { %v5640_v40 = vmul.f32 -1.442695, %v3697_v5  ;;  %v5639_v56 = vmul.f32 -1.442695, %v3696_v18  ;;  %v5642_v8 = vmul.f32 -1.442695, %v3699_v34  ;;  %v3555_v25 = vadd.f32 %v10611_v6, %v3539_v35 }
 0x352   :  { %v3702_v37 = vadd.f32 %v3690_v31, %v3557_v60  ;;  %6781 = vpow2.f32 %v5637_v51  ;;  %v3531_v16 = vpop.xlane.xlu0 %3530  ;;  %v3701_v32 = vadd.f32 %v3689_v26, %v3556_v39  ;;  %v3558_v19 = vadd.f32 %v10611_v6, %v3542_v22 }
 0x353   :  { %4592 = vrot.lane.b32.xlu1 %v11873_v61, %s7033_s11  ;;  %4580 = vrot.lane.b32.xlu0 %v11874_v29, %s7033_s11  ;;  %v3543_v46 = vsel %vm628_vm1, %v10518_v59, %v3531_v16  ;;  %6783 = vpow2.f32 %v5638_v9  ;;  %v3700_v14 = vadd.f32 %v3688_v24, %v3555_v25  ;;  %v5641_v31 = vmul.f32 -1.442695, %v3698_v53  ;;  %v3794_v21 = vpop.permute.xlu1 %3793 }
 0x354   :  { %v5645_v2 = vmul.f32 -1.442695, %v3702_v37  ;;  %v3559_v44 = vadd.f32 %v10611_v6, %v3543_v46  ;;  %6785 = vpow2.f32 %v5636_v63  ;;  %v3703_v38 = vadd.f32 %v3691_v4, %v3558_v19  ;;  %v11877_v46 = vld [vmem:[#allocation82_spill] sm:$0xff] }
 0x355   :  { %6787 = vpow2.f32 %v5640_v40  ;;  %v5644_v43 = vmul.f32 -1.442695, %v3701_v32  ;;  %v5643_v24 = vmul.f32 -1.442695, %v3700_v14  ;;  %v10656_v7 = vadd.f32 %v10095_v50, %v11600_v28 }
 0x356   :  { %6789 = vpow2.f32 %v5645_v2  ;;  %v3704_v59 = vadd.f32 %v3692_v48, %v3559_v44  ;;  %v10646_v26 = vpop.permute.xlu0 %3789  ;;  %v5646_v33 = vmul.f32 -1.442695, %v3703_v38  ;;  %v10660_v15 = vadd.f32 %v10104_v54, %v11600_v28 }
 0x357   :  { %4586 = vrot.lane.b32.xlu0 %v11875_v36, %s7033_s11  ;;  %6791 = vpow2.f32 %v5639_v56  ;;  %v3798_v57 = vpop.permute.xlu1 %3797  ;;  %v5011_v50 = vmax.f32 %v10656_v7, 0.0  ;;  %v10668_v22 = vadd.f32 %v10111_v49, %v11600_v28  ;;  %v10672_v40 = vadd.f32 %v10144_v41, %v11600_v28  ;;  %v5701_v7 = vld [vmem:[%s11347_s2 + $0x1a8] sm:$0xff] }
 0x358   :  { %v5647_v3 = vmul.f32 -1.442695, %v3704_v59  ;;  %6793 = vpow2.f32 %v5642_v8  ;;  %v5010_v9 = vmax.f32 %v10660_v15, 0.0  ;;  %v10676_v37 = vadd.f32 %v10124_v20, %v11600_v28  ;;  %v5697_v15 = vld [vmem:[%s11347_s2 + $0x188] sm:$0xff] }
 0x359   :  { %6795 = vpow2.f32 %v5641_v31  ;;  %v5023_v8 = vmul.f32 %v5011_v50, %v11741_v47  ;;  %v10690_v20 = vadd.f32 %v11877_v46, %v11600_v28  ;;  %v5013_v36 = vmax.f32 %v10668_v22, 0.0 }
 0x35a   :  { %6797 = vpow2.f32 %v5647_v3  ;;  %v10650_v4 = vpop.permute.xlu0 %3795  ;;  %v10686_v41 = vmul.f32 %v5010_v9, %v11741_v47  ;;  %v5014_v14 = vmax.f32 %v10672_v40, 0.0  ;;  %v5696_v40 = vld [vmem:[%s11347_s2 + $0x180] sm:$0xff] }
 0x35b   :  { %4590 = vrot.lane.b32.xlu0 %v11876_v10, %s7033_s11  ;;  %6799 = vpow2.f32 %v5644_v43  ;;  %v3802_v56 = vpop.permute.xlu1 %3801  ;;  %v5012_v43 = vmax.f32 %v10676_v37, 0.0 }
 0x35c   :  { %v6782_v52 = vpop.eup %6781  ;;  %6801 = vpow2.f32 %v5643_v24 }
 0x35d   :  { %v6784_v1 = vpop.eup %6783  ;;  %v3742_v58 = vadd.f32 1.0, %v6782_v52  ;;  %6803 = vpow2.f32 %v5646_v33  ;;  %v11878_v52 = vld [vmem:[#allocation80_spill] sm:$0xff] }
 0x35e   :  { %v6786_v48 = vpop.eup %6785  ;;  %v3743_v13 = vadd.f32 1.0, %v6784_v1  ;;  %v10652_v27 = vpop.permute.xlu0 %3799 }
 0x35f   :  { %v6788_v62 = vpop.eup %6787  ;;  %6805 = vrcp.f32 %v3742_v58  ;;  %v3741_v11 = vadd.f32 1.0, %v6786_v48  ;;  %v3806_v48 = vpop.permute.xlu1 %3805 }
 0x360   :  { %v6790_v42 = vpop.eup %6789  ;;  %6807 = vrcp.f32 %v3743_v13  ;;  %v3745_v35 = vadd.f32 1.0, %v6788_v62  ;;  %v5016_v62 = vmax.f32 %v10690_v20, 0.0 }
 0x361   :  { %v6792_v23 = vpop.eup %6791  ;;  %v3750_v45 = vadd.f32 1.0, %v6790_v42  ;;  %6809 = vrcp.f32 %v3741_v11 }
 0x362   :  { %v6794_v0 = vpop.eup %6793  ;;  %6811 = vrcp.f32 %v3745_v35  ;;  %v3744_v55 = vadd.f32 1.0, %v6792_v23  ;;  %v10662_v51 = vpop.permute.xlu0 %3803 }
 0x363   :  { %v6796_v5 = vpop.eup %6795  ;;  %6813 = vrcp.f32 %v3750_v45  ;;  %v3747_v17 = vadd.f32 1.0, %v6794_v0  ;;  %v5026_v45 = vmul.f32 %v5014_v14, %v11741_v47 }
 0x364   :  { %v6798_v18 = vpop.eup %6797  ;;  %6815 = vrcp.f32 %v3744_v55  ;;  %v3746_v34 = vadd.f32 1.0, %v6796_v5 }
 0x365   :  { %v6800_v39 = vpop.eup %6799  ;;  %v3752_v60 = vadd.f32 1.0, %v6798_v18  ;;  %6817 = vrcp.f32 %v3747_v17  ;;  %v11879_v17 = vld [vmem:[#allocation14_spill] sm:$0xff]  ;;  %v5046_v46 = vsel %vm609_vm0, %v5026_v45, 0.0 }
 0x366   :  { %v6802_v61 = vpop.eup %6801  ;;  %6819 = vrcp.f32 %v3746_v34  ;;  %v3749_v29 = vadd.f32 1.0, %v6800_v39  ;;  %v3808_v44 = vpop.permute.xlu0 %3807 }
 0x367   :  { %v6804_v54 = vpop.eup %6803  ;;  %6821 = vrcp.f32 %v3752_v60  ;;  %v3748_v63 = vadd.f32 1.0, %v6802_v61 }
 0x368   :  { %6823 = vrcp.f32 %v3749_v29  ;;  %v3751_v53 = vadd.f32 1.0, %v6804_v54  ;;  %v5037_v29 = vsel %vm609_vm0, %v5023_v8, 0.0 }
 0x369   :  { %v6806_v16 = vpop.eup %6805  ;;  %6825 = vrcp.f32 %v3748_v63 }
 0x36a   :  { %v6808_v25 = vpop.eup %6807  ;;  %v3826_v49 = vsel %vm1420_vm2, %v6806_v16, %v10641_v12  ;;  %6827 = vrcp.f32 %v3751_v53  ;;  %v3812_v61 = vpop.permute.xlu0 %3811 }
 0x36b   :  { %v6810_v32 = vpop.eup %6809  ;;  %v3838_v19 = vsel %vm1433_vm3, %v3826_v49, 0.0  ;;  %v3827_v2 = vsel %vm1420_vm2, %v6808_v25, %v3794_v21  ;;  %v10709_v21 = vadd.f32 %v11878_v52, %v11600_v28  ;;  %v5024_v52 = vmul.f32 %v5012_v43, %v11741_v47 }
 0x36c   :  { %v6812_v31 = vpop.eup %6811  ;;  %v3850_v38 = vsel %vm1446_vm4, %v3838_v19, 0.0  ;;  %v3839_v12 = vsel %vm1433_vm3, %v3827_v2, 0.0  ;;  %v3825_v59 = vsel %vm1420_vm2, %v6810_v32, %v10646_v26 }
 0x36d   :  { %v6814_v3 = vpop.eup %6813  ;;  %5649 = vst [vmem:[%s11349_s7 + $0x128] sm:$0xff] %v3850_v38  ;;  %v3851_v10 = vsel %vm1446_vm4, %v3839_v12, 0.0  ;;  %v3837_v24 = vsel %vm1433_vm3, %v3825_v59, 0.0  ;;  %v3829_v33 = vsel %vm1420_vm2, %v6812_v31, %v3798_v57 }
 0x36e   :  { %v6816_v1 = vpop.eup %6815  ;;  %5650 = vst [vmem:[%s11349_s7 + $0x130] sm:$0xff] %v3851_v10  ;;  %v3849_v26 = vsel %vm1446_vm4, %v3837_v24, 0.0  ;;  %v3841_v58 = vsel %vm1433_vm3, %v3829_v33, 0.0  ;;  %v3834_v13 = vsel %vm1420_vm2, %v6814_v3, %v3808_v44  ;;  %v3810_v44 = vpop.permute.xlu1 %3809  ;;  %v11880_v10 = vld [vmem:[#allocation7_spill] sm:$0xff] }
 0x36f   :  { %v6818_v11 = vpop.eup %6817  ;;  %5648 = vst [vmem:[%s11349_s7 + $0x120] sm:$0xff] %v3849_v26  ;;  %v3853_v42 = vsel %vm1446_vm4, %v3841_v58, 0.0  ;;  %v3828_v35 = vsel %vm1420_vm2, %v6816_v1, %v10650_v4  ;;  %v3846_v23 = vsel %vm1433_vm3, %v3834_v13, 0.0  ;;  %v10736_v4 = vadd.f32 %v11879_v17, %v11600_v28 }
 0x370   :  { %v6820_v0 = vpop.eup %6819  ;;  %5652 = vst [vmem:[%s11349_s7 + $0x140] sm:$0xff] %v3853_v42  ;;  %v3840_v57 = vsel %vm1433_vm3, %v3828_v35, 0.0  ;;  %v3831_v55 = vsel %vm1420_vm2, %v6818_v11, %v3802_v56  ;;  %v3858_v5 = vsel %vm1446_vm4, %v3846_v23, 0.0  ;;  %v10778_v24 = vadd.f32 %v11880_v10, %v11600_v28  ;;  %v11881_v42 = vld [vmem:[#allocation10_spill] sm:$0xff] }
 0x371   :  { %v6822_v18 = vpop.eup %6821  ;;  %v3852_v34 = vsel %vm1446_vm4, %v3840_v57, 0.0  ;;  %v3843_v39 = vsel %vm1433_vm3, %v3831_v55, 0.0  ;;  %v3830_v60 = vsel %vm1420_vm2, %v6820_v0, %v10652_v27  ;;  %5657 = vst [vmem:[%s11349_s7 + $0x168] sm:$0xff] %v3858_v5  ;;  %v5028_v27 = vmul.f32 %v5016_v62, %v11741_v47 }
 0x372   :  { %v6824_v54 = vpop.eup %6823  ;;  %5651 = vst [vmem:[%s11349_s7 + $0x138] sm:$0xff] %v3852_v34  ;;  %v3855_v63 = vsel %vm1446_vm4, %v3843_v39, 0.0  ;;  %v3842_v56 = vsel %vm1433_vm3, %v3830_v60, 0.0  ;;  %v3836_v53 = vsel %vm1420_vm2, %v6822_v18, %v3812_v61  ;;  %v5018_v38 = vmax.f32 %v10736_v4, 0.0  ;;  %v11883_v60 = vld [vmem:[#allocation20_spill] sm:$0xff] }
 0x373   :  { %v6826_v16 = vpop.eup %6825  ;;  %5654 = vst [vmem:[%s11349_s7 + $0x150] sm:$0xff] %v3855_v63  ;;  %v3854_v8 = vsel %vm1446_vm4, %v3842_v56, 0.0  ;;  %v3833_v25 = vsel %vm1420_vm2, %v6824_v54, %v3806_v48  ;;  %v3848_v49 = vsel %vm1433_vm3, %v3836_v53, 0.0  ;;  %v5034_v1 = vsel %vm609_vm0, %v10686_v41, 0.0 }
 0x374   :  { %v6828_v32 = vpop.eup %6827  ;;  %5653 = vst [vmem:[%s11349_s7 + $0x148] sm:$0xff] %v3854_v8  ;;  %v3845_v19 = vsel %vm1433_vm3, %v3833_v25, 0.0  ;;  %v3832_v2 = vsel %vm1420_vm2, %v6826_v16, %v10662_v51  ;;  %v3860_v31 = vsel %vm1446_vm4, %v3848_v49, 0.0  ;;  %v5030_v58 = vmul.f32 %v5018_v38, %v11741_v47  ;;  %v5699_v25 = vld [vmem:[%s11347_s2 + $0x198] sm:$0xff] }
 0x375   :  { %v3857_v12 = vsel %vm1446_vm4, %v3845_v19, 0.0  ;;  %v3844_v59 = vsel %vm1433_vm3, %v3832_v2, 0.0  ;;  %v3835_v3 = vsel %vm1420_vm2, %v6828_v32, %v3810_v44  ;;  %5659 = vst [vmem:[%s11349_s7 + $0x178] sm:$0xff] %v3860_v31  ;;  %v5020_v48 = vmax.f32 %v10778_v24, 0.0 }
 0x376   :  { %5656 = vst [vmem:[%s11349_s7 + $0x160] sm:$0xff] %v3857_v12  ;;  %v3856_v51 = vsel %vm1446_vm4, %v3844_v59, 0.0  ;;  %v3847_v33 = vsel %vm1433_vm3, %v3835_v3, 0.0  ;;  %v5052_v41 = vsel %vm609_vm0, %v5028_v27, 0.0  ;;  %v5025_v13 = vmul.f32 %v5013_v36, %v11741_v47  ;;  %v5698_v3 = vld [vmem:[%s11347_s2 + $0x190] sm:$0xff] }
 0x377   :  { %5038 = vadd.xlane.f32.xlu1 %v5037_v29  ;;  %5655 = vst [vmem:[%s11349_s7 + $0x158] sm:$0xff] %v3856_v51  ;;  %v3859_v26 = vsel %vm1446_vm4, %v3847_v33, 0.0  ;;  %v5015_v11 = vmax.f32 %v10709_v21, 0.0  ;;  %v10808_v35 = vadd.f32 %v11881_v42, %v11600_v28  ;;  %v5040_v23 = vsel %vm609_vm0, %v5024_v52, 0.0  ;;  %v11882_v21 = vld [vmem:[#allocation18_spill] sm:$0xff] }
 0x378   :  { %5658 = vst [vmem:[%s11349_s7 + $0x170] sm:$0xff] %v3859_v26  ;;  %v5032_v45 = vmul.f32 %v5020_v48, %v11741_v47  ;;  %v5058_v0 = vsel %vm609_vm0, %v5030_v58, 0.0  ;;  %v10819_v5 = vadd.f32 %v11882_v21, %v11600_v28  ;;  %v5043_v17 = vsel %vm609_vm0, %v5025_v13, 0.0  ;;  %v5700_v52 = vld [vmem:[%s11347_s2 + $0x1a0] sm:$0xff] }
 0x379   :  { %v5027_v57 = vmul.f32 %v5015_v11, %v11741_v47  ;;  %v5017_v55 = vmax.f32 %v10808_v35, 0.0  ;;  %v10829_v61 = vadd.f32 %v11883_v60, %v11600_v28  ;;  %v5070_v54 = vmul.f32 %v5010_v9, %v11751_v30  ;;  %v5702_v35 = vld [vmem:[%s11347_s2 + $0x1b0] sm:$0xff] }
 0x37a   :  { %5035 = vadd.xlane.f32.xlu0 %v5034_v1  ;;  %v5064_v18 = vsel %vm609_vm0, %v5032_v45, 0.0  ;;  %v5019_v39 = vmax.f32 %v10819_v5, 0.0  ;;  %v5072_v28 = vmul.f32 %v5012_v43, %v11751_v30  ;;  %v5074_v8 = vmul.f32 %v5014_v14, %v11751_v30 }
 0x37b   :  { %5047 = vadd.xlane.f32.xlu1 %v5046_v46  ;;  %v5029_v34 = vmul.f32 %v5017_v55, %v11741_v47  ;;  %v5049_v29 = vsel %vm609_vm0, %v5027_v57, 0.0  ;;  %v5021_v56 = vmax.f32 %v10829_v61, 0.0  ;;  %v5082_v27 = vsel %vm609_vm0, %v5070_v54, 0.0 }
 0x37c   :  { %v5031_v63 = vmul.f32 %v5019_v39, %v11741_v47  ;;  %v5088_v37 = vsel %vm609_vm0, %v5072_v28, 0.0  ;;  %v4365_v43 = vmax.f32 %v5697_v15, 0.0  ;;  %v5071_v49 = vmul.f32 %v5011_v50, %v11751_v30 }
 0x37d   :  { %v5055_v53 = vsel %vm609_vm0, %v5029_v34, 0.0  ;;  %v5033_v9 = vmul.f32 %v5021_v56, %v11741_v47  ;;  %v5076_v14 = vmul.f32 %v5016_v62, %v11751_v30  ;;  %v5094_v46 = vsel %vm609_vm0, %v5074_v8, 0.0 }
 0x37e   :  { %5041 = vadd.xlane.f32.xlu0 %v5040_v23  ;;  %v5061_v16 = vsel %vm609_vm0, %v5031_v63, 0.0  ;;  %v4377_v32 = vmin.f32 %v4365_v43, 1.0  ;;  %v4367_v19 = vmax.f32 %v5699_v25, 0.0  ;;  %v4364_v50 = vmax.f32 %v5696_v40, 0.0 }
 0x37f   :  { %5053 = vadd.xlane.f32.xlu1 %v5052_v41  ;;  %v5067_v47 = vsel %vm609_vm0, %v5033_v9, 0.0  ;;  %v5073_v2 = vmul.f32 %v5013_v36, %v11751_v30  ;;  %v5078_v20 = vmul.f32 %v5018_v38, %v11751_v30  ;;  %v5085_v62 = vsel %vm609_vm0, %v5071_v49, 0.0 }
 0x380   :  { %v5100_v44 = vsel %vm609_vm0, %v5076_v14, 0.0  ;;  %v4425_v31 = vsub.f32 1.0, %v4377_v32  ;;  %v4379_v12 = vmin.f32 %v4367_v19, 1.0  ;;  %v4369_v59 = vmax.f32 %v5701_v7, 0.0 }
 0x381   :  { %v5075_v22 = vmul.f32 %v5015_v11, %v11751_v30  ;;  %v4376_v36 = vmin.f32 %v4364_v50, 1.0  ;;  %v5080_v4 = vmul.f32 %v5020_v48, %v11751_v30  ;;  %v5091_v38 = vsel %vm609_vm0, %v5073_v2, 0.0 }
 0x382   :  { %5044 = vadd.xlane.f32.xlu0 %v5043_v17  ;;  %v4389_v51 = vmax.f32 %v4377_v32, 0.001  ;;  %v4366_v33 = vmax.f32 %v5698_v3, 0.0  ;;  %v5106_v1 = vsel %vm609_vm0, %v5078_v20, 0.0  ;;  %v4437_v26 = vmax.f32 %v4425_v31, 0.001 }
 0x383   :  { %5059 = vadd.xlane.f32.xlu1 %v5058_v0  ;;  %v4427_v58 = vsub.f32 1.0, %v4379_v12  ;;  %v4381_v41 = vmin.f32 %v4369_v59, 1.0  ;;  %v5077_v24 = vmul.f32 %v5017_v55, %v11751_v30  ;;  %v4424_v48 = vsub.f32 1.0, %v4376_v36 }
 0x384   :  { %v4368_v11 = vmax.f32 %v5700_v52, 0.0  ;;  %v5097_v42 = vsel %vm609_vm0, %v5075_v22, 0.0  ;;  %6829 = vlog2.f32 %v4389_v51  ;;  %v4391_v23 = vmax.f32 %v4379_v12, 0.001 }
 0x385   :  { %v4378_v45 = vmin.f32 %v4366_v33, 1.0  ;;  %v5112_v57 = vsel %vm609_vm0, %v5080_v4, 0.0  ;;  %6831 = vlog2.f32 %v4437_v26  ;;  %v4439_v21 = vmax.f32 %v4427_v58, 0.001  ;;  %v11884_v33 = vld [vmem:[#allocation58_spill] sm:$0xff] }
 0x386   :  { %5050 = vadd.xlane.f32.xlu0 %v5049_v29  ;;  %v4429_v17 = vsub.f32 1.0, %v4381_v41  ;;  %v5079_v34 = vmul.f32 %v5019_v39, %v11751_v30  ;;  %v5103_v60 = vsel %vm609_vm0, %v5077_v24, 0.0  ;;  %v4436_v29 = vmax.f32 %v4424_v48, 0.001 }
 0x387   :  { %5065 = vadd.xlane.f32.xlu1 %v5064_v18  ;;  %v4388_v18 = vmax.f32 %v4376_v36, 0.001  ;;  %v4380_v54 = vmin.f32 %v4368_v11, 1.0  ;;  %6833 = vlog2.f32 %v4391_v23  ;;  %v4393_v63 = vmax.f32 %v4381_v41, 0.001 }
 0x388   :  { %v4370_v28 = vmax.f32 %v5702_v35, 0.0  ;;  %6835 = vlog2.f32 %v4439_v21  ;;  %v4441_v15 = vmax.f32 %v4429_v17, 0.001  ;;  %v5081_v5 = vmul.f32 %v5021_v56, %v11751_v30 }
 0x389   :  { %6837 = vlog2.f32 %v4388_v18  ;;  %v4390_v39 = vmax.f32 %v4378_v45, 0.001  ;;  %v5109_v8 = vsel %vm609_vm0, %v5079_v34, 0.0  ;;  %v4392_v40 = vmax.f32 %v4380_v54, 0.001 }
 0x38a   :  { %5056 = vadd.xlane.f32.xlu0 %v5055_v53  ;;  %v4426_v53 = vsub.f32 1.0, %v4378_v45  ;;  %6839 = vlog2.f32 %v4436_v29  ;;  %v4382_v43 = vmin.f32 %v4370_v28, 1.0  ;;  %v5115_v30 = vsel %vm609_vm0, %v5081_v5, 0.0 }
 0x38b   :  { %5083 = vadd.xlane.f32.xlu1 %v5082_v27  ;;  %6841 = vlog2.f32 %v4393_v63 }
 0x38c   :  { %6843 = vlog2.f32 %v4441_v15  ;;  %v4430_v56 = vsub.f32 1.0, %v4382_v43  ;;  %v4394_v20 = vmax.f32 %v4382_v43, 0.001 }
 0x38d   :  { %6845 = vlog2.f32 %v4390_v39  ;;  %v11886_v39 = vld [vmem:[#allocation64_spill] sm:$0xff] }
 0x38e   :  { %5062 = vadd.xlane.f32.xlu0 %v5061_v16  ;;  %v4428_v16 = vsub.f32 1.0, %v4380_v54  ;;  %v6830_v49 = vpop.eup %6829 }
 0x38f   :  { %5089 = vadd.xlane.f32.xlu1 %v5088_v37  ;;  %v4438_v37 = vmax.f32 %v4426_v53, 0.001  ;;  %v6832_v14 = vpop.eup %6831  ;;  %v4403_v7 = vmul.f32 0.6931472, %v6830_v49 }
 0x390   :  { %v4440_v61 = vmax.f32 %v4428_v16, 0.001  ;;  %v4451_v50 = vmul.f32 0.6931472, %v6832_v14 }
 0x391   :  { %6847 = vlog2.f32 %v4438_v37  ;;  %v6834_v32 = vpop.eup %6833 }
 0x392   :  { %5068 = vadd.xlane.f32.xlu0 %v5067_v47  ;;  %6849 = vlog2.f32 %v4392_v40  ;;  %v6836_v2 = vpop.eup %6835  ;;  %v4473_v3 = vsub.f32 %v4403_v7, %v4451_v50  ;;  %v4407_v36 = vmul.f32 0.6931472, %v6834_v32 }
 0x393   :  { %5095 = vadd.xlane.f32.xlu1 %v5094_v46  ;;  %v10883_v10 = vpop.xlane.xlu1 %4245  ;;  %6851 = vlog2.f32 %v4440_v61  ;;  %v4455_v4 = vmul.f32 0.6931472, %v6836_v2  ;;  %v11887_v2 = vld [vmem:[#allocation69_spill] sm:$0xff] }
 0x394   :  { %6853 = vlog2.f32 %v4394_v20 }
 0x395   :  { %v4475_v11 = vsub.f32 %v4407_v36, %v4455_v4 }
 0x396   :  { %5086 = vadd.xlane.f32.xlu0 %v5085_v62  ;;  %v6838_v62 = vpop.eup %6837 }
 0x397   :  { %5101 = vadd.xlane.f32.xlu1 %v5100_v44  ;;  %v4442_v44 = vmax.f32 %v4430_v56, 0.001  ;;  %v6840_v31 = vpop.eup %6839  ;;  %v4401_v58 = vmul.f32 0.6931472, %v6838_v62 }
 0x398   :  { %v10894_v13 = vpop.xlane.xlu1 %4254  ;;  %v6842_v59 = vpop.eup %6841  ;;  %v4449_v41 = vmul.f32 0.6931472, %v6840_v31 }
 0x399   :  { %v10900_v0 = vpop.xlane.xlu0 %4248  ;;  %6855 = vlog2.f32 %v4442_v44  ;;  %v4411_v23 = vmul.f32 0.6931472, %v6842_v59 }
 0x39a   :  { %5092 = vadd.xlane.f32.xlu0 %v5091_v38  ;;  %v6844_v38 = vpop.eup %6843  ;;  %v4472_v34 = vsub.f32 %v4401_v58, %v4449_v41 }
 0x39b   :  { %5107 = vadd.xlane.f32.xlu1 %v5106_v1  ;;  %v6846_v1 = vpop.eup %6845  ;;  %v4459_v45 = vmul.f32 0.6931472, %v6844_v38  ;;  %v11888_v38 = vld [vmem:[#allocation73_spill] sm:$0xff] }
 0x39c   :  { %v10906_v55 = vpop.xlane.xlu1 %4260  ;;  %v6848_v24 = vpop.eup %6847  ;;  %v4405_v29 = vmul.f32 0.6931472, %v6846_v1 }
 0x39d   :  { %v10912_v27 = vpop.xlane.xlu0 %4251  ;;  %v6850_v21 = vpop.eup %6849  ;;  %v4453_v54 = vmul.f32 0.6931472, %v6848_v24  ;;  %v4477_v28 = vsub.f32 %v4411_v23, %v4459_v45  ;;  %v11891_v23 = vld [vmem:[#allocation63_spill] sm:$0xff] }
 0x39e   :  { %5098 = vadd.xlane.f32.xlu0 %v5097_v42  ;;  %v6852_v18 = vpop.eup %6851  ;;  %v4409_v37 = vmul.f32 0.6931472, %v6850_v21 }
 0x39f   :  { %5113 = vadd.xlane.f32.xlu1 %v5112_v57  ;;  %v11885_v57 = vld [vmem:[#allocation61_spill] sm:$0xff]  ;;  %v4457_v43 = vmul.f32 0.6931472, %v6852_v18  ;;  %v6854_v49 = vpop.eup %6853  ;;  %v4474_v14 = vsub.f32 %v4405_v29, %v4453_v54  ;;  %v11893_v18 = vld [vmem:[#allocation68_spill] sm:$0xff] }
 0x3a0   :  { %v10914_v9 = vpop.xlane.xlu1 %4266  ;;  %v4413_v59 = vmul.f32 0.6931472, %v6854_v49 }
 0x3a1   :  { %v10920_v25 = vpop.xlane.xlu0 %4257  ;;  %v4476_v62 = vsub.f32 %v4409_v37, %v4457_v43  ;;  %v11897_v43 = vld [vmem:[#allocation77_spill] sm:$0xff] }
 0x3a2   :  { %5104 = vadd.xlane.f32.xlu0 %v5103_v60 }
 0x3a4   :  { %v10922_v47 = vpop.xlane.xlu1 %4272 }
 0x3a5   :  { %v10925_v46 = vpop.xlane.xlu0 %4263 }
 0x3a6   :  { %5110 = vadd.xlane.f32.xlu0 %v5109_v8 }
 0x3a8   :  { %v10927_v19 = vpop.xlane.xlu1 %4278 }
 0x3a9   :  { %v10929_v12 = vpop.xlane.xlu0 %4269 }
 0x3aa   :  { %5116 = vadd.xlane.f32.xlu0 %v5115_v30 }
 0x3ac   :  { %v4297_v22 = vpop.xlane.xlu1 %4296 }
 0x3ad   :  { %v4329_v51 = vsel %vm628_vm1, %v10900_v0, %v4297_v22  ;;  %v10936_v26 = vpop.xlane.xlu0 %4275 }
 0x3ae   :  { %v4341_v52 = vadd.f32 %v4329_v51, %v10611_v6  ;;  %v11889_v51 = vld [vmem:[#allocation62_spill] sm:$0xff] }
 0x3b0   :  { %4594 = vrot.lane.b32.xlu1 %v11884_v33, %s7033_s11  ;;  %v4485_v48 = vadd.f32 %v4473_v3, %v4341_v52  ;;  %v4303_v42 = vpop.xlane.xlu1 %4302 }
 0x3b1   :  { %v4331_v0 = vsel %vm628_vm1, %v10894_v13, %v4303_v42  ;;  %v4294_v60 = vpop.xlane.xlu0 %4293  ;;  %v11890_v42 = vld [vmem:[#allocation79_spill] sm:$0xff] }
 0x3b2   :  { %v5709_v17 = vmul.f32 -1.442695, %v4485_v48  ;;  %v4343_v35 = vadd.f32 %v4331_v0, %v10611_v6  ;;  %v4328_v53 = vsel %vm628_vm1, %v10883_v10, %v4294_v60  ;;  %v6856_v10 = vpop.eup %6855 }
 0x3b3   :  { %v4340_v13 = vadd.f32 %v4328_v53, %v10611_v6  ;;  %v4461_v3 = vmul.f32 0.6931472, %v6856_v10  ;;  %v11894_v53 = vld [vmem:[#allocation90_spill] sm:$0xff] }
 0x3b4   :  { %4598 = vrot.lane.b32.xlu1 %v11885_v57, %s7033_s11  ;;  %6857 = vpow2.f32 %v5709_v17  ;;  %v4487_v63 = vadd.f32 %v4475_v11, %v4343_v35  ;;  %v4309_v15 = vpop.xlane.xlu1 %4308 }
 0x3b5   :  { %v4333_v5 = vsel %vm628_vm1, %v10906_v55, %v4309_v15  ;;  %v4484_v40 = vadd.f32 %v4472_v34, %v4340_v13  ;;  %v4478_v58 = vsub.f32 %v4413_v59, %v4461_v3 }
 0x3b6   :  { %v5711_v16 = vmul.f32 -1.442695, %v4487_v63  ;;  %v4345_v8 = vadd.f32 %v4333_v5, %v10611_v6 }
 0x3b7   :  { %v5708_v55 = vmul.f32 -1.442695, %v4484_v40 }
 0x3b8   :  { %4600 = vrot.lane.b32.xlu1 %v11886_v39, %s7033_s11  ;;  %v4300_v61 = vpop.xlane.xlu0 %4299  ;;  %6859 = vpow2.f32 %v5711_v16  ;;  %v4489_v30 = vadd.f32 %v4477_v28, %v4345_v8  ;;  %v11895_v28 = vld [vmem:[#allocation72_spill] sm:$0xff] }
 0x3b9   :  { %v4330_v56 = vsel %vm628_vm1, %v10912_v27, %v4300_v61  ;;  %6861 = vpow2.f32 %v5708_v55 }
 0x3ba   :  { %v4315_v32 = vpop.xlane.xlu1 %4314  ;;  %v4342_v7 = vadd.f32 %v4330_v56, %v10611_v6  ;;  %v5713_v20 = vmul.f32 -1.442695, %v4489_v30 }
 0x3bb   :  { %v10956_v50 = vsel %vm628_vm1, %v10914_v9, %v4315_v32  ;;  %v11898_v32 = vld [vmem:[#allocation83_spill] sm:$0xff] }
 0x3bc   :  { %5370 = vrot.lane.b32.xlu1 %v11887_v2, %s7033_s11  ;;  %v4486_v44 = vadd.f32 %v4474_v14, %v4342_v7  ;;  %6863 = vpow2.f32 %v5713_v20 }
 0x3be   :  { %v4306_v31 = vpop.xlane.xlu0 %4305  ;;  %v4321_v22 = vpop.xlane.xlu1 %4320  ;;  %v5710_v36 = vmul.f32 -1.442695, %v4486_v44 }
 0x3bf   :  { %v4332_v27 = vsel %vm628_vm1, %v10920_v25, %v4306_v31  ;;  %v10965_v9 = vsel %vm628_vm1, %v10922_v47, %v4321_v22  ;;  %v6858_v33 = vpop.eup %6857 }
 0x3c0   :  { %v4344_v4 = vadd.f32 %v4332_v27, %v10611_v6  ;;  %5374 = vrot.lane.b32.xlu1 %v11888_v38, %s7033_s11  ;;  %4596 = vrot.lane.b32.xlu0 %v11889_v51, %s7033_s11  ;;  %v4533_v52 = vadd.f32 1.0, %v6858_v33  ;;  %6865 = vpow2.f32 %v5710_v36  ;;  %v11899_v36 = vld [vmem:[#allocation89_spill] sm:$0xff] }
 0x3c2   :  { %v4488_v1 = vadd.f32 %v4476_v62, %v4344_v4  ;;  %v4312_v25 = vpop.xlane.xlu0 %4311  ;;  %6867 = vrcp.f32 %v4533_v52  ;;  %v6860_v45 = vpop.eup %6859 }
 0x3c3   :  { %v4334_v41 = vsel %vm628_vm1, %v10925_v46, %v4312_v25  ;;  %v4327_v24 = vpop.xlane.xlu1 %4326  ;;  %v4535_v0 = vadd.f32 1.0, %v6860_v45  ;;  %v6862_v17 = vpop.eup %6861 }
 0x3c4   :  { %v5712_v48 = vmul.f32 -1.442695, %v4488_v1  ;;  %v4346_v47 = vadd.f32 %v4334_v41, %v10611_v6  ;;  %v10976_v11 = vsel %vm628_vm1, %v10927_v19, %v4327_v24  ;;  %5378 = vrot.lane.b32.xlu1 %v11890_v42, %s7033_s11  ;;  %4602 = vrot.lane.b32.xlu0 %v11891_v23, %s7033_s11  ;;  %v11892_v19 = vld [vmem:[#allocation85_spill] sm:$0xff]  ;;  %v4532_v60 = vadd.f32 1.0, %v6862_v17  ;;  %v5705_v23 = vld [vmem:[%s11347_s2 + $0x1c8] sm:$0xff] }
 0x3c5   :  { %v5703_v24 = vld [vmem:[%s11347_s2 + $0x1b8] sm:$0xff]  ;;  %v4373_v17 = vmax.f32 %v5705_v23, 0.0 }
 0x3c6   :  { %6869 = vpow2.f32 %v5712_v48  ;;  %v4490_v57 = vadd.f32 %v4478_v58, %v4346_v47  ;;  %v4318_v46 = vpop.xlane.xlu0 %4317  ;;  %v6864_v34 = vpop.eup %6863  ;;  %v11900_v58 = vld [vmem:[#allocation92_spill] sm:$0xff] }
 0x3c7   :  { %v10984_v21 = vsel %vm628_vm1, %v10929_v12, %v4318_v46  ;;  %6871 = vrcp.f32 %v4535_v0  ;;  %v4537_v29 = vadd.f32 1.0, %v6864_v34  ;;  %v4583_v5 = vpop.permute.xlu1 %4582  ;;  %v4371_v0 = vmax.f32 %v5703_v24, 0.0 }
 0x3c8   :  { %v5714_v35 = vmul.f32 -1.442695, %v4490_v57  ;;  %5382 = vrot.lane.b32.xlu1 %v11892_v19, %s7033_s11  ;;  %5372 = vrot.lane.b32.xlu0 %v11893_v18, %s7033_s11 }
 0x3c9   :  { %v4383_v18 = vmin.f32 %v4371_v0, 1.0 }
 0x3ca   :  { %6873 = vpow2.f32 %v5714_v35  ;;  %v4324_v54 = vpop.xlane.xlu0 %4323  ;;  %v6866_v12 = vpop.eup %6865  ;;  %v5707_v35 = vld [vmem:[%s11347_s2 + $0x1d8] sm:$0xff] }
 0x3cb   :  { %6875 = vrcp.f32 %v4532_v60  ;;  %v10992_v63 = vsel %vm628_vm1, %v10936_v26, %v4324_v54  ;;  %v4534_v15 = vadd.f32 1.0, %v6866_v12  ;;  %v11896_v26 = vld [vmem:[#allocation94_spill] sm:$0xff]  ;;  %v4585_v2 = vpop.permute.xlu1 %4584  ;;  %v4375_v34 = vmax.f32 %v5707_v35, 0.0  ;;  %v5706_v54 = vld [vmem:[%s11347_s2 + $0x1d0] sm:$0xff]  ;;  %v5773_v35 = vld [vmem:[%s11347_s2 + $0x208] sm:$0xff] }
 0x3cc   :  { %6877 = vrcp.f32 %v4537_v29  ;;  %5386 = vrot.lane.b32.xlu1 %v11894_v53, %s7033_s11  ;;  %5376 = vrot.lane.b32.xlu0 %v11895_v28, %s7033_s11  ;;  %v6868_v13 = vpop.eup %6867  ;;  %v4385_v60 = vmin.f32 %v4373_v17, 1.0  ;;  %v4431_v29 = vsub.f32 1.0, %v4383_v18  ;;  %v5704_v28 = vld [vmem:[%s11347_s2 + $0x1c0] sm:$0xff] }
 0x3cd   :  { %6879 = vrcp.f32 %v4534_v15  ;;  %v4617_v16 = vsel %vm1420_vm2, %v6868_v13, %v4583_v5  ;;  %v4387_v12 = vmin.f32 %v4375_v34, 1.0  ;;  %v4395_v15 = vmax.f32 %v4383_v18, 0.001 }
 0x3ce   :  { %v4581_v39 = vpop.permute.xlu0 %4580  ;;  %v4629_v37 = vsel %vm1433_vm3, %v4617_v16, 0.0  ;;  %v4433_v53 = vsub.f32 1.0, %v4385_v60  ;;  %v4374_v13 = vmax.f32 %v5706_v54, 0.0  ;;  %v4443_v5 = vmax.f32 %v4431_v29, 0.001 }
 0x3cf   :  { %v4641_v40 = vsel %vm1446_vm4, %v4629_v37, 0.0  ;;  %v4589_v52 = vpop.permute.xlu1 %4588  ;;  %v4435_v16 = vsub.f32 1.0, %v4387_v12 }
 0x3d0   :  { %v6870_v8 = vpop.eup %6869  ;;  %5390 = vrot.lane.b32.xlu1 %v11896_v26, %s7033_s11  ;;  %5380 = vrot.lane.b32.xlu0 %v11897_v43, %s7033_s11  ;;  %5721 = vst [vmem:[%s11349_s7 + $0x188] sm:$0xff] %v4641_v40  ;;  %v4445_v37 = vmax.f32 %v4433_v53, 0.001  ;;  %v5768_v26 = vld [vmem:[%s11347_s2 + $0x1e0] sm:$0xff]  ;;  %v4386_v43 = vmin.f32 %v4374_v13, 1.0 }
 0x3d1   :  { %v4536_v49 = vadd.f32 1.0, %v6870_v8  ;;  %v6872_v14 = vpop.eup %6871  ;;  %v4372_v8 = vmax.f32 %v5704_v28, 0.0  ;;  %v4447_v40 = vmax.f32 %v4435_v16, 0.001 }
 0x3d2   :  { %v4587_v61 = vpop.permute.xlu0 %4586 }
 0x3d3   :  { %6881 = vrcp.f32 %v4536_v49  ;;  %v4619_v10 = vsel %vm1420_vm2, %v6872_v14, %v4587_v61  ;;  %v4593_v45 = vpop.permute.xlu1 %4592  ;;  %v4399_v49 = vmax.f32 %v4387_v12, 0.001  ;;  %v4384_v14 = vmin.f32 %v4372_v8, 1.0 }
 0x3d4   :  { %v6874_v30 = vpop.eup %6873  ;;  %v4631_v56 = vsel %vm1433_vm3, %v4619_v10, 0.0  ;;  %5384 = vrot.lane.b32.xlu0 %v11898_v32, %s7033_s11  ;;  %v5154_v61 = vmax.f32 %v5768_v26, 0.0  ;;  %v5770_v10 = vld [vmem:[%s11347_s2 + $0x1f0] sm:$0xff] }
 0x3d5   :  { %v6876_v55 = vpop.eup %6875  ;;  %v4538_v7 = vadd.f32 1.0, %v6874_v30  ;;  %v4643_v20 = vsel %vm1446_vm4, %v4631_v56, 0.0  ;;  %v4434_v30 = vsub.f32 1.0, %v4386_v43  ;;  %v4396_v56 = vmax.f32 %v4384_v14, 0.001 }
 0x3d6   :  { %v6878_v62 = vpop.eup %6877  ;;  %v4616_v44 = vsel %vm1420_vm2, %v6876_v55, %v4581_v39  ;;  %5723 = vst [vmem:[%s11349_s7 + $0x198] sm:$0xff] %v4643_v20  ;;  %v4591_v31 = vpop.permute.xlu0 %4590  ;;  %v4397_v39 = vmax.f32 %v4385_v60, 0.001  ;;  %v4432_v32 = vsub.f32 1.0, %v4384_v14  ;;  %v5166_v55 = vmin.f32 %v5154_v61, 1.0 }
 0x3d7   :  { %6883 = vrcp.f32 %v4538_v7  ;;  %v4628_v59 = vsel %vm1433_vm3, %v4616_v44, 0.0  ;;  %v4621_v3 = vsel %vm1420_vm2, %v6878_v62, %v4591_v31  ;;  %v6880_v4 = vpop.eup %6879  ;;  %v5156_v7 = vmax.f32 %v5770_v10, 0.0  ;;  %v5769_v44 = vld [vmem:[%s11347_s2 + $0x1e8] sm:$0xff] }
 0x3d8   :  { %v4640_v27 = vsel %vm1446_vm4, %v4628_v59, 0.0  ;;  %v4633_v22 = vsel %vm1433_vm3, %v4621_v3, 0.0  ;;  %5388 = vrot.lane.b32.xlu0 %v11899_v36, %s7033_s11  ;;  %v4618_v51 = vsel %vm1420_vm2, %v6880_v4, %v4585_v2  ;;  %6885 = vlog2.f32 %v4395_v15  ;;  %v5772_v2 = vld [vmem:[%s11347_s2 + $0x200] sm:$0xff]  ;;  %v5774_v36 = vld [vmem:[%s11347_s2 + $0x210] sm:$0xff] }
 0x3d9   :  { %5720 = vst [vmem:[%s11349_s7 + $0x180] sm:$0xff] %v4640_v27  ;;  %v4645_v38 = vsel %vm1446_vm4, %v4633_v22, 0.0  ;;  %v4630_v33 = vsel %vm1433_vm3, %v4618_v51, 0.0  ;;  %6887 = vlog2.f32 %v4443_v5  ;;  %v4398_v20 = vmax.f32 %v4386_v43, 0.001 }
 0x3da   :  { %5725 = vst [vmem:[%s11349_s7 + $0x1a8] sm:$0xff] %v4645_v38  ;;  %v4642_v1 = vsel %vm1446_vm4, %v4630_v33, 0.0  ;;  %6889 = vlog2.f32 %v4397_v39  ;;  %v4446_v62 = vmax.f32 %v4434_v30, 0.001  ;;  %v5158_v31 = vmax.f32 %v5772_v2, 0.0  ;;  %v5778_v39 = vld [vmem:[%s11347_s2 + $0x230] sm:$0xff] }
 0x3db   :  { %5722 = vst [vmem:[%s11349_s7 + $0x190] sm:$0xff] %v4642_v1  ;;  %6891 = vlog2.f32 %v4445_v37  ;;  %v4444_v3 = vmax.f32 %v4432_v32, 0.001  ;;  %v5214_v27 = vsub.f32 1.0, %v5166_v55  ;;  %v5168_v22 = vmin.f32 %v5156_v7, 1.0 }
 0x3dc   :  { %5392 = vrot.lane.b32.xlu0 %v11900_v58, %s7033_s11  ;;  %6893 = vlog2.f32 %v4399_v49  ;;  %v5155_v38 = vmax.f32 %v5769_v44, 0.0  ;;  %v5178_v33 = vmax.f32 %v5166_v55, 0.001  ;;  %v5170_v58 = vmin.f32 %v5158_v31, 1.0 }
 0x3dd   :  { %v6882_v25 = vpop.eup %6881  ;;  %6895 = vlog2.f32 %v4447_v40  ;;  %v5216_v24 = vsub.f32 1.0, %v5168_v22  ;;  %v5159_v5 = vmax.f32 %v5773_v35, 0.0  ;;  %v4347_v31 = vadd.f32 %v10956_v50, %v10611_v6 }
 0x3de   :  { %v4620_v41 = vsel %vm1420_vm2, %v6882_v25, %v4589_v52  ;;  %6897 = vlog2.f32 %v4396_v56  ;;  %v5771_v52 = vld [vmem:[%s11347_s2 + $0x1f8] sm:$0xff]  ;;  %v5160_v25 = vmax.f32 %v5774_v36, 0.0  ;;  %v5218_v18 = vsub.f32 1.0, %v5170_v58 }
 0x3df   :  { %v4632_v48 = vsel %vm1433_vm3, %v4620_v41, 0.0  ;;  %6899 = vlog2.f32 %v4398_v20  ;;  %v5226_v41 = vmax.f32 %v5214_v27, 0.001  ;;  %v5157_v0 = vmax.f32 %v5771_v52, 0.0 }
 0x3e0   :  { %v4644_v47 = vsel %vm1446_vm4, %v4632_v48, 0.0  ;;  %6901 = vlog2.f32 %v4446_v62  ;;  %v5776_v48 = vld [vmem:[%s11347_s2 + $0x220] sm:$0xff]  ;;  %v5172_v34 = vmin.f32 %v5160_v25, 1.0  ;;  %v5228_v54 = vmax.f32 %v5216_v24, 0.001  ;;  %v5775_v62 = vld [vmem:[%s11347_s2 + $0x218] sm:$0xff] }
 0x3e1   :  { %v6884_v42 = vpop.eup %6883  ;;  %5724 = vst [vmem:[%s11349_s7 + $0x1a0] sm:$0xff] %v4644_v47  ;;  %6903 = vlog2.f32 %v4444_v3  ;;  %v5162_v60 = vmax.f32 %v5776_v48, 0.0  ;;  %v5169_v13 = vmin.f32 %v5157_v0, 1.0  ;;  %v5182_v37 = vmax.f32 %v5170_v58, 0.001 }
 0x3e2   :  { %v4622_v57 = vsel %vm1420_vm2, %v6884_v42, %v4593_v45  ;;  %v6886_v59 = vpop.eup %6885  ;;  %v5167_v45 = vmin.f32 %v5155_v38, 1.0  ;;  %6905 = vlog2.f32 %v5178_v33  ;;  %v5230_v43 = vmax.f32 %v5218_v18, 0.001 }
 0x3e3   :  { %v4634_v46 = vsel %vm1433_vm3, %v4622_v57, 0.0  ;;  %v6888_v4 = vpop.eup %6887  ;;  %v11086_v42 = vmul.f32 0.6931472, %v6886_v59  ;;  %6907 = vlog2.f32 %v5226_v41  ;;  %v5220_v49 = vsub.f32 1.0, %v5172_v34 }
 0x3e4   :  { %v4646_v19 = vsel %vm1446_vm4, %v4634_v46, 0.0  ;;  %v6890_v51 = vpop.eup %6889  ;;  %v11088_v23 = vmul.f32 0.6931472, %v6888_v4  ;;  %v5215_v15 = vsub.f32 1.0, %v5167_v45  ;;  %v5174_v40 = vmin.f32 %v5162_v60, 1.0 }
 0x3e5   :  { %5726 = vst [vmem:[%s11349_s7 + $0x1b0] sm:$0xff] %v4646_v19  ;;  %v6892_v1 = vpop.eup %6891  ;;  %v11090_v46 = vmul.f32 0.6931472, %v6890_v51  ;;  %v5180_v19 = vmax.f32 %v5168_v22, 0.001  ;;  %v5164_v56 = vmax.f32 %v5778_v39, 0.0 }
 0x3e6   :  { %v6894_v47 = vpop.eup %6893  ;;  %v11092_v17 = vmul.f32 0.6931472, %v6892_v1  ;;  %v4479_v16 = vsub.f32 %v11086_v42, %v11088_v23  ;;  %v5179_v30 = vmax.f32 %v5167_v45, 0.001  ;;  %v5227_v7 = vmax.f32 %v5215_v15, 0.001 }
 0x3e7   :  { %v6896_v57 = vpop.eup %6895  ;;  %v11097_v29 = vmul.f32 0.6931472, %v6894_v47  ;;  %6909 = vlog2.f32 %v5180_v19  ;;  %v5217_v2 = vsub.f32 1.0, %v5169_v13  ;;  %v5171_v20 = vmin.f32 %v5159_v5, 1.0  ;;  %v5777_v1 = vld [vmem:[%s11347_s2 + $0x228] sm:$0xff]  ;;  %v5779_v5 = vld [vmem:[%s11347_s2 + $0x238] sm:$0xff] }
 0x3e8   :  { %v6898_v12 = vpop.eup %6897  ;;  %v11099_v53 = vmul.f32 0.6931472, %v6896_v57  ;;  %v4481_v8 = vsub.f32 %v11090_v46, %v11092_v17  ;;  %6911 = vlog2.f32 %v5228_v54  ;;  %v5184_v3 = vmax.f32 %v5172_v34, 0.001 }
 0x3e9   :  { %v6900_v26 = vpop.eup %6899  ;;  %v11110_v61 = vmul.f32 0.6931472, %v6898_v12  ;;  %6913 = vlog2.f32 %v5182_v37  ;;  %v5232_v22 = vmax.f32 %v5220_v49, 0.001  ;;  %v5222_v36 = vsub.f32 1.0, %v5174_v40 }
 0x3ea   :  { %v6902_v14 = vpop.eup %6901  ;;  %v4483_v32 = vsub.f32 %v11097_v29, %v11099_v53  ;;  %v11123_v59 = vmul.f32 0.6931472, %v6900_v26  ;;  %6915 = vlog2.f32 %v5230_v43  ;;  %v5181_v51 = vmax.f32 %v5169_v13, 0.001 }
 0x3eb   :  { %v6904_v44 = vpop.eup %6903  ;;  %v4469_v27 = vmul.f32 0.6931472, %v6902_v14  ;;  %6917 = vlog2.f32 %v5179_v30  ;;  %v5176_v33 = vmin.f32 %v5164_v56, 1.0  ;;  %v5161_v52 = vmax.f32 %v5775_v62, 0.0 }
 0x3ec   :  { %v6906_v4 = vpop.eup %6905  ;;  %v4465_v50 = vmul.f32 0.6931472, %v6904_v44  ;;  %6919 = vlog2.f32 %v5227_v7  ;;  %v5229_v25 = vmax.f32 %v5217_v2, 0.001  ;;  %v5219_v41 = vsub.f32 1.0, %v5171_v20 }
 0x3ed   :  { %v6908_v24 = vpop.eup %6907  ;;  %v4491_v48 = vadd.f32 %v4479_v16, %v4347_v31  ;;  %v4349_v47 = vadd.f32 %v10965_v9, %v10611_v6  ;;  %6921 = vlog2.f32 %v5184_v3  ;;  %v5186_v42 = vmax.f32 %v5174_v40, 0.001 }
 0x3ee   :  { %v4482_v23 = vsub.f32 %v11123_v59, %v4469_v27  ;;  %6923 = vlog2.f32 %v5232_v22  ;;  %v5234_v45 = vmax.f32 %v5222_v36, 0.001  ;;  %v5163_v0 = vmax.f32 %v5777_v1, 0.0 }
 0x3ef   :  { %6925 = vlog2.f32 %v5181_v51  ;;  %v5183_v46 = vmax.f32 %v5171_v20, 0.001  ;;  %v5224_v17 = vsub.f32 1.0, %v5176_v33  ;;  %v5173_v35 = vmin.f32 %v5161_v52, 1.0 }
 0x3f0   :  { %v11139_v34 = vmul.f32 0.6931472, %v6906_v4  ;;  %v11141_v60 = vmul.f32 0.6931472, %v6908_v24  ;;  %6927 = vlog2.f32 %v5229_v25  ;;  %v5231_v9 = vmax.f32 %v5219_v41, 0.001 }
 0x3f1   :  { %v6910_v19 = vpop.eup %6909  ;;  %v5715_v12 = vmul.f32 -1.442695, %v4491_v48  ;;  %v4493_v15 = vadd.f32 %v4481_v8, %v4349_v47  ;;  %v4350_v13 = vadd.f32 %v10992_v63, %v10611_v6  ;;  %6929 = vlog2.f32 %v5186_v42 }
 0x3f2   :  { %v6912_v54 = vpop.eup %6911  ;;  %v4480_v39 = vsub.f32 %v11110_v61, %v4465_v50  ;;  %6931 = vlog2.f32 %v5234_v45  ;;  %v5188_v16 = vmax.f32 %v5176_v33, 0.001  ;;  %v5175_v37 = vmin.f32 %v5163_v0, 1.0 }
 0x3f3   :  { %v6914_v26 = vpop.eup %6913  ;;  %v4348_v43 = vadd.f32 %v10984_v21, %v10611_v6  ;;  %6933 = vlog2.f32 %v5183_v46  ;;  %v5236_v8 = vmax.f32 %v5224_v17, 0.001  ;;  %v5221_v40 = vsub.f32 1.0, %v5173_v35 }
 0x3f4   :  { %v6916_v63 = vpop.eup %6915  ;;  %v11155_v30 = vmul.f32 0.6931472, %v6910_v19  ;;  %v11157_v56 = vmul.f32 0.6931472, %v6912_v54  ;;  %6935 = vlog2.f32 %v5231_v9  ;;  %v5165_v61 = vmax.f32 %v5779_v5, 0.0 }
 0x3f5   :  { %v6918_v7 = vpop.eup %6917  ;;  %6937 = vpow2.f32 %v5715_v12  ;;  %v5717_v2 = vmul.f32 -1.442695, %v4493_v15  ;;  %v4494_v20 = vadd.f32 %v4482_v23, %v4350_v13  ;;  %v5262_v21 = vsub.f32 %v11139_v34, %v11141_v60 }
 0x3f6   :  { %v6920_v62 = vpop.eup %6919  ;;  %v11161_v44 = vmul.f32 0.6931472, %v6914_v26  ;;  %6939 = vlog2.f32 %v5188_v16  ;;  %v5185_v31 = vmax.f32 %v5173_v35, 0.001  ;;  %v5223_v59 = vsub.f32 1.0, %v5175_v37 }
 0x3f7   :  { %v6922_v3 = vpop.eup %6921  ;;  %v4351_v27 = vadd.f32 %v10976_v11, %v10611_v6  ;;  %v4492_v22 = vadd.f32 %v4480_v39, %v4348_v43  ;;  %6941 = vlog2.f32 %v5236_v8  ;;  %v5233_v4 = vmax.f32 %v5221_v40, 0.001 }
 0x3f8   :  { %v6924_v51 = vpop.eup %6923  ;;  %v5264_v52 = vsub.f32 %v11155_v30, %v11157_v56  ;;  %v11169_v1 = vmul.f32 0.6931472, %v6916_v63  ;;  %v5187_v50 = vmax.f32 %v5175_v37, 0.001  ;;  %v5177_v25 = vmin.f32 %v5165_v61, 1.0 }
 0x3f9   :  { %v6926_v41 = vpop.eup %6925  ;;  %6943 = vpow2.f32 %v5717_v2  ;;  %v5718_v24 = vmul.f32 -1.442695, %v4494_v20  ;;  %v11173_v48 = vmul.f32 0.6931472, %v6918_v7  ;;  %v11176_v23 = vmul.f32 0.6931472, %v6920_v62 }
 0x3fa   :  { %v6928_v47 = vpop.eup %6927  ;;  %6945 = vlog2.f32 %v5185_v31  ;;  %v5235_v45 = vmax.f32 %v5223_v59, 0.001  ;;  %v4495_v46 = vadd.f32 %v4483_v32, %v4351_v27  ;;  %v5716_v17 = vmul.f32 -1.442695, %v4492_v22 }
 0x3fb   :  { %v6930_v0 = vpop.eup %6929  ;;  %v11183_v19 = vmul.f32 0.6931472, %v6922_v3  ;;  %6947 = vlog2.f32 %v5233_v4  ;;  %v11185_v9 = vmul.f32 0.6931472, %v6924_v51  ;;  %v5225_v54 = vsub.f32 1.0, %v5177_v25 }
 0x3fc   :  { %6949 = vlog2.f32 %v5187_v50  ;;  %v5266_v29 = vsub.f32 %v11161_v44, %v11169_v1  ;;  %v5189_v5 = vmax.f32 %v5177_v25, 0.001  ;;  %v5719_v16 = vmul.f32 -1.442695, %v4495_v46 }
 0x3fd   :  { %6951 = vpow2.f32 %v5718_v24  ;;  %v5263_v26 = vsub.f32 %v11173_v48, %v11176_v23  ;;  %v5197_v43 = vmul.f32 0.6931472, %v6926_v41  ;;  %v5268_v63 = vsub.f32 %v11183_v19, %v11185_v9 }
 0x3fe   :  { %6953 = vlog2.f32 %v5235_v45  ;;  %v5245_v30 = vmul.f32 0.6931472, %v6928_v47  ;;  %v5237_v56 = vmax.f32 %v5225_v54, 0.001  ;;  %v5207_v2 = vmul.f32 0.6931472, %v6930_v0 }
 0x3ff   :  { %6955 = vpow2.f32 %v5716_v17 }
 0x400   :  { %v5265_v41 = vsub.f32 %v5197_v43, %v5245_v30 }
 0x404   :  { %v11101_v28 = vpop.xlane.xlu1 %5038 }
 0x407   :  { %v11112_v10 = vpop.xlane.xlu0 %5035 }
 0x408   :  { %v11116_v55 = vpop.xlane.xlu1 %5047 }
 0x40b   :  { %v11125_v38 = vpop.xlane.xlu0 %5041 }
 0x40c   :  { %v11130_v58 = vpop.xlane.xlu1 %5053 }
 0x40f   :  { %v11135_v57 = vpop.xlane.xlu0 %5044 }
 0x410   :  { %v11137_v18 = vpop.xlane.xlu1 %5059 }
 0x413   :  { %v11151_v49 = vpop.xlane.xlu0 %5050 }
 0x414   :  { %v11153_v14 = vpop.xlane.xlu1 %5065 }
 0x417   :  { %v11165_v36 = vpop.xlane.xlu0 %5056 }
 0x418   :  { %v5084_v33 = vpop.xlane.xlu1 %5083 }
 0x419   :  { %v5118_v11 = vsel %vm628_vm1, %v11112_v10, %v5084_v33  ;;  %v6932_v10 = vpop.eup %6931 }
 0x41a   :  { %v5130_v42 = vadd.f32 %v5118_v11, %v10611_v6  ;;  %v6934_v12 = vpop.eup %6933  ;;  %v5255_v20 = vmul.f32 0.6931472, %v6932_v10 }
 0x41b   :  { %v11181_v35 = vpop.xlane.xlu0 %5062  ;;  %v6936_v53 = vpop.eup %6935  ;;  %v11201_v3 = vmul.f32 0.6931472, %v6934_v12 }
 0x41c   :  { %v5274_v34 = vadd.f32 %v5262_v21, %v5130_v42  ;;  %v5090_v60 = vpop.xlane.xlu1 %5089  ;;  %v6938_v39 = vpop.eup %6937  ;;  %v11203_v27 = vmul.f32 0.6931472, %v6936_v53  ;;  %v5270_v45 = vsub.f32 %v5207_v2, %v5255_v20 }
 0x41d   :  { %v5120_v15 = vsel %vm628_vm1, %v11125_v38, %v5090_v60  ;;  %v6940_v8 = vpop.eup %6939  ;;  %v4539_v21 = vadd.f32 1.0, %v6938_v39 }
 0x41e   :  { %v5780_v32 = vmul.f32 -1.442695, %v5274_v34  ;;  %v5132_v13 = vadd.f32 %v5120_v15, %v10611_v6  ;;  %v6942_v61 = vpop.eup %6941  ;;  %v11205_v22 = vmul.f32 0.6931472, %v6940_v8  ;;  %v5267_v0 = vsub.f32 %v11201_v3, %v11203_v27 }
 0x41f   :  { %v11192_v37 = vpop.xlane.xlu0 %5068  ;;  %v6944_v31 = vpop.eup %6943 }
 0x420   :  { %v5276_v38 = vadd.f32 %v5264_v52, %v5132_v13  ;;  %v5096_v40 = vpop.xlane.xlu1 %5095  ;;  %6957 = vpow2.f32 %v5780_v32  ;;  %v6946_v4 = vpop.eup %6945  ;;  %v11209_v52 = vmul.f32 0.6931472, %v6942_v61  ;;  %v4541_v11 = vadd.f32 1.0, %v6944_v31 }
 0x421   :  { %v5122_v7 = vsel %vm628_vm1, %v11116_v55, %v5096_v40  ;;  %6959 = vlog2.f32 %v5189_v5  ;;  %v6948_v1 = vpop.eup %6947  ;;  %v5205_v46 = vmul.f32 0.6931472, %v6946_v4 }
 0x422   :  { %v5782_v62 = vmul.f32 -1.442695, %v5276_v38  ;;  %v5134_v44 = vadd.f32 %v5122_v7, %v10611_v6  ;;  %6961 = vpow2.f32 %v5719_v16  ;;  %v6950_v24 = vpop.eup %6949  ;;  %v5272_v34 = vsub.f32 %v11205_v22, %v11209_v52 }
 0x423   :  { %v5087_v59 = vpop.xlane.xlu0 %5086  ;;  %6963 = vlog2.f32 %v5237_v56  ;;  %v6952_v42 = vpop.eup %6951  ;;  %v5253_v60 = vmul.f32 0.6931472, %v6948_v1  ;;  %v5209_v39 = vmul.f32 0.6931472, %v6950_v24 }
 0x424   :  { %v5278_v51 = vadd.f32 %v5266_v29, %v5134_v44  ;;  %v5119_v55 = vsel %vm628_vm1, %v11101_v28, %v5087_v59  ;;  %v5102_v33 = vpop.xlane.xlu1 %5101  ;;  %6965 = vpow2.f32 %v5782_v62  ;;  %v6954_v17 = vpop.eup %6953  ;;  %v4542_v29 = vadd.f32 1.0, %v6952_v42 }
 0x425   :  { %v5131_v50 = vadd.f32 %v5119_v55, %v10611_v6  ;;  %v5124_v25 = vsel %vm628_vm1, %v11130_v58, %v5102_v33  ;;  %6967 = vrcp.f32 %v4539_v21  ;;  %v6956_v9 = vpop.eup %6955  ;;  %v5257_v16 = vmul.f32 0.6931472, %v6954_v17 }
 0x426   :  { %v5784_v48 = vmul.f32 -1.442695, %v5278_v51  ;;  %v5136_v47 = vadd.f32 %v5124_v25, %v10611_v6  ;;  %v4540_v43 = vadd.f32 1.0, %v6956_v9 }
 0x427   :  { %v5275_v28 = vadd.f32 %v5263_v26, %v5131_v50  ;;  %v5093_v23 = vpop.xlane.xlu0 %5092  ;;  %v5271_v31 = vsub.f32 %v5209_v39, %v5257_v16 }
 0x428   :  { %v5280_v19 = vadd.f32 %v5268_v63, %v5136_v47  ;;  %v5121_v58 = vsel %vm628_vm1, %v11135_v57, %v5093_v23  ;;  %v5108_v10 = vpop.xlane.xlu1 %5107  ;;  %6969 = vpow2.f32 %v5784_v48  ;;  %v5269_v63 = vsub.f32 %v5205_v46, %v5253_v60 }
 0x429   :  { %v5781_v54 = vmul.f32 -1.442695, %v5275_v28  ;;  %v5133_v12 = vadd.f32 %v5121_v58, %v10611_v6  ;;  %v5126_v15 = vsel %vm628_vm1, %v11137_v18, %v5108_v10  ;;  %6971 = vrcp.f32 %v4541_v11 }
 0x42a   :  { %v5786_v53 = vmul.f32 -1.442695, %v5280_v19  ;;  %v5138_v32 = vadd.f32 %v5126_v15, %v10611_v6  ;;  %v6958_v13 = vpop.eup %6957 }
 0x42b   :  { %6973 = vpow2.f32 %v5781_v54  ;;  %v5277_v57 = vadd.f32 %v5265_v41, %v5133_v12  ;;  %v5099_v5 = vpop.xlane.xlu0 %5098  ;;  %v6960_v26 = vpop.eup %6959  ;;  %v5322_v2 = vadd.f32 1.0, %v6958_v13 }
 0x42c   :  { %v5282_v8 = vadd.f32 %v5270_v45, %v5138_v32  ;;  %v5123_v38 = vsel %vm628_vm1, %v11151_v49, %v5099_v5  ;;  %v5114_v40 = vpop.xlane.xlu1 %5113  ;;  %v6962_v18 = vpop.eup %6961  ;;  %6975 = vpow2.f32 %v5786_v53  ;;  %v5213_v59 = vmul.f32 0.6931472, %v6960_v26 }
 0x42d   :  { %v5783_v30 = vmul.f32 -1.442695, %v5277_v57  ;;  %v5135_v56 = vadd.f32 %v5123_v38, %v10611_v6  ;;  %v5128_v61 = vsel %vm628_vm1, %v11153_v14, %v5114_v40  ;;  %v6964_v7 = vpop.eup %6963  ;;  %6977 = vrcp.f32 %v4542_v29 }
 0x42e   :  { %v5788_v20 = vmul.f32 -1.442695, %v5282_v8  ;;  %v5140_v21 = vadd.f32 %v5128_v61, %v10611_v6  ;;  %v6966_v62 = vpop.eup %6965  ;;  %v4543_v27 = vadd.f32 1.0, %v6962_v18  ;;  %v5261_v48 = vmul.f32 0.6931472, %v6964_v7 }
 0x42f   :  { %6979 = vpow2.f32 %v5783_v30  ;;  %v5279_v44 = vadd.f32 %v5267_v0, %v5135_v56  ;;  %v5105_v49 = vpop.xlane.xlu0 %5104  ;;  %v6968_v3 = vpop.eup %6967  ;;  %v5324_v52 = vadd.f32 1.0, %v6966_v62 }
 0x430   :  { %6981 = vpow2.f32 %v5788_v20  ;;  %v5284_v22 = vadd.f32 %v5272_v34, %v5140_v21  ;;  %v5125_v4 = vsel %vm628_vm1, %v11165_v36, %v5105_v49  ;;  %v4595_v14 = vpop.permute.xlu1 %4594  ;;  %v5273_v60 = vsub.f32 %v5213_v59, %v5261_v48 }
 0x431   :  { %6983 = vrcp.f32 %v4540_v43  ;;  %v5785_v51 = vmul.f32 -1.442695, %v5279_v44  ;;  %v5137_v55 = vadd.f32 %v5125_v4, %v10611_v6  ;;  %v4623_v33 = vsel %vm1420_vm2, %v6968_v3, %v4595_v14 }
 0x432   :  { %6985 = vrcp.f32 %v5322_v2  ;;  %v5790_v1 = vmul.f32 -1.442695, %v5284_v22  ;;  %v4635_v50 = vsel %vm1433_vm3, %v4623_v33, 0.0  ;;  %v6970_v25 = vpop.eup %6969 }
 0x433   :  { %6987 = vpow2.f32 %v5785_v51  ;;  %v5281_v41 = vadd.f32 %v5269_v63, %v5137_v55  ;;  %v4647_v24 = vsel %vm1446_vm4, %v4635_v50, 0.0  ;;  %v5111_v11 = vpop.xlane.xlu0 %5110  ;;  %v6972_v36 = vpop.eup %6971  ;;  %v5326_v46 = vadd.f32 1.0, %v6970_v25 }
 0x434   :  { %6989 = vrcp.f32 %v4543_v27  ;;  %5727 = vst [vmem:[%s11349_s7 + $0x1b8] sm:$0xff] %v4647_v24  ;;  %v5127_v47 = vsel %vm628_vm1, %v11181_v35, %v5111_v11  ;;  %v4599_v42 = vpop.permute.xlu1 %4598 }
 0x435   :  { %v6974_v28 = vpop.eup %6973  ;;  %6991 = vpow2.f32 %v5790_v1  ;;  %v5787_v23 = vmul.f32 -1.442695, %v5281_v41  ;;  %v5139_v45 = vadd.f32 %v5127_v47, %v10611_v6  ;;  %v4625_v0 = vsel %vm1420_vm2, %v6972_v36, %v4599_v42 }
 0x436   :  { %6993 = vrcp.f32 %v5324_v52  ;;  %v5323_v17 = vadd.f32 1.0, %v6974_v28  ;;  %v4637_v19 = vsel %vm1433_vm3, %v4625_v0, 0.0  ;;  %v6976_v58 = vpop.eup %6975 }
 0x437   :  { %6995 = vpow2.f32 %v5787_v23  ;;  %v5283_v10 = vadd.f32 %v5271_v31, %v5139_v45  ;;  %v4649_v34 = vsel %vm1446_vm4, %v4637_v19, 0.0  ;;  %v5117_v35 = vpop.xlane.xlu0 %5116  ;;  %v6978_v9 = vpop.eup %6977  ;;  %v5328_v57 = vadd.f32 1.0, %v6976_v58 }
 0x438   :  { %6997 = vrcp.f32 %v5323_v17  ;;  %5729 = vst [vmem:[%s11349_s7 + $0x1c8] sm:$0xff] %v4649_v34  ;;  %v5129_v54 = vsel %vm628_vm1, %v11192_v37, %v5117_v35  ;;  %v4601_v12 = vpop.permute.xlu1 %4600 }
 0x439   :  { %v6980_v15 = vpop.eup %6979  ;;  %v5789_v29 = vmul.f32 -1.442695, %v5283_v10  ;;  %v5141_v53 = vadd.f32 %v5129_v54, %v10611_v6  ;;  %v4626_v32 = vsel %vm1420_vm2, %v6978_v9, %v4601_v12  ;;  %6999 = vrcp.f32 %v5326_v46 }
 0x43a   :  { %v6982_v13 = vpop.eup %6981  ;;  %v5325_v5 = vadd.f32 1.0, %v6980_v15  ;;  %v4638_v39 = vsel %vm1433_vm3, %v4626_v32, 0.0 }
 0x43b   :  { %v6984_v16 = vpop.eup %6983  ;;  %7001 = vpow2.f32 %v5789_v29  ;;  %v5285_v26 = vadd.f32 %v5273_v60, %v5141_v53  ;;  %v4650_v43 = vsel %vm1446_vm4, %v4638_v39, 0.0  ;;  %v4597_v8 = vpop.permute.xlu0 %4596  ;;  %v5330_v63 = vadd.f32 1.0, %v6982_v13 }
 0x43c   :  { %v6986_v37 = vpop.eup %6985  ;;  %7003 = vrcp.f32 %v5325_v5  ;;  %5730 = vst [vmem:[%s11349_s7 + $0x1d0] sm:$0xff] %v4650_v43  ;;  %v4624_v6 = vsel %vm1420_vm2, %v6984_v16, %v4597_v8  ;;  %v5371_v38 = vpop.permute.xlu1 %5370 }
 0x43d   :  { %v6988_v40 = vpop.eup %6987  ;;  %v5791_v18 = vmul.f32 -1.442695, %v5285_v26  ;;  %v4636_v30 = vsel %vm1433_vm3, %v4624_v6, 0.0  ;;  %v5406_v56 = vsel %vm1420_vm2, %v6986_v37, %v5371_v38  ;;  %7005 = vrcp.f32 %v5328_v57 }
 0x43e   :  { %v6990_v61 = vpop.eup %6989  ;;  %v5327_v7 = vadd.f32 1.0, %v6988_v40  ;;  %v4648_v2 = vsel %vm1446_vm4, %v4636_v30, 0.0  ;;  %v5418_v20 = vsel %vm1433_vm3, %v5406_v56, 0.0 }
 0x43f   :  { %v6992_v21 = vpop.eup %6991  ;;  %7007 = vpow2.f32 %v5791_v18  ;;  %5728 = vst [vmem:[%s11349_s7 + $0x1c0] sm:$0xff] %v4648_v2  ;;  %v5430_v62 = vsel %vm1446_vm4, %v5418_v20, 0.0  ;;  %v4603_v44 = vpop.permute.xlu0 %4602 }
 0x440   :  { %v6994_v49 = vpop.eup %6993  ;;  %7009 = vrcp.f32 %v5327_v7  ;;  %5792 = vst [vmem:[%s11349_s7 + $0x1e0] sm:$0xff] %v5430_v62  ;;  %v4627_v31 = vsel %vm1420_vm2, %v6990_v61, %v4603_v44  ;;  %v5375_v59 = vpop.permute.xlu1 %5374  ;;  %v5332_v14 = vadd.f32 1.0, %v6992_v21 }
 0x441   :  { %v6996_v3 = vpop.eup %6995  ;;  %7011 = vrcp.f32 %v5330_v63  ;;  %v4639_v27 = vsel %vm1433_vm3, %v4627_v31, 0.0  ;;  %v5408_v22 = vsel %vm1420_vm2, %v6994_v49, %v5375_v59 }
 0x442   :  { %v6998_v4 = vpop.eup %6997  ;;  %v5329_v51 = vadd.f32 1.0, %v6996_v3  ;;  %v4651_v55 = vsel %vm1446_vm4, %v4639_v27, 0.0  ;;  %v5420_v33 = vsel %vm1433_vm3, %v5408_v22, 0.0 }
 0x443   :  { %5731 = vst [vmem:[%s11349_s7 + $0x1d8] sm:$0xff] %v4651_v55  ;;  %v5432_v52 = vsel %vm1446_vm4, %v5420_v33, 0.0  ;;  %v5373_v1 = vpop.permute.xlu0 %5372  ;;  %v7000_v50 = vpop.eup %6999 }
 0x444   :  { %7013 = vrcp.f32 %v5329_v51  ;;  %5794 = vst [vmem:[%s11349_s7 + $0x1f0] sm:$0xff] %v5432_v52  ;;  %v5407_v25 = vsel %vm1420_vm2, %v6998_v4, %v5373_v1  ;;  %v5379_v41 = vpop.permute.xlu1 %5378 }
 0x445   :  { %v7002_v24 = vpop.eup %7001  ;;  %v5419_v11 = vsel %vm1433_vm3, %v5407_v25, 0.0  ;;  %v5410_v48 = vsel %vm1420_vm2, %v7000_v50, %v5379_v41  ;;  %7015 = vrcp.f32 %v5332_v14 }
 0x446   :  { %v7004_v36 = vpop.eup %7003  ;;  %v5331_v47 = vadd.f32 1.0, %v7002_v24  ;;  %v5431_v42 = vsel %vm1446_vm4, %v5419_v11, 0.0  ;;  %v5422_v28 = vsel %vm1433_vm3, %v5410_v48, 0.0 }
 0x447   :  { %5793 = vst [vmem:[%s11349_s7 + $0x1e8] sm:$0xff] %v5431_v42  ;;  %v5434_v23 = vsel %vm1446_vm4, %v5422_v28, 0.0  ;;  %v5377_v45 = vpop.permute.xlu0 %5376  ;;  %v7006_v0 = vpop.eup %7005 }
 0x448   :  { %7017 = vrcp.f32 %v5331_v47  ;;  %5796 = vst [vmem:[%s11349_s7 + $0x200] sm:$0xff] %v5434_v23  ;;  %v5409_v46 = vsel %vm1420_vm2, %v7004_v36, %v5377_v45  ;;  %v5383_v17 = vpop.permute.xlu1 %5382 }
 0x449   :  { %v7008_v19 = vpop.eup %7007  ;;  %v5421_v58 = vsel %vm1433_vm3, %v5409_v46, 0.0  ;;  %v5412_v10 = vsel %vm1420_vm2, %v7006_v0, %v5383_v17 }
 0x44a   :  { %v7010_v34 = vpop.eup %7009  ;;  %v5333_v60 = vadd.f32 1.0, %v7008_v19  ;;  %v5433_v35 = vsel %vm1446_vm4, %v5421_v58, 0.0  ;;  %v5424_v9 = vsel %vm1433_vm3, %v5412_v10, 0.0 }
 0x44b   :  { %v7012_v54 = vpop.eup %7011  ;;  %5795 = vst [vmem:[%s11349_s7 + $0x1f8] sm:$0xff] %v5433_v35  ;;  %v5436_v12 = vsel %vm1446_vm4, %v5424_v9, 0.0  ;;  %v5381_v15 = vpop.permute.xlu0 %5380 }
 0x44c   :  { %7019 = vrcp.f32 %v5333_v60  ;;  %5798 = vst [vmem:[%s11349_s7 + $0x210] sm:$0xff] %v5436_v12  ;;  %v5411_v29 = vsel %vm1420_vm2, %v7010_v34, %v5381_v15  ;;  %v5387_v53 = vpop.permute.xlu1 %5386 }
 0x44d   :  { %v5423_v32 = vsel %vm1433_vm3, %v5411_v29, 0.0  ;;  %v5414_v13 = vsel %vm1420_vm2, %v7012_v54, %v5387_v53 }
 0x44e   :  { %v7014_v57 = vpop.eup %7013  ;;  %v5435_v5 = vsel %vm1446_vm4, %v5423_v32, 0.0  ;;  %v5426_v39 = vsel %vm1433_vm3, %v5414_v13, 0.0 }
 0x44f   :  { %5797 = vst [vmem:[%s11349_s7 + $0x208] sm:$0xff] %v5435_v5  ;;  %v5438_v16 = vsel %vm1446_vm4, %v5426_v39, 0.0  ;;  %v5385_v26 = vpop.permute.xlu0 %5384  ;;  %v7016_v43 = vpop.eup %7015 }
 0x450   :  { %5800 = vst [vmem:[%s11349_s7 + $0x220] sm:$0xff] %v5438_v16  ;;  %v5413_v8 = vsel %vm1420_vm2, %v7014_v57, %v5385_v26  ;;  %v5391_v37 = vpop.permute.xlu1 %5390 }
 0x451   :  { %v5425_v6 = vsel %vm1433_vm3, %v5413_v8, 0.0  ;;  %v5416_v38 = vsel %vm1420_vm2, %v7016_v43, %v5391_v37 }
 0x452   :  { %v7018_v40 = vpop.eup %7017  ;;  %v5437_v63 = vsel %vm1446_vm4, %v5425_v6, 0.0  ;;  %v5428_v18 = vsel %vm1433_vm3, %v5416_v38, 0.0 }
 0x453   :  { %5799 = vst [vmem:[%s11349_s7 + $0x218] sm:$0xff] %v5437_v63  ;;  %v5440_v30 = vsel %vm1446_vm4, %v5428_v18, 0.0  ;;  %v5389_v56 = vpop.permute.xlu0 %5388 }
 0x454   :  { %5802 = vst [vmem:[%s11349_s7 + $0x230] sm:$0xff] %v5440_v30  ;;  %v5415_v61 = vsel %vm1420_vm2, %v7018_v40, %v5389_v56 }
 0x455   :  { %v5427_v7 = vsel %vm1433_vm3, %v5415_v61, 0.0 }
 0x456   :  { %v7020_v2 = vpop.eup %7019  ;;  %v5439_v20 = vsel %vm1446_vm4, %v5427_v7, 0.0 }
 0x457   :  { %5801 = vst [vmem:[%s11349_s7 + $0x228] sm:$0xff] %v5439_v20  ;;  %v5393_v21 = vpop.permute.xlu0 %5392 }
 0x458   :  { %v5417_v62 = vsel %vm1420_vm2, %v7020_v2, %v5393_v21 }
 0x459   :  { %v5429_v44 = vsel %vm1433_vm3, %v5417_v62, 0.0 }
 0x45a   :  { %v5441_v49 = vsel %vm1446_vm4, %v5429_v44, 0.0 }
 0x45b   :  { %5803 = vst [vmem:[%s11349_s7 + $0x238] sm:$0xff] %v5441_v49 }

</bundles_post_ra>
